<compile_context>
chip_gen: v5e
topology: v5e:2x2
jax: 0.10.0
libtpu: 0.0.40
codegen_flags: <defaults>
</compile_context>

<pallas_src>
import functools

import jax
import jax.numpy as jnp
from jax.experimental import pallas as pl
from jax.experimental.pallas import tpu as pltpu

EPS = 1e-5


# ----------------------------------------------------------------------------
# In-kernel helpers
# ----------------------------------------------------------------------------
def _sigmoid(v):
    return 1.0 / (1.0 + jnp.exp(-v))


def _shifted(x, dy, dx, row, col, H, W):
    """out[:, h*W + w] = x[:, (h+dy)*W + (w+dx)] if in bounds, else 0.

    x has HW = H*W on the lane (last) axis; the spatial shift is a lane roll
    (XLU) and zero padding is a broadcasted mask multiply (VPU)."""
    HW = H * W
    s = dy * W + dx
    if s != 0:
        x = pltpu.roll(x, (-s) % HW, axis=1)
    conds = []
    if dy > 0:
        conds.append(row < H - dy)
    if dy < 0:
        conds.append(row >= -dy)
    if dx > 0:
        conds.append(col < W - dx)
    if dx < 0:
        conds.append(col >= -dx)
    if conds:
        m = conds[0]
        for c in conds[1:]:
            m = jnp.logical_and(m, c)
        x = x * m.astype(x.dtype)
    return x


def _conv3x3_bn_relu(x, w_ref, b_ref, row, col, H, W):
    """3x3 conv (padding=1) + folded-BN bias + ReLU.

    x: (Cin, HW); w_ref: (9, Cout, Cin) with BN scale pre-folded; b_ref: (Cout, 1).
    Accumulates 9 MXU matmuls on shifted/masked inputs."""
    Cout = w_ref.shape[1]
    HW = H * W
    acc = jnp.zeros((Cout, HW), jnp.float32)
    k = 0
    for ky in range(3):
        for kx in range(3):
            xs = _shifted(x, ky - 1, kx - 1, row, col, H, W)
            acc = acc + jnp.dot(w_ref[k], xs, preferred_element_type=jnp.float32)
            k += 1
    return jnp.maximum(acc + b_ref[...], 0.0)


# ----------------------------------------------------------------------------
# Fused Up-block kernel (per batch element)
# ----------------------------------------------------------------------------
def up_block_kernel(x_ref, w1_ref, b1_ref, w2_ref, b2_ref,
                    wca1_ref, wca2_ref, wsa_ref, o_ref, *, H, W):
    HW = H * W

    # lane-position -> (row, col) maps, computed once and reused by every tap
    pos = jax.lax.broadcasted_iota(jnp.int32, (1, HW), 1)
    if W & (W - 1) == 0:                       # power-of-two fast path
        row = pos >> (W.bit_length() - 1)
        col = pos & (W - 1)
    else:
        row = pos // W
        col = pos - row * W

    # -------- double conv (BN folded into weights) --------
    x = x_ref[0]                                           # (Cin, HW)
    y1 = _conv3x3_bn_relu(x, w1_ref, b1_ref, row, col, H, W)   # (mid, HW)
    y2 = _conv3x3_bn_relu(y1, w2_ref, b2_ref, row, col, H, W)  # (Cout, HW)

    # -------- channel attention --------
    avg_c = jnp.mean(y2, axis=1, keepdims=True)            # (C, 1)
    max_c = jnp.max(y2, axis=1, keepdims=True)             # (C, 1)

    def fc(v):                                             # (C,1) -> (C,1)
        h = jnp.maximum(
            jnp.dot(wca1_ref[...], v, preferred_element_type=jnp.float32), 0.0)
        return jnp.dot(wca2_ref[...], h, preferred_element_type=jnp.float32)

    ca = _sigmoid(fc(avg_c) + fc(max_c))                   # (C, 1)
    y_ca = y2 * ca                                         # (C, HW)

    # -------- spatial attention (7x7 conv over [mean, max] maps) --------
    avg_s = jnp.mean(y_ca, axis=0, keepdims=True)          # (1, HW)
    max_s = jnp.max(y_ca, axis=0, keepdims=True)           # (1, HW)
    acc = jnp.zeros((1, HW), jnp.float32)
    for ky in range(7):
        for kx in range(7):
            dy, dx = ky - 3, kx - 3
            a_sh = _shifted(avg_s, dy, dx, row, col, H, W)
            m_sh = _shifted(max_s, dy, dx, row, col, H, W)
            acc = acc + a_sh * wsa_ref[ky * 7 + kx] + m_sh * wsa_ref[49 + ky * 7 + kx]
    sa = _sigmoid(acc)                                     # (1, HW)

    o_ref[0] = (y_ca * sa).astype(o_ref.dtype)             # (Cout, HW), lane-dense


# ----------------------------------------------------------------------------
# Glue: bilinear 2x upsample (align_corners=True), pad, concat
# ----------------------------------------------------------------------------
def _bilinear_up2x_matrix(in_size):
    out_size = 2 * in_size
    src = jnp.arange(out_size, dtype=jnp.float32) * (in_size - 1) / (out_size - 1)
    i0 = jnp.clip(jnp.floor(src).astype(jnp.int32), 0, in_size - 1)
    i1 = jnp.clip(i0 + 1, 0, in_size - 1)
    frac = src - i0.astype(jnp.float32)
    M = jnp.zeros((out_size, in_size), jnp.float32)
    M = M.at[jnp.arange(out_size), i0].add(1.0 - frac)
    M = M.at[jnp.arange(out_size), i1].add(frac)
    return M


def _upsample_pad_cat(x1, x2):
    Mh = _bilinear_up2x_matrix(x1.shape[2])
    Mw = _bilinear_up2x_matrix(x1.shape[3])
    x1u = jnp.einsum('oh,nchw->ncow', Mh, x1)
    x1u = jnp.einsum('pw,ncow->ncop', Mw, x1u)
    diffY = x2.shape[2] - x1u.shape[2]
    diffX = x2.shape[3] - x1u.shape[3]
    x1u = jnp.pad(x1u, ((0, 0), (0, 0),
                        (diffY // 2, diffY - diffY // 2),
                        (diffX // 2, diffX - diffX // 2)))
    return jnp.concatenate([x2, x1u], axis=1)


# ----------------------------------------------------------------------------
# Up module forward (bilinear=True, use_cbam=True)
# ----------------------------------------------------------------------------
def up_forward(x1, x2, p):
    x = _upsample_pad_cat(x1, x2)                          # (N, Cin, H, W) NCHW
    N, Cin, H, W = x.shape
    HW = H * W
    x_flat = x.reshape(N, Cin, HW)                         # free reshape, no transpose

    mid = p['w_conv1'].shape[-1]
    Cout = p['w_conv2'].shape[-1]
    Cr = p['w_ca1'].shape[-1]

    # Fold BN scale into conv weights; lay weights out per tap as (Cout, Cin).
    w1 = p['w_conv1'] * p['scale1'].reshape(1, 1, 1, mid)          # (3,3,Cin,mid)
    w1s = jnp.transpose(w1, (0, 1, 3, 2)).reshape(9, mid, Cin)
    b1 = p['bias1'].reshape(mid, 1)
    w2 = p['w_conv2'] * p['scale2'].reshape(1, 1, 1, Cout)         # (3,3,mid,Cout)
    w2s = jnp.transpose(w2, (0, 1, 3, 2)).reshape(9, Cout, mid)
    b2 = p['bias2'].reshape(Cout, 1)
    w_ca1t = p['w_ca1'].T                                          # (Cr, Cout)
    w_ca2t = p['w_ca2'].T                                          # (Cout, Cr)
    w_sa = p['w_sa']                                               # (98,) [c, ky, kx]

    kernel = functools.partial(up_block_kernel, H=H, W=W)
    out = pl.pallas_call(
        kernel,
        out_shape=jax.ShapeDtypeStruct((N, Cout, HW), jnp.float32),
        grid_spec=pltpu.PrefetchScalarGridSpec(
            num_scalar_prefetch=0,
            grid=(N,),
            in_specs=[
                pl.BlockSpec((1, Cin, HW), lambda n: (n, 0, 0)),
                pl.BlockSpec((9, mid, Cin), lambda n: (0, 0, 0)),
                pl.BlockSpec((mid, 1), lambda n: (0, 0)),
                pl.BlockSpec((9, Cout, mid), lambda n: (0, 0, 0)),
                pl.BlockSpec((Cout, 1), lambda n: (0, 0)),
                pl.BlockSpec((Cr, Cout), lambda n: (0, 0)),
                pl.BlockSpec((Cout, Cr), lambda n: (0, 0)),
                pl.BlockSpec(memory_space=pltpu.MemorySpace.SMEM),
            ],
            out_specs=pl.BlockSpec((1, Cout, HW), lambda n: (n, 0, 0)),
        ),
        compiler_params=pltpu.CompilerParams(
            dimension_semantics=("parallel",)),
    )(x_flat, w1s, b1, w2s, b2, w_ca1t, w_ca2t, w_sa)
    return out.reshape(N, Cout, H, W)                      # free reshape


# ----------------------------------------------------------------------------
# Pure-JAX reference (mirrors the PyTorch module, NCHW)
# ----------------------------------------------------------------------------
def up_forward_ref(x1, x2, p):
    x = _upsample_pad_cat(x1, x2)

    def conv_bn_relu_ref(v, w, scale, bias):
        w_oihw = jnp.transpose(w, (3, 2, 0, 1))
        y = jax.lax.conv_general_dilated(
            v, w_oihw, (1, 1), ((1, 1), (1, 1)),
            dimension_numbers=('NCHW', 'OIHW', 'NCHW'))
        y = y * scale.reshape(1, -1, 1, 1) + bias.reshape(1, -1, 1, 1)
        return jnp.maximum(y, 0.0)

    y = conv_bn_relu_ref(x, p['w_conv1'], p['scale1'], p['bias1'])
    y = conv_bn_relu_ref(y, p['w_conv2'], p['scale2'], p['bias2'])

    avg = jnp.mean(y, axis=(2, 3))
    mx = jnp.max(y, axis=(2, 3))

    def fc(v):
        return jnp.maximum(v @ p['w_ca1'], 0.0) @ p['w_ca2']

    ca = jax.nn.sigmoid(fc(avg) + fc(mx))
    y_ca = y * ca[:, :, None, None]

    avg_s = jnp.mean(y_ca, axis=1, keepdims=True)
    max_s = jnp.max(y_ca, axis=1, keepdims=True)
    st = jnp.concatenate([avg_s, max_s], axis=1)
    w7 = p['w_sa'].reshape(1, 2, 7, 7)
    sa = jax.lax.conv_general_dilated(
        st, w7, (1, 1), ((3, 3), (3, 3)),
        dimension_numbers=('NCHW', 'OIHW', 'NCHW'))
    return y_ca * jax.nn.sigmoid(sa)


# ----------------------------------------------------------------------------
# Deterministic parameter init + run
# ----------------------------------------------------------------------------
def make_params(in_channels, out_channels, key):
    mid_channels = in_channels // 2          # bilinear branch of Up
    cr = out_channels // 16                  # CBAM channel-attention ratio=16
    ks = jax.random.split(key, 16)

    def bn_fold(kg, kb, km, kv, c):
        gamma = 1.0 + 0.1 * jax.random.normal(kg, (c,), jnp.float32)
        beta = 0.1 * jax.random.normal(kb, (c,), jnp.float32)
        mean = 0.1 * jax.random.normal(km, (c,), jnp.float32)
        var = 1.0 + 0.1 * jax.random.uniform(kv, (c,), jnp.float32)
        scale = gamma / jnp.sqrt(var + EPS)
        bias = beta - mean * scale
        return scale.reshape(1, c), bias.reshape(1, c)

    scale1, bias1 = bn_fold(ks[1], ks[2], ks[3], ks[4], mid_channels)
    scale2, bias2 = bn_fold(ks[6], ks[7], ks[8], ks[9], out_channels)
    return {
        'w_conv1': 0.1 * jax.random.normal(ks[0], (3, 3, in_channels, mid_channels), jnp.float32),
        'scale1': scale1, 'bias1': bias1,
        'w_conv2': 0.1 * jax.random.normal(ks[5], (3, 3, mid_channels, out_channels), jnp.float32),
        'scale2': scale2, 'bias2': bias2,
        'w_ca1': 0.1 * jax.random.normal(ks[10], (out_channels, cr), jnp.float32),
        'w_ca2': 0.1 * jax.random.normal(ks[11], (cr, out_channels), jnp.float32),
        'w_sa': 0.1 * jax.random.normal(ks[12], (2 * 7 * 7,), jnp.float32),
    }


if __name__ == "__main__":
    N = 2
    in_channels = 64       # Up(in_channels=64, out_channels=32, bilinear=True)
    out_channels = 32
    H = W = 16

    key = jax.random.PRNGKey(0)
    k1, k2, kp = jax.random.split(key, 3)
    # bilinear UNet convention: x1 and x2 each carry in_channels // 2 channels
    x1 = jax.random.normal(k1, (N, in_channels // 2, H // 2, W // 2), jnp.float32)
    x2 = jax.random.normal(k2, (N, in_channels // 2, H, W), jnp.float32)
    params = make_params(in_channels, out_channels, kp)

    out = jax.jit(up_forward)(x1, x2, params)
    out = jax.block_until_ready(out)
    assert out.shape == (N, out_channels, H, W), out.shape

    ref = up_forward_ref(x1, x2, params)
    assert jnp.allclose(out, ref, rtol=1e-4, atol=1e-4), \
        float(jnp.max(jnp.abs(out - ref)))

    print("KERNEL_OK")
</pallas_src>

<mosaic_0001>
module attributes {stable_mosaic.version = 11 : i64} {
  func.func @up_block_kernel(%arg0: i32, %arg1: memref<1x64x256xf32, #tpu.memory_space<vmem>>, %arg2: memref<9x32x64xf32, #tpu.memory_space<vmem>>, %arg3: memref<32x1xf32, #tpu.memory_space<vmem>>, %arg4: memref<9x32x32xf32, #tpu.memory_space<vmem>>, %arg5: memref<32x1xf32, #tpu.memory_space<vmem>>, %arg6: memref<2x32xf32, #tpu.memory_space<vmem>>, %arg7: memref<32x2xf32, #tpu.memory_space<vmem>>, %arg8: memref<98xf32, #tpu.memory_space<smem>>, %arg9: memref<1x32x256xf32, #tpu.memory_space<vmem>>) attributes {dimension_semantics = [#tpu.dimension_semantics<parallel>], iteration_bounds = array<i64: 2>, scalar_prefetch = 0 : i64, scratch_operands = 0 : i64, tpu.core_type = #tpu.core_type<tc>, window_params = [{transform_indices = @transform_0, window_bounds = array<i64: 1, 64, 256>}, {pipeline_mode = #tpu.pipeline_mode<synchronous>, transform_indices = @transform_1, window_bounds = array<i64: 9, 32, 64>}, {pipeline_mode = #tpu.pipeline_mode<synchronous>, transform_indices = @transform_2, window_bounds = array<i64: 32, 1>}, {pipeline_mode = #tpu.pipeline_mode<synchronous>, transform_indices = @transform_3, window_bounds = array<i64: 9, 32, 32>}, {pipeline_mode = #tpu.pipeline_mode<synchronous>, transform_indices = @transform_4, window_bounds = array<i64: 32, 1>}, {pipeline_mode = #tpu.pipeline_mode<synchronous>, transform_indices = @transform_5, window_bounds = array<i64: 2, 32>}, {pipeline_mode = #tpu.pipeline_mode<synchronous>, transform_indices = @transform_6, window_bounds = array<i64: 32, 2>}, {transform_indices = @transform_7, window_bounds = array<i64: 98>}, {transform_indices = @transform_8, window_bounds = array<i64: 1, 32, 256>}]} {
    %0 = tpu.iota {dimensions = array<i32: 1>} : vector<1x256xi32>
    %c4_i32 = arith.constant 4 : i32
    %1 = vector.broadcast %c4_i32 : i32 to vector<1x256xi32>
    %2 = arith.shrsi %0, %1 : vector<1x256xi32>
    %c15_i32 = arith.constant 15 : i32
    %3 = vector.broadcast %c15_i32 : i32 to vector<1x256xi32>
    %4 = arith.andi %0, %3 : vector<1x256xi32>
    %c0 = arith.constant 0 : index
    %c0_0 = arith.constant 0 : index
    %c0_1 = arith.constant 0 : index
    %5 = vector.load %arg1[%c0, %c0_0, %c0_1] : memref<1x64x256xf32, #tpu.memory_space<vmem>>, vector<1x64x256xf32>
    %6 = vector.shape_cast %5 : vector<1x64x256xf32> to vector<64x256xf32>
    %cst = arith.constant 0.000000e+00 : f32
    %7 = vector.broadcast %cst : f32 to vector<32x256xf32>
    %c17_i32 = arith.constant 17 : i32
    %8 = tpu.dynamic_rotate %6 by %c17_i32 dim 1 : vector<64x256xf32>, i32 -> vector<64x256xf32>
    %c1_i32 = arith.constant 1 : i32
    %9 = vector.broadcast %c1_i32 : i32 to vector<1x256xi32>
    %10 = arith.cmpi sge, %2, %9 : vector<1x256xi32>
    %c1_i32_2 = arith.constant 1 : i32
    %11 = vector.broadcast %c1_i32_2 : i32 to vector<1x256xi32>
    %12 = arith.cmpi sge, %4, %11 : vector<1x256xi32>
    %13 = arith.andi %10, %12 : vector<1x256xi1>
    %14 = arith.extui %13 : vector<1x256xi1> to vector<1x256xi32>
    %15 = arith.sitofp %14 : vector<1x256xi32> to vector<1x256xf32>
    %16 = vector.broadcast %15 : vector<1x256xf32> to vector<64x256xf32>
    %17 = arith.mulf %8, %16 : vector<64x256xf32>
    %c0_3 = arith.constant 0 : index
    %c0_4 = arith.constant 0 : index
    %c0_5 = arith.constant 0 : index
    %18 = vector.load %arg2[%c0_3, %c0_4, %c0_5] : memref<9x32x64xf32, #tpu.memory_space<vmem>>, vector<1x32x64xf32>
    %19 = vector.shape_cast %18 : vector<1x32x64xf32> to vector<32x64xf32>
    %cst_6 = arith.constant dense<0.000000e+00> : vector<32x256xf32>
    %20 = tpu.matmul %19, %17, %cst_6 {dimension_numbers = #tpu.dot_dimension_numbers<[1], [0], [0], [1], [0, 0, 1, 1], [], []>} : vector<32x64xf32>, vector<64x256xf32>, vector<32x256xf32> -> vector<32x256xf32>
    %21 = arith.addf %7, %20 : vector<32x256xf32>
    %c16_i32 = arith.constant 16 : i32
    %22 = tpu.dynamic_rotate %6 by %c16_i32 dim 1 : vector<64x256xf32>, i32 -> vector<64x256xf32>
    %c1_i32_7 = arith.constant 1 : i32
    %23 = vector.broadcast %c1_i32_7 : i32 to vector<1x256xi32>
    %24 = arith.cmpi sge, %2, %23 : vector<1x256xi32>
    %25 = arith.extui %24 : vector<1x256xi1> to vector<1x256xi32>
    %26 = arith.sitofp %25 : vector<1x256xi32> to vector<1x256xf32>
    %27 = vector.broadcast %26 : vector<1x256xf32> to vector<64x256xf32>
    %28 = arith.mulf %22, %27 : vector<64x256xf32>
    %c1 = arith.constant 1 : index
    %c0_8 = arith.constant 0 : index
    %c0_9 = arith.constant 0 : index
    %29 = vector.load %arg2[%c1, %c0_8, %c0_9] : memref<9x32x64xf32, #tpu.memory_space<vmem>>, vector<1x32x64xf32>
    %30 = vector.shape_cast %29 : vector<1x32x64xf32> to vector<32x64xf32>
    %cst_10 = arith.constant dense<0.000000e+00> : vector<32x256xf32>
    %31 = tpu.matmul %30, %28, %cst_10 {dimension_numbers = #tpu.dot_dimension_numbers<[1], [0], [0], [1], [0, 0, 1, 1], [], []>} : vector<32x64xf32>, vector<64x256xf32>, vector<32x256xf32> -> vector<32x256xf32>
    %32 = arith.addf %21, %31 : vector<32x256xf32>
    %c15_i32_11 = arith.constant 15 : i32
    %33 = tpu.dynamic_rotate %6 by %c15_i32_11 dim 1 : vector<64x256xf32>, i32 -> vector<64x256xf32>
    %c1_i32_12 = arith.constant 1 : i32
    %34 = vector.broadcast %c1_i32_12 : i32 to vector<1x256xi32>
    %35 = arith.cmpi sge, %2, %34 : vector<1x256xi32>
    %c15_i32_13 = arith.constant 15 : i32
    %36 = vector.broadcast %c15_i32_13 : i32 to vector<1x256xi32>
    %37 = arith.cmpi slt, %4, %36 : vector<1x256xi32>
    %38 = arith.andi %35, %37 : vector<1x256xi1>
    %39 = arith.extui %38 : vector<1x256xi1> to vector<1x256xi32>
    %40 = arith.sitofp %39 : vector<1x256xi32> to vector<1x256xf32>
    %41 = vector.broadcast %40 : vector<1x256xf32> to vector<64x256xf32>
    %42 = arith.mulf %33, %41 : vector<64x256xf32>
    %c2 = arith.constant 2 : index
    %c0_14 = arith.constant 0 : index
    %c0_15 = arith.constant 0 : index
    %43 = vector.load %arg2[%c2, %c0_14, %c0_15] : memref<9x32x64xf32, #tpu.memory_space<vmem>>, vector<1x32x64xf32>
    %44 = vector.shape_cast %43 : vector<1x32x64xf32> to vector<32x64xf32>
    %cst_16 = arith.constant dense<0.000000e+00> : vector<32x256xf32>
    %45 = tpu.matmul %44, %42, %cst_16 {dimension_numbers = #tpu.dot_dimension_numbers<[1], [0], [0], [1], [0, 0, 1, 1], [], []>} : vector<32x64xf32>, vector<64x256xf32>, vector<32x256xf32> -> vector<32x256xf32>
    %46 = arith.addf %32, %45 : vector<32x256xf32>
    %c1_i32_17 = arith.constant 1 : i32
    %47 = tpu.dynamic_rotate %6 by %c1_i32_17 dim 1 : vector<64x256xf32>, i32 -> vector<64x256xf32>
    %c1_i32_18 = arith.constant 1 : i32
    %48 = vector.broadcast %c1_i32_18 : i32 to vector<1x256xi32>
    %49 = arith.cmpi sge, %4, %48 : vector<1x256xi32>
    %50 = arith.extui %49 : vector<1x256xi1> to vector<1x256xi32>
    %51 = arith.sitofp %50 : vector<1x256xi32> to vector<1x256xf32>
    %52 = vector.broadcast %51 : vector<1x256xf32> to vector<64x256xf32>
    %53 = arith.mulf %47, %52 : vector<64x256xf32>
    %c3 = arith.constant 3 : index
    %c0_19 = arith.constant 0 : index
    %c0_20 = arith.constant 0 : index
    %54 = vector.load %arg2[%c3, %c0_19, %c0_20] : memref<9x32x64xf32, #tpu.memory_space<vmem>>, vector<1x32x64xf32>
    %55 = vector.shape_cast %54 : vector<1x32x64xf32> to vector<32x64xf32>
    %cst_21 = arith.constant dense<0.000000e+00> : vector<32x256xf32>
    %56 = tpu.matmul %55, %53, %cst_21 {dimension_numbers = #tpu.dot_dimension_numbers<[1], [0], [0], [1], [0, 0, 1, 1], [], []>} : vector<32x64xf32>, vector<64x256xf32>, vector<32x256xf32> -> vector<32x256xf32>
    %57 = arith.addf %46, %56 : vector<32x256xf32>
    %c4 = arith.constant 4 : index
    %c0_22 = arith.constant 0 : index
    %c0_23 = arith.constant 0 : index
    %58 = vector.load %arg2[%c4, %c0_22, %c0_23] : memref<9x32x64xf32, #tpu.memory_space<vmem>>, vector<1x32x64xf32>
    %59 = vector.shape_cast %58 : vector<1x32x64xf32> to vector<32x64xf32>
    %cst_24 = arith.constant dense<0.000000e+00> : vector<32x256xf32>
    %60 = tpu.matmul %59, %6, %cst_24 {dimension_numbers = #tpu.dot_dimension_numbers<[1], [0], [0], [1], [0, 0, 1, 1], [], []>} : vector<32x64xf32>, vector<64x256xf32>, vector<32x256xf32> -> vector<32x256xf32>
    %61 = arith.addf %57, %60 : vector<32x256xf32>
    %c255_i32 = arith.constant 255 : i32
    %62 = tpu.dynamic_rotate %6 by %c255_i32 dim 1 : vector<64x256xf32>, i32 -> vector<64x256xf32>
    %c15_i32_25 = arith.constant 15 : i32
    %63 = vector.broadcast %c15_i32_25 : i32 to vector<1x256xi32>
    %64 = arith.cmpi slt, %4, %63 : vector<1x256xi32>
    %65 = arith.extui %64 : vector<1x256xi1> to vector<1x256xi32>
    %66 = arith.sitofp %65 : vector<1x256xi32> to vector<1x256xf32>
    %67 = vector.broadcast %66 : vector<1x256xf32> to vector<64x256xf32>
    %68 = arith.mulf %62, %67 : vector<64x256xf32>
    %c5 = arith.constant 5 : index
    %c0_26 = arith.constant 0 : index
    %c0_27 = arith.constant 0 : index
    %69 = vector.load %arg2[%c5, %c0_26, %c0_27] : memref<9x32x64xf32, #tpu.memory_space<vmem>>, vector<1x32x64xf32>
    %70 = vector.shape_cast %69 : vector<1x32x64xf32> to vector<32x64xf32>
    %cst_28 = arith.constant dense<0.000000e+00> : vector<32x256xf32>
    %71 = tpu.matmul %70, %68, %cst_28 {dimension_numbers = #tpu.dot_dimension_numbers<[1], [0], [0], [1], [0, 0, 1, 1], [], []>} : vector<32x64xf32>, vector<64x256xf32>, vector<32x256xf32> -> vector<32x256xf32>
    %72 = arith.addf %61, %71 : vector<32x256xf32>
    %c241_i32 = arith.constant 241 : i32
    %73 = tpu.dynamic_rotate %6 by %c241_i32 dim 1 : vector<64x256xf32>, i32 -> vector<64x256xf32>
    %c15_i32_29 = arith.constant 15 : i32
    %74 = vector.broadcast %c15_i32_29 : i32 to vector<1x256xi32>
    %75 = arith.cmpi slt, %2, %74 : vector<1x256xi32>
    %c1_i32_30 = arith.constant 1 : i32
    %76 = vector.broadcast %c1_i32_30 : i32 to vector<1x256xi32>
    %77 = arith.cmpi sge, %4, %76 : vector<1x256xi32>
    %78 = arith.andi %75, %77 : vector<1x256xi1>
    %79 = arith.extui %78 : vector<1x256xi1> to vector<1x256xi32>
    %80 = arith.sitofp %79 : vector<1x256xi32> to vector<1x256xf32>
    %81 = vector.broadcast %80 : vector<1x256xf32> to vector<64x256xf32>
    %82 = arith.mulf %73, %81 : vector<64x256xf32>
    %c6 = arith.constant 6 : index
    %c0_31 = arith.constant 0 : index
    %c0_32 = arith.constant 0 : index
    %83 = vector.load %arg2[%c6, %c0_31, %c0_32] : memref<9x32x64xf32, #tpu.memory_space<vmem>>, vector<1x32x64xf32>
    %84 = vector.shape_cast %83 : vector<1x32x64xf32> to vector<32x64xf32>
    %cst_33 = arith.constant dense<0.000000e+00> : vector<32x256xf32>
    %85 = tpu.matmul %84, %82, %cst_33 {dimension_numbers = #tpu.dot_dimension_numbers<[1], [0], [0], [1], [0, 0, 1, 1], [], []>} : vector<32x64xf32>, vector<64x256xf32>, vector<32x256xf32> -> vector<32x256xf32>
    %86 = arith.addf %72, %85 : vector<32x256xf32>
    %c240_i32 = arith.constant 240 : i32
    %87 = tpu.dynamic_rotate %6 by %c240_i32 dim 1 : vector<64x256xf32>, i32 -> vector<64x256xf32>
    %c15_i32_34 = arith.constant 15 : i32
    %88 = vector.broadcast %c15_i32_34 : i32 to vector<1x256xi32>
    %89 = arith.cmpi slt, %2, %88 : vector<1x256xi32>
    %90 = arith.extui %89 : vector<1x256xi1> to vector<1x256xi32>
    %91 = arith.sitofp %90 : vector<1x256xi32> to vector<1x256xf32>
    %92 = vector.broadcast %91 : vector<1x256xf32> to vector<64x256xf32>
    %93 = arith.mulf %87, %92 : vector<64x256xf32>
    %c7 = arith.constant 7 : index
    %c0_35 = arith.constant 0 : index
    %c0_36 = arith.constant 0 : index
    %94 = vector.load %arg2[%c7, %c0_35, %c0_36] : memref<9x32x64xf32, #tpu.memory_space<vmem>>, vector<1x32x64xf32>
    %95 = vector.shape_cast %94 : vector<1x32x64xf32> to vector<32x64xf32>
    %cst_37 = arith.constant dense<0.000000e+00> : vector<32x256xf32>
    %96 = tpu.matmul %95, %93, %cst_37 {dimension_numbers = #tpu.dot_dimension_numbers<[1], [0], [0], [1], [0, 0, 1, 1], [], []>} : vector<32x64xf32>, vector<64x256xf32>, vector<32x256xf32> -> vector<32x256xf32>
    %97 = arith.addf %86, %96 : vector<32x256xf32>
    %c239_i32 = arith.constant 239 : i32
    %98 = tpu.dynamic_rotate %6 by %c239_i32 dim 1 : vector<64x256xf32>, i32 -> vector<64x256xf32>
    %c15_i32_38 = arith.constant 15 : i32
    %99 = vector.broadcast %c15_i32_38 : i32 to vector<1x256xi32>
    %100 = arith.cmpi slt, %2, %99 : vector<1x256xi32>
    %c15_i32_39 = arith.constant 15 : i32
    %101 = vector.broadcast %c15_i32_39 : i32 to vector<1x256xi32>
    %102 = arith.cmpi slt, %4, %101 : vector<1x256xi32>
    %103 = arith.andi %100, %102 : vector<1x256xi1>
    %104 = arith.extui %103 : vector<1x256xi1> to vector<1x256xi32>
    %105 = arith.sitofp %104 : vector<1x256xi32> to vector<1x256xf32>
    %106 = vector.broadcast %105 : vector<1x256xf32> to vector<64x256xf32>
    %107 = arith.mulf %98, %106 : vector<64x256xf32>
    %c8 = arith.constant 8 : index
    %c0_40 = arith.constant 0 : index
    %c0_41 = arith.constant 0 : index
    %108 = vector.load %arg2[%c8, %c0_40, %c0_41] : memref<9x32x64xf32, #tpu.memory_space<vmem>>, vector<1x32x64xf32>
    %109 = vector.shape_cast %108 : vector<1x32x64xf32> to vector<32x64xf32>
    %cst_42 = arith.constant dense<0.000000e+00> : vector<32x256xf32>
    %110 = tpu.matmul %109, %107, %cst_42 {dimension_numbers = #tpu.dot_dimension_numbers<[1], [0], [0], [1], [0, 0, 1, 1], [], []>} : vector<32x64xf32>, vector<64x256xf32>, vector<32x256xf32> -> vector<32x256xf32>
    %111 = arith.addf %97, %110 : vector<32x256xf32>
    %c0_43 = arith.constant 0 : index
    %c0_44 = arith.constant 0 : index
    %112 = vector.load %arg3[%c0_43, %c0_44] : memref<32x1xf32, #tpu.memory_space<vmem>>, vector<32x1xf32>
    %113 = vector.broadcast %112 : vector<32x1xf32> to vector<32x256xf32>
    %114 = arith.addf %111, %113 : vector<32x256xf32>
    %cst_45 = arith.constant 0.000000e+00 : f32
    %115 = vector.broadcast %cst_45 : f32 to vector<32x256xf32>
    %116 = arith.maximumf %114, %115 : vector<32x256xf32>
    %cst_46 = arith.constant 0.000000e+00 : f32
    %117 = vector.broadcast %cst_46 : f32 to vector<32x256xf32>
    %c17_i32_47 = arith.constant 17 : i32
    %118 = tpu.dynamic_rotate %116 by %c17_i32_47 dim 1 : vector<32x256xf32>, i32 -> vector<32x256xf32>
    %c1_i32_48 = arith.constant 1 : i32
    %119 = vector.broadcast %c1_i32_48 : i32 to vector<1x256xi32>
    %120 = arith.cmpi sge, %2, %119 : vector<1x256xi32>
    %c1_i32_49 = arith.constant 1 : i32
    %121 = vector.broadcast %c1_i32_49 : i32 to vector<1x256xi32>
    %122 = arith.cmpi sge, %4, %121 : vector<1x256xi32>
    %123 = arith.andi %120, %122 : vector<1x256xi1>
    %124 = arith.extui %123 : vector<1x256xi1> to vector<1x256xi32>
    %125 = arith.sitofp %124 : vector<1x256xi32> to vector<1x256xf32>
    %126 = vector.broadcast %125 : vector<1x256xf32> to vector<32x256xf32>
    %127 = arith.mulf %118, %126 : vector<32x256xf32>
    %c0_50 = arith.constant 0 : index
    %c0_51 = arith.constant 0 : index
    %c0_52 = arith.constant 0 : index
    %128 = vector.load %arg4[%c0_50, %c0_51, %c0_52] : memref<9x32x32xf32, #tpu.memory_space<vmem>>, vector<1x32x32xf32>
    %129 = vector.shape_cast %128 : vector<1x32x32xf32> to vector<32x32xf32>
    %cst_53 = arith.constant dense<0.000000e+00> : vector<32x256xf32>
    %130 = tpu.matmul %129, %127, %cst_53 {dimension_numbers = #tpu.dot_dimension_numbers<[1], [0], [0], [1], [0, 0, 1, 1], [], []>} : vector<32x32xf32>, vector<32x256xf32>, vector<32x256xf32> -> vector<32x256xf32>
    %131 = arith.addf %117, %130 : vector<32x256xf32>
    %c16_i32_54 = arith.constant 16 : i32
    %132 = tpu.dynamic_rotate %116 by %c16_i32_54 dim 1 : vector<32x256xf32>, i32 -> vector<32x256xf32>
    %c1_i32_55 = arith.constant 1 : i32
    %133 = vector.broadcast %c1_i32_55 : i32 to vector<1x256xi32>
    %134 = arith.cmpi sge, %2, %133 : vector<1x256xi32>
    %135 = arith.extui %134 : vector<1x256xi1> to vector<1x256xi32>
    %136 = arith.sitofp %135 : vector<1x256xi32> to vector<1x256xf32>
    %137 = vector.broadcast %136 : vector<1x256xf32> to vector<32x256xf32>
    %138 = arith.mulf %132, %137 : vector<32x256xf32>
    %c1_56 = arith.constant 1 : index
    %c0_57 = arith.constant 0 : index
    %c0_58 = arith.constant 0 : index
    %139 = vector.load %arg4[%c1_56, %c0_57, %c0_58] : memref<9x32x32xf32, #tpu.memory_space<vmem>>, vector<1x32x32xf32>
    %140 = vector.shape_cast %139 : vector<1x32x32xf32> to vector<32x32xf32>
    %cst_59 = arith.constant dense<0.000000e+00> : vector<32x256xf32>
    %141 = tpu.matmul %140, %138, %cst_59 {dimension_numbers = #tpu.dot_dimension_numbers<[1], [0], [0], [1], [0, 0, 1, 1], [], []>} : vector<32x32xf32>, vector<32x256xf32>, vector<32x256xf32> -> vector<32x256xf32>
    %142 = arith.addf %131, %141 : vector<32x256xf32>
    %c15_i32_60 = arith.constant 15 : i32
    %143 = tpu.dynamic_rotate %116 by %c15_i32_60 dim 1 : vector<32x256xf32>, i32 -> vector<32x256xf32>
    %c1_i32_61 = arith.constant 1 : i32
    %144 = vector.broadcast %c1_i32_61 : i32 to vector<1x256xi32>
    %145 = arith.cmpi sge, %2, %144 : vector<1x256xi32>
    %c15_i32_62 = arith.constant 15 : i32
    %146 = vector.broadcast %c15_i32_62 : i32 to vector<1x256xi32>
    %147 = arith.cmpi slt, %4, %146 : vector<1x256xi32>
    %148 = arith.andi %145, %147 : vector<1x256xi1>
    %149 = arith.extui %148 : vector<1x256xi1> to vector<1x256xi32>
    %150 = arith.sitofp %149 : vector<1x256xi32> to vector<1x256xf32>
    %151 = vector.broadcast %150 : vector<1x256xf32> to vector<32x256xf32>
    %152 = arith.mulf %143, %151 : vector<32x256xf32>
    %c2_63 = arith.constant 2 : index
    %c0_64 = arith.constant 0 : index
    %c0_65 = arith.constant 0 : index
    %153 = vector.load %arg4[%c2_63, %c0_64, %c0_65] : memref<9x32x32xf32, #tpu.memory_space<vmem>>, vector<1x32x32xf32>
    %154 = vector.shape_cast %153 : vector<1x32x32xf32> to vector<32x32xf32>
    %cst_66 = arith.constant dense<0.000000e+00> : vector<32x256xf32>
    %155 = tpu.matmul %154, %152, %cst_66 {dimension_numbers = #tpu.dot_dimension_numbers<[1], [0], [0], [1], [0, 0, 1, 1], [], []>} : vector<32x32xf32>, vector<32x256xf32>, vector<32x256xf32> -> vector<32x256xf32>
    %156 = arith.addf %142, %155 : vector<32x256xf32>
    %c1_i32_67 = arith.constant 1 : i32
    %157 = tpu.dynamic_rotate %116 by %c1_i32_67 dim 1 : vector<32x256xf32>, i32 -> vector<32x256xf32>
    %c1_i32_68 = arith.constant 1 : i32
    %158 = vector.broadcast %c1_i32_68 : i32 to vector<1x256xi32>
    %159 = arith.cmpi sge, %4, %158 : vector<1x256xi32>
    %160 = arith.extui %159 : vector<1x256xi1> to vector<1x256xi32>
    %161 = arith.sitofp %160 : vector<1x256xi32> to vector<1x256xf32>
    %162 = vector.broadcast %161 : vector<1x256xf32> to vector<32x256xf32>
    %163 = arith.mulf %157, %162 : vector<32x256xf32>
    %c3_69 = arith.constant 3 : index
    %c0_70 = arith.constant 0 : index
    %c0_71 = arith.constant 0 : index
    %164 = vector.load %arg4[%c3_69, %c0_70, %c0_71] : memref<9x32x32xf32, #tpu.memory_space<vmem>>, vector<1x32x32xf32>
    %165 = vector.shape_cast %164 : vector<1x32x32xf32> to vector<32x32xf32>
    %cst_72 = arith.constant dense<0.000000e+00> : vector<32x256xf32>
    %166 = tpu.matmul %165, %163, %cst_72 {dimension_numbers = #tpu.dot_dimension_numbers<[1], [0], [0], [1], [0, 0, 1, 1], [], []>} : vector<32x32xf32>, vector<32x256xf32>, vector<32x256xf32> -> vector<32x256xf32>
    %167 = arith.addf %156, %166 : vector<32x256xf32>
    %c4_73 = arith.constant 4 : index
    %c0_74 = arith.constant 0 : index
    %c0_75 = arith.constant 0 : index
    %168 = vector.load %arg4[%c4_73, %c0_74, %c0_75] : memref<9x32x32xf32, #tpu.memory_space<vmem>>, vector<1x32x32xf32>
    %169 = vector.shape_cast %168 : vector<1x32x32xf32> to vector<32x32xf32>
    %cst_76 = arith.constant dense<0.000000e+00> : vector<32x256xf32>
    %170 = tpu.matmul %169, %116, %cst_76 {dimension_numbers = #tpu.dot_dimension_numbers<[1], [0], [0], [1], [0, 0, 1, 1], [], []>} : vector<32x32xf32>, vector<32x256xf32>, vector<32x256xf32> -> vector<32x256xf32>
    %171 = arith.addf %167, %170 : vector<32x256xf32>
    %c255_i32_77 = arith.constant 255 : i32
    %172 = tpu.dynamic_rotate %116 by %c255_i32_77 dim 1 : vector<32x256xf32>, i32 -> vector<32x256xf32>
    %c15_i32_78 = arith.constant 15 : i32
    %173 = vector.broadcast %c15_i32_78 : i32 to vector<1x256xi32>
    %174 = arith.cmpi slt, %4, %173 : vector<1x256xi32>
    %175 = arith.extui %174 : vector<1x256xi1> to vector<1x256xi32>
    %176 = arith.sitofp %175 : vector<1x256xi32> to vector<1x256xf32>
    %177 = vector.broadcast %176 : vector<1x256xf32> to vector<32x256xf32>
    %178 = arith.mulf %172, %177 : vector<32x256xf32>
    %c5_79 = arith.constant 5 : index
    %c0_80 = arith.constant 0 : index
    %c0_81 = arith.constant 0 : index
    %179 = vector.load %arg4[%c5_79, %c0_80, %c0_81] : memref<9x32x32xf32, #tpu.memory_space<vmem>>, vector<1x32x32xf32>
    %180 = vector.shape_cast %179 : vector<1x32x32xf32> to vector<32x32xf32>
    %cst_82 = arith.constant dense<0.000000e+00> : vector<32x256xf32>
    %181 = tpu.matmul %180, %178, %cst_82 {dimension_numbers = #tpu.dot_dimension_numbers<[1], [0], [0], [1], [0, 0, 1, 1], [], []>} : vector<32x32xf32>, vector<32x256xf32>, vector<32x256xf32> -> vector<32x256xf32>
    %182 = arith.addf %171, %181 : vector<32x256xf32>
    %c241_i32_83 = arith.constant 241 : i32
    %183 = tpu.dynamic_rotate %116 by %c241_i32_83 dim 1 : vector<32x256xf32>, i32 -> vector<32x256xf32>
    %c15_i32_84 = arith.constant 15 : i32
    %184 = vector.broadcast %c15_i32_84 : i32 to vector<1x256xi32>
    %185 = arith.cmpi slt, %2, %184 : vector<1x256xi32>
    %c1_i32_85 = arith.constant 1 : i32
    %186 = vector.broadcast %c1_i32_85 : i32 to vector<1x256xi32>
    %187 = arith.cmpi sge, %4, %186 : vector<1x256xi32>
    %188 = arith.andi %185, %187 : vector<1x256xi1>
    %189 = arith.extui %188 : vector<1x256xi1> to vector<1x256xi32>
    %190 = arith.sitofp %189 : vector<1x256xi32> to vector<1x256xf32>
    %191 = vector.broadcast %190 : vector<1x256xf32> to vector<32x256xf32>
    %192 = arith.mulf %183, %191 : vector<32x256xf32>
    %c6_86 = arith.constant 6 : index
    %c0_87 = arith.constant 0 : index
    %c0_88 = arith.constant 0 : index
    %193 = vector.load %arg4[%c6_86, %c0_87, %c0_88] : memref<9x32x32xf32, #tpu.memory_space<vmem>>, vector<1x32x32xf32>
    %194 = vector.shape_cast %193 : vector<1x32x32xf32> to vector<32x32xf32>
    %cst_89 = arith.constant dense<0.000000e+00> : vector<32x256xf32>
    %195 = tpu.matmul %194, %192, %cst_89 {dimension_numbers = #tpu.dot_dimension_numbers<[1], [0], [0], [1], [0, 0, 1, 1], [], []>} : vector<32x32xf32>, vector<32x256xf32>, vector<32x256xf32> -> vector<32x256xf32>
    %196 = arith.addf %182, %195 : vector<32x256xf32>
    %c240_i32_90 = arith.constant 240 : i32
    %197 = tpu.dynamic_rotate %116 by %c240_i32_90 dim 1 : vector<32x256xf32>, i32 -> vector<32x256xf32>
    %c15_i32_91 = arith.constant 15 : i32
    %198 = vector.broadcast %c15_i32_91 : i32 to vector<1x256xi32>
    %199 = arith.cmpi slt, %2, %198 : vector<1x256xi32>
    %200 = arith.extui %199 : vector<1x256xi1> to vector<1x256xi32>
    %201 = arith.sitofp %200 : vector<1x256xi32> to vector<1x256xf32>
    %202 = vector.broadcast %201 : vector<1x256xf32> to vector<32x256xf32>
    %203 = arith.mulf %197, %202 : vector<32x256xf32>
    %c7_92 = arith.constant 7 : index
    %c0_93 = arith.constant 0 : index
    %c0_94 = arith.constant 0 : index
    %204 = vector.load %arg4[%c7_92, %c0_93, %c0_94] : memref<9x32x32xf32, #tpu.memory_space<vmem>>, vector<1x32x32xf32>
    %205 = vector.shape_cast %204 : vector<1x32x32xf32> to vector<32x32xf32>
    %cst_95 = arith.constant dense<0.000000e+00> : vector<32x256xf32>
    %206 = tpu.matmul %205, %203, %cst_95 {dimension_numbers = #tpu.dot_dimension_numbers<[1], [0], [0], [1], [0, 0, 1, 1], [], []>} : vector<32x32xf32>, vector<32x256xf32>, vector<32x256xf32> -> vector<32x256xf32>
    %207 = arith.addf %196, %206 : vector<32x256xf32>
    %c239_i32_96 = arith.constant 239 : i32
    %208 = tpu.dynamic_rotate %116 by %c239_i32_96 dim 1 : vector<32x256xf32>, i32 -> vector<32x256xf32>
    %c15_i32_97 = arith.constant 15 : i32
    %209 = vector.broadcast %c15_i32_97 : i32 to vector<1x256xi32>
    %210 = arith.cmpi slt, %2, %209 : vector<1x256xi32>
    %c15_i32_98 = arith.constant 15 : i32
    %211 = vector.broadcast %c15_i32_98 : i32 to vector<1x256xi32>
    %212 = arith.cmpi slt, %4, %211 : vector<1x256xi32>
    %213 = arith.andi %210, %212 : vector<1x256xi1>
    %214 = arith.extui %213 : vector<1x256xi1> to vector<1x256xi32>
    %215 = arith.sitofp %214 : vector<1x256xi32> to vector<1x256xf32>
    %216 = vector.broadcast %215 : vector<1x256xf32> to vector<32x256xf32>
    %217 = arith.mulf %208, %216 : vector<32x256xf32>
    %c8_99 = arith.constant 8 : index
    %c0_100 = arith.constant 0 : index
    %c0_101 = arith.constant 0 : index
    %218 = vector.load %arg4[%c8_99, %c0_100, %c0_101] : memref<9x32x32xf32, #tpu.memory_space<vmem>>, vector<1x32x32xf32>
    %219 = vector.shape_cast %218 : vector<1x32x32xf32> to vector<32x32xf32>
    %cst_102 = arith.constant dense<0.000000e+00> : vector<32x256xf32>
    %220 = tpu.matmul %219, %217, %cst_102 {dimension_numbers = #tpu.dot_dimension_numbers<[1], [0], [0], [1], [0, 0, 1, 1], [], []>} : vector<32x32xf32>, vector<32x256xf32>, vector<32x256xf32> -> vector<32x256xf32>
    %221 = arith.addf %207, %220 : vector<32x256xf32>
    %c0_103 = arith.constant 0 : index
    %c0_104 = arith.constant 0 : index
    %222 = vector.load %arg5[%c0_103, %c0_104] : memref<32x1xf32, #tpu.memory_space<vmem>>, vector<32x1xf32>
    %223 = vector.broadcast %222 : vector<32x1xf32> to vector<32x256xf32>
    %224 = arith.addf %221, %223 : vector<32x256xf32>
    %cst_105 = arith.constant 0.000000e+00 : f32
    %225 = vector.broadcast %cst_105 : f32 to vector<32x256xf32>
    %226 = arith.maximumf %224, %225 : vector<32x256xf32>
    %cst_106 = arith.constant dense<0.000000e+00> : vector<32xf32>
    %227 = vector.multi_reduction <add>, %226, %cst_106 [1] : vector<32x256xf32> to vector<32xf32>
    %228 = vector.shape_cast %227 : vector<32xf32> to vector<32x1xf32>
    %cst_107 = arith.constant 2.560000e+02 : f32
    %229 = vector.broadcast %cst_107 : f32 to vector<32x1xf32>
    %230 = arith.divf %228, %229 : vector<32x1xf32>
    %cst_108 = arith.constant dense<0xFF800000> : vector<32xf32>
    %231 = vector.multi_reduction <maximumf>, %226, %cst_108 [1] : vector<32x256xf32> to vector<32xf32>
    %232 = vector.shape_cast %231 : vector<32xf32> to vector<32x1xf32>
    %c0_109 = arith.constant 0 : index
    %c0_110 = arith.constant 0 : index
    %233 = vector.load %arg6[%c0_109, %c0_110] : memref<2x32xf32, #tpu.memory_space<vmem>>, vector<2x32xf32>
    %cst_111 = arith.constant dense<0.000000e+00> : vector<2x1xf32>
    %234 = tpu.matmul %233, %230, %cst_111 {dimension_numbers = #tpu.dot_dimension_numbers<[1], [0], [0], [1], [0, 0, 1, 1], [], []>} : vector<2x32xf32>, vector<32x1xf32>, vector<2x1xf32> -> vector<2x1xf32>
    %cst_112 = arith.constant 0.000000e+00 : f32
    %235 = vector.broadcast %cst_112 : f32 to vector<2x1xf32>
    %236 = arith.maximumf %234, %235 : vector<2x1xf32>
    %c0_113 = arith.constant 0 : index
    %c0_114 = arith.constant 0 : index
    %237 = vector.load %arg7[%c0_113, %c0_114] : memref<32x2xf32, #tpu.memory_space<vmem>>, vector<32x2xf32>
    %cst_115 = arith.constant dense<0.000000e+00> : vector<32x1xf32>
    %238 = tpu.matmul %237, %236, %cst_115 {dimension_numbers = #tpu.dot_dimension_numbers<[1], [0], [0], [1], [0, 0, 1, 1], [], []>} : vector<32x2xf32>, vector<2x1xf32>, vector<32x1xf32> -> vector<32x1xf32>
    %c0_116 = arith.constant 0 : index
    %c0_117 = arith.constant 0 : index
    %239 = vector.load %arg6[%c0_116, %c0_117] : memref<2x32xf32, #tpu.memory_space<vmem>>, vector<2x32xf32>
    %cst_118 = arith.constant dense<0.000000e+00> : vector<2x1xf32>
    %240 = tpu.matmul %239, %232, %cst_118 {dimension_numbers = #tpu.dot_dimension_numbers<[1], [0], [0], [1], [0, 0, 1, 1], [], []>} : vector<2x32xf32>, vector<32x1xf32>, vector<2x1xf32> -> vector<2x1xf32>
    %cst_119 = arith.constant 0.000000e+00 : f32
    %241 = vector.broadcast %cst_119 : f32 to vector<2x1xf32>
    %242 = arith.maximumf %240, %241 : vector<2x1xf32>
    %c0_120 = arith.constant 0 : index
    %c0_121 = arith.constant 0 : index
    %243 = vector.load %arg7[%c0_120, %c0_121] : memref<32x2xf32, #tpu.memory_space<vmem>>, vector<32x2xf32>
    %cst_122 = arith.constant dense<0.000000e+00> : vector<32x1xf32>
    %244 = tpu.matmul %243, %242, %cst_122 {dimension_numbers = #tpu.dot_dimension_numbers<[1], [0], [0], [1], [0, 0, 1, 1], [], []>} : vector<32x2xf32>, vector<2x1xf32>, vector<32x1xf32> -> vector<32x1xf32>
    %245 = arith.addf %238, %244 : vector<32x1xf32>
    %cst_123 = arith.constant 0.000000e+00 : f32
    %246 = vector.broadcast %cst_123 : f32 to vector<32x1xf32>
    %247 = arith.subf %246, %245 : vector<32x1xf32>
    %248 = math.exp %247 : vector<32x1xf32>
    %cst_124 = arith.constant 1.000000e+00 : f32
    %249 = vector.broadcast %cst_124 : f32 to vector<32x1xf32>
    %250 = arith.addf %249, %248 : vector<32x1xf32>
    %cst_125 = arith.constant 1.000000e+00 : f32
    %251 = vector.broadcast %cst_125 : f32 to vector<32x1xf32>
    %252 = arith.divf %251, %250 : vector<32x1xf32>
    %253 = vector.broadcast %252 : vector<32x1xf32> to vector<32x256xf32>
    %254 = arith.mulf %226, %253 : vector<32x256xf32>
    %cst_126 = arith.constant dense<0.000000e+00> : vector<256xf32>
    %255 = vector.multi_reduction <add>, %254, %cst_126 [0] : vector<32x256xf32> to vector<256xf32>
    %256 = vector.shape_cast %255 : vector<256xf32> to vector<1x256xf32>
    %cst_127 = arith.constant 3.200000e+01 : f32
    %257 = vector.broadcast %cst_127 : f32 to vector<1x256xf32>
    %258 = arith.divf %256, %257 : vector<1x256xf32>
    %cst_128 = arith.constant dense<0xFF800000> : vector<256xf32>
    %259 = vector.multi_reduction <maximumf>, %254, %cst_128 [0] : vector<32x256xf32> to vector<256xf32>
    %260 = vector.shape_cast %259 : vector<256xf32> to vector<1x256xf32>
    %cst_129 = arith.constant 0.000000e+00 : f32
    %261 = vector.broadcast %cst_129 : f32 to vector<1x256xf32>
    %c51_i32 = arith.constant 51 : i32
    %262 = tpu.dynamic_rotate %258 by %c51_i32 dim 1 : vector<1x256xf32>, i32 -> vector<1x256xf32>
    %c3_i32 = arith.constant 3 : i32
    %263 = vector.broadcast %c3_i32 : i32 to vector<1x256xi32>
    %264 = arith.cmpi sge, %2, %263 : vector<1x256xi32>
    %c3_i32_130 = arith.constant 3 : i32
    %265 = vector.broadcast %c3_i32_130 : i32 to vector<1x256xi32>
    %266 = arith.cmpi sge, %4, %265 : vector<1x256xi32>
    %267 = arith.andi %264, %266 : vector<1x256xi1>
    %268 = arith.extui %267 : vector<1x256xi1> to vector<1x256xi32>
    %269 = arith.sitofp %268 : vector<1x256xi32> to vector<1x256xf32>
    %270 = arith.mulf %262, %269 : vector<1x256xf32>
    %c51_i32_131 = arith.constant 51 : i32
    %271 = tpu.dynamic_rotate %260 by %c51_i32_131 dim 1 : vector<1x256xf32>, i32 -> vector<1x256xf32>
    %c3_i32_132 = arith.constant 3 : i32
    %272 = vector.broadcast %c3_i32_132 : i32 to vector<1x256xi32>
    %273 = arith.cmpi sge, %2, %272 : vector<1x256xi32>
    %c3_i32_133 = arith.constant 3 : i32
    %274 = vector.broadcast %c3_i32_133 : i32 to vector<1x256xi32>
    %275 = arith.cmpi sge, %4, %274 : vector<1x256xi32>
    %276 = arith.andi %273, %275 : vector<1x256xi1>
    %277 = arith.extui %276 : vector<1x256xi1> to vector<1x256xi32>
    %278 = arith.sitofp %277 : vector<1x256xi32> to vector<1x256xf32>
    %279 = arith.mulf %271, %278 : vector<1x256xf32>
    %c0_134 = arith.constant 0 : index
    %280 = memref.load %arg8[%c0_134] : memref<98xf32, #tpu.memory_space<smem>>
    %281 = vector.broadcast %280 : f32 to vector<1x256xf32>
    %282 = arith.mulf %270, %281 : vector<1x256xf32>
    %283 = arith.addf %261, %282 : vector<1x256xf32>
    %c49 = arith.constant 49 : index
    %284 = memref.load %arg8[%c49] : memref<98xf32, #tpu.memory_space<smem>>
    %285 = vector.broadcast %284 : f32 to vector<1x256xf32>
    %286 = arith.mulf %279, %285 : vector<1x256xf32>
    %287 = arith.addf %283, %286 : vector<1x256xf32>
    %c50_i32 = arith.constant 50 : i32
    %288 = tpu.dynamic_rotate %258 by %c50_i32 dim 1 : vector<1x256xf32>, i32 -> vector<1x256xf32>
    %c3_i32_135 = arith.constant 3 : i32
    %289 = vector.broadcast %c3_i32_135 : i32 to vector<1x256xi32>
    %290 = arith.cmpi sge, %2, %289 : vector<1x256xi32>
    %c2_i32 = arith.constant 2 : i32
    %291 = vector.broadcast %c2_i32 : i32 to vector<1x256xi32>
    %292 = arith.cmpi sge, %4, %291 : vector<1x256xi32>
    %293 = arith.andi %290, %292 : vector<1x256xi1>
    %294 = arith.extui %293 : vector<1x256xi1> to vector<1x256xi32>
    %295 = arith.sitofp %294 : vector<1x256xi32> to vector<1x256xf32>
    %296 = arith.mulf %288, %295 : vector<1x256xf32>
    %c50_i32_136 = arith.constant 50 : i32
    %297 = tpu.dynamic_rotate %260 by %c50_i32_136 dim 1 : vector<1x256xf32>, i32 -> vector<1x256xf32>
    %c3_i32_137 = arith.constant 3 : i32
    %298 = vector.broadcast %c3_i32_137 : i32 to vector<1x256xi32>
    %299 = arith.cmpi sge, %2, %298 : vector<1x256xi32>
    %c2_i32_138 = arith.constant 2 : i32
    %300 = vector.broadcast %c2_i32_138 : i32 to vector<1x256xi32>
    %301 = arith.cmpi sge, %4, %300 : vector<1x256xi32>
    %302 = arith.andi %299, %301 : vector<1x256xi1>
    %303 = arith.extui %302 : vector<1x256xi1> to vector<1x256xi32>
    %304 = arith.sitofp %303 : vector<1x256xi32> to vector<1x256xf32>
    %305 = arith.mulf %297, %304 : vector<1x256xf32>
    %c1_139 = arith.constant 1 : index
    %306 = memref.load %arg8[%c1_139] : memref<98xf32, #tpu.memory_space<smem>>
    %307 = vector.broadcast %306 : f32 to vector<1x256xf32>
    %308 = arith.mulf %296, %307 : vector<1x256xf32>
    %309 = arith.addf %287, %308 : vector<1x256xf32>
    %c50 = arith.constant 50 : index
    %310 = memref.load %arg8[%c50] : memref<98xf32, #tpu.memory_space<smem>>
    %311 = vector.broadcast %310 : f32 to vector<1x256xf32>
    %312 = arith.mulf %305, %311 : vector<1x256xf32>
    %313 = arith.addf %309, %312 : vector<1x256xf32>
    %c49_i32 = arith.constant 49 : i32
    %314 = tpu.dynamic_rotate %258 by %c49_i32 dim 1 : vector<1x256xf32>, i32 -> vector<1x256xf32>
    %c3_i32_140 = arith.constant 3 : i32
    %315 = vector.broadcast %c3_i32_140 : i32 to vector<1x256xi32>
    %316 = arith.cmpi sge, %2, %315 : vector<1x256xi32>
    %c1_i32_141 = arith.constant 1 : i32
    %317 = vector.broadcast %c1_i32_141 : i32 to vector<1x256xi32>
    %318 = arith.cmpi sge, %4, %317 : vector<1x256xi32>
    %319 = arith.andi %316, %318 : vector<1x256xi1>
    %320 = arith.extui %319 : vector<1x256xi1> to vector<1x256xi32>
    %321 = arith.sitofp %320 : vector<1x256xi32> to vector<1x256xf32>
    %322 = arith.mulf %314, %321 : vector<1x256xf32>
    %c49_i32_142 = arith.constant 49 : i32
    %323 = tpu.dynamic_rotate %260 by %c49_i32_142 dim 1 : vector<1x256xf32>, i32 -> vector<1x256xf32>
    %c3_i32_143 = arith.constant 3 : i32
    %324 = vector.broadcast %c3_i32_143 : i32 to vector<1x256xi32>
    %325 = arith.cmpi sge, %2, %324 : vector<1x256xi32>
    %c1_i32_144 = arith.constant 1 : i32
    %326 = vector.broadcast %c1_i32_144 : i32 to vector<1x256xi32>
    %327 = arith.cmpi sge, %4, %326 : vector<1x256xi32>
    %328 = arith.andi %325, %327 : vector<1x256xi1>
    %329 = arith.extui %328 : vector<1x256xi1> to vector<1x256xi32>
    %330 = arith.sitofp %329 : vector<1x256xi32> to vector<1x256xf32>
    %331 = arith.mulf %323, %330 : vector<1x256xf32>
    %c2_145 = arith.constant 2 : index
    %332 = memref.load %arg8[%c2_145] : memref<98xf32, #tpu.memory_space<smem>>
    %333 = vector.broadcast %332 : f32 to vector<1x256xf32>
    %334 = arith.mulf %322, %333 : vector<1x256xf32>
    %335 = arith.addf %313, %334 : vector<1x256xf32>
    %c51 = arith.constant 51 : index
    %336 = memref.load %arg8[%c51] : memref<98xf32, #tpu.memory_space<smem>>
    %337 = vector.broadcast %336 : f32 to vector<1x256xf32>
    %338 = arith.mulf %331, %337 : vector<1x256xf32>
    %339 = arith.addf %335, %338 : vector<1x256xf32>
    %c48_i32 = arith.constant 48 : i32
    %340 = tpu.dynamic_rotate %258 by %c48_i32 dim 1 : vector<1x256xf32>, i32 -> vector<1x256xf32>
    %c3_i32_146 = arith.constant 3 : i32
    %341 = vector.broadcast %c3_i32_146 : i32 to vector<1x256xi32>
    %342 = arith.cmpi sge, %2, %341 : vector<1x256xi32>
    %343 = arith.extui %342 : vector<1x256xi1> to vector<1x256xi32>
    %344 = arith.sitofp %343 : vector<1x256xi32> to vector<1x256xf32>
    %345 = arith.mulf %340, %344 : vector<1x256xf32>
    %c48_i32_147 = arith.constant 48 : i32
    %346 = tpu.dynamic_rotate %260 by %c48_i32_147 dim 1 : vector<1x256xf32>, i32 -> vector<1x256xf32>
    %c3_i32_148 = arith.constant 3 : i32
    %347 = vector.broadcast %c3_i32_148 : i32 to vector<1x256xi32>
    %348 = arith.cmpi sge, %2, %347 : vector<1x256xi32>
    %349 = arith.extui %348 : vector<1x256xi1> to vector<1x256xi32>
    %350 = arith.sitofp %349 : vector<1x256xi32> to vector<1x256xf32>
    %351 = arith.mulf %346, %350 : vector<1x256xf32>
    %c3_149 = arith.constant 3 : index
    %352 = memref.load %arg8[%c3_149] : memref<98xf32, #tpu.memory_space<smem>>
    %353 = vector.broadcast %352 : f32 to vector<1x256xf32>
    %354 = arith.mulf %345, %353 : vector<1x256xf32>
    %355 = arith.addf %339, %354 : vector<1x256xf32>
    %c52 = arith.constant 52 : index
    %356 = memref.load %arg8[%c52] : memref<98xf32, #tpu.memory_space<smem>>
    %357 = vector.broadcast %356 : f32 to vector<1x256xf32>
    %358 = arith.mulf %351, %357 : vector<1x256xf32>
    %359 = arith.addf %355, %358 : vector<1x256xf32>
    %c47_i32 = arith.constant 47 : i32
    %360 = tpu.dynamic_rotate %258 by %c47_i32 dim 1 : vector<1x256xf32>, i32 -> vector<1x256xf32>
    %c3_i32_150 = arith.constant 3 : i32
    %361 = vector.broadcast %c3_i32_150 : i32 to vector<1x256xi32>
    %362 = arith.cmpi sge, %2, %361 : vector<1x256xi32>
    %c15_i32_151 = arith.constant 15 : i32
    %363 = vector.broadcast %c15_i32_151 : i32 to vector<1x256xi32>
    %364 = arith.cmpi slt, %4, %363 : vector<1x256xi32>
    %365 = arith.andi %362, %364 : vector<1x256xi1>
    %366 = arith.extui %365 : vector<1x256xi1> to vector<1x256xi32>
    %367 = arith.sitofp %366 : vector<1x256xi32> to vector<1x256xf32>
    %368 = arith.mulf %360, %367 : vector<1x256xf32>
    %c47_i32_152 = arith.constant 47 : i32
    %369 = tpu.dynamic_rotate %260 by %c47_i32_152 dim 1 : vector<1x256xf32>, i32 -> vector<1x256xf32>
    %c3_i32_153 = arith.constant 3 : i32
    %370 = vector.broadcast %c3_i32_153 : i32 to vector<1x256xi32>
    %371 = arith.cmpi sge, %2, %370 : vector<1x256xi32>
    %c15_i32_154 = arith.constant 15 : i32
    %372 = vector.broadcast %c15_i32_154 : i32 to vector<1x256xi32>
    %373 = arith.cmpi slt, %4, %372 : vector<1x256xi32>
    %374 = arith.andi %371, %373 : vector<1x256xi1>
    %375 = arith.extui %374 : vector<1x256xi1> to vector<1x256xi32>
    %376 = arith.sitofp %375 : vector<1x256xi32> to vector<1x256xf32>
    %377 = arith.mulf %369, %376 : vector<1x256xf32>
    %c4_155 = arith.constant 4 : index
    %378 = memref.load %arg8[%c4_155] : memref<98xf32, #tpu.memory_space<smem>>
    %379 = vector.broadcast %378 : f32 to vector<1x256xf32>
    %380 = arith.mulf %368, %379 : vector<1x256xf32>
    %381 = arith.addf %359, %380 : vector<1x256xf32>
    %c53 = arith.constant 53 : index
    %382 = memref.load %arg8[%c53] : memref<98xf32, #tpu.memory_space<smem>>
    %383 = vector.broadcast %382 : f32 to vector<1x256xf32>
    %384 = arith.mulf %377, %383 : vector<1x256xf32>
    %385 = arith.addf %381, %384 : vector<1x256xf32>
    %c46_i32 = arith.constant 46 : i32
    %386 = tpu.dynamic_rotate %258 by %c46_i32 dim 1 : vector<1x256xf32>, i32 -> vector<1x256xf32>
    %c3_i32_156 = arith.constant 3 : i32
    %387 = vector.broadcast %c3_i32_156 : i32 to vector<1x256xi32>
    %388 = arith.cmpi sge, %2, %387 : vector<1x256xi32>
    %c14_i32 = arith.constant 14 : i32
    %389 = vector.broadcast %c14_i32 : i32 to vector<1x256xi32>
    %390 = arith.cmpi slt, %4, %389 : vector<1x256xi32>
    %391 = arith.andi %388, %390 : vector<1x256xi1>
    %392 = arith.extui %391 : vector<1x256xi1> to vector<1x256xi32>
    %393 = arith.sitofp %392 : vector<1x256xi32> to vector<1x256xf32>
    %394 = arith.mulf %386, %393 : vector<1x256xf32>
    %c46_i32_157 = arith.constant 46 : i32
    %395 = tpu.dynamic_rotate %260 by %c46_i32_157 dim 1 : vector<1x256xf32>, i32 -> vector<1x256xf32>
    %c3_i32_158 = arith.constant 3 : i32
    %396 = vector.broadcast %c3_i32_158 : i32 to vector<1x256xi32>
    %397 = arith.cmpi sge, %2, %396 : vector<1x256xi32>
    %c14_i32_159 = arith.constant 14 : i32
    %398 = vector.broadcast %c14_i32_159 : i32 to vector<1x256xi32>
    %399 = arith.cmpi slt, %4, %398 : vector<1x256xi32>
    %400 = arith.andi %397, %399 : vector<1x256xi1>
    %401 = arith.extui %400 : vector<1x256xi1> to vector<1x256xi32>
    %402 = arith.sitofp %401 : vector<1x256xi32> to vector<1x256xf32>
    %403 = arith.mulf %395, %402 : vector<1x256xf32>
    %c5_160 = arith.constant 5 : index
    %404 = memref.load %arg8[%c5_160] : memref<98xf32, #tpu.memory_space<smem>>
    %405 = vector.broadcast %404 : f32 to vector<1x256xf32>
    %406 = arith.mulf %394, %405 : vector<1x256xf32>
    %407 = arith.addf %385, %406 : vector<1x256xf32>
    %c54 = arith.constant 54 : index
    %408 = memref.load %arg8[%c54] : memref<98xf32, #tpu.memory_space<smem>>
    %409 = vector.broadcast %408 : f32 to vector<1x256xf32>
    %410 = arith.mulf %403, %409 : vector<1x256xf32>
    %411 = arith.addf %407, %410 : vector<1x256xf32>
    %c45_i32 = arith.constant 45 : i32
    %412 = tpu.dynamic_rotate %258 by %c45_i32 dim 1 : vector<1x256xf32>, i32 -> vector<1x256xf32>
    %c3_i32_161 = arith.constant 3 : i32
    %413 = vector.broadcast %c3_i32_161 : i32 to vector<1x256xi32>
    %414 = arith.cmpi sge, %2, %413 : vector<1x256xi32>
    %c13_i32 = arith.constant 13 : i32
    %415 = vector.broadcast %c13_i32 : i32 to vector<1x256xi32>
    %416 = arith.cmpi slt, %4, %415 : vector<1x256xi32>
    %417 = arith.andi %414, %416 : vector<1x256xi1>
    %418 = arith.extui %417 : vector<1x256xi1> to vector<1x256xi32>
    %419 = arith.sitofp %418 : vector<1x256xi32> to vector<1x256xf32>
    %420 = arith.mulf %412, %419 : vector<1x256xf32>
    %c45_i32_162 = arith.constant 45 : i32
    %421 = tpu.dynamic_rotate %260 by %c45_i32_162 dim 1 : vector<1x256xf32>, i32 -> vector<1x256xf32>
    %c3_i32_163 = arith.constant 3 : i32
    %422 = vector.broadcast %c3_i32_163 : i32 to vector<1x256xi32>
    %423 = arith.cmpi sge, %2, %422 : vector<1x256xi32>
    %c13_i32_164 = arith.constant 13 : i32
    %424 = vector.broadcast %c13_i32_164 : i32 to vector<1x256xi32>
    %425 = arith.cmpi slt, %4, %424 : vector<1x256xi32>
    %426 = arith.andi %423, %425 : vector<1x256xi1>
    %427 = arith.extui %426 : vector<1x256xi1> to vector<1x256xi32>
    %428 = arith.sitofp %427 : vector<1x256xi32> to vector<1x256xf32>
    %429 = arith.mulf %421, %428 : vector<1x256xf32>
    %c6_165 = arith.constant 6 : index
    %430 = memref.load %arg8[%c6_165] : memref<98xf32, #tpu.memory_space<smem>>
    %431 = vector.broadcast %430 : f32 to vector<1x256xf32>
    %432 = arith.mulf %420, %431 : vector<1x256xf32>
    %433 = arith.addf %411, %432 : vector<1x256xf32>
    %c55 = arith.constant 55 : index
    %434 = memref.load %arg8[%c55] : memref<98xf32, #tpu.memory_space<smem>>
    %435 = vector.broadcast %434 : f32 to vector<1x256xf32>
    %436 = arith.mulf %429, %435 : vector<1x256xf32>
    %437 = arith.addf %433, %436 : vector<1x256xf32>
    %c35_i32 = arith.constant 35 : i32
    %438 = tpu.dynamic_rotate %258 by %c35_i32 dim 1 : vector<1x256xf32>, i32 -> vector<1x256xf32>
    %c2_i32_166 = arith.constant 2 : i32
    %439 = vector.broadcast %c2_i32_166 : i32 to vector<1x256xi32>
    %440 = arith.cmpi sge, %2, %439 : vector<1x256xi32>
    %c3_i32_167 = arith.constant 3 : i32
    %441 = vector.broadcast %c3_i32_167 : i32 to vector<1x256xi32>
    %442 = arith.cmpi sge, %4, %441 : vector<1x256xi32>
    %443 = arith.andi %440, %442 : vector<1x256xi1>
    %444 = arith.extui %443 : vector<1x256xi1> to vector<1x256xi32>
    %445 = arith.sitofp %444 : vector<1x256xi32> to vector<1x256xf32>
    %446 = arith.mulf %438, %445 : vector<1x256xf32>
    %c35_i32_168 = arith.constant 35 : i32
    %447 = tpu.dynamic_rotate %260 by %c35_i32_168 dim 1 : vector<1x256xf32>, i32 -> vector<1x256xf32>
    %c2_i32_169 = arith.constant 2 : i32
    %448 = vector.broadcast %c2_i32_169 : i32 to vector<1x256xi32>
    %449 = arith.cmpi sge, %2, %448 : vector<1x256xi32>
    %c3_i32_170 = arith.constant 3 : i32
    %450 = vector.broadcast %c3_i32_170 : i32 to vector<1x256xi32>
    %451 = arith.cmpi sge, %4, %450 : vector<1x256xi32>
    %452 = arith.andi %449, %451 : vector<1x256xi1>
    %453 = arith.extui %452 : vector<1x256xi1> to vector<1x256xi32>
    %454 = arith.sitofp %453 : vector<1x256xi32> to vector<1x256xf32>
    %455 = arith.mulf %447, %454 : vector<1x256xf32>
    %c7_171 = arith.constant 7 : index
    %456 = memref.load %arg8[%c7_171] : memref<98xf32, #tpu.memory_space<smem>>
    %457 = vector.broadcast %456 : f32 to vector<1x256xf32>
    %458 = arith.mulf %446, %457 : vector<1x256xf32>
    %459 = arith.addf %437, %458 : vector<1x256xf32>
    %c56 = arith.constant 56 : index
    %460 = memref.load %arg8[%c56] : memref<98xf32, #tpu.memory_space<smem>>
    %461 = vector.broadcast %460 : f32 to vector<1x256xf32>
    %462 = arith.mulf %455, %461 : vector<1x256xf32>
    %463 = arith.addf %459, %462 : vector<1x256xf32>
    %c34_i32 = arith.constant 34 : i32
    %464 = tpu.dynamic_rotate %258 by %c34_i32 dim 1 : vector<1x256xf32>, i32 -> vector<1x256xf32>
    %c2_i32_172 = arith.constant 2 : i32
    %465 = vector.broadcast %c2_i32_172 : i32 to vector<1x256xi32>
    %466 = arith.cmpi sge, %2, %465 : vector<1x256xi32>
    %c2_i32_173 = arith.constant 2 : i32
    %467 = vector.broadcast %c2_i32_173 : i32 to vector<1x256xi32>
    %468 = arith.cmpi sge, %4, %467 : vector<1x256xi32>
    %469 = arith.andi %466, %468 : vector<1x256xi1>
    %470 = arith.extui %469 : vector<1x256xi1> to vector<1x256xi32>
    %471 = arith.sitofp %470 : vector<1x256xi32> to vector<1x256xf32>
    %472 = arith.mulf %464, %471 : vector<1x256xf32>
    %c34_i32_174 = arith.constant 34 : i32
    %473 = tpu.dynamic_rotate %260 by %c34_i32_174 dim 1 : vector<1x256xf32>, i32 -> vector<1x256xf32>
    %c2_i32_175 = arith.constant 2 : i32
    %474 = vector.broadcast %c2_i32_175 : i32 to vector<1x256xi32>
    %475 = arith.cmpi sge, %2, %474 : vector<1x256xi32>
    %c2_i32_176 = arith.constant 2 : i32
    %476 = vector.broadcast %c2_i32_176 : i32 to vector<1x256xi32>
    %477 = arith.cmpi sge, %4, %476 : vector<1x256xi32>
    %478 = arith.andi %475, %477 : vector<1x256xi1>
    %479 = arith.extui %478 : vector<1x256xi1> to vector<1x256xi32>
    %480 = arith.sitofp %479 : vector<1x256xi32> to vector<1x256xf32>
    %481 = arith.mulf %473, %480 : vector<1x256xf32>
    %c8_177 = arith.constant 8 : index
    %482 = memref.load %arg8[%c8_177] : memref<98xf32, #tpu.memory_space<smem>>
    %483 = vector.broadcast %482 : f32 to vector<1x256xf32>
    %484 = arith.mulf %472, %483 : vector<1x256xf32>
    %485 = arith.addf %463, %484 : vector<1x256xf32>
    %c57 = arith.constant 57 : index
    %486 = memref.load %arg8[%c57] : memref<98xf32, #tpu.memory_space<smem>>
    %487 = vector.broadcast %486 : f32 to vector<1x256xf32>
    %488 = arith.mulf %481, %487 : vector<1x256xf32>
    %489 = arith.addf %485, %488 : vector<1x256xf32>
    %c33_i32 = arith.constant 33 : i32
    %490 = tpu.dynamic_rotate %258 by %c33_i32 dim 1 : vector<1x256xf32>, i32 -> vector<1x256xf32>
    %c2_i32_178 = arith.constant 2 : i32
    %491 = vector.broadcast %c2_i32_178 : i32 to vector<1x256xi32>
    %492 = arith.cmpi sge, %2, %491 : vector<1x256xi32>
    %c1_i32_179 = arith.constant 1 : i32
    %493 = vector.broadcast %c1_i32_179 : i32 to vector<1x256xi32>
    %494 = arith.cmpi sge, %4, %493 : vector<1x256xi32>
    %495 = arith.andi %492, %494 : vector<1x256xi1>
    %496 = arith.extui %495 : vector<1x256xi1> to vector<1x256xi32>
    %497 = arith.sitofp %496 : vector<1x256xi32> to vector<1x256xf32>
    %498 = arith.mulf %490, %497 : vector<1x256xf32>
    %c33_i32_180 = arith.constant 33 : i32
    %499 = tpu.dynamic_rotate %260 by %c33_i32_180 dim 1 : vector<1x256xf32>, i32 -> vector<1x256xf32>
    %c2_i32_181 = arith.constant 2 : i32
    %500 = vector.broadcast %c2_i32_181 : i32 to vector<1x256xi32>
    %501 = arith.cmpi sge, %2, %500 : vector<1x256xi32>
    %c1_i32_182 = arith.constant 1 : i32
    %502 = vector.broadcast %c1_i32_182 : i32 to vector<1x256xi32>
    %503 = arith.cmpi sge, %4, %502 : vector<1x256xi32>
    %504 = arith.andi %501, %503 : vector<1x256xi1>
    %505 = arith.extui %504 : vector<1x256xi1> to vector<1x256xi32>
    %506 = arith.sitofp %505 : vector<1x256xi32> to vector<1x256xf32>
    %507 = arith.mulf %499, %506 : vector<1x256xf32>
    %c9 = arith.constant 9 : index
    %508 = memref.load %arg8[%c9] : memref<98xf32, #tpu.memory_space<smem>>
    %509 = vector.broadcast %508 : f32 to vector<1x256xf32>
    %510 = arith.mulf %498, %509 : vector<1x256xf32>
    %511 = arith.addf %489, %510 : vector<1x256xf32>
    %c58 = arith.constant 58 : index
    %512 = memref.load %arg8[%c58] : memref<98xf32, #tpu.memory_space<smem>>
    %513 = vector.broadcast %512 : f32 to vector<1x256xf32>
    %514 = arith.mulf %507, %513 : vector<1x256xf32>
    %515 = arith.addf %511, %514 : vector<1x256xf32>
    %c32_i32 = arith.constant 32 : i32
    %516 = tpu.dynamic_rotate %258 by %c32_i32 dim 1 : vector<1x256xf32>, i32 -> vector<1x256xf32>
    %c2_i32_183 = arith.constant 2 : i32
    %517 = vector.broadcast %c2_i32_183 : i32 to vector<1x256xi32>
    %518 = arith.cmpi sge, %2, %517 : vector<1x256xi32>
    %519 = arith.extui %518 : vector<1x256xi1> to vector<1x256xi32>
    %520 = arith.sitofp %519 : vector<1x256xi32> to vector<1x256xf32>
    %521 = arith.mulf %516, %520 : vector<1x256xf32>
    %c32_i32_184 = arith.constant 32 : i32
    %522 = tpu.dynamic_rotate %260 by %c32_i32_184 dim 1 : vector<1x256xf32>, i32 -> vector<1x256xf32>
    %c2_i32_185 = arith.constant 2 : i32
    %523 = vector.broadcast %c2_i32_185 : i32 to vector<1x256xi32>
    %524 = arith.cmpi sge, %2, %523 : vector<1x256xi32>
    %525 = arith.extui %524 : vector<1x256xi1> to vector<1x256xi32>
    %526 = arith.sitofp %525 : vector<1x256xi32> to vector<1x256xf32>
    %527 = arith.mulf %522, %526 : vector<1x256xf32>
    %c10 = arith.constant 10 : index
    %528 = memref.load %arg8[%c10] : memref<98xf32, #tpu.memory_space<smem>>
    %529 = vector.broadcast %528 : f32 to vector<1x256xf32>
    %530 = arith.mulf %521, %529 : vector<1x256xf32>
    %531 = arith.addf %515, %530 : vector<1x256xf32>
    %c59 = arith.constant 59 : index
    %532 = memref.load %arg8[%c59] : memref<98xf32, #tpu.memory_space<smem>>
    %533 = vector.broadcast %532 : f32 to vector<1x256xf32>
    %534 = arith.mulf %527, %533 : vector<1x256xf32>
    %535 = arith.addf %531, %534 : vector<1x256xf32>
    %c31_i32 = arith.constant 31 : i32
    %536 = tpu.dynamic_rotate %258 by %c31_i32 dim 1 : vector<1x256xf32>, i32 -> vector<1x256xf32>
    %c2_i32_186 = arith.constant 2 : i32
    %537 = vector.broadcast %c2_i32_186 : i32 to vector<1x256xi32>
    %538 = arith.cmpi sge, %2, %537 : vector<1x256xi32>
    %c15_i32_187 = arith.constant 15 : i32
    %539 = vector.broadcast %c15_i32_187 : i32 to vector<1x256xi32>
    %540 = arith.cmpi slt, %4, %539 : vector<1x256xi32>
    %541 = arith.andi %538, %540 : vector<1x256xi1>
    %542 = arith.extui %541 : vector<1x256xi1> to vector<1x256xi32>
    %543 = arith.sitofp %542 : vector<1x256xi32> to vector<1x256xf32>
    %544 = arith.mulf %536, %543 : vector<1x256xf32>
    %c31_i32_188 = arith.constant 31 : i32
    %545 = tpu.dynamic_rotate %260 by %c31_i32_188 dim 1 : vector<1x256xf32>, i32 -> vector<1x256xf32>
    %c2_i32_189 = arith.constant 2 : i32
    %546 = vector.broadcast %c2_i32_189 : i32 to vector<1x256xi32>
    %547 = arith.cmpi sge, %2, %546 : vector<1x256xi32>
    %c15_i32_190 = arith.constant 15 : i32
    %548 = vector.broadcast %c15_i32_190 : i32 to vector<1x256xi32>
    %549 = arith.cmpi slt, %4, %548 : vector<1x256xi32>
    %550 = arith.andi %547, %549 : vector<1x256xi1>
    %551 = arith.extui %550 : vector<1x256xi1> to vector<1x256xi32>
    %552 = arith.sitofp %551 : vector<1x256xi32> to vector<1x256xf32>
    %553 = arith.mulf %545, %552 : vector<1x256xf32>
    %c11 = arith.constant 11 : index
    %554 = memref.load %arg8[%c11] : memref<98xf32, #tpu.memory_space<smem>>
    %555 = vector.broadcast %554 : f32 to vector<1x256xf32>
    %556 = arith.mulf %544, %555 : vector<1x256xf32>
    %557 = arith.addf %535, %556 : vector<1x256xf32>
    %c60 = arith.constant 60 : index
    %558 = memref.load %arg8[%c60] : memref<98xf32, #tpu.memory_space<smem>>
    %559 = vector.broadcast %558 : f32 to vector<1x256xf32>
    %560 = arith.mulf %553, %559 : vector<1x256xf32>
    %561 = arith.addf %557, %560 : vector<1x256xf32>
    %c30_i32 = arith.constant 30 : i32
    %562 = tpu.dynamic_rotate %258 by %c30_i32 dim 1 : vector<1x256xf32>, i32 -> vector<1x256xf32>
    %c2_i32_191 = arith.constant 2 : i32
    %563 = vector.broadcast %c2_i32_191 : i32 to vector<1x256xi32>
    %564 = arith.cmpi sge, %2, %563 : vector<1x256xi32>
    %c14_i32_192 = arith.constant 14 : i32
    %565 = vector.broadcast %c14_i32_192 : i32 to vector<1x256xi32>
    %566 = arith.cmpi slt, %4, %565 : vector<1x256xi32>
    %567 = arith.andi %564, %566 : vector<1x256xi1>
    %568 = arith.extui %567 : vector<1x256xi1> to vector<1x256xi32>
    %569 = arith.sitofp %568 : vector<1x256xi32> to vector<1x256xf32>
    %570 = arith.mulf %562, %569 : vector<1x256xf32>
    %c30_i32_193 = arith.constant 30 : i32
    %571 = tpu.dynamic_rotate %260 by %c30_i32_193 dim 1 : vector<1x256xf32>, i32 -> vector<1x256xf32>
    %c2_i32_194 = arith.constant 2 : i32
    %572 = vector.broadcast %c2_i32_194 : i32 to vector<1x256xi32>
    %573 = arith.cmpi sge, %2, %572 : vector<1x256xi32>
    %c14_i32_195 = arith.constant 14 : i32
    %574 = vector.broadcast %c14_i32_195 : i32 to vector<1x256xi32>
    %575 = arith.cmpi slt, %4, %574 : vector<1x256xi32>
    %576 = arith.andi %573, %575 : vector<1x256xi1>
    %577 = arith.extui %576 : vector<1x256xi1> to vector<1x256xi32>
    %578 = arith.sitofp %577 : vector<1x256xi32> to vector<1x256xf32>
    %579 = arith.mulf %571, %578 : vector<1x256xf32>
    %c12 = arith.constant 12 : index
    %580 = memref.load %arg8[%c12] : memref<98xf32, #tpu.memory_space<smem>>
    %581 = vector.broadcast %580 : f32 to vector<1x256xf32>
    %582 = arith.mulf %570, %581 : vector<1x256xf32>
    %583 = arith.addf %561, %582 : vector<1x256xf32>
    %c61 = arith.constant 61 : index
    %584 = memref.load %arg8[%c61] : memref<98xf32, #tpu.memory_space<smem>>
    %585 = vector.broadcast %584 : f32 to vector<1x256xf32>
    %586 = arith.mulf %579, %585 : vector<1x256xf32>
    %587 = arith.addf %583, %586 : vector<1x256xf32>
    %c29_i32 = arith.constant 29 : i32
    %588 = tpu.dynamic_rotate %258 by %c29_i32 dim 1 : vector<1x256xf32>, i32 -> vector<1x256xf32>
    %c2_i32_196 = arith.constant 2 : i32
    %589 = vector.broadcast %c2_i32_196 : i32 to vector<1x256xi32>
    %590 = arith.cmpi sge, %2, %589 : vector<1x256xi32>
    %c13_i32_197 = arith.constant 13 : i32
    %591 = vector.broadcast %c13_i32_197 : i32 to vector<1x256xi32>
    %592 = arith.cmpi slt, %4, %591 : vector<1x256xi32>
    %593 = arith.andi %590, %592 : vector<1x256xi1>
    %594 = arith.extui %593 : vector<1x256xi1> to vector<1x256xi32>
    %595 = arith.sitofp %594 : vector<1x256xi32> to vector<1x256xf32>
    %596 = arith.mulf %588, %595 : vector<1x256xf32>
    %c29_i32_198 = arith.constant 29 : i32
    %597 = tpu.dynamic_rotate %260 by %c29_i32_198 dim 1 : vector<1x256xf32>, i32 -> vector<1x256xf32>
    %c2_i32_199 = arith.constant 2 : i32
    %598 = vector.broadcast %c2_i32_199 : i32 to vector<1x256xi32>
    %599 = arith.cmpi sge, %2, %598 : vector<1x256xi32>
    %c13_i32_200 = arith.constant 13 : i32
    %600 = vector.broadcast %c13_i32_200 : i32 to vector<1x256xi32>
    %601 = arith.cmpi slt, %4, %600 : vector<1x256xi32>
    %602 = arith.andi %599, %601 : vector<1x256xi1>
    %603 = arith.extui %602 : vector<1x256xi1> to vector<1x256xi32>
    %604 = arith.sitofp %603 : vector<1x256xi32> to vector<1x256xf32>
    %605 = arith.mulf %597, %604 : vector<1x256xf32>
    %c13 = arith.constant 13 : index
    %606 = memref.load %arg8[%c13] : memref<98xf32, #tpu.memory_space<smem>>
    %607 = vector.broadcast %606 : f32 to vector<1x256xf32>
    %608 = arith.mulf %596, %607 : vector<1x256xf32>
    %609 = arith.addf %587, %608 : vector<1x256xf32>
    %c62 = arith.constant 62 : index
    %610 = memref.load %arg8[%c62] : memref<98xf32, #tpu.memory_space<smem>>
    %611 = vector.broadcast %610 : f32 to vector<1x256xf32>
    %612 = arith.mulf %605, %611 : vector<1x256xf32>
    %613 = arith.addf %609, %612 : vector<1x256xf32>
    %c19_i32 = arith.constant 19 : i32
    %614 = tpu.dynamic_rotate %258 by %c19_i32 dim 1 : vector<1x256xf32>, i32 -> vector<1x256xf32>
    %c1_i32_201 = arith.constant 1 : i32
    %615 = vector.broadcast %c1_i32_201 : i32 to vector<1x256xi32>
    %616 = arith.cmpi sge, %2, %615 : vector<1x256xi32>
    %c3_i32_202 = arith.constant 3 : i32
    %617 = vector.broadcast %c3_i32_202 : i32 to vector<1x256xi32>
    %618 = arith.cmpi sge, %4, %617 : vector<1x256xi32>
    %619 = arith.andi %616, %618 : vector<1x256xi1>
    %620 = arith.extui %619 : vector<1x256xi1> to vector<1x256xi32>
    %621 = arith.sitofp %620 : vector<1x256xi32> to vector<1x256xf32>
    %622 = arith.mulf %614, %621 : vector<1x256xf32>
    %c19_i32_203 = arith.constant 19 : i32
    %623 = tpu.dynamic_rotate %260 by %c19_i32_203 dim 1 : vector<1x256xf32>, i32 -> vector<1x256xf32>
    %c1_i32_204 = arith.constant 1 : i32
    %624 = vector.broadcast %c1_i32_204 : i32 to vector<1x256xi32>
    %625 = arith.cmpi sge, %2, %624 : vector<1x256xi32>
    %c3_i32_205 = arith.constant 3 : i32
    %626 = vector.broadcast %c3_i32_205 : i32 to vector<1x256xi32>
    %627 = arith.cmpi sge, %4, %626 : vector<1x256xi32>
    %628 = arith.andi %625, %627 : vector<1x256xi1>
    %629 = arith.extui %628 : vector<1x256xi1> to vector<1x256xi32>
    %630 = arith.sitofp %629 : vector<1x256xi32> to vector<1x256xf32>
    %631 = arith.mulf %623, %630 : vector<1x256xf32>
    %c14 = arith.constant 14 : index
    %632 = memref.load %arg8[%c14] : memref<98xf32, #tpu.memory_space<smem>>
    %633 = vector.broadcast %632 : f32 to vector<1x256xf32>
    %634 = arith.mulf %622, %633 : vector<1x256xf32>
    %635 = arith.addf %613, %634 : vector<1x256xf32>
    %c63 = arith.constant 63 : index
    %636 = memref.load %arg8[%c63] : memref<98xf32, #tpu.memory_space<smem>>
    %637 = vector.broadcast %636 : f32 to vector<1x256xf32>
    %638 = arith.mulf %631, %637 : vector<1x256xf32>
    %639 = arith.addf %635, %638 : vector<1x256xf32>
    %c18_i32 = arith.constant 18 : i32
    %640 = tpu.dynamic_rotate %258 by %c18_i32 dim 1 : vector<1x256xf32>, i32 -> vector<1x256xf32>
    %c1_i32_206 = arith.constant 1 : i32
    %641 = vector.broadcast %c1_i32_206 : i32 to vector<1x256xi32>
    %642 = arith.cmpi sge, %2, %641 : vector<1x256xi32>
    %c2_i32_207 = arith.constant 2 : i32
    %643 = vector.broadcast %c2_i32_207 : i32 to vector<1x256xi32>
    %644 = arith.cmpi sge, %4, %643 : vector<1x256xi32>
    %645 = arith.andi %642, %644 : vector<1x256xi1>
    %646 = arith.extui %645 : vector<1x256xi1> to vector<1x256xi32>
    %647 = arith.sitofp %646 : vector<1x256xi32> to vector<1x256xf32>
    %648 = arith.mulf %640, %647 : vector<1x256xf32>
    %c18_i32_208 = arith.constant 18 : i32
    %649 = tpu.dynamic_rotate %260 by %c18_i32_208 dim 1 : vector<1x256xf32>, i32 -> vector<1x256xf32>
    %c1_i32_209 = arith.constant 1 : i32
    %650 = vector.broadcast %c1_i32_209 : i32 to vector<1x256xi32>
    %651 = arith.cmpi sge, %2, %650 : vector<1x256xi32>
    %c2_i32_210 = arith.constant 2 : i32
    %652 = vector.broadcast %c2_i32_210 : i32 to vector<1x256xi32>
    %653 = arith.cmpi sge, %4, %652 : vector<1x256xi32>
    %654 = arith.andi %651, %653 : vector<1x256xi1>
    %655 = arith.extui %654 : vector<1x256xi1> to vector<1x256xi32>
    %656 = arith.sitofp %655 : vector<1x256xi32> to vector<1x256xf32>
    %657 = arith.mulf %649, %656 : vector<1x256xf32>
    %c15 = arith.constant 15 : index
    %658 = memref.load %arg8[%c15] : memref<98xf32, #tpu.memory_space<smem>>
    %659 = vector.broadcast %658 : f32 to vector<1x256xf32>
    %660 = arith.mulf %648, %659 : vector<1x256xf32>
    %661 = arith.addf %639, %660 : vector<1x256xf32>
    %c64 = arith.constant 64 : index
    %662 = memref.load %arg8[%c64] : memref<98xf32, #tpu.memory_space<smem>>
    %663 = vector.broadcast %662 : f32 to vector<1x256xf32>
    %664 = arith.mulf %657, %663 : vector<1x256xf32>
    %665 = arith.addf %661, %664 : vector<1x256xf32>
    %c17_i32_211 = arith.constant 17 : i32
    %666 = tpu.dynamic_rotate %258 by %c17_i32_211 dim 1 : vector<1x256xf32>, i32 -> vector<1x256xf32>
    %c1_i32_212 = arith.constant 1 : i32
    %667 = vector.broadcast %c1_i32_212 : i32 to vector<1x256xi32>
    %668 = arith.cmpi sge, %2, %667 : vector<1x256xi32>
    %c1_i32_213 = arith.constant 1 : i32
    %669 = vector.broadcast %c1_i32_213 : i32 to vector<1x256xi32>
    %670 = arith.cmpi sge, %4, %669 : vector<1x256xi32>
    %671 = arith.andi %668, %670 : vector<1x256xi1>
    %672 = arith.extui %671 : vector<1x256xi1> to vector<1x256xi32>
    %673 = arith.sitofp %672 : vector<1x256xi32> to vector<1x256xf32>
    %674 = arith.mulf %666, %673 : vector<1x256xf32>
    %c17_i32_214 = arith.constant 17 : i32
    %675 = tpu.dynamic_rotate %260 by %c17_i32_214 dim 1 : vector<1x256xf32>, i32 -> vector<1x256xf32>
    %c1_i32_215 = arith.constant 1 : i32
    %676 = vector.broadcast %c1_i32_215 : i32 to vector<1x256xi32>
    %677 = arith.cmpi sge, %2, %676 : vector<1x256xi32>
    %c1_i32_216 = arith.constant 1 : i32
    %678 = vector.broadcast %c1_i32_216 : i32 to vector<1x256xi32>
    %679 = arith.cmpi sge, %4, %678 : vector<1x256xi32>
    %680 = arith.andi %677, %679 : vector<1x256xi1>
    %681 = arith.extui %680 : vector<1x256xi1> to vector<1x256xi32>
    %682 = arith.sitofp %681 : vector<1x256xi32> to vector<1x256xf32>
    %683 = arith.mulf %675, %682 : vector<1x256xf32>
    %c16 = arith.constant 16 : index
    %684 = memref.load %arg8[%c16] : memref<98xf32, #tpu.memory_space<smem>>
    %685 = vector.broadcast %684 : f32 to vector<1x256xf32>
    %686 = arith.mulf %674, %685 : vector<1x256xf32>
    %687 = arith.addf %665, %686 : vector<1x256xf32>
    %c65 = arith.constant 65 : index
    %688 = memref.load %arg8[%c65] : memref<98xf32, #tpu.memory_space<smem>>
    %689 = vector.broadcast %688 : f32 to vector<1x256xf32>
    %690 = arith.mulf %683, %689 : vector<1x256xf32>
    %691 = arith.addf %687, %690 : vector<1x256xf32>
    %c16_i32_217 = arith.constant 16 : i32
    %692 = tpu.dynamic_rotate %258 by %c16_i32_217 dim 1 : vector<1x256xf32>, i32 -> vector<1x256xf32>
    %c1_i32_218 = arith.constant 1 : i32
    %693 = vector.broadcast %c1_i32_218 : i32 to vector<1x256xi32>
    %694 = arith.cmpi sge, %2, %693 : vector<1x256xi32>
    %695 = arith.extui %694 : vector<1x256xi1> to vector<1x256xi32>
    %696 = arith.sitofp %695 : vector<1x256xi32> to vector<1x256xf32>
    %697 = arith.mulf %692, %696 : vector<1x256xf32>
    %c16_i32_219 = arith.constant 16 : i32
    %698 = tpu.dynamic_rotate %260 by %c16_i32_219 dim 1 : vector<1x256xf32>, i32 -> vector<1x256xf32>
    %c1_i32_220 = arith.constant 1 : i32
    %699 = vector.broadcast %c1_i32_220 : i32 to vector<1x256xi32>
    %700 = arith.cmpi sge, %2, %699 : vector<1x256xi32>
    %701 = arith.extui %700 : vector<1x256xi1> to vector<1x256xi32>
    %702 = arith.sitofp %701 : vector<1x256xi32> to vector<1x256xf32>
    %703 = arith.mulf %698, %702 : vector<1x256xf32>
    %c17 = arith.constant 17 : index
    %704 = memref.load %arg8[%c17] : memref<98xf32, #tpu.memory_space<smem>>
    %705 = vector.broadcast %704 : f32 to vector<1x256xf32>
    %706 = arith.mulf %697, %705 : vector<1x256xf32>
    %707 = arith.addf %691, %706 : vector<1x256xf32>
    %c66 = arith.constant 66 : index
    %708 = memref.load %arg8[%c66] : memref<98xf32, #tpu.memory_space<smem>>
    %709 = vector.broadcast %708 : f32 to vector<1x256xf32>
    %710 = arith.mulf %703, %709 : vector<1x256xf32>
    %711 = arith.addf %707, %710 : vector<1x256xf32>
    %c15_i32_221 = arith.constant 15 : i32
    %712 = tpu.dynamic_rotate %258 by %c15_i32_221 dim 1 : vector<1x256xf32>, i32 -> vector<1x256xf32>
    %c1_i32_222 = arith.constant 1 : i32
    %713 = vector.broadcast %c1_i32_222 : i32 to vector<1x256xi32>
    %714 = arith.cmpi sge, %2, %713 : vector<1x256xi32>
    %c15_i32_223 = arith.constant 15 : i32
    %715 = vector.broadcast %c15_i32_223 : i32 to vector<1x256xi32>
    %716 = arith.cmpi slt, %4, %715 : vector<1x256xi32>
    %717 = arith.andi %714, %716 : vector<1x256xi1>
    %718 = arith.extui %717 : vector<1x256xi1> to vector<1x256xi32>
    %719 = arith.sitofp %718 : vector<1x256xi32> to vector<1x256xf32>
    %720 = arith.mulf %712, %719 : vector<1x256xf32>
    %c15_i32_224 = arith.constant 15 : i32
    %721 = tpu.dynamic_rotate %260 by %c15_i32_224 dim 1 : vector<1x256xf32>, i32 -> vector<1x256xf32>
    %c1_i32_225 = arith.constant 1 : i32
    %722 = vector.broadcast %c1_i32_225 : i32 to vector<1x256xi32>
    %723 = arith.cmpi sge, %2, %722 : vector<1x256xi32>
    %c15_i32_226 = arith.constant 15 : i32
    %724 = vector.broadcast %c15_i32_226 : i32 to vector<1x256xi32>
    %725 = arith.cmpi slt, %4, %724 : vector<1x256xi32>
    %726 = arith.andi %723, %725 : vector<1x256xi1>
    %727 = arith.extui %726 : vector<1x256xi1> to vector<1x256xi32>
    %728 = arith.sitofp %727 : vector<1x256xi32> to vector<1x256xf32>
    %729 = arith.mulf %721, %728 : vector<1x256xf32>
    %c18 = arith.constant 18 : index
    %730 = memref.load %arg8[%c18] : memref<98xf32, #tpu.memory_space<smem>>
    %731 = vector.broadcast %730 : f32 to vector<1x256xf32>
    %732 = arith.mulf %720, %731 : vector<1x256xf32>
    %733 = arith.addf %711, %732 : vector<1x256xf32>
    %c67 = arith.constant 67 : index
    %734 = memref.load %arg8[%c67] : memref<98xf32, #tpu.memory_space<smem>>
    %735 = vector.broadcast %734 : f32 to vector<1x256xf32>
    %736 = arith.mulf %729, %735 : vector<1x256xf32>
    %737 = arith.addf %733, %736 : vector<1x256xf32>
    %c14_i32_227 = arith.constant 14 : i32
    %738 = tpu.dynamic_rotate %258 by %c14_i32_227 dim 1 : vector<1x256xf32>, i32 -> vector<1x256xf32>
    %c1_i32_228 = arith.constant 1 : i32
    %739 = vector.broadcast %c1_i32_228 : i32 to vector<1x256xi32>
    %740 = arith.cmpi sge, %2, %739 : vector<1x256xi32>
    %c14_i32_229 = arith.constant 14 : i32
    %741 = vector.broadcast %c14_i32_229 : i32 to vector<1x256xi32>
    %742 = arith.cmpi slt, %4, %741 : vector<1x256xi32>
    %743 = arith.andi %740, %742 : vector<1x256xi1>
    %744 = arith.extui %743 : vector<1x256xi1> to vector<1x256xi32>
    %745 = arith.sitofp %744 : vector<1x256xi32> to vector<1x256xf32>
    %746 = arith.mulf %738, %745 : vector<1x256xf32>
    %c14_i32_230 = arith.constant 14 : i32
    %747 = tpu.dynamic_rotate %260 by %c14_i32_230 dim 1 : vector<1x256xf32>, i32 -> vector<1x256xf32>
    %c1_i32_231 = arith.constant 1 : i32
    %748 = vector.broadcast %c1_i32_231 : i32 to vector<1x256xi32>
    %749 = arith.cmpi sge, %2, %748 : vector<1x256xi32>
    %c14_i32_232 = arith.constant 14 : i32
    %750 = vector.broadcast %c14_i32_232 : i32 to vector<1x256xi32>
    %751 = arith.cmpi slt, %4, %750 : vector<1x256xi32>
    %752 = arith.andi %749, %751 : vector<1x256xi1>
    %753 = arith.extui %752 : vector<1x256xi1> to vector<1x256xi32>
    %754 = arith.sitofp %753 : vector<1x256xi32> to vector<1x256xf32>
    %755 = arith.mulf %747, %754 : vector<1x256xf32>
    %c19 = arith.constant 19 : index
    %756 = memref.load %arg8[%c19] : memref<98xf32, #tpu.memory_space<smem>>
    %757 = vector.broadcast %756 : f32 to vector<1x256xf32>
    %758 = arith.mulf %746, %757 : vector<1x256xf32>
    %759 = arith.addf %737, %758 : vector<1x256xf32>
    %c68 = arith.constant 68 : index
    %760 = memref.load %arg8[%c68] : memref<98xf32, #tpu.memory_space<smem>>
    %761 = vector.broadcast %760 : f32 to vector<1x256xf32>
    %762 = arith.mulf %755, %761 : vector<1x256xf32>
    %763 = arith.addf %759, %762 : vector<1x256xf32>
    %c13_i32_233 = arith.constant 13 : i32
    %764 = tpu.dynamic_rotate %258 by %c13_i32_233 dim 1 : vector<1x256xf32>, i32 -> vector<1x256xf32>
    %c1_i32_234 = arith.constant 1 : i32
    %765 = vector.broadcast %c1_i32_234 : i32 to vector<1x256xi32>
    %766 = arith.cmpi sge, %2, %765 : vector<1x256xi32>
    %c13_i32_235 = arith.constant 13 : i32
    %767 = vector.broadcast %c13_i32_235 : i32 to vector<1x256xi32>
    %768 = arith.cmpi slt, %4, %767 : vector<1x256xi32>
    %769 = arith.andi %766, %768 : vector<1x256xi1>
    %770 = arith.extui %769 : vector<1x256xi1> to vector<1x256xi32>
    %771 = arith.sitofp %770 : vector<1x256xi32> to vector<1x256xf32>
    %772 = arith.mulf %764, %771 : vector<1x256xf32>
    %c13_i32_236 = arith.constant 13 : i32
    %773 = tpu.dynamic_rotate %260 by %c13_i32_236 dim 1 : vector<1x256xf32>, i32 -> vector<1x256xf32>
    %c1_i32_237 = arith.constant 1 : i32
    %774 = vector.broadcast %c1_i32_237 : i32 to vector<1x256xi32>
    %775 = arith.cmpi sge, %2, %774 : vector<1x256xi32>
    %c13_i32_238 = arith.constant 13 : i32
    %776 = vector.broadcast %c13_i32_238 : i32 to vector<1x256xi32>
    %777 = arith.cmpi slt, %4, %776 : vector<1x256xi32>
    %778 = arith.andi %775, %777 : vector<1x256xi1>
    %779 = arith.extui %778 : vector<1x256xi1> to vector<1x256xi32>
    %780 = arith.sitofp %779 : vector<1x256xi32> to vector<1x256xf32>
    %781 = arith.mulf %773, %780 : vector<1x256xf32>
    %c20 = arith.constant 20 : index
    %782 = memref.load %arg8[%c20] : memref<98xf32, #tpu.memory_space<smem>>
    %783 = vector.broadcast %782 : f32 to vector<1x256xf32>
    %784 = arith.mulf %772, %783 : vector<1x256xf32>
    %785 = arith.addf %763, %784 : vector<1x256xf32>
    %c69 = arith.constant 69 : index
    %786 = memref.load %arg8[%c69] : memref<98xf32, #tpu.memory_space<smem>>
    %787 = vector.broadcast %786 : f32 to vector<1x256xf32>
    %788 = arith.mulf %781, %787 : vector<1x256xf32>
    %789 = arith.addf %785, %788 : vector<1x256xf32>
    %c3_i32_239 = arith.constant 3 : i32
    %790 = tpu.dynamic_rotate %258 by %c3_i32_239 dim 1 : vector<1x256xf32>, i32 -> vector<1x256xf32>
    %c3_i32_240 = arith.constant 3 : i32
    %791 = vector.broadcast %c3_i32_240 : i32 to vector<1x256xi32>
    %792 = arith.cmpi sge, %4, %791 : vector<1x256xi32>
    %793 = arith.extui %792 : vector<1x256xi1> to vector<1x256xi32>
    %794 = arith.sitofp %793 : vector<1x256xi32> to vector<1x256xf32>
    %795 = arith.mulf %790, %794 : vector<1x256xf32>
    %c3_i32_241 = arith.constant 3 : i32
    %796 = tpu.dynamic_rotate %260 by %c3_i32_241 dim 1 : vector<1x256xf32>, i32 -> vector<1x256xf32>
    %c3_i32_242 = arith.constant 3 : i32
    %797 = vector.broadcast %c3_i32_242 : i32 to vector<1x256xi32>
    %798 = arith.cmpi sge, %4, %797 : vector<1x256xi32>
    %799 = arith.extui %798 : vector<1x256xi1> to vector<1x256xi32>
    %800 = arith.sitofp %799 : vector<1x256xi32> to vector<1x256xf32>
    %801 = arith.mulf %796, %800 : vector<1x256xf32>
    %c21 = arith.constant 21 : index
    %802 = memref.load %arg8[%c21] : memref<98xf32, #tpu.memory_space<smem>>
    %803 = vector.broadcast %802 : f32 to vector<1x256xf32>
    %804 = arith.mulf %795, %803 : vector<1x256xf32>
    %805 = arith.addf %789, %804 : vector<1x256xf32>
    %c70 = arith.constant 70 : index
    %806 = memref.load %arg8[%c70] : memref<98xf32, #tpu.memory_space<smem>>
    %807 = vector.broadcast %806 : f32 to vector<1x256xf32>
    %808 = arith.mulf %801, %807 : vector<1x256xf32>
    %809 = arith.addf %805, %808 : vector<1x256xf32>
    %c2_i32_243 = arith.constant 2 : i32
    %810 = tpu.dynamic_rotate %258 by %c2_i32_243 dim 1 : vector<1x256xf32>, i32 -> vector<1x256xf32>
    %c2_i32_244 = arith.constant 2 : i32
    %811 = vector.broadcast %c2_i32_244 : i32 to vector<1x256xi32>
    %812 = arith.cmpi sge, %4, %811 : vector<1x256xi32>
    %813 = arith.extui %812 : vector<1x256xi1> to vector<1x256xi32>
    %814 = arith.sitofp %813 : vector<1x256xi32> to vector<1x256xf32>
    %815 = arith.mulf %810, %814 : vector<1x256xf32>
    %c2_i32_245 = arith.constant 2 : i32
    %816 = tpu.dynamic_rotate %260 by %c2_i32_245 dim 1 : vector<1x256xf32>, i32 -> vector<1x256xf32>
    %c2_i32_246 = arith.constant 2 : i32
    %817 = vector.broadcast %c2_i32_246 : i32 to vector<1x256xi32>
    %818 = arith.cmpi sge, %4, %817 : vector<1x256xi32>
    %819 = arith.extui %818 : vector<1x256xi1> to vector<1x256xi32>
    %820 = arith.sitofp %819 : vector<1x256xi32> to vector<1x256xf32>
    %821 = arith.mulf %816, %820 : vector<1x256xf32>
    %c22 = arith.constant 22 : index
    %822 = memref.load %arg8[%c22] : memref<98xf32, #tpu.memory_space<smem>>
    %823 = vector.broadcast %822 : f32 to vector<1x256xf32>
    %824 = arith.mulf %815, %823 : vector<1x256xf32>
    %825 = arith.addf %809, %824 : vector<1x256xf32>
    %c71 = arith.constant 71 : index
    %826 = memref.load %arg8[%c71] : memref<98xf32, #tpu.memory_space<smem>>
    %827 = vector.broadcast %826 : f32 to vector<1x256xf32>
    %828 = arith.mulf %821, %827 : vector<1x256xf32>
    %829 = arith.addf %825, %828 : vector<1x256xf32>
    %c1_i32_247 = arith.constant 1 : i32
    %830 = tpu.dynamic_rotate %258 by %c1_i32_247 dim 1 : vector<1x256xf32>, i32 -> vector<1x256xf32>
    %c1_i32_248 = arith.constant 1 : i32
    %831 = vector.broadcast %c1_i32_248 : i32 to vector<1x256xi32>
    %832 = arith.cmpi sge, %4, %831 : vector<1x256xi32>
    %833 = arith.extui %832 : vector<1x256xi1> to vector<1x256xi32>
    %834 = arith.sitofp %833 : vector<1x256xi32> to vector<1x256xf32>
    %835 = arith.mulf %830, %834 : vector<1x256xf32>
    %c1_i32_249 = arith.constant 1 : i32
    %836 = tpu.dynamic_rotate %260 by %c1_i32_249 dim 1 : vector<1x256xf32>, i32 -> vector<1x256xf32>
    %c1_i32_250 = arith.constant 1 : i32
    %837 = vector.broadcast %c1_i32_250 : i32 to vector<1x256xi32>
    %838 = arith.cmpi sge, %4, %837 : vector<1x256xi32>
    %839 = arith.extui %838 : vector<1x256xi1> to vector<1x256xi32>
    %840 = arith.sitofp %839 : vector<1x256xi32> to vector<1x256xf32>
    %841 = arith.mulf %836, %840 : vector<1x256xf32>
    %c23 = arith.constant 23 : index
    %842 = memref.load %arg8[%c23] : memref<98xf32, #tpu.memory_space<smem>>
    %843 = vector.broadcast %842 : f32 to vector<1x256xf32>
    %844 = arith.mulf %835, %843 : vector<1x256xf32>
    %845 = arith.addf %829, %844 : vector<1x256xf32>
    %c72 = arith.constant 72 : index
    %846 = memref.load %arg8[%c72] : memref<98xf32, #tpu.memory_space<smem>>
    %847 = vector.broadcast %846 : f32 to vector<1x256xf32>
    %848 = arith.mulf %841, %847 : vector<1x256xf32>
    %849 = arith.addf %845, %848 : vector<1x256xf32>
    %c24 = arith.constant 24 : index
    %850 = memref.load %arg8[%c24] : memref<98xf32, #tpu.memory_space<smem>>
    %851 = vector.broadcast %850 : f32 to vector<1x256xf32>
    %852 = arith.mulf %258, %851 : vector<1x256xf32>
    %853 = arith.addf %849, %852 : vector<1x256xf32>
    %c73 = arith.constant 73 : index
    %854 = memref.load %arg8[%c73] : memref<98xf32, #tpu.memory_space<smem>>
    %855 = vector.broadcast %854 : f32 to vector<1x256xf32>
    %856 = arith.mulf %260, %855 : vector<1x256xf32>
    %857 = arith.addf %853, %856 : vector<1x256xf32>
    %c255_i32_251 = arith.constant 255 : i32
    %858 = tpu.dynamic_rotate %258 by %c255_i32_251 dim 1 : vector<1x256xf32>, i32 -> vector<1x256xf32>
    %c15_i32_252 = arith.constant 15 : i32
    %859 = vector.broadcast %c15_i32_252 : i32 to vector<1x256xi32>
    %860 = arith.cmpi slt, %4, %859 : vector<1x256xi32>
    %861 = arith.extui %860 : vector<1x256xi1> to vector<1x256xi32>
    %862 = arith.sitofp %861 : vector<1x256xi32> to vector<1x256xf32>
    %863 = arith.mulf %858, %862 : vector<1x256xf32>
    %c255_i32_253 = arith.constant 255 : i32
    %864 = tpu.dynamic_rotate %260 by %c255_i32_253 dim 1 : vector<1x256xf32>, i32 -> vector<1x256xf32>
    %c15_i32_254 = arith.constant 15 : i32
    %865 = vector.broadcast %c15_i32_254 : i32 to vector<1x256xi32>
    %866 = arith.cmpi slt, %4, %865 : vector<1x256xi32>
    %867 = arith.extui %866 : vector<1x256xi1> to vector<1x256xi32>
    %868 = arith.sitofp %867 : vector<1x256xi32> to vector<1x256xf32>
    %869 = arith.mulf %864, %868 : vector<1x256xf32>
    %c25 = arith.constant 25 : index
    %870 = memref.load %arg8[%c25] : memref<98xf32, #tpu.memory_space<smem>>
    %871 = vector.broadcast %870 : f32 to vector<1x256xf32>
    %872 = arith.mulf %863, %871 : vector<1x256xf32>
    %873 = arith.addf %857, %872 : vector<1x256xf32>
    %c74 = arith.constant 74 : index
    %874 = memref.load %arg8[%c74] : memref<98xf32, #tpu.memory_space<smem>>
    %875 = vector.broadcast %874 : f32 to vector<1x256xf32>
    %876 = arith.mulf %869, %875 : vector<1x256xf32>
    %877 = arith.addf %873, %876 : vector<1x256xf32>
    %c254_i32 = arith.constant 254 : i32
    %878 = tpu.dynamic_rotate %258 by %c254_i32 dim 1 : vector<1x256xf32>, i32 -> vector<1x256xf32>
    %c14_i32_255 = arith.constant 14 : i32
    %879 = vector.broadcast %c14_i32_255 : i32 to vector<1x256xi32>
    %880 = arith.cmpi slt, %4, %879 : vector<1x256xi32>
    %881 = arith.extui %880 : vector<1x256xi1> to vector<1x256xi32>
    %882 = arith.sitofp %881 : vector<1x256xi32> to vector<1x256xf32>
    %883 = arith.mulf %878, %882 : vector<1x256xf32>
    %c254_i32_256 = arith.constant 254 : i32
    %884 = tpu.dynamic_rotate %260 by %c254_i32_256 dim 1 : vector<1x256xf32>, i32 -> vector<1x256xf32>
    %c14_i32_257 = arith.constant 14 : i32
    %885 = vector.broadcast %c14_i32_257 : i32 to vector<1x256xi32>
    %886 = arith.cmpi slt, %4, %885 : vector<1x256xi32>
    %887 = arith.extui %886 : vector<1x256xi1> to vector<1x256xi32>
    %888 = arith.sitofp %887 : vector<1x256xi32> to vector<1x256xf32>
    %889 = arith.mulf %884, %888 : vector<1x256xf32>
    %c26 = arith.constant 26 : index
    %890 = memref.load %arg8[%c26] : memref<98xf32, #tpu.memory_space<smem>>
    %891 = vector.broadcast %890 : f32 to vector<1x256xf32>
    %892 = arith.mulf %883, %891 : vector<1x256xf32>
    %893 = arith.addf %877, %892 : vector<1x256xf32>
    %c75 = arith.constant 75 : index
    %894 = memref.load %arg8[%c75] : memref<98xf32, #tpu.memory_space<smem>>
    %895 = vector.broadcast %894 : f32 to vector<1x256xf32>
    %896 = arith.mulf %889, %895 : vector<1x256xf32>
    %897 = arith.addf %893, %896 : vector<1x256xf32>
    %c253_i32 = arith.constant 253 : i32
    %898 = tpu.dynamic_rotate %258 by %c253_i32 dim 1 : vector<1x256xf32>, i32 -> vector<1x256xf32>
    %c13_i32_258 = arith.constant 13 : i32
    %899 = vector.broadcast %c13_i32_258 : i32 to vector<1x256xi32>
    %900 = arith.cmpi slt, %4, %899 : vector<1x256xi32>
    %901 = arith.extui %900 : vector<1x256xi1> to vector<1x256xi32>
    %902 = arith.sitofp %901 : vector<1x256xi32> to vector<1x256xf32>
    %903 = arith.mulf %898, %902 : vector<1x256xf32>
    %c253_i32_259 = arith.constant 253 : i32
    %904 = tpu.dynamic_rotate %260 by %c253_i32_259 dim 1 : vector<1x256xf32>, i32 -> vector<1x256xf32>
    %c13_i32_260 = arith.constant 13 : i32
    %905 = vector.broadcast %c13_i32_260 : i32 to vector<1x256xi32>
    %906 = arith.cmpi slt, %4, %905 : vector<1x256xi32>
    %907 = arith.extui %906 : vector<1x256xi1> to vector<1x256xi32>
    %908 = arith.sitofp %907 : vector<1x256xi32> to vector<1x256xf32>
    %909 = arith.mulf %904, %908 : vector<1x256xf32>
    %c27 = arith.constant 27 : index
    %910 = memref.load %arg8[%c27] : memref<98xf32, #tpu.memory_space<smem>>
    %911 = vector.broadcast %910 : f32 to vector<1x256xf32>
    %912 = arith.mulf %903, %911 : vector<1x256xf32>
    %913 = arith.addf %897, %912 : vector<1x256xf32>
    %c76 = arith.constant 76 : index
    %914 = memref.load %arg8[%c76] : memref<98xf32, #tpu.memory_space<smem>>
    %915 = vector.broadcast %914 : f32 to vector<1x256xf32>
    %916 = arith.mulf %909, %915 : vector<1x256xf32>
    %917 = arith.addf %913, %916 : vector<1x256xf32>
    %c243_i32 = arith.constant 243 : i32
    %918 = tpu.dynamic_rotate %258 by %c243_i32 dim 1 : vector<1x256xf32>, i32 -> vector<1x256xf32>
    %c15_i32_261 = arith.constant 15 : i32
    %919 = vector.broadcast %c15_i32_261 : i32 to vector<1x256xi32>
    %920 = arith.cmpi slt, %2, %919 : vector<1x256xi32>
    %c3_i32_262 = arith.constant 3 : i32
    %921 = vector.broadcast %c3_i32_262 : i32 to vector<1x256xi32>
    %922 = arith.cmpi sge, %4, %921 : vector<1x256xi32>
    %923 = arith.andi %920, %922 : vector<1x256xi1>
    %924 = arith.extui %923 : vector<1x256xi1> to vector<1x256xi32>
    %925 = arith.sitofp %924 : vector<1x256xi32> to vector<1x256xf32>
    %926 = arith.mulf %918, %925 : vector<1x256xf32>
    %c243_i32_263 = arith.constant 243 : i32
    %927 = tpu.dynamic_rotate %260 by %c243_i32_263 dim 1 : vector<1x256xf32>, i32 -> vector<1x256xf32>
    %c15_i32_264 = arith.constant 15 : i32
    %928 = vector.broadcast %c15_i32_264 : i32 to vector<1x256xi32>
    %929 = arith.cmpi slt, %2, %928 : vector<1x256xi32>
    %c3_i32_265 = arith.constant 3 : i32
    %930 = vector.broadcast %c3_i32_265 : i32 to vector<1x256xi32>
    %931 = arith.cmpi sge, %4, %930 : vector<1x256xi32>
    %932 = arith.andi %929, %931 : vector<1x256xi1>
    %933 = arith.extui %932 : vector<1x256xi1> to vector<1x256xi32>
    %934 = arith.sitofp %933 : vector<1x256xi32> to vector<1x256xf32>
    %935 = arith.mulf %927, %934 : vector<1x256xf32>
    %c28 = arith.constant 28 : index
    %936 = memref.load %arg8[%c28] : memref<98xf32, #tpu.memory_space<smem>>
    %937 = vector.broadcast %936 : f32 to vector<1x256xf32>
    %938 = arith.mulf %926, %937 : vector<1x256xf32>
    %939 = arith.addf %917, %938 : vector<1x256xf32>
    %c77 = arith.constant 77 : index
    %940 = memref.load %arg8[%c77] : memref<98xf32, #tpu.memory_space<smem>>
    %941 = vector.broadcast %940 : f32 to vector<1x256xf32>
    %942 = arith.mulf %935, %941 : vector<1x256xf32>
    %943 = arith.addf %939, %942 : vector<1x256xf32>
    %c242_i32 = arith.constant 242 : i32
    %944 = tpu.dynamic_rotate %258 by %c242_i32 dim 1 : vector<1x256xf32>, i32 -> vector<1x256xf32>
    %c15_i32_266 = arith.constant 15 : i32
    %945 = vector.broadcast %c15_i32_266 : i32 to vector<1x256xi32>
    %946 = arith.cmpi slt, %2, %945 : vector<1x256xi32>
    %c2_i32_267 = arith.constant 2 : i32
    %947 = vector.broadcast %c2_i32_267 : i32 to vector<1x256xi32>
    %948 = arith.cmpi sge, %4, %947 : vector<1x256xi32>
    %949 = arith.andi %946, %948 : vector<1x256xi1>
    %950 = arith.extui %949 : vector<1x256xi1> to vector<1x256xi32>
    %951 = arith.sitofp %950 : vector<1x256xi32> to vector<1x256xf32>
    %952 = arith.mulf %944, %951 : vector<1x256xf32>
    %c242_i32_268 = arith.constant 242 : i32
    %953 = tpu.dynamic_rotate %260 by %c242_i32_268 dim 1 : vector<1x256xf32>, i32 -> vector<1x256xf32>
    %c15_i32_269 = arith.constant 15 : i32
    %954 = vector.broadcast %c15_i32_269 : i32 to vector<1x256xi32>
    %955 = arith.cmpi slt, %2, %954 : vector<1x256xi32>
    %c2_i32_270 = arith.constant 2 : i32
    %956 = vector.broadcast %c2_i32_270 : i32 to vector<1x256xi32>
    %957 = arith.cmpi sge, %4, %956 : vector<1x256xi32>
    %958 = arith.andi %955, %957 : vector<1x256xi1>
    %959 = arith.extui %958 : vector<1x256xi1> to vector<1x256xi32>
    %960 = arith.sitofp %959 : vector<1x256xi32> to vector<1x256xf32>
    %961 = arith.mulf %953, %960 : vector<1x256xf32>
    %c29 = arith.constant 29 : index
    %962 = memref.load %arg8[%c29] : memref<98xf32, #tpu.memory_space<smem>>
    %963 = vector.broadcast %962 : f32 to vector<1x256xf32>
    %964 = arith.mulf %952, %963 : vector<1x256xf32>
    %965 = arith.addf %943, %964 : vector<1x256xf32>
    %c78 = arith.constant 78 : index
    %966 = memref.load %arg8[%c78] : memref<98xf32, #tpu.memory_space<smem>>
    %967 = vector.broadcast %966 : f32 to vector<1x256xf32>
    %968 = arith.mulf %961, %967 : vector<1x256xf32>
    %969 = arith.addf %965, %968 : vector<1x256xf32>
    %c241_i32_271 = arith.constant 241 : i32
    %970 = tpu.dynamic_rotate %258 by %c241_i32_271 dim 1 : vector<1x256xf32>, i32 -> vector<1x256xf32>
    %c15_i32_272 = arith.constant 15 : i32
    %971 = vector.broadcast %c15_i32_272 : i32 to vector<1x256xi32>
    %972 = arith.cmpi slt, %2, %971 : vector<1x256xi32>
    %c1_i32_273 = arith.constant 1 : i32
    %973 = vector.broadcast %c1_i32_273 : i32 to vector<1x256xi32>
    %974 = arith.cmpi sge, %4, %973 : vector<1x256xi32>
    %975 = arith.andi %972, %974 : vector<1x256xi1>
    %976 = arith.extui %975 : vector<1x256xi1> to vector<1x256xi32>
    %977 = arith.sitofp %976 : vector<1x256xi32> to vector<1x256xf32>
    %978 = arith.mulf %970, %977 : vector<1x256xf32>
    %c241_i32_274 = arith.constant 241 : i32
    %979 = tpu.dynamic_rotate %260 by %c241_i32_274 dim 1 : vector<1x256xf32>, i32 -> vector<1x256xf32>
    %c15_i32_275 = arith.constant 15 : i32
    %980 = vector.broadcast %c15_i32_275 : i32 to vector<1x256xi32>
    %981 = arith.cmpi slt, %2, %980 : vector<1x256xi32>
    %c1_i32_276 = arith.constant 1 : i32
    %982 = vector.broadcast %c1_i32_276 : i32 to vector<1x256xi32>
    %983 = arith.cmpi sge, %4, %982 : vector<1x256xi32>
    %984 = arith.andi %981, %983 : vector<1x256xi1>
    %985 = arith.extui %984 : vector<1x256xi1> to vector<1x256xi32>
    %986 = arith.sitofp %985 : vector<1x256xi32> to vector<1x256xf32>
    %987 = arith.mulf %979, %986 : vector<1x256xf32>
    %c30 = arith.constant 30 : index
    %988 = memref.load %arg8[%c30] : memref<98xf32, #tpu.memory_space<smem>>
    %989 = vector.broadcast %988 : f32 to vector<1x256xf32>
    %990 = arith.mulf %978, %989 : vector<1x256xf32>
    %991 = arith.addf %969, %990 : vector<1x256xf32>
    %c79 = arith.constant 79 : index
    %992 = memref.load %arg8[%c79] : memref<98xf32, #tpu.memory_space<smem>>
    %993 = vector.broadcast %992 : f32 to vector<1x256xf32>
    %994 = arith.mulf %987, %993 : vector<1x256xf32>
    %995 = arith.addf %991, %994 : vector<1x256xf32>
    %c240_i32_277 = arith.constant 240 : i32
    %996 = tpu.dynamic_rotate %258 by %c240_i32_277 dim 1 : vector<1x256xf32>, i32 -> vector<1x256xf32>
    %c15_i32_278 = arith.constant 15 : i32
    %997 = vector.broadcast %c15_i32_278 : i32 to vector<1x256xi32>
    %998 = arith.cmpi slt, %2, %997 : vector<1x256xi32>
    %999 = arith.extui %998 : vector<1x256xi1> to vector<1x256xi32>
    %1000 = arith.sitofp %999 : vector<1x256xi32> to vector<1x256xf32>
    %1001 = arith.mulf %996, %1000 : vector<1x256xf32>
    %c240_i32_279 = arith.constant 240 : i32
    %1002 = tpu.dynamic_rotate %260 by %c240_i32_279 dim 1 : vector<1x256xf32>, i32 -> vector<1x256xf32>
    %c15_i32_280 = arith.constant 15 : i32
    %1003 = vector.broadcast %c15_i32_280 : i32 to vector<1x256xi32>
    %1004 = arith.cmpi slt, %2, %1003 : vector<1x256xi32>
    %1005 = arith.extui %1004 : vector<1x256xi1> to vector<1x256xi32>
    %1006 = arith.sitofp %1005 : vector<1x256xi32> to vector<1x256xf32>
    %1007 = arith.mulf %1002, %1006 : vector<1x256xf32>
    %c31 = arith.constant 31 : index
    %1008 = memref.load %arg8[%c31] : memref<98xf32, #tpu.memory_space<smem>>
    %1009 = vector.broadcast %1008 : f32 to vector<1x256xf32>
    %1010 = arith.mulf %1001, %1009 : vector<1x256xf32>
    %1011 = arith.addf %995, %1010 : vector<1x256xf32>
    %c80 = arith.constant 80 : index
    %1012 = memref.load %arg8[%c80] : memref<98xf32, #tpu.memory_space<smem>>
    %1013 = vector.broadcast %1012 : f32 to vector<1x256xf32>
    %1014 = arith.mulf %1007, %1013 : vector<1x256xf32>
    %1015 = arith.addf %1011, %1014 : vector<1x256xf32>
    %c239_i32_281 = arith.constant 239 : i32
    %1016 = tpu.dynamic_rotate %258 by %c239_i32_281 dim 1 : vector<1x256xf32>, i32 -> vector<1x256xf32>
    %c15_i32_282 = arith.constant 15 : i32
    %1017 = vector.broadcast %c15_i32_282 : i32 to vector<1x256xi32>
    %1018 = arith.cmpi slt, %2, %1017 : vector<1x256xi32>
    %c15_i32_283 = arith.constant 15 : i32
    %1019 = vector.broadcast %c15_i32_283 : i32 to vector<1x256xi32>
    %1020 = arith.cmpi slt, %4, %1019 : vector<1x256xi32>
    %1021 = arith.andi %1018, %1020 : vector<1x256xi1>
    %1022 = arith.extui %1021 : vector<1x256xi1> to vector<1x256xi32>
    %1023 = arith.sitofp %1022 : vector<1x256xi32> to vector<1x256xf32>
    %1024 = arith.mulf %1016, %1023 : vector<1x256xf32>
    %c239_i32_284 = arith.constant 239 : i32
    %1025 = tpu.dynamic_rotate %260 by %c239_i32_284 dim 1 : vector<1x256xf32>, i32 -> vector<1x256xf32>
    %c15_i32_285 = arith.constant 15 : i32
    %1026 = vector.broadcast %c15_i32_285 : i32 to vector<1x256xi32>
    %1027 = arith.cmpi slt, %2, %1026 : vector<1x256xi32>
    %c15_i32_286 = arith.constant 15 : i32
    %1028 = vector.broadcast %c15_i32_286 : i32 to vector<1x256xi32>
    %1029 = arith.cmpi slt, %4, %1028 : vector<1x256xi32>
    %1030 = arith.andi %1027, %1029 : vector<1x256xi1>
    %1031 = arith.extui %1030 : vector<1x256xi1> to vector<1x256xi32>
    %1032 = arith.sitofp %1031 : vector<1x256xi32> to vector<1x256xf32>
    %1033 = arith.mulf %1025, %1032 : vector<1x256xf32>
    %c32 = arith.constant 32 : index
    %1034 = memref.load %arg8[%c32] : memref<98xf32, #tpu.memory_space<smem>>
    %1035 = vector.broadcast %1034 : f32 to vector<1x256xf32>
    %1036 = arith.mulf %1024, %1035 : vector<1x256xf32>
    %1037 = arith.addf %1015, %1036 : vector<1x256xf32>
    %c81 = arith.constant 81 : index
    %1038 = memref.load %arg8[%c81] : memref<98xf32, #tpu.memory_space<smem>>
    %1039 = vector.broadcast %1038 : f32 to vector<1x256xf32>
    %1040 = arith.mulf %1033, %1039 : vector<1x256xf32>
    %1041 = arith.addf %1037, %1040 : vector<1x256xf32>
    %c238_i32 = arith.constant 238 : i32
    %1042 = tpu.dynamic_rotate %258 by %c238_i32 dim 1 : vector<1x256xf32>, i32 -> vector<1x256xf32>
    %c15_i32_287 = arith.constant 15 : i32
    %1043 = vector.broadcast %c15_i32_287 : i32 to vector<1x256xi32>
    %1044 = arith.cmpi slt, %2, %1043 : vector<1x256xi32>
    %c14_i32_288 = arith.constant 14 : i32
    %1045 = vector.broadcast %c14_i32_288 : i32 to vector<1x256xi32>
    %1046 = arith.cmpi slt, %4, %1045 : vector<1x256xi32>
    %1047 = arith.andi %1044, %1046 : vector<1x256xi1>
    %1048 = arith.extui %1047 : vector<1x256xi1> to vector<1x256xi32>
    %1049 = arith.sitofp %1048 : vector<1x256xi32> to vector<1x256xf32>
    %1050 = arith.mulf %1042, %1049 : vector<1x256xf32>
    %c238_i32_289 = arith.constant 238 : i32
    %1051 = tpu.dynamic_rotate %260 by %c238_i32_289 dim 1 : vector<1x256xf32>, i32 -> vector<1x256xf32>
    %c15_i32_290 = arith.constant 15 : i32
    %1052 = vector.broadcast %c15_i32_290 : i32 to vector<1x256xi32>
    %1053 = arith.cmpi slt, %2, %1052 : vector<1x256xi32>
    %c14_i32_291 = arith.constant 14 : i32
    %1054 = vector.broadcast %c14_i32_291 : i32 to vector<1x256xi32>
    %1055 = arith.cmpi slt, %4, %1054 : vector<1x256xi32>
    %1056 = arith.andi %1053, %1055 : vector<1x256xi1>
    %1057 = arith.extui %1056 : vector<1x256xi1> to vector<1x256xi32>
    %1058 = arith.sitofp %1057 : vector<1x256xi32> to vector<1x256xf32>
    %1059 = arith.mulf %1051, %1058 : vector<1x256xf32>
    %c33 = arith.constant 33 : index
    %1060 = memref.load %arg8[%c33] : memref<98xf32, #tpu.memory_space<smem>>
    %1061 = vector.broadcast %1060 : f32 to vector<1x256xf32>
    %1062 = arith.mulf %1050, %1061 : vector<1x256xf32>
    %1063 = arith.addf %1041, %1062 : vector<1x256xf32>
    %c82 = arith.constant 82 : index
    %1064 = memref.load %arg8[%c82] : memref<98xf32, #tpu.memory_space<smem>>
    %1065 = vector.broadcast %1064 : f32 to vector<1x256xf32>
    %1066 = arith.mulf %1059, %1065 : vector<1x256xf32>
    %1067 = arith.addf %1063, %1066 : vector<1x256xf32>
    %c237_i32 = arith.constant 237 : i32
    %1068 = tpu.dynamic_rotate %258 by %c237_i32 dim 1 : vector<1x256xf32>, i32 -> vector<1x256xf32>
    %c15_i32_292 = arith.constant 15 : i32
    %1069 = vector.broadcast %c15_i32_292 : i32 to vector<1x256xi32>
    %1070 = arith.cmpi slt, %2, %1069 : vector<1x256xi32>
    %c13_i32_293 = arith.constant 13 : i32
    %1071 = vector.broadcast %c13_i32_293 : i32 to vector<1x256xi32>
    %1072 = arith.cmpi slt, %4, %1071 : vector<1x256xi32>
    %1073 = arith.andi %1070, %1072 : vector<1x256xi1>
    %1074 = arith.extui %1073 : vector<1x256xi1> to vector<1x256xi32>
    %1075 = arith.sitofp %1074 : vector<1x256xi32> to vector<1x256xf32>
    %1076 = arith.mulf %1068, %1075 : vector<1x256xf32>
    %c237_i32_294 = arith.constant 237 : i32
    %1077 = tpu.dynamic_rotate %260 by %c237_i32_294 dim 1 : vector<1x256xf32>, i32 -> vector<1x256xf32>
    %c15_i32_295 = arith.constant 15 : i32
    %1078 = vector.broadcast %c15_i32_295 : i32 to vector<1x256xi32>
    %1079 = arith.cmpi slt, %2, %1078 : vector<1x256xi32>
    %c13_i32_296 = arith.constant 13 : i32
    %1080 = vector.broadcast %c13_i32_296 : i32 to vector<1x256xi32>
    %1081 = arith.cmpi slt, %4, %1080 : vector<1x256xi32>
    %1082 = arith.andi %1079, %1081 : vector<1x256xi1>
    %1083 = arith.extui %1082 : vector<1x256xi1> to vector<1x256xi32>
    %1084 = arith.sitofp %1083 : vector<1x256xi32> to vector<1x256xf32>
    %1085 = arith.mulf %1077, %1084 : vector<1x256xf32>
    %c34 = arith.constant 34 : index
    %1086 = memref.load %arg8[%c34] : memref<98xf32, #tpu.memory_space<smem>>
    %1087 = vector.broadcast %1086 : f32 to vector<1x256xf32>
    %1088 = arith.mulf %1076, %1087 : vector<1x256xf32>
    %1089 = arith.addf %1067, %1088 : vector<1x256xf32>
    %c83 = arith.constant 83 : index
    %1090 = memref.load %arg8[%c83] : memref<98xf32, #tpu.memory_space<smem>>
    %1091 = vector.broadcast %1090 : f32 to vector<1x256xf32>
    %1092 = arith.mulf %1085, %1091 : vector<1x256xf32>
    %1093 = arith.addf %1089, %1092 : vector<1x256xf32>
    %c227_i32 = arith.constant 227 : i32
    %1094 = tpu.dynamic_rotate %258 by %c227_i32 dim 1 : vector<1x256xf32>, i32 -> vector<1x256xf32>
    %c14_i32_297 = arith.constant 14 : i32
    %1095 = vector.broadcast %c14_i32_297 : i32 to vector<1x256xi32>
    %1096 = arith.cmpi slt, %2, %1095 : vector<1x256xi32>
    %c3_i32_298 = arith.constant 3 : i32
    %1097 = vector.broadcast %c3_i32_298 : i32 to vector<1x256xi32>
    %1098 = arith.cmpi sge, %4, %1097 : vector<1x256xi32>
    %1099 = arith.andi %1096, %1098 : vector<1x256xi1>
    %1100 = arith.extui %1099 : vector<1x256xi1> to vector<1x256xi32>
    %1101 = arith.sitofp %1100 : vector<1x256xi32> to vector<1x256xf32>
    %1102 = arith.mulf %1094, %1101 : vector<1x256xf32>
    %c227_i32_299 = arith.constant 227 : i32
    %1103 = tpu.dynamic_rotate %260 by %c227_i32_299 dim 1 : vector<1x256xf32>, i32 -> vector<1x256xf32>
    %c14_i32_300 = arith.constant 14 : i32
    %1104 = vector.broadcast %c14_i32_300 : i32 to vector<1x256xi32>
    %1105 = arith.cmpi slt, %2, %1104 : vector<1x256xi32>
    %c3_i32_301 = arith.constant 3 : i32
    %1106 = vector.broadcast %c3_i32_301 : i32 to vector<1x256xi32>
    %1107 = arith.cmpi sge, %4, %1106 : vector<1x256xi32>
    %1108 = arith.andi %1105, %1107 : vector<1x256xi1>
    %1109 = arith.extui %1108 : vector<1x256xi1> to vector<1x256xi32>
    %1110 = arith.sitofp %1109 : vector<1x256xi32> to vector<1x256xf32>
    %1111 = arith.mulf %1103, %1110 : vector<1x256xf32>
    %c35 = arith.constant 35 : index
    %1112 = memref.load %arg8[%c35] : memref<98xf32, #tpu.memory_space<smem>>
    %1113 = vector.broadcast %1112 : f32 to vector<1x256xf32>
    %1114 = arith.mulf %1102, %1113 : vector<1x256xf32>
    %1115 = arith.addf %1093, %1114 : vector<1x256xf32>
    %c84 = arith.constant 84 : index
    %1116 = memref.load %arg8[%c84] : memref<98xf32, #tpu.memory_space<smem>>
    %1117 = vector.broadcast %1116 : f32 to vector<1x256xf32>
    %1118 = arith.mulf %1111, %1117 : vector<1x256xf32>
    %1119 = arith.addf %1115, %1118 : vector<1x256xf32>
    %c226_i32 = arith.constant 226 : i32
    %1120 = tpu.dynamic_rotate %258 by %c226_i32 dim 1 : vector<1x256xf32>, i32 -> vector<1x256xf32>
    %c14_i32_302 = arith.constant 14 : i32
    %1121 = vector.broadcast %c14_i32_302 : i32 to vector<1x256xi32>
    %1122 = arith.cmpi slt, %2, %1121 : vector<1x256xi32>
    %c2_i32_303 = arith.constant 2 : i32
    %1123 = vector.broadcast %c2_i32_303 : i32 to vector<1x256xi32>
    %1124 = arith.cmpi sge, %4, %1123 : vector<1x256xi32>
    %1125 = arith.andi %1122, %1124 : vector<1x256xi1>
    %1126 = arith.extui %1125 : vector<1x256xi1> to vector<1x256xi32>
    %1127 = arith.sitofp %1126 : vector<1x256xi32> to vector<1x256xf32>
    %1128 = arith.mulf %1120, %1127 : vector<1x256xf32>
    %c226_i32_304 = arith.constant 226 : i32
    %1129 = tpu.dynamic_rotate %260 by %c226_i32_304 dim 1 : vector<1x256xf32>, i32 -> vector<1x256xf32>
    %c14_i32_305 = arith.constant 14 : i32
    %1130 = vector.broadcast %c14_i32_305 : i32 to vector<1x256xi32>
    %1131 = arith.cmpi slt, %2, %1130 : vector<1x256xi32>
    %c2_i32_306 = arith.constant 2 : i32
    %1132 = vector.broadcast %c2_i32_306 : i32 to vector<1x256xi32>
    %1133 = arith.cmpi sge, %4, %1132 : vector<1x256xi32>
    %1134 = arith.andi %1131, %1133 : vector<1x256xi1>
    %1135 = arith.extui %1134 : vector<1x256xi1> to vector<1x256xi32>
    %1136 = arith.sitofp %1135 : vector<1x256xi32> to vector<1x256xf32>
    %1137 = arith.mulf %1129, %1136 : vector<1x256xf32>
    %c36 = arith.constant 36 : index
    %1138 = memref.load %arg8[%c36] : memref<98xf32, #tpu.memory_space<smem>>
    %1139 = vector.broadcast %1138 : f32 to vector<1x256xf32>
    %1140 = arith.mulf %1128, %1139 : vector<1x256xf32>
    %1141 = arith.addf %1119, %1140 : vector<1x256xf32>
    %c85 = arith.constant 85 : index
    %1142 = memref.load %arg8[%c85] : memref<98xf32, #tpu.memory_space<smem>>
    %1143 = vector.broadcast %1142 : f32 to vector<1x256xf32>
    %1144 = arith.mulf %1137, %1143 : vector<1x256xf32>
    %1145 = arith.addf %1141, %1144 : vector<1x256xf32>
    %c225_i32 = arith.constant 225 : i32
    %1146 = tpu.dynamic_rotate %258 by %c225_i32 dim 1 : vector<1x256xf32>, i32 -> vector<1x256xf32>
    %c14_i32_307 = arith.constant 14 : i32
    %1147 = vector.broadcast %c14_i32_307 : i32 to vector<1x256xi32>
    %1148 = arith.cmpi slt, %2, %1147 : vector<1x256xi32>
    %c1_i32_308 = arith.constant 1 : i32
    %1149 = vector.broadcast %c1_i32_308 : i32 to vector<1x256xi32>
    %1150 = arith.cmpi sge, %4, %1149 : vector<1x256xi32>
    %1151 = arith.andi %1148, %1150 : vector<1x256xi1>
    %1152 = arith.extui %1151 : vector<1x256xi1> to vector<1x256xi32>
    %1153 = arith.sitofp %1152 : vector<1x256xi32> to vector<1x256xf32>
    %1154 = arith.mulf %1146, %1153 : vector<1x256xf32>
    %c225_i32_309 = arith.constant 225 : i32
    %1155 = tpu.dynamic_rotate %260 by %c225_i32_309 dim 1 : vector<1x256xf32>, i32 -> vector<1x256xf32>
    %c14_i32_310 = arith.constant 14 : i32
    %1156 = vector.broadcast %c14_i32_310 : i32 to vector<1x256xi32>
    %1157 = arith.cmpi slt, %2, %1156 : vector<1x256xi32>
    %c1_i32_311 = arith.constant 1 : i32
    %1158 = vector.broadcast %c1_i32_311 : i32 to vector<1x256xi32>
    %1159 = arith.cmpi sge, %4, %1158 : vector<1x256xi32>
    %1160 = arith.andi %1157, %1159 : vector<1x256xi1>
    %1161 = arith.extui %1160 : vector<1x256xi1> to vector<1x256xi32>
    %1162 = arith.sitofp %1161 : vector<1x256xi32> to vector<1x256xf32>
    %1163 = arith.mulf %1155, %1162 : vector<1x256xf32>
    %c37 = arith.constant 37 : index
    %1164 = memref.load %arg8[%c37] : memref<98xf32, #tpu.memory_space<smem>>
    %1165 = vector.broadcast %1164 : f32 to vector<1x256xf32>
    %1166 = arith.mulf %1154, %1165 : vector<1x256xf32>
    %1167 = arith.addf %1145, %1166 : vector<1x256xf32>
    %c86 = arith.constant 86 : index
    %1168 = memref.load %arg8[%c86] : memref<98xf32, #tpu.memory_space<smem>>
    %1169 = vector.broadcast %1168 : f32 to vector<1x256xf32>
    %1170 = arith.mulf %1163, %1169 : vector<1x256xf32>
    %1171 = arith.addf %1167, %1170 : vector<1x256xf32>
    %c224_i32 = arith.constant 224 : i32
    %1172 = tpu.dynamic_rotate %258 by %c224_i32 dim 1 : vector<1x256xf32>, i32 -> vector<1x256xf32>
    %c14_i32_312 = arith.constant 14 : i32
    %1173 = vector.broadcast %c14_i32_312 : i32 to vector<1x256xi32>
    %1174 = arith.cmpi slt, %2, %1173 : vector<1x256xi32>
    %1175 = arith.extui %1174 : vector<1x256xi1> to vector<1x256xi32>
    %1176 = arith.sitofp %1175 : vector<1x256xi32> to vector<1x256xf32>
    %1177 = arith.mulf %1172, %1176 : vector<1x256xf32>
    %c224_i32_313 = arith.constant 224 : i32
    %1178 = tpu.dynamic_rotate %260 by %c224_i32_313 dim 1 : vector<1x256xf32>, i32 -> vector<1x256xf32>
    %c14_i32_314 = arith.constant 14 : i32
    %1179 = vector.broadcast %c14_i32_314 : i32 to vector<1x256xi32>
    %1180 = arith.cmpi slt, %2, %1179 : vector<1x256xi32>
    %1181 = arith.extui %1180 : vector<1x256xi1> to vector<1x256xi32>
    %1182 = arith.sitofp %1181 : vector<1x256xi32> to vector<1x256xf32>
    %1183 = arith.mulf %1178, %1182 : vector<1x256xf32>
    %c38 = arith.constant 38 : index
    %1184 = memref.load %arg8[%c38] : memref<98xf32, #tpu.memory_space<smem>>
    %1185 = vector.broadcast %1184 : f32 to vector<1x256xf32>
    %1186 = arith.mulf %1177, %1185 : vector<1x256xf32>
    %1187 = arith.addf %1171, %1186 : vector<1x256xf32>
    %c87 = arith.constant 87 : index
    %1188 = memref.load %arg8[%c87] : memref<98xf32, #tpu.memory_space<smem>>
    %1189 = vector.broadcast %1188 : f32 to vector<1x256xf32>
    %1190 = arith.mulf %1183, %1189 : vector<1x256xf32>
    %1191 = arith.addf %1187, %1190 : vector<1x256xf32>
    %c223_i32 = arith.constant 223 : i32
    %1192 = tpu.dynamic_rotate %258 by %c223_i32 dim 1 : vector<1x256xf32>, i32 -> vector<1x256xf32>
    %c14_i32_315 = arith.constant 14 : i32
    %1193 = vector.broadcast %c14_i32_315 : i32 to vector<1x256xi32>
    %1194 = arith.cmpi slt, %2, %1193 : vector<1x256xi32>
    %c15_i32_316 = arith.constant 15 : i32
    %1195 = vector.broadcast %c15_i32_316 : i32 to vector<1x256xi32>
    %1196 = arith.cmpi slt, %4, %1195 : vector<1x256xi32>
    %1197 = arith.andi %1194, %1196 : vector<1x256xi1>
    %1198 = arith.extui %1197 : vector<1x256xi1> to vector<1x256xi32>
    %1199 = arith.sitofp %1198 : vector<1x256xi32> to vector<1x256xf32>
    %1200 = arith.mulf %1192, %1199 : vector<1x256xf32>
    %c223_i32_317 = arith.constant 223 : i32
    %1201 = tpu.dynamic_rotate %260 by %c223_i32_317 dim 1 : vector<1x256xf32>, i32 -> vector<1x256xf32>
    %c14_i32_318 = arith.constant 14 : i32
    %1202 = vector.broadcast %c14_i32_318 : i32 to vector<1x256xi32>
    %1203 = arith.cmpi slt, %2, %1202 : vector<1x256xi32>
    %c15_i32_319 = arith.constant 15 : i32
    %1204 = vector.broadcast %c15_i32_319 : i32 to vector<1x256xi32>
    %1205 = arith.cmpi slt, %4, %1204 : vector<1x256xi32>
    %1206 = arith.andi %1203, %1205 : vector<1x256xi1>
    %1207 = arith.extui %1206 : vector<1x256xi1> to vector<1x256xi32>
    %1208 = arith.sitofp %1207 : vector<1x256xi32> to vector<1x256xf32>
    %1209 = arith.mulf %1201, %1208 : vector<1x256xf32>
    %c39 = arith.constant 39 : index
    %1210 = memref.load %arg8[%c39] : memref<98xf32, #tpu.memory_space<smem>>
    %1211 = vector.broadcast %1210 : f32 to vector<1x256xf32>
    %1212 = arith.mulf %1200, %1211 : vector<1x256xf32>
    %1213 = arith.addf %1191, %1212 : vector<1x256xf32>
    %c88 = arith.constant 88 : index
    %1214 = memref.load %arg8[%c88] : memref<98xf32, #tpu.memory_space<smem>>
    %1215 = vector.broadcast %1214 : f32 to vector<1x256xf32>
    %1216 = arith.mulf %1209, %1215 : vector<1x256xf32>
    %1217 = arith.addf %1213, %1216 : vector<1x256xf32>
    %c222_i32 = arith.constant 222 : i32
    %1218 = tpu.dynamic_rotate %258 by %c222_i32 dim 1 : vector<1x256xf32>, i32 -> vector<1x256xf32>
    %c14_i32_320 = arith.constant 14 : i32
    %1219 = vector.broadcast %c14_i32_320 : i32 to vector<1x256xi32>
    %1220 = arith.cmpi slt, %2, %1219 : vector<1x256xi32>
    %c14_i32_321 = arith.constant 14 : i32
    %1221 = vector.broadcast %c14_i32_321 : i32 to vector<1x256xi32>
    %1222 = arith.cmpi slt, %4, %1221 : vector<1x256xi32>
    %1223 = arith.andi %1220, %1222 : vector<1x256xi1>
    %1224 = arith.extui %1223 : vector<1x256xi1> to vector<1x256xi32>
    %1225 = arith.sitofp %1224 : vector<1x256xi32> to vector<1x256xf32>
    %1226 = arith.mulf %1218, %1225 : vector<1x256xf32>
    %c222_i32_322 = arith.constant 222 : i32
    %1227 = tpu.dynamic_rotate %260 by %c222_i32_322 dim 1 : vector<1x256xf32>, i32 -> vector<1x256xf32>
    %c14_i32_323 = arith.constant 14 : i32
    %1228 = vector.broadcast %c14_i32_323 : i32 to vector<1x256xi32>
    %1229 = arith.cmpi slt, %2, %1228 : vector<1x256xi32>
    %c14_i32_324 = arith.constant 14 : i32
    %1230 = vector.broadcast %c14_i32_324 : i32 to vector<1x256xi32>
    %1231 = arith.cmpi slt, %4, %1230 : vector<1x256xi32>
    %1232 = arith.andi %1229, %1231 : vector<1x256xi1>
    %1233 = arith.extui %1232 : vector<1x256xi1> to vector<1x256xi32>
    %1234 = arith.sitofp %1233 : vector<1x256xi32> to vector<1x256xf32>
    %1235 = arith.mulf %1227, %1234 : vector<1x256xf32>
    %c40 = arith.constant 40 : index
    %1236 = memref.load %arg8[%c40] : memref<98xf32, #tpu.memory_space<smem>>
    %1237 = vector.broadcast %1236 : f32 to vector<1x256xf32>
    %1238 = arith.mulf %1226, %1237 : vector<1x256xf32>
    %1239 = arith.addf %1217, %1238 : vector<1x256xf32>
    %c89 = arith.constant 89 : index
    %1240 = memref.load %arg8[%c89] : memref<98xf32, #tpu.memory_space<smem>>
    %1241 = vector.broadcast %1240 : f32 to vector<1x256xf32>
    %1242 = arith.mulf %1235, %1241 : vector<1x256xf32>
    %1243 = arith.addf %1239, %1242 : vector<1x256xf32>
    %c221_i32 = arith.constant 221 : i32
    %1244 = tpu.dynamic_rotate %258 by %c221_i32 dim 1 : vector<1x256xf32>, i32 -> vector<1x256xf32>
    %c14_i32_325 = arith.constant 14 : i32
    %1245 = vector.broadcast %c14_i32_325 : i32 to vector<1x256xi32>
    %1246 = arith.cmpi slt, %2, %1245 : vector<1x256xi32>
    %c13_i32_326 = arith.constant 13 : i32
    %1247 = vector.broadcast %c13_i32_326 : i32 to vector<1x256xi32>
    %1248 = arith.cmpi slt, %4, %1247 : vector<1x256xi32>
    %1249 = arith.andi %1246, %1248 : vector<1x256xi1>
    %1250 = arith.extui %1249 : vector<1x256xi1> to vector<1x256xi32>
    %1251 = arith.sitofp %1250 : vector<1x256xi32> to vector<1x256xf32>
    %1252 = arith.mulf %1244, %1251 : vector<1x256xf32>
    %c221_i32_327 = arith.constant 221 : i32
    %1253 = tpu.dynamic_rotate %260 by %c221_i32_327 dim 1 : vector<1x256xf32>, i32 -> vector<1x256xf32>
    %c14_i32_328 = arith.constant 14 : i32
    %1254 = vector.broadcast %c14_i32_328 : i32 to vector<1x256xi32>
    %1255 = arith.cmpi slt, %2, %1254 : vector<1x256xi32>
    %c13_i32_329 = arith.constant 13 : i32
    %1256 = vector.broadcast %c13_i32_329 : i32 to vector<1x256xi32>
    %1257 = arith.cmpi slt, %4, %1256 : vector<1x256xi32>
    %1258 = arith.andi %1255, %1257 : vector<1x256xi1>
    %1259 = arith.extui %1258 : vector<1x256xi1> to vector<1x256xi32>
    %1260 = arith.sitofp %1259 : vector<1x256xi32> to vector<1x256xf32>
    %1261 = arith.mulf %1253, %1260 : vector<1x256xf32>
    %c41 = arith.constant 41 : index
    %1262 = memref.load %arg8[%c41] : memref<98xf32, #tpu.memory_space<smem>>
    %1263 = vector.broadcast %1262 : f32 to vector<1x256xf32>
    %1264 = arith.mulf %1252, %1263 : vector<1x256xf32>
    %1265 = arith.addf %1243, %1264 : vector<1x256xf32>
    %c90 = arith.constant 90 : index
    %1266 = memref.load %arg8[%c90] : memref<98xf32, #tpu.memory_space<smem>>
    %1267 = vector.broadcast %1266 : f32 to vector<1x256xf32>
    %1268 = arith.mulf %1261, %1267 : vector<1x256xf32>
    %1269 = arith.addf %1265, %1268 : vector<1x256xf32>
    %c211_i32 = arith.constant 211 : i32
    %1270 = tpu.dynamic_rotate %258 by %c211_i32 dim 1 : vector<1x256xf32>, i32 -> vector<1x256xf32>
    %c13_i32_330 = arith.constant 13 : i32
    %1271 = vector.broadcast %c13_i32_330 : i32 to vector<1x256xi32>
    %1272 = arith.cmpi slt, %2, %1271 : vector<1x256xi32>
    %c3_i32_331 = arith.constant 3 : i32
    %1273 = vector.broadcast %c3_i32_331 : i32 to vector<1x256xi32>
    %1274 = arith.cmpi sge, %4, %1273 : vector<1x256xi32>
    %1275 = arith.andi %1272, %1274 : vector<1x256xi1>
    %1276 = arith.extui %1275 : vector<1x256xi1> to vector<1x256xi32>
    %1277 = arith.sitofp %1276 : vector<1x256xi32> to vector<1x256xf32>
    %1278 = arith.mulf %1270, %1277 : vector<1x256xf32>
    %c211_i32_332 = arith.constant 211 : i32
    %1279 = tpu.dynamic_rotate %260 by %c211_i32_332 dim 1 : vector<1x256xf32>, i32 -> vector<1x256xf32>
    %c13_i32_333 = arith.constant 13 : i32
    %1280 = vector.broadcast %c13_i32_333 : i32 to vector<1x256xi32>
    %1281 = arith.cmpi slt, %2, %1280 : vector<1x256xi32>
    %c3_i32_334 = arith.constant 3 : i32
    %1282 = vector.broadcast %c3_i32_334 : i32 to vector<1x256xi32>
    %1283 = arith.cmpi sge, %4, %1282 : vector<1x256xi32>
    %1284 = arith.andi %1281, %1283 : vector<1x256xi1>
    %1285 = arith.extui %1284 : vector<1x256xi1> to vector<1x256xi32>
    %1286 = arith.sitofp %1285 : vector<1x256xi32> to vector<1x256xf32>
    %1287 = arith.mulf %1279, %1286 : vector<1x256xf32>
    %c42 = arith.constant 42 : index
    %1288 = memref.load %arg8[%c42] : memref<98xf32, #tpu.memory_space<smem>>
    %1289 = vector.broadcast %1288 : f32 to vector<1x256xf32>
    %1290 = arith.mulf %1278, %1289 : vector<1x256xf32>
    %1291 = arith.addf %1269, %1290 : vector<1x256xf32>
    %c91 = arith.constant 91 : index
    %1292 = memref.load %arg8[%c91] : memref<98xf32, #tpu.memory_space<smem>>
    %1293 = vector.broadcast %1292 : f32 to vector<1x256xf32>
    %1294 = arith.mulf %1287, %1293 : vector<1x256xf32>
    %1295 = arith.addf %1291, %1294 : vector<1x256xf32>
    %c210_i32 = arith.constant 210 : i32
    %1296 = tpu.dynamic_rotate %258 by %c210_i32 dim 1 : vector<1x256xf32>, i32 -> vector<1x256xf32>
    %c13_i32_335 = arith.constant 13 : i32
    %1297 = vector.broadcast %c13_i32_335 : i32 to vector<1x256xi32>
    %1298 = arith.cmpi slt, %2, %1297 : vector<1x256xi32>
    %c2_i32_336 = arith.constant 2 : i32
    %1299 = vector.broadcast %c2_i32_336 : i32 to vector<1x256xi32>
    %1300 = arith.cmpi sge, %4, %1299 : vector<1x256xi32>
    %1301 = arith.andi %1298, %1300 : vector<1x256xi1>
    %1302 = arith.extui %1301 : vector<1x256xi1> to vector<1x256xi32>
    %1303 = arith.sitofp %1302 : vector<1x256xi32> to vector<1x256xf32>
    %1304 = arith.mulf %1296, %1303 : vector<1x256xf32>
    %c210_i32_337 = arith.constant 210 : i32
    %1305 = tpu.dynamic_rotate %260 by %c210_i32_337 dim 1 : vector<1x256xf32>, i32 -> vector<1x256xf32>
    %c13_i32_338 = arith.constant 13 : i32
    %1306 = vector.broadcast %c13_i32_338 : i32 to vector<1x256xi32>
    %1307 = arith.cmpi slt, %2, %1306 : vector<1x256xi32>
    %c2_i32_339 = arith.constant 2 : i32
    %1308 = vector.broadcast %c2_i32_339 : i32 to vector<1x256xi32>
    %1309 = arith.cmpi sge, %4, %1308 : vector<1x256xi32>
    %1310 = arith.andi %1307, %1309 : vector<1x256xi1>
    %1311 = arith.extui %1310 : vector<1x256xi1> to vector<1x256xi32>
    %1312 = arith.sitofp %1311 : vector<1x256xi32> to vector<1x256xf32>
    %1313 = arith.mulf %1305, %1312 : vector<1x256xf32>
    %c43 = arith.constant 43 : index
    %1314 = memref.load %arg8[%c43] : memref<98xf32, #tpu.memory_space<smem>>
    %1315 = vector.broadcast %1314 : f32 to vector<1x256xf32>
    %1316 = arith.mulf %1304, %1315 : vector<1x256xf32>
    %1317 = arith.addf %1295, %1316 : vector<1x256xf32>
    %c92 = arith.constant 92 : index
    %1318 = memref.load %arg8[%c92] : memref<98xf32, #tpu.memory_space<smem>>
    %1319 = vector.broadcast %1318 : f32 to vector<1x256xf32>
    %1320 = arith.mulf %1313, %1319 : vector<1x256xf32>
    %1321 = arith.addf %1317, %1320 : vector<1x256xf32>
    %c209_i32 = arith.constant 209 : i32
    %1322 = tpu.dynamic_rotate %258 by %c209_i32 dim 1 : vector<1x256xf32>, i32 -> vector<1x256xf32>
    %c13_i32_340 = arith.constant 13 : i32
    %1323 = vector.broadcast %c13_i32_340 : i32 to vector<1x256xi32>
    %1324 = arith.cmpi slt, %2, %1323 : vector<1x256xi32>
    %c1_i32_341 = arith.constant 1 : i32
    %1325 = vector.broadcast %c1_i32_341 : i32 to vector<1x256xi32>
    %1326 = arith.cmpi sge, %4, %1325 : vector<1x256xi32>
    %1327 = arith.andi %1324, %1326 : vector<1x256xi1>
    %1328 = arith.extui %1327 : vector<1x256xi1> to vector<1x256xi32>
    %1329 = arith.sitofp %1328 : vector<1x256xi32> to vector<1x256xf32>
    %1330 = arith.mulf %1322, %1329 : vector<1x256xf32>
    %c209_i32_342 = arith.constant 209 : i32
    %1331 = tpu.dynamic_rotate %260 by %c209_i32_342 dim 1 : vector<1x256xf32>, i32 -> vector<1x256xf32>
    %c13_i32_343 = arith.constant 13 : i32
    %1332 = vector.broadcast %c13_i32_343 : i32 to vector<1x256xi32>
    %1333 = arith.cmpi slt, %2, %1332 : vector<1x256xi32>
    %c1_i32_344 = arith.constant 1 : i32
    %1334 = vector.broadcast %c1_i32_344 : i32 to vector<1x256xi32>
    %1335 = arith.cmpi sge, %4, %1334 : vector<1x256xi32>
    %1336 = arith.andi %1333, %1335 : vector<1x256xi1>
    %1337 = arith.extui %1336 : vector<1x256xi1> to vector<1x256xi32>
    %1338 = arith.sitofp %1337 : vector<1x256xi32> to vector<1x256xf32>
    %1339 = arith.mulf %1331, %1338 : vector<1x256xf32>
    %c44 = arith.constant 44 : index
    %1340 = memref.load %arg8[%c44] : memref<98xf32, #tpu.memory_space<smem>>
    %1341 = vector.broadcast %1340 : f32 to vector<1x256xf32>
    %1342 = arith.mulf %1330, %1341 : vector<1x256xf32>
    %1343 = arith.addf %1321, %1342 : vector<1x256xf32>
    %c93 = arith.constant 93 : index
    %1344 = memref.load %arg8[%c93] : memref<98xf32, #tpu.memory_space<smem>>
    %1345 = vector.broadcast %1344 : f32 to vector<1x256xf32>
    %1346 = arith.mulf %1339, %1345 : vector<1x256xf32>
    %1347 = arith.addf %1343, %1346 : vector<1x256xf32>
    %c208_i32 = arith.constant 208 : i32
    %1348 = tpu.dynamic_rotate %258 by %c208_i32 dim 1 : vector<1x256xf32>, i32 -> vector<1x256xf32>
    %c13_i32_345 = arith.constant 13 : i32
    %1349 = vector.broadcast %c13_i32_345 : i32 to vector<1x256xi32>
    %1350 = arith.cmpi slt, %2, %1349 : vector<1x256xi32>
    %1351 = arith.extui %1350 : vector<1x256xi1> to vector<1x256xi32>
    %1352 = arith.sitofp %1351 : vector<1x256xi32> to vector<1x256xf32>
    %1353 = arith.mulf %1348, %1352 : vector<1x256xf32>
    %c208_i32_346 = arith.constant 208 : i32
    %1354 = tpu.dynamic_rotate %260 by %c208_i32_346 dim 1 : vector<1x256xf32>, i32 -> vector<1x256xf32>
    %c13_i32_347 = arith.constant 13 : i32
    %1355 = vector.broadcast %c13_i32_347 : i32 to vector<1x256xi32>
    %1356 = arith.cmpi slt, %2, %1355 : vector<1x256xi32>
    %1357 = arith.extui %1356 : vector<1x256xi1> to vector<1x256xi32>
    %1358 = arith.sitofp %1357 : vector<1x256xi32> to vector<1x256xf32>
    %1359 = arith.mulf %1354, %1358 : vector<1x256xf32>
    %c45 = arith.constant 45 : index
    %1360 = memref.load %arg8[%c45] : memref<98xf32, #tpu.memory_space<smem>>
    %1361 = vector.broadcast %1360 : f32 to vector<1x256xf32>
    %1362 = arith.mulf %1353, %1361 : vector<1x256xf32>
    %1363 = arith.addf %1347, %1362 : vector<1x256xf32>
    %c94 = arith.constant 94 : index
    %1364 = memref.load %arg8[%c94] : memref<98xf32, #tpu.memory_space<smem>>
    %1365 = vector.broadcast %1364 : f32 to vector<1x256xf32>
    %1366 = arith.mulf %1359, %1365 : vector<1x256xf32>
    %1367 = arith.addf %1363, %1366 : vector<1x256xf32>
    %c207_i32 = arith.constant 207 : i32
    %1368 = tpu.dynamic_rotate %258 by %c207_i32 dim 1 : vector<1x256xf32>, i32 -> vector<1x256xf32>
    %c13_i32_348 = arith.constant 13 : i32
    %1369 = vector.broadcast %c13_i32_348 : i32 to vector<1x256xi32>
    %1370 = arith.cmpi slt, %2, %1369 : vector<1x256xi32>
    %c15_i32_349 = arith.constant 15 : i32
    %1371 = vector.broadcast %c15_i32_349 : i32 to vector<1x256xi32>
    %1372 = arith.cmpi slt, %4, %1371 : vector<1x256xi32>
    %1373 = arith.andi %1370, %1372 : vector<1x256xi1>
    %1374 = arith.extui %1373 : vector<1x256xi1> to vector<1x256xi32>
    %1375 = arith.sitofp %1374 : vector<1x256xi32> to vector<1x256xf32>
    %1376 = arith.mulf %1368, %1375 : vector<1x256xf32>
    %c207_i32_350 = arith.constant 207 : i32
    %1377 = tpu.dynamic_rotate %260 by %c207_i32_350 dim 1 : vector<1x256xf32>, i32 -> vector<1x256xf32>
    %c13_i32_351 = arith.constant 13 : i32
    %1378 = vector.broadcast %c13_i32_351 : i32 to vector<1x256xi32>
    %1379 = arith.cmpi slt, %2, %1378 : vector<1x256xi32>
    %c15_i32_352 = arith.constant 15 : i32
    %1380 = vector.broadcast %c15_i32_352 : i32 to vector<1x256xi32>
    %1381 = arith.cmpi slt, %4, %1380 : vector<1x256xi32>
    %1382 = arith.andi %1379, %1381 : vector<1x256xi1>
    %1383 = arith.extui %1382 : vector<1x256xi1> to vector<1x256xi32>
    %1384 = arith.sitofp %1383 : vector<1x256xi32> to vector<1x256xf32>
    %1385 = arith.mulf %1377, %1384 : vector<1x256xf32>
    %c46 = arith.constant 46 : index
    %1386 = memref.load %arg8[%c46] : memref<98xf32, #tpu.memory_space<smem>>
    %1387 = vector.broadcast %1386 : f32 to vector<1x256xf32>
    %1388 = arith.mulf %1376, %1387 : vector<1x256xf32>
    %1389 = arith.addf %1367, %1388 : vector<1x256xf32>
    %c95 = arith.constant 95 : index
    %1390 = memref.load %arg8[%c95] : memref<98xf32, #tpu.memory_space<smem>>
    %1391 = vector.broadcast %1390 : f32 to vector<1x256xf32>
    %1392 = arith.mulf %1385, %1391 : vector<1x256xf32>
    %1393 = arith.addf %1389, %1392 : vector<1x256xf32>
    %c206_i32 = arith.constant 206 : i32
    %1394 = tpu.dynamic_rotate %258 by %c206_i32 dim 1 : vector<1x256xf32>, i32 -> vector<1x256xf32>
    %c13_i32_353 = arith.constant 13 : i32
    %1395 = vector.broadcast %c13_i32_353 : i32 to vector<1x256xi32>
    %1396 = arith.cmpi slt, %2, %1395 : vector<1x256xi32>
    %c14_i32_354 = arith.constant 14 : i32
    %1397 = vector.broadcast %c14_i32_354 : i32 to vector<1x256xi32>
    %1398 = arith.cmpi slt, %4, %1397 : vector<1x256xi32>
    %1399 = arith.andi %1396, %1398 : vector<1x256xi1>
    %1400 = arith.extui %1399 : vector<1x256xi1> to vector<1x256xi32>
    %1401 = arith.sitofp %1400 : vector<1x256xi32> to vector<1x256xf32>
    %1402 = arith.mulf %1394, %1401 : vector<1x256xf32>
    %c206_i32_355 = arith.constant 206 : i32
    %1403 = tpu.dynamic_rotate %260 by %c206_i32_355 dim 1 : vector<1x256xf32>, i32 -> vector<1x256xf32>
    %c13_i32_356 = arith.constant 13 : i32
    %1404 = vector.broadcast %c13_i32_356 : i32 to vector<1x256xi32>
    %1405 = arith.cmpi slt, %2, %1404 : vector<1x256xi32>
    %c14_i32_357 = arith.constant 14 : i32
    %1406 = vector.broadcast %c14_i32_357 : i32 to vector<1x256xi32>
    %1407 = arith.cmpi slt, %4, %1406 : vector<1x256xi32>
    %1408 = arith.andi %1405, %1407 : vector<1x256xi1>
    %1409 = arith.extui %1408 : vector<1x256xi1> to vector<1x256xi32>
    %1410 = arith.sitofp %1409 : vector<1x256xi32> to vector<1x256xf32>
    %1411 = arith.mulf %1403, %1410 : vector<1x256xf32>
    %c47 = arith.constant 47 : index
    %1412 = memref.load %arg8[%c47] : memref<98xf32, #tpu.memory_space<smem>>
    %1413 = vector.broadcast %1412 : f32 to vector<1x256xf32>
    %1414 = arith.mulf %1402, %1413 : vector<1x256xf32>
    %1415 = arith.addf %1393, %1414 : vector<1x256xf32>
    %c96 = arith.constant 96 : index
    %1416 = memref.load %arg8[%c96] : memref<98xf32, #tpu.memory_space<smem>>
    %1417 = vector.broadcast %1416 : f32 to vector<1x256xf32>
    %1418 = arith.mulf %1411, %1417 : vector<1x256xf32>
    %1419 = arith.addf %1415, %1418 : vector<1x256xf32>
    %c205_i32 = arith.constant 205 : i32
    %1420 = tpu.dynamic_rotate %258 by %c205_i32 dim 1 : vector<1x256xf32>, i32 -> vector<1x256xf32>
    %c13_i32_358 = arith.constant 13 : i32
    %1421 = vector.broadcast %c13_i32_358 : i32 to vector<1x256xi32>
    %1422 = arith.cmpi slt, %2, %1421 : vector<1x256xi32>
    %c13_i32_359 = arith.constant 13 : i32
    %1423 = vector.broadcast %c13_i32_359 : i32 to vector<1x256xi32>
    %1424 = arith.cmpi slt, %4, %1423 : vector<1x256xi32>
    %1425 = arith.andi %1422, %1424 : vector<1x256xi1>
    %1426 = arith.extui %1425 : vector<1x256xi1> to vector<1x256xi32>
    %1427 = arith.sitofp %1426 : vector<1x256xi32> to vector<1x256xf32>
    %1428 = arith.mulf %1420, %1427 : vector<1x256xf32>
    %c205_i32_360 = arith.constant 205 : i32
    %1429 = tpu.dynamic_rotate %260 by %c205_i32_360 dim 1 : vector<1x256xf32>, i32 -> vector<1x256xf32>
    %c13_i32_361 = arith.constant 13 : i32
    %1430 = vector.broadcast %c13_i32_361 : i32 to vector<1x256xi32>
    %1431 = arith.cmpi slt, %2, %1430 : vector<1x256xi32>
    %c13_i32_362 = arith.constant 13 : i32
    %1432 = vector.broadcast %c13_i32_362 : i32 to vector<1x256xi32>
    %1433 = arith.cmpi slt, %4, %1432 : vector<1x256xi32>
    %1434 = arith.andi %1431, %1433 : vector<1x256xi1>
    %1435 = arith.extui %1434 : vector<1x256xi1> to vector<1x256xi32>
    %1436 = arith.sitofp %1435 : vector<1x256xi32> to vector<1x256xf32>
    %1437 = arith.mulf %1429, %1436 : vector<1x256xf32>
    %c48 = arith.constant 48 : index
    %1438 = memref.load %arg8[%c48] : memref<98xf32, #tpu.memory_space<smem>>
    %1439 = vector.broadcast %1438 : f32 to vector<1x256xf32>
    %1440 = arith.mulf %1428, %1439 : vector<1x256xf32>
    %1441 = arith.addf %1419, %1440 : vector<1x256xf32>
    %c97 = arith.constant 97 : index
    %1442 = memref.load %arg8[%c97] : memref<98xf32, #tpu.memory_space<smem>>
    %1443 = vector.broadcast %1442 : f32 to vector<1x256xf32>
    %1444 = arith.mulf %1437, %1443 : vector<1x256xf32>
    %1445 = arith.addf %1441, %1444 : vector<1x256xf32>
    %cst_363 = arith.constant 0.000000e+00 : f32
    %1446 = vector.broadcast %cst_363 : f32 to vector<1x256xf32>
    %1447 = arith.subf %1446, %1445 : vector<1x256xf32>
    %1448 = math.exp %1447 : vector<1x256xf32>
    %cst_364 = arith.constant 1.000000e+00 : f32
    %1449 = vector.broadcast %cst_364 : f32 to vector<1x256xf32>
    %1450 = arith.addf %1449, %1448 : vector<1x256xf32>
    %cst_365 = arith.constant 1.000000e+00 : f32
    %1451 = vector.broadcast %cst_365 : f32 to vector<1x256xf32>
    %1452 = arith.divf %1451, %1450 : vector<1x256xf32>
    %1453 = vector.broadcast %1452 : vector<1x256xf32> to vector<32x256xf32>
    %1454 = arith.mulf %254, %1453 : vector<32x256xf32>
    %c0_366 = arith.constant 0 : index
    %c0_367 = arith.constant 0 : index
    %c0_368 = arith.constant 0 : index
    %1455 = vector.load %arg9[%c0_366, %c0_367, %c0_368] : memref<1x32x256xf32, #tpu.memory_space<vmem>>, vector<1x32x256xf32>
    %1456 = vector.shape_cast %1455 : vector<1x32x256xf32> to vector<32x256xf32>
    %1457 = vector.shape_cast %1454 : vector<32x256xf32> to vector<1x32x256xf32>
    tpu.vector_store %arg9[%c0_366, %c0_367, %c0_368], %1457 {strides = array<i32>} : memref<1x32x256xf32, #tpu.memory_space<vmem>>, vector<1x32x256xf32>,
    return
  }
  func.func @transform_0(%arg0: i32) -> (i32, i32, i32) {
    %c0_i32 = arith.constant 0 : i32
    %c0_i32_0 = arith.constant 0 : i32
    %c0_i32_1 = arith.constant 0 : i32
    return %arg0, %c0_i32, %c0_i32_0 : i32, i32, i32
  }
  func.func @transform_1(%arg0: i32) -> (i32, i32, i32) {
    %c0_i32 = arith.constant 0 : i32
    %c0_i32_0 = arith.constant 0 : i32
    %c0_i32_1 = arith.constant 0 : i32
    %c0_i32_2 = arith.constant 0 : i32
    return %c0_i32, %c0_i32_0, %c0_i32_1 : i32, i32, i32
  }
  func.func @transform_2(%arg0: i32) -> (i32, i32) {
    %c0_i32 = arith.constant 0 : i32
    %c0_i32_0 = arith.constant 0 : i32
    %c0_i32_1 = arith.constant 0 : i32
    return %c0_i32, %c0_i32_0 : i32, i32
  }
  func.func @transform_3(%arg0: i32) -> (i32, i32, i32) {
    %c0_i32 = arith.constant 0 : i32
    %c0_i32_0 = arith.constant 0 : i32
    %c0_i32_1 = arith.constant 0 : i32
    %c0_i32_2 = arith.constant 0 : i32
    return %c0_i32, %c0_i32_0, %c0_i32_1 : i32, i32, i32
  }
  func.func @transform_4(%arg0: i32) -> (i32, i32) {
    %c0_i32 = arith.constant 0 : i32
    %c0_i32_0 = arith.constant 0 : i32
    %c0_i32_1 = arith.constant 0 : i32
    return %c0_i32, %c0_i32_0 : i32, i32
  }
  func.func @transform_5(%arg0: i32) -> (i32, i32) {
    %c0_i32 = arith.constant 0 : i32
    %c0_i32_0 = arith.constant 0 : i32
    %c0_i32_1 = arith.constant 0 : i32
    return %c0_i32, %c0_i32_0 : i32, i32
  }
  func.func @transform_6(%arg0: i32) -> (i32, i32) {
    %c0_i32 = arith.constant 0 : i32
    %c0_i32_0 = arith.constant 0 : i32
    %c0_i32_1 = arith.constant 0 : i32
    return %c0_i32, %c0_i32_0 : i32, i32
  }
  func.func @transform_7(%arg0: i32) -> i32 {
    %c0_i32 = arith.constant 0 : i32
    %c0_i32_0 = arith.constant 0 : i32
    return %c0_i32 : i32
  }
  func.func @transform_8(%arg0: i32) -> (i32, i32, i32) {
    %c0_i32 = arith.constant 0 : i32
    %c0_i32_0 = arith.constant 0 : i32
    %c0_i32_1 = arith.constant 0 : i32
    return %arg0, %c0_i32, %c0_i32_0 : i32, i32, i32
  }
}

</mosaic_0001>

<bundles_post_ra>
// kernel: up_forward.1
= control target key start
LH: loop header
LB: loop body
LE: loop exit
PB: predicated region body
PF: predicated region fallthrough
CT: control target
= control target key end

     0   :  { %13 = vsyncpa [#allocation3], 0  ;;  %s5464_s27 = smov 0   ;;  %s9104_s0 = inlined_call_operand.vmem [shape: f32[2,64,256], index: 0, kind: input, shape index: {}]   ;;  %s9105_s1 = inlined_call_operand.vmem [shape: f32[9,32,64], index: 1, kind: input, shape index: {}]   ;;  %s9106_s2 = inlined_call_operand.vmem [shape: f32[32,1], index: 2, kind: input, shape index: {}]   ;;  %s9107_s3 = inlined_call_operand.vmem [shape: f32[9,32,32], index: 3, kind: input, shape index: {}]   ;;  %s9108_s4 = inlined_call_operand.vmem [shape: f32[32,1], index: 4, kind: input, shape index: {}]   ;;  %s9109_s5 = inlined_call_operand.vmem [shape: f32[2,32], index: 5, kind: input, shape index: {}]   ;;  %s9110_s6 = inlined_call_operand.vmem [shape: f32[32,2], index: 6, kind: input, shape index: {}]   ;;  %s9111_s7 = inlined_call_operand.vmem [shape: f32[98], index: 7, kind: input, shape index: {}]   ;;  %s9112_s8 = inlined_call_operand.vmem [shape: f32[2,32,256], index: 8, kind: output, shape index: {}]  }
   0x1 LB: > { %s4780_s28 = sadd.s32 4294967295, %s5364_s27   ;;  %p4782_p0 = scmp.ge.s32.totalorder %s5364_s27, 1  ;;  %s5364_s27 = sphi %s5464_s27, %s19_s27  }
   0x2   : > { %p223_p1 = scmp.lt.s32.totalorder %s5364_s27, 3  ;;  %s253_s9 = sshll.u32 %s9111_s7, 4  ;;  %s254_s9 = int_to_ptr.vmem [resolvable:$true] %s253_s9 }
   0x3   : > { %p5232_p3 = scmp.eq.s32.totalorder %s4780_s28, 0  ;;  %s5366_s10 = smov [#allocation2]  }
   0x4   : > { %p224_p2 = pnand %p4782_p0, %p223_p1 }
   0x6   : > { %p5228_p4 = pneg %p224_p2  ;;  %274 = sbr.rel (%p224_p2) target bundleno = 2306 (0x902), region = 52 }
   0x8   : > { %p5229_p5 = pnand %p5232_p3, %p5228_p4 }
   0xa   : > { %5231 = dma.vmem_to_smem (!%p5229_p5), %s254_s9, 16, %s5366_s10, [#allocation3]  }
   0xb   : > { %5359 = dma.done.wait (%p5232_p3), [#allocation3], 16  }
   0xc   : > { %5361 = vsyncadd (%p5232_p3), [#allocation3], 4294967280 }
   0xd   : > { %281 = sfence }
   0xe   : > { %p310_p6 = scmp.lt.s32.totalorder %s4780_s28, 1  ;;  %s5367_s15 = smov 16   ;;  %v320_v18 = vlaneseq  ;;  %v9116_v29 = vmov 0.0   ;;  %vm496_vm8 = vcmask 523264  }
   0xf   : > { %s5368_s16 = smov 17   ;;  %s5369_s17 = smov 15  }
  0x10   : > { %s9332_s28 = smov (!%p310_p6, %s4780_s28), 1  ;;  %v5615_v19 = vand.u32 127, %v320_v18  ;;  %s5371_s18 = smov 1  }
  0x11   : > { %s5206_s11 = sshll.u32 %s9332_s28, 7  ;;  %s5372_s19 = smov 127  }
  0x12   : > { %s5481_s14 = scalar_lea.vmem %s9104_s0, %s5206_s11  ;;  %9184 = vst [vmem:[#allocation5_spill] sm:$0xff] %v5615_v19  ;;  %v5618_v21 = vadd.s32 128, %v5615_v19  ;;  %v5627_v24 = vshra.s32 %v5615_v19, 4  ;;  %vm9180_vm2 = vcmp.lt.s32.totalorder %v5615_v19, 16  ;;  %v5704_v63 = vand.u32 15, %v5615_v19  ;;  %s5373_s22 = smov 113  }
  0x13   : > { %v5484_v0 = vld [vmem:[%s5481_s14 + $0x70] sm:$0xff]  ;;  %v5487_v1 = vld [vmem:[%s5481_s14 + $0x60] sm:$0xff]  ;;  %v5499_v3 = vld [vmem:[%s5481_s14 + $0x78] sm:$0xff]  ;;  %vm9181_vm7 = vcmp.lt.s32.totalorder %v5615_v19, 17  ;;  %vm9177_vm13 = vcmp.lt.s32.totalorder %v5615_v19, 15  ;;  %vm9176_vm14 = vcmp.lt.s32.totalorder %v5615_v19, 1 }
  0x14   : > { %436 = vrot.lane.b32.xlu0 %v5484_v0, %s5367_s15  ;;  %434 = vrot.lane.b32.xlu1 %v5487_v1, %s5367_s15  ;;  %v5494_v2 = vld [vmem:[%s5481_s14 + $0x50] sm:$0xff]  ;;  %v5502_v4 = vld [vmem:[%s5481_s14 + $0x68] sm:$0xff]  ;;  %9185 = vst [vmem:[#allocation6_spill] sm:$0xff] %v5627_v24  ;;  %v5630_v25 = vshra.s32 %v5618_v21, 4  ;;  %vm9114_vm0 = vcmp.ge.s32.totalorder %v5627_v24, 1  ;;  %vm394_vm3 = vcmp.ge.s32.totalorder %v5704_v63, 1 }
  0x15   : > { %432 = vrot.lane.b32.xlu2 %v5494_v2, %s5367_s15  ;;  %v5505_v5 = vld [vmem:[%s5481_s14 + $0x58] sm:$0xff]  ;;  %v5514_v6 = vld [vmem:[%s5481_s14 + $0x48] sm:$0xff]  ;;  %v5517_v7 = vld [vmem:[%s5481_s14 + $0x40] sm:$0xff]  ;;  %v5642_v30 = vsel %vm9114_vm0, 1.0, %v9116_v29  ;;  %9189 = vst [vmem:[#allocation10_spill] sm:$0xff] %v5704_v63  ;;  %vm686_vm9 = vcmp.lt.s32.totalorder %v5704_v63, 15 }
  0x16   : > { %v5520_v8 = vld [vmem:[%s5481_s14 + $0x30] sm:$0xff]  ;;  %v5529_v9 = vld [vmem:[%s5481_s14 + $0x38] sm:$0xff]  ;;  %v5532_v10 = vld [vmem:[%s5481_s14 + $0x20] sm:$0xff]  ;;  %9186 = vst [vmem:[#allocation7_spill] sm:$0xff] %v5630_v25  ;;  %vm9113_vm1 = vcmp.ge.s32.totalorder %v5630_v25, 1  ;;  %s5374_s24 = smov 112  }
  0x17   : > { %v5535_v11 = vld [vmem:[%s5481_s14 + $0x28] sm:$0xff]  ;;  %v5544_v12 = vld [vmem:[%s5481_s14 + $0x18] sm:$0xff]  ;;  %v5547_v13 = vld [vmem:[%s5481_s14 + $0x10] sm:$0xff]  ;;  %9187 = vst [vmem:[#allocation8_spill] sm:$0xff] %v5642_v30  ;;  %v5647_v31 = vsel %vm9113_vm1, 1.0, %v9116_v29  ;;  %s5375_s13 = smov 111  }
  0x18   : > { %v5550_v14 = vld [vmem:[%s5481_s14] sm:$0xff]  ;;  %v5559_v15 = vld [vmem:[%s5481_s14 + $0x8] sm:$0xff]  ;;  %9188 = vst [vmem:[#allocation9_spill] sm:$0xff] %v5647_v31  ;;  %vm396_vm5 = vmand %vm9114_vm0, %vm394_vm3  ;;  %vm9175_vm15 = vcmp.lt.s32.totalorder %v5615_v19, 127  ;;  %s5379_s25 = smov 51   ;;  %s5380_s26 = smov 50  }
  0x19   : > { %vm688_vm11 = vmand %vm9114_vm0, %vm686_vm9  ;;  %s5382_s29 = smov 48   ;;  %s5383_s30 = smov 47  }
  0x1a   : > { %s5384_s9 = smov 46   ;;  %s5385_s10 = smov 45  }
  0x1b   : > { %s5386_s11 = smov 35   ;;  %s5387_s12 = smov 34  }
  0x1c   : > { %452 = vrot.lane.b32.xlu0 %v5499_v3, %s5367_s15  ;;  %450 = vrot.lane.b32.xlu1 %v5502_v4, %s5367_s15  ;;  %s5388_s20 = smov 33   ;;  %s5389_s21 = smov 32  }
  0x1d   : > { %448 = vrot.lane.b32.xlu2 %v5505_v5, %s5367_s15  ;;  %s5390_s23 = smov 31  }
  0x24   : > { %446 = vrot.lane.b32.xlu1 %v5514_v6, %s5367_s15  ;;  %430 = vrot.lane.b32.xlu0 %v5517_v7, %s5367_s15 }
  0x25   : > { %428 = vrot.lane.b32.xlu2 %v5520_v8, %s5367_s15 }
  0x2c   : > { %444 = vrot.lane.b32.xlu0 %v5529_v9, %s5367_s15  ;;  %426 = vrot.lane.b32.xlu1 %v5532_v10, %s5367_s15 }
  0x2d   : > { %442 = vrot.lane.b32.xlu2 %v5535_v11, %s5367_s15 }
  0x34   : > { %440 = vrot.lane.b32.xlu1 %v5544_v12, %s5367_s15  ;;  %424 = vrot.lane.b32.xlu0 %v5547_v13, %s5367_s15 }
  0x35   : > { %422 = vrot.lane.b32.xlu2 %v5550_v14, %s5367_s15 }
  0x3c   : > { %357 = vrot.lane.b32.xlu1 %v5484_v0, %s5368_s16  ;;  %438 = vrot.lane.b32.xlu0 %v5559_v15, %s5367_s15 }
  0x3d   : > { %373 = vrot.lane.b32.xlu2 %v5499_v3, %s5368_s16 }
  0x44   : > { %371 = vrot.lane.b32.xlu1 %v5502_v4, %s5368_s16  ;;  %355 = vrot.lane.b32.xlu0 %v5487_v1, %s5368_s16 }
  0x45   : > { %353 = vrot.lane.b32.xlu2 %v5494_v2, %s5368_s16 }
  0x4c   : > { %351 = vrot.lane.b32.xlu1 %v5517_v7, %s5368_s16  ;;  %369 = vrot.lane.b32.xlu0 %v5505_v5, %s5368_s16 }
  0x4d   : > { %367 = vrot.lane.b32.xlu2 %v5514_v6, %s5368_s16 }
  0x54   : > { %365 = vrot.lane.b32.xlu1 %v5529_v9, %s5368_s16  ;;  %349 = vrot.lane.b32.xlu0 %v5520_v8, %s5368_s16 }
  0x55   : > { %347 = vrot.lane.b32.xlu2 %v5532_v10, %s5368_s16 }
  0x5c   : > { %345 = vrot.lane.b32.xlu1 %v5547_v13, %s5368_s16  ;;  %363 = vrot.lane.b32.xlu0 %v5535_v11, %s5368_s16 }
  0x5d   : > { %361 = vrot.lane.b32.xlu2 %v5544_v12, %s5368_s16 }
  0x64   : > { %359 = vrot.lane.b32.xlu1 %v5559_v15, %s5368_s16  ;;  %343 = vrot.lane.b32.xlu0 %v5550_v14, %s5368_s16 }
  0x65   : > { %651 = vrot.lane.b32.xlu2 %v5484_v0, %s5369_s17 }
  0x6c   : > { %649 = vrot.lane.b32.xlu1 %v5487_v1, %s5369_s17  ;;  %667 = vrot.lane.b32.xlu0 %v5499_v3, %s5369_s17 }
  0x6d   : > { %665 = vrot.lane.b32.xlu2 %v5502_v4, %s5369_s17 }
  0x6f   : > { %v433_v16 = vpop.permute.xlu2 %432 }
  0x74   : > { %663 = vrot.lane.b32.xlu1 %v5505_v5, %s5369_s17  ;;  %647 = vrot.lane.b32.xlu0 %v5494_v2, %s5369_s17 }
  0x75   : > { %645 = vrot.lane.b32.xlu2 %v5517_v7, %s5369_s17 }
  0x77   : > { %v449_v17 = vpop.permute.xlu2 %448 }
  0x78   : > { %v468_v39 = vsel %vm9180_vm2, %v449_v17, %v433_v16  ;;  %v460_v40 = vsel %vm9180_vm2, %v433_v16, %v449_v17  ;;  %v5707_v16 = vand.u32 15, %v5618_v21 }
  0x79   : > { %v485_v43 = vmul.f32 %v5642_v30, %v468_v39  ;;  %v486_v44 = vmul.f32 %v5647_v31, %v460_v40 }
  0x7a   : > { %9190 = vst [vmem:[#allocation11_spill] sm:$0xff] %v5707_v16  ;;  %vm9115_vm4 = vcmp.ge.s32.totalorder %v5707_v16, 1  ;;  %vm687_vm10 = vcmp.lt.s32.totalorder %v5707_v16, 15 }
  0x7b   : > { %vm397_vm6 = vmand %vm9113_vm1, %vm9115_vm4 }
  0x7c   : > { %643 = vrot.lane.b32.xlu1 %v5520_v8, %s5369_s17  ;;  %661 = vrot.lane.b32.xlu0 %v5514_v6, %s5369_s17  ;;  %vm689_vm12 = vmand %vm9113_vm1, %vm687_vm10  ;;  %vm9172_vm1 = vcmp.lt.s32.totalorder %v5615_v19, 113 }
  0x7d   : > { %659 = vrot.lane.b32.xlu2 %v5529_v9, %s5369_s17 }
  0x7f   : > { %v429_v20 = vpop.permute.xlu2 %428 }
  0x84   : > { %657 = vrot.lane.b32.xlu1 %v5535_v11, %s5369_s17  ;;  %641 = vrot.lane.b32.xlu0 %v5532_v10, %s5369_s17 }
  0x85   : > { %639 = vrot.lane.b32.xlu2 %v5547_v13, %s5369_s17 }
  0x86   : > { %v437_v22 = vpop.permute.xlu0 %436  ;;  %v435_v23 = vpop.permute.xlu1 %434 }
  0x87   : > { %v443_v26 = vpop.permute.xlu2 %442 }
  0x8c   : > { %637 = vrot.lane.b32.xlu1 %v5550_v14, %s5369_s17  ;;  %655 = vrot.lane.b32.xlu0 %v5544_v12, %s5369_s17 }
  0x8d   : > { %653 = vrot.lane.b32.xlu2 %v5559_v15, %s5369_s17 }
  0x8e   : > { %v453_v27 = vpop.permute.xlu0 %452  ;;  %v451_v28 = vpop.permute.xlu1 %450 }
  0x8f   : > { %v470_v32 = vsel %vm9180_vm2, %v453_v27, %v437_v22  ;;  %v462_v33 = vsel %vm9180_vm2, %v437_v22, %v453_v27  ;;  %v469_v34 = vsel %vm9180_vm2, %v451_v28, %v435_v23  ;;  %v461_v35 = vsel %vm9180_vm2, %v435_v23, %v451_v28  ;;  %v5661_v38 = vpop.permute.xlu2 %422 }
  0x90   : > { %v489_v36 = vmul.f32 %v5642_v30, %v470_v32  ;;  %v490_v37 = vmul.f32 %v5647_v31, %v462_v33  ;;  %v487_v41 = vmul.f32 %v5642_v30, %v469_v34  ;;  %v488_v42 = vmul.f32 %v5647_v31, %v461_v35 }
  0x91   : > { %v5737_v27 = vsel %vm396_vm5, 1.0, %v9116_v29  ;;  %v5740_v28 = vsel %vm397_vm6, 1.0, %v9116_v29  ;;  %vm9174_vm5 = vcmp.lt.s32.totalorder %v5627_v24, 15  ;;  %vm9173_vm6 = vcmp.lt.s32.totalorder %v5630_v25, 15 }
  0x92   : > { %517 = vmatpush.msra.mxu0 %v489_v36  ;;  %546 = vmatpush.msra.mxu1 %v490_v37  ;;  %9191 = vst [vmem:[#allocation12_spill] sm:$0xff] %v5737_v27  ;;  %vm1538_vm0 = vmand %vm9173_vm6, %vm687_vm10 }
  0x93   : > { %9192 = vst [vmem:[#allocation13_spill] sm:$0xff] %v5740_v28 }
  0x94   : > { %518 = vmatpush.msra.mxu0 %v487_v41  ;;  %547 = vmatpush.msra.mxu1 %v488_v42 }
  0x95   : > { %823 = vrot.lane.b32.xlu1 %v5499_v3, %s5371_s18  ;;  %807 = vrot.lane.b32.xlu0 %v5484_v0, %s5371_s18 }
  0x96   : > { %519 = vmatpush.msra.mxu0 %v485_v43  ;;  %548 = vmatpush.msra.mxu1 %v486_v44  ;;  %v447_v45 = vpop.permute.xlu1 %446  ;;  %v431_v46 = vpop.permute.xlu0 %430 }
  0x97   : > { %v467_v47 = vsel %vm9180_vm2, %v447_v45, %v431_v46  ;;  %v459_v48 = vsel %vm9180_vm2, %v431_v46, %v447_v45  ;;  %805 = vrot.lane.b32.xlu2 %v5487_v1, %s5371_s18  ;;  %v374_v51 = vpop.permute.xlu2 %373 }
  0x98   : > { %v483_v49 = vmul.f32 %v5642_v30, %v467_v47  ;;  %v484_v50 = vmul.f32 %v5647_v31, %v459_v48 }
  0x9a   : > { %520 = vmatpush.msra.mxu0 %v483_v49  ;;  %549 = vmatpush.msra.mxu1 %v484_v50 }
  0x9d   : > { %803 = vrot.lane.b32.xlu1 %v5494_v2, %s5371_s18  ;;  %821 = vrot.lane.b32.xlu0 %v5502_v4, %s5371_s18 }
  0x9e   : > { %v445_v52 = vpop.permute.xlu0 %444  ;;  %v427_v53 = vpop.permute.xlu1 %426 }
  0x9f   : > { %v466_v54 = vsel %vm9180_vm2, %v445_v52, %v429_v20  ;;  %v458_v55 = vsel %vm9180_vm2, %v429_v20, %v445_v52  ;;  %v465_v56 = vsel %vm9180_vm2, %v443_v26, %v427_v53  ;;  %v457_v57 = vsel %vm9180_vm2, %v427_v53, %v443_v26  ;;  %819 = vrot.lane.b32.xlu2 %v5505_v5, %s5371_s18  ;;  %v5699_v60 = vpop.permute.xlu2 %353 }
  0xa0   : > { %v481_v58 = vmul.f32 %v5642_v30, %v466_v54  ;;  %v482_v59 = vmul.f32 %v5647_v31, %v458_v55  ;;  %v479_v61 = vmul.f32 %v5642_v30, %v465_v56  ;;  %v480_v62 = vmul.f32 %v5647_v31, %v457_v57 }
  0xa2   : > { %521 = vmatpush.msra.mxu0 %v481_v58  ;;  %550 = vmatpush.msra.mxu1 %v482_v59 }
  0xa4   : > { %522 = vmatpush.msra.mxu0 %v479_v61  ;;  %551 = vmatpush.msra.mxu1 %v480_v62  ;;  %v4795_v61 = vld [vmem:[%s9105_s1 + $0x20] sm:$0xff] }
  0xa5   : > { %817 = vrot.lane.b32.xlu1 %v5514_v6, %s5371_s18  ;;  %801 = vrot.lane.b32.xlu0 %v5517_v7, %s5371_s18 }
  0xa6   : > { %v441_v17 = vpop.permute.xlu1 %440  ;;  %v425_v18 = vpop.permute.xlu0 %424 }
  0xa7   : > { %v464_v20 = vsel %vm9180_vm2, %v441_v17, %v425_v18  ;;  %v456_v22 = vsel %vm9180_vm2, %v425_v18, %v441_v17  ;;  %799 = vrot.lane.b32.xlu2 %v5520_v8, %s5371_s18  ;;  %v368_v26 = vpop.permute.xlu2 %367 }
  0xa8   : > { %v477_v21 = vmul.f32 %v5642_v30, %v464_v20  ;;  %v478_v23 = vmul.f32 %v5647_v31, %v456_v22 }
  0xaa   : > { %523 = vmatpush.msra.mxu0 %v477_v21  ;;  %552 = vmatpush.msra.mxu1 %v478_v23 }
  0xad   : > { %797 = vrot.lane.b32.xlu1 %v5532_v10, %s5371_s18  ;;  %815 = vrot.lane.b32.xlu0 %v5529_v9, %s5371_s18 }
  0xae   : > { %v358_v32 = vpop.permute.xlu1 %357  ;;  %v439_v33 = vpop.permute.xlu0 %438 }
  0xaf   : > { %v463_v34 = vsel %vm9180_vm2, %v439_v33, %v5661_v38  ;;  %v455_v35 = vsel %vm9180_vm2, %v5661_v38, %v439_v33  ;;  %v391_v36 = vsel %vm9181_vm7, %v374_v51, %v358_v32  ;;  %v383_v37 = vsel %vm9181_vm7, %v358_v32, %v374_v51  ;;  %813 = vrot.lane.b32.xlu2 %v5535_v11, %s5371_s18  ;;  %v5758_v43 = vpop.permute.xlu2 %347 }
  0xb0   : > { %v475_v39 = vmul.f32 %v5642_v30, %v463_v34  ;;  %v476_v40 = vmul.f32 %v5647_v31, %v455_v35  ;;  %v416_v41 = vmul.f32 %v5737_v27, %v391_v36  ;;  %v417_v42 = vmul.f32 %v5740_v28, %v383_v37 }
  0xb2   : > { %524 = vmatpush.msra.mxu0 %v475_v39  ;;  %553 = vmatpush.msra.mxu1 %v476_v40 }
  0xb3   : > { %5208 = vmatpush.msra.mxu2 %v416_v41  ;;  %5216 = vmatpush.msra.mxu3 %v417_v42 }
  0xb4   : > { %587 = vmatpush.msrb.mxu0 %v416_v41  ;;  %616 = vmatpush.msrb.mxu1 %v417_v42 }
  0xb5   : > { %811 = vrot.lane.b32.xlu1 %v5544_v12, %s5371_s18  ;;  %795 = vrot.lane.b32.xlu0 %v5547_v13, %s5371_s18 }
  0xb6   : > { %v372_v38 = vpop.permute.xlu1 %371  ;;  %v356_v44 = vpop.permute.xlu0 %355  ;;  %4799 = vmatmul.msk.f32.vlgmr.msra.gmra.mxu0 %vm496_vm8, %v4795_v61  ;;  %4803 = vmatmul.msk.f32.vlgmr.msra.gmra.mxu1 %vm496_vm8, %v4795_v61 }
  0xb7   : > { %v390_v45 = vsel %vm9181_vm7, %v372_v38, %v356_v44  ;;  %v382_v46 = vsel %vm9181_vm7, %v356_v44, %v372_v38  ;;  %793 = vrot.lane.b32.xlu2 %v5550_v14, %s5371_s18  ;;  %v362_v49 = vpop.permute.xlu2 %361 }
  0xb8   : > { %v414_v47 = vmul.f32 %v5737_v27, %v390_v45  ;;  %v415_v48 = vmul.f32 %v5740_v28, %v382_v46 }
  0xba   : > { %588 = vmatpush.msrb.mxu0 %v414_v47  ;;  %5209 = vmatpush.msra.mxu2 %v414_v47 }
  0xbb   : > { %617 = vmatpush.msrb.mxu1 %v415_v48  ;;  %5217 = vmatpush.msra.mxu3 %v415_v48 }
  0xbd   : > { %1042 = vrot.lane.b32.xlu1 %v5484_v0, %s5372_s19  ;;  %809 = vrot.lane.b32.xlu0 %v5559_v15, %s5371_s18 }
  0xbe   : > { %v352_v50 = vpop.permute.xlu1 %351  ;;  %v370_v51 = vpop.permute.xlu0 %369 }
  0xbf   : > { %v389_v52 = vsel %vm9181_vm7, %v370_v51, %v5699_v60  ;;  %v381_v53 = vsel %vm9181_vm7, %v5699_v60, %v370_v51  ;;  %v388_v54 = vsel %vm9181_vm7, %v368_v26, %v352_v50  ;;  %1058 = vrot.lane.b32.xlu2 %v5499_v3, %s5372_s19  ;;  %v5788_v57 = vpop.permute.xlu2 %651  ;;  %v380_v58 = vsel %vm9181_vm7, %v352_v50, %v368_v26 }
  0xc0   : > { %v412_v55 = vmul.f32 %v5737_v27, %v389_v52  ;;  %v413_v56 = vmul.f32 %v5740_v28, %v381_v53  ;;  %v410_v59 = vmul.f32 %v5737_v27, %v388_v54  ;;  %v411_v60 = vmul.f32 %v5740_v28, %v380_v58 }
  0xc1   : > { %v5864_v50 = vsel %vm689_vm12, 1.0, %v9116_v29  ;;  %vm1232_vm12 = vmand %vm9173_vm6, %vm9115_vm4 }
  0xc2   : > { %589 = vmatpush.msrb.mxu0 %v412_v55  ;;  %5210 = vmatpush.msra.mxu2 %v412_v55  ;;  %9194 = vst [vmem:[#allocation15_spill] sm:$0xff] %v5864_v50 }
  0xc3   : > { %618 = vmatpush.msrb.mxu1 %v413_v56  ;;  %5218 = vmatpush.msra.mxu3 %v413_v56 }
  0xc4   : > { %590 = vmatpush.msrb.mxu0 %v410_v59  ;;  %5211 = vmatpush.msra.mxu2 %v410_v59 }
  0xc5   : > { %1056 = vrot.lane.b32.xlu1 %v5502_v4, %s5372_s19  ;;  %1040 = vrot.lane.b32.xlu0 %v5487_v1, %s5372_s19 }
  0xc6   : > { %619 = vmatpush.msrb.mxu1 %v411_v60  ;;  %5219 = vmatpush.msra.mxu3 %v411_v60  ;;  %v366_v62 = vpop.permute.xlu1 %365  ;;  %v350_v17 = vpop.permute.xlu0 %349 }
  0xc7   : > { %v387_v18 = vsel %vm9181_vm7, %v366_v62, %v350_v17  ;;  %v379_v20 = vsel %vm9181_vm7, %v350_v17, %v366_v62  ;;  %1038 = vrot.lane.b32.xlu2 %v5494_v2, %s5372_s19  ;;  %v666_v23 = vpop.permute.xlu2 %665 }
  0xc8   : > { %v408_v22 = vmul.f32 %v5737_v27, %v387_v18  ;;  %v409_v21 = vmul.f32 %v5740_v28, %v379_v20 }
  0xca   : > { %591 = vmatpush.msrb.mxu0 %v408_v22  ;;  %5212 = vmatpush.msra.mxu2 %v408_v22  ;;  %v4796_v22 = vld [vmem:[%s9105_s1 + $0x28] sm:$0xff] }
  0xcb   : > { %620 = vmatpush.msrb.mxu1 %v409_v21  ;;  %5220 = vmatpush.msra.mxu3 %v409_v21 }
  0xcc   : > { %4800 = vmatmul.msk.f32.gmra.mxu0 %vm496_vm8, %v4796_v22  ;;  %4804 = vmatmul.msk.f32.gmra.mxu1 %vm496_vm8, %v4796_v22  ;;  %v5982_v22 = vsel %vm394_vm3, 1.0, %v9116_v29 }
  0xcd   : > { %1036 = vrot.lane.b32.xlu1 %v5517_v7, %s5372_s19  ;;  %1054 = vrot.lane.b32.xlu0 %v5505_v5, %s5372_s19  ;;  %9195 = vst [vmem:[#allocation16_spill] sm:$0xff] %v5982_v22 }
  0xce   : > { %v346_v26 = vpop.permute.xlu1 %345  ;;  %v364_v32 = vpop.permute.xlu0 %363 }
  0xcf   : > { %v386_v33 = vsel %vm9181_vm7, %v364_v32, %v5758_v43  ;;  %v378_v34 = vsel %vm9181_vm7, %v5758_v43, %v364_v32  ;;  %v385_v35 = vsel %vm9181_vm7, %v362_v49, %v346_v26  ;;  %1052 = vrot.lane.b32.xlu2 %v5514_v6, %s5372_s19  ;;  %v5827_v39 = vpop.permute.xlu2 %645  ;;  %v377_v40 = vsel %vm9181_vm7, %v346_v26, %v362_v49 }
  0xd0   : > { %v406_v36 = vmul.f32 %v5737_v27, %v386_v33  ;;  %v407_v37 = vmul.f32 %v5740_v28, %v378_v34  ;;  %v404_v41 = vmul.f32 %v5737_v27, %v385_v35  ;;  %v405_v42 = vmul.f32 %v5740_v28, %v377_v40  ;;  %v4797_v40 = vld [vmem:[%s9105_s1 + $0x30] sm:$0xff] }
  0xd1   : > { %v5861_v49 = vsel %vm688_vm11, 1.0, %v9116_v29  ;;  %vm1231_vm11 = vmand %vm9174_vm5, %vm394_vm3 }
  0xd2   : > { %592 = vmatpush.msrb.mxu0 %v406_v36  ;;  %5213 = vmatpush.msra.mxu2 %v406_v36  ;;  %9193 = vst [vmem:[#allocation14_spill] sm:$0xff] %v5861_v49 }
  0xd3   : > { %621 = vmatpush.msrb.mxu1 %v407_v37  ;;  %5221 = vmatpush.msra.mxu3 %v407_v37 }
  0xd4   : > { %593 = vmatpush.msrb.mxu0 %v404_v41  ;;  %5214 = vmatpush.msra.mxu2 %v404_v41 }
  0xd5   : > { %1050 = vrot.lane.b32.xlu1 %v5529_v9, %s5372_s19  ;;  %1034 = vrot.lane.b32.xlu0 %v5520_v8, %s5372_s19 }
  0xd6   : > { %622 = vmatpush.msrb.mxu1 %v405_v42  ;;  %5222 = vmatpush.msra.mxu3 %v405_v42  ;;  %v360_v43 = vpop.permute.xlu1 %359  ;;  %v344_v38 = vpop.permute.xlu0 %343 }
  0xd7   : > { %v384_v44 = vsel %vm9181_vm7, %v360_v43, %v344_v38  ;;  %v376_v45 = vsel %vm9181_vm7, %v344_v38, %v360_v43  ;;  %1194 = vrot.lane.b32.xlu2 %v5484_v0, %s5373_s22  ;;  %v660_v48 = vpop.permute.xlu2 %659  ;;  %4801 = vmatmul.msk.f32.gmra.mxu0 %vm496_vm8, %v4797_v40 }
  0xd8   : > { %v402_v46 = vmul.f32 %v5737_v27, %v384_v44  ;;  %v403_v47 = vmul.f32 %v5740_v28, %v376_v45  ;;  %4805 = vmatmul.msk.f32.gmra.mxu1 %vm496_vm8, %v4797_v40 }
  0xda   : > { %594 = vmatpush.msrb.mxu0 %v402_v46  ;;  %5215 = vmatpush.msra.mxu2 %v402_v46 }
  0xdb   : > { %623 = vmatpush.msrb.mxu1 %v403_v47  ;;  %5223 = vmatpush.msra.mxu3 %v403_v47 }
  0xdd   : > { %1032 = vrot.lane.b32.xlu1 %v5532_v10, %s5372_s19  ;;  %1210 = vrot.lane.b32.xlu0 %v5499_v3, %s5373_s22 }
  0xde   : > { %v650_v51 = vpop.permute.xlu1 %649  ;;  %v668_v52 = vpop.permute.xlu0 %667 }
  0xdf   : > { %v677_v53 = vsel %vm9177_vm13, %v5788_v57, %v668_v52  ;;  %v685_v54 = vsel %vm9177_vm13, %v668_v52, %v5788_v57  ;;  %v676_v55 = vsel %vm9177_vm13, %v650_v51, %v666_v23  ;;  %v684_v56 = vsel %vm9177_vm13, %v666_v23, %v650_v51  ;;  %1048 = vrot.lane.b32.xlu2 %v5535_v11, %s5372_s19  ;;  %v5880_v60 = vpop.permute.xlu2 %639 }
  0xe0   : > { %v708_v58 = vmul.f32 %v5861_v49, %v685_v54  ;;  %v709_v59 = vmul.f32 %v5864_v50, %v677_v53  ;;  %v706_v61 = vmul.f32 %v5861_v49, %v684_v56  ;;  %v707_v57 = vmul.f32 %v5864_v50, %v676_v55 }
  0xe2   : > { %735 = vmatpush.msra.mxu0 %v708_v58  ;;  %764 = vmatpush.msra.mxu1 %v709_v59 }
  0xe4   : > { %736 = vmatpush.msra.mxu0 %v706_v61  ;;  %765 = vmatpush.msra.mxu1 %v707_v57  ;;  %v418_v57 = vld [vmem:[%s9105_s1] sm:$0xff] }
  0xe5   : > { %1208 = vrot.lane.b32.xlu1 %v5502_v4, %s5373_s22  ;;  %1192 = vrot.lane.b32.xlu0 %v5487_v1, %s5373_s22 }
  0xe6   : > { %v664_v62 = vpop.permute.xlu1 %663  ;;  %v648_v17 = vpop.permute.xlu0 %647 }
  0xe7   : > { %v675_v18 = vsel %vm9177_vm13, %v648_v17, %v664_v62  ;;  %v683_v20 = vsel %vm9177_vm13, %v664_v62, %v648_v17  ;;  %1030 = vrot.lane.b32.xlu2 %v5547_v13, %s5372_s19  ;;  %v654_v26 = vpop.permute.xlu2 %653 }
  0xe8   : > { %v704_v21 = vmul.f32 %v5861_v49, %v683_v20  ;;  %v705_v23 = vmul.f32 %v5864_v50, %v675_v18 }
  0xea   : > { %737 = vmatpush.msra.mxu0 %v704_v21  ;;  %766 = vmatpush.msra.mxu1 %v705_v23  ;;  %v5987_v21 = vsel %vm9115_vm4, 1.0, %v9116_v29  ;;  %vm9170_vm4 = vcmp.lt.s32.totalorder %v5615_v19, 111 }
  0xeb   : > { %9196 = vst [vmem:[#allocation17_spill] sm:$0xff] %v5987_v21 }
  0xed   : > { %1190 = vrot.lane.b32.xlu1 %v5494_v2, %s5373_s22  ;;  %1046 = vrot.lane.b32.xlu0 %v5544_v12, %s5372_s19 }
  0xee   : > { %v644_v32 = vpop.permute.xlu1 %643  ;;  %v662_v33 = vpop.permute.xlu0 %661 }
  0xef   : > { %v674_v34 = vsel %vm9177_vm13, %v5827_v39, %v662_v33  ;;  %v682_v35 = vsel %vm9177_vm13, %v662_v33, %v5827_v39  ;;  %v673_v36 = vsel %vm9177_vm13, %v644_v32, %v660_v48  ;;  %v681_v37 = vsel %vm9177_vm13, %v660_v48, %v644_v32  ;;  %1206 = vrot.lane.b32.xlu2 %v5505_v5, %s5373_s22  ;;  %v4798_v48 = vld [vmem:[%s9105_s1 + $0x38] sm:$0xff]  ;;  %v419_v32 = vld [vmem:[%s9105_s1 + $0x8] sm:$0xff] }
  0xf0   : > { %v702_v41 = vmul.f32 %v5861_v49, %v682_v35  ;;  %v703_v42 = vmul.f32 %v5864_v50, %v674_v34  ;;  %v700_v43 = vmul.f32 %v5861_v49, %v681_v37  ;;  %v701_v38 = vmul.f32 %v5864_v50, %v673_v36  ;;  %4802 = vmatmul.msk.f32.gmra.mxu0 %vm496_vm8, %v4798_v48 }
  0xf1   : > { %v5923_v39 = vpop.permute.xlu2 %805  ;;  %4806 = vmatmul.msk.f32.gmra.mxu1 %vm496_vm8, %v4798_v48  ;;  %v420_v48 = vld [vmem:[%s9105_s1 + $0x10] sm:$0xff] }
  0xf2   : > { %738 = vmatpush.msra.mxu0 %v702_v41  ;;  %767 = vmatpush.msra.mxu1 %v703_v42 }
  0xf3   : > { %4809 = vmatmul.msk.f32.vlgmr.msra.gmra.mxu2 %vm496_vm8, %v420_v48  ;;  %4813 = vmatmul.msk.f32.vlgmr.msra.gmra.mxu3 %vm496_vm8, %v420_v48 }
  0xf4   : > { %739 = vmatpush.msra.mxu0 %v700_v43  ;;  %768 = vmatpush.msra.mxu1 %v701_v38 }
  0xf5   : > { %1044 = vrot.lane.b32.xlu1 %v5559_v15, %s5372_s19  ;;  %1028 = vrot.lane.b32.xlu0 %v5550_v14, %s5372_s19 }
  0xf6   : > { %v658_v44 = vpop.permute.xlu1 %657  ;;  %v642_v45 = vpop.permute.xlu0 %641 }
  0xf7   : > { %v672_v46 = vsel %vm9177_vm13, %v642_v45, %v658_v44  ;;  %v680_v47 = vsel %vm9177_vm13, %v658_v44, %v642_v45  ;;  %1188 = vrot.lane.b32.xlu2 %v5517_v7, %s5373_s22 }
  0xf8   : > { %v698_v51 = vmul.f32 %v5861_v49, %v680_v47  ;;  %v699_v52 = vmul.f32 %v5864_v50, %v672_v46  ;;  %4807 = vmatmul.msk.f32.vlgmr.msrb.gmra.mxu0 %vm496_vm8, %v418_v57 }
  0xf9   : > { %v5944_v53 = vpop.permute.xlu2 %819  ;;  %4811 = vmatmul.msk.f32.vlgmr.msrb.gmra.mxu1 %vm496_vm8, %v418_v57 }
  0xfa   : > { %740 = vmatpush.msra.mxu0 %v698_v51  ;;  %769 = vmatpush.msra.mxu1 %v699_v52 }
  0xfd   : > { %1186 = vrot.lane.b32.xlu1 %v5520_v8, %s5373_s22  ;;  %1204 = vrot.lane.b32.xlu0 %v5514_v6, %s5373_s22 }
  0xfe   : > { %v638_v54 = vpop.permute.xlu1 %637  ;;  %v656_v55 = vpop.permute.xlu0 %655 }
  0xff   : > { %v671_v56 = vsel %vm9177_vm13, %v5880_v60, %v656_v55  ;;  %v679_v58 = vsel %vm9177_vm13, %v656_v55, %v5880_v60  ;;  %v670_v59 = vsel %vm9177_vm13, %v638_v54, %v654_v26  ;;  %v678_v61 = vsel %vm9177_vm13, %v654_v26, %v638_v54  ;;  %1202 = vrot.lane.b32.xlu2 %v5529_v9, %s5373_s22 }
 0x100   : > { %v696_v62 = vmul.f32 %v5861_v49, %v679_v58  ;;  %v697_v17 = vmul.f32 %v5864_v50, %v671_v56  ;;  %v694_v18 = vmul.f32 %v5861_v49, %v678_v61  ;;  %v695_v20 = vmul.f32 %v5864_v50, %v670_v59  ;;  %4808 = vmatmul.msk.f32.gmra.mxu0 %vm496_vm8, %v419_v32  ;;  %v4818_v58 = vld [vmem:[%s9105_s1 + $0x48] sm:$0xff] }
 0x101   : > { %v5969_v60 = vpop.permute.xlu2 %799  ;;  %4812 = vmatmul.msk.f32.gmra.mxu1 %vm496_vm8, %v419_v32 }
 0x102   : > { %741 = vmatpush.msra.mxu0 %v696_v62  ;;  %770 = vmatpush.msra.mxu1 %v697_v17 }
 0x104   : > { %742 = vmatpush.msra.mxu0 %v694_v18  ;;  %771 = vmatpush.msra.mxu1 %v695_v20 }
 0x105   : > { %1200 = vrot.lane.b32.xlu1 %v5535_v11, %s5373_s22  ;;  %1184 = vrot.lane.b32.xlu0 %v5532_v10, %s5373_s22 }
 0x106   : > { %970 = vmatpush.msrb.mxu0 %v5484_v0  ;;  %999 = vmatpush.msrb.mxu1 %v5499_v3 }
 0x107   : > { %v824_v23 = vpop.permute.xlu1 %823  ;;  %v808_v26 = vpop.permute.xlu0 %807  ;;  %1182 = vrot.lane.b32.xlu2 %v5547_v13, %s5373_s22 }
 0x108   : > { %v841_v33 = vsel %vm9176_vm14, %v824_v23, %v808_v26  ;;  %v833_v34 = vsel %vm9176_vm14, %v808_v26, %v824_v23  ;;  %1000 = vmatpush.msrb.mxu1 %v5502_v4  ;;  %971 = vmatpush.msrb.mxu0 %v5487_v1 }
 0x109   : > { %v860_v35 = vmul.f32 %v5982_v22, %v841_v33  ;;  %v861_v36 = vmul.f32 %v5987_v21, %v833_v34  ;;  %v6004_v37 = vpop.permute.xlu2 %813 }
 0x10a   : > { %1001 = vmatpush.msrb.mxu1 %v5505_v5  ;;  %972 = vmatpush.msrb.mxu0 %v5494_v2 }
 0x10b   : > { %887 = vmatpush.msrb.mxu2 %v860_v35  ;;  %916 = vmatpush.msrb.mxu3 %v861_v36 }
 0x10c   : > { %1002 = vmatpush.msrb.mxu1 %v5514_v6  ;;  %973 = vmatpush.msrb.mxu0 %v5517_v7 }
 0x10d   : > { %1180 = vrot.lane.b32.xlu1 %v5550_v14, %s5373_s22  ;;  %1198 = vrot.lane.b32.xlu0 %v5544_v12, %s5373_s22 }
 0x10e   : > { %1003 = vmatpush.msrb.mxu1 %v5529_v9  ;;  %974 = vmatpush.msrb.mxu0 %v5520_v8 }
 0x10f   : > { %v804_v40 = vpop.permute.xlu1 %803  ;;  %v822_v41 = vpop.permute.xlu0 %821  ;;  %1196 = vrot.lane.b32.xlu2 %v5559_v15, %s5373_s22 }
 0x110   : > { %v840_v42 = vsel %vm9176_vm14, %v822_v41, %v5923_v39  ;;  %v832_v43 = vsel %vm9176_vm14, %v5923_v39, %v822_v41  ;;  %v839_v45 = vsel %vm9176_vm14, %v5944_v53, %v804_v40  ;;  %v831_v46 = vsel %vm9176_vm14, %v804_v40, %v5944_v53  ;;  %v4817_v39 = vld [vmem:[%s9105_s1 + $0x40] sm:$0xff]  ;;  %1004 = vmatpush.msrb.mxu1 %v5535_v11 }
 0x111   : > { %v858_v38 = vmul.f32 %v5982_v22, %v840_v42  ;;  %v859_v44 = vmul.f32 %v5987_v21, %v832_v43  ;;  %v6034_v47 = vpop.permute.xlu2 %793  ;;  %4821 = vmatmul.msk.f32.vlgmr.msra.gmra.mxu0 %vm496_vm8, %v4817_v39  ;;  %4825 = vmatmul.msk.f32.vlgmr.msra.gmra.mxu1 %vm496_vm8, %v4817_v39  ;;  %v856_v51 = vmul.f32 %v5982_v22, %v839_v45  ;;  %v6135_v41 = vsel %vm687_vm10, 1.0, %v9116_v29 }
 0x112   : > { %v857_v52 = vmul.f32 %v5987_v21, %v831_v46  ;;  %975 = vmatpush.msrb.mxu0 %v5532_v10  ;;  %1005 = vmatpush.msrb.mxu1 %v5544_v12  ;;  %9198 = vst [vmem:[#allocation19_spill] sm:$0xff] %v6135_v41 }
 0x113   : > { %888 = vmatpush.msrb.mxu2 %v858_v38  ;;  %917 = vmatpush.msrb.mxu3 %v859_v44 }
 0x114   : > { %976 = vmatpush.msrb.mxu0 %v5547_v13  ;;  %1006 = vmatpush.msrb.mxu1 %v5559_v15 }
 0x115   : > { %1366 = vrot.lane.b32.xlu1 %v5499_v3, %s5374_s24  ;;  %1350 = vrot.lane.b32.xlu0 %v5484_v0, %s5374_s24 }
 0x116   : > { %889 = vmatpush.msrb.mxu2 %v856_v51  ;;  %918 = vmatpush.msrb.mxu3 %v857_v52  ;;  %v4843_v51 = vld [vmem:[%s9105_s1 + $0x80] sm:$0xff] }
 0x117   : > { %v818_v53 = vpop.permute.xlu1 %817  ;;  %v802_v54 = vpop.permute.xlu0 %801  ;;  %1348 = vrot.lane.b32.xlu2 %v5487_v1, %s5374_s24  ;;  %977 = vmatpush.msrb.mxu0 %v5550_v14 }
 0x118   : > { %v838_v55 = vsel %vm9176_vm14, %v818_v53, %v802_v54  ;;  %v830_v56 = vsel %vm9176_vm14, %v802_v54, %v818_v53 }
 0x119   : > { %v854_v59 = vmul.f32 %v5982_v22, %v838_v55  ;;  %v855_v61 = vmul.f32 %v5987_v21, %v830_v56  ;;  %v1059_v57 = vpop.permute.xlu2 %1058  ;;  %4822 = vmatmul.msk.f32.gmra.mxu0 %vm496_vm8, %v4818_v58  ;;  %4826 = vmatmul.msk.f32.gmra.mxu1 %vm496_vm8, %v4818_v58 }
 0x11b   : > { %890 = vmatpush.msrb.mxu2 %v854_v59  ;;  %919 = vmatpush.msrb.mxu3 %v855_v61  ;;  %v5326_v59 = vld [vmem:[%s5481_s14 + $0x68] sm:$0xff] }
 0x11d   : > { %1346 = vrot.lane.b32.xlu1 %v5494_v2, %s5374_s24  ;;  %1364 = vrot.lane.b32.xlu0 %v5502_v4, %s5374_s24  ;;  %v421_v2 = vld [vmem:[%s9105_s1 + $0x18] sm:$0xff]  ;;  %v4819_v4 = vld [vmem:[%s9105_s1 + $0x50] sm:$0xff] }
 0x11e   : > { %4810 = vmatmul.msk.f32.gmra.mxu2 %vm496_vm8, %v421_v2  ;;  %4814 = vmatmul.msk.f32.gmra.mxu3 %vm496_vm8, %v421_v2 }
 0x11f   : > { %v798_v62 = vpop.permute.xlu1 %797  ;;  %v816_v17 = vpop.permute.xlu0 %815  ;;  %1362 = vrot.lane.b32.xlu2 %v5505_v5, %s5374_s24 }
 0x120   : > { %v837_v18 = vsel %vm9176_vm14, %v816_v17, %v5969_v60  ;;  %v829_v14 = vsel %vm9176_vm14, %v5969_v60, %v816_v17  ;;  %v836_v20 = vsel %vm9176_vm14, %v6004_v37, %v798_v62  ;;  %v828_v60 = vsel %vm9176_vm14, %v798_v62, %v6004_v37  ;;  %v4845_v17 = vld [vmem:[%s9105_s1 + $0x90] sm:$0xff] }
 0x121   : > { %v852_v15 = vmul.f32 %v5982_v22, %v837_v18  ;;  %v853_v5 = vmul.f32 %v5987_v21, %v829_v14  ;;  %v6097_v23 = vpop.permute.xlu2 %1038  ;;  %4823 = vmatmul.msk.f32.gmra.mxu0 %vm496_vm8, %v4819_v4  ;;  %v850_v26 = vmul.f32 %v5982_v22, %v836_v20  ;;  %v851_v32 = vmul.f32 %v5987_v21, %v828_v60  ;;  %v4833_v20 = vld [vmem:[%s9105_s1 + $0x70] sm:$0xff]  ;;  %v5327_v60 = vld [vmem:[%s5481_s14 + $0x58] sm:$0xff] }
 0x122   : > { %4827 = vmatmul.msk.f32.gmra.mxu1 %vm496_vm8, %v4819_v4 }
 0x123   : > { %891 = vmatpush.msrb.mxu2 %v852_v15  ;;  %920 = vmatpush.msrb.mxu3 %v853_v5 }
 0x125   : > { %1360 = vrot.lane.b32.xlu1 %v5514_v6, %s5374_s24  ;;  %1344 = vrot.lane.b32.xlu0 %v5517_v7, %s5374_s24  ;;  %v4820_v6 = vld [vmem:[%s9105_s1 + $0x58] sm:$0xff] }
 0x126   : > { %892 = vmatpush.msrb.mxu2 %v850_v26  ;;  %921 = vmatpush.msrb.mxu3 %v851_v32 }
 0x127   : > { %v812_v33 = vpop.permute.xlu1 %811  ;;  %v796_v34 = vpop.permute.xlu0 %795  ;;  %1342 = vrot.lane.b32.xlu2 %v5520_v8, %s5374_s24  ;;  %v6130_v8 = vsel %vm686_vm9, 1.0, %v9116_v29 }
 0x128   : > { %v835_v35 = vsel %vm9176_vm14, %v812_v33, %v796_v34  ;;  %v827_v36 = vsel %vm9176_vm14, %v796_v34, %v812_v33  ;;  %9197 = vst [vmem:[#allocation18_spill] sm:$0xff] %v6130_v8 }
 0x129   : > { %v848_v37 = vmul.f32 %v5982_v22, %v835_v35  ;;  %v849_v7 = vmul.f32 %v5987_v21, %v827_v36  ;;  %v1053_v40 = vpop.permute.xlu2 %1052  ;;  %4824 = vmatmul.msk.f32.gmra.mxu0 %vm496_vm8, %v4820_v6  ;;  %v6231_v35 = vld [vmem:[%s5481_s14] sm:$0xff]  ;;  %v4846_v36 = vld [vmem:[%s9105_s1 + $0x98] sm:$0xff] }
 0x12a   : > { %4828 = vmatmul.msk.f32.gmra.mxu1 %vm496_vm8, %v4820_v6 }
 0x12b   : > { %893 = vmatpush.msrb.mxu2 %v848_v37  ;;  %922 = vmatpush.msrb.mxu3 %v849_v7 }
 0x12d   : > { %1502 = vrot.lane.b32.xlu1 %v5484_v0, %s5375_s13  ;;  %1358 = vrot.lane.b32.xlu0 %v5529_v9, %s5374_s24 }
 0x12f   : > { %v1043_v42 = vpop.permute.xlu1 %1042  ;;  %v810_v43 = vpop.permute.xlu0 %809  ;;  %1518 = vrot.lane.b32.xlu2 %v5499_v3, %s5375_s13 }
 0x130   : > { %v1068_v0 = vsel %vm9175_vm15, %v1043_v42, %v1059_v57  ;;  %v1076_v9 = vsel %vm9175_vm15, %v1059_v57, %v1043_v42  ;;  %v834_v38 = vsel %vm9176_vm14, %v810_v43, %v6034_v47  ;;  %v826_v44 = vsel %vm9176_vm14, %v6034_v47, %v810_v43  ;;  %v4831_v47 = vld [vmem:[%s9105_s1 + $0x60] sm:$0xff]  ;;  %v5331_v43 = vld [vmem:[%s5481_s14 + $0x8] sm:$0xff] }
 0x131   : > { %v1095_v45 = vmul.f32 %v6130_v8, %v1068_v0  ;;  %v1096_v46 = vmul.f32 %v6135_v41, %v1076_v9  ;;  %v846_v3 = vmul.f32 %v5982_v22, %v834_v38  ;;  %v847_v39 = vmul.f32 %v5987_v21, %v826_v44  ;;  %v6153_v48 = vpop.permute.xlu2 %1194  ;;  %4847 = vmatmul.msk.f32.vlgmr.msrb.gmra.mxu0 %vm496_vm8, %v4843_v51  ;;  %v5330_v42 = vld [vmem:[%s5481_s14 + $0x40] sm:$0xff] }
 0x132   : > { %4851 = vmatmul.msk.f32.vlgmr.msrb.gmra.mxu1 %vm496_vm8, %v4843_v51  ;;  %v6259_v0 = vsel %vm1231_vm11, 1.0, %v9116_v29  ;;  %v6262_v9 = vsel %vm1232_vm12, 1.0, %v9116_v29  ;;  %v5332_v51 = vld [vmem:[%s5481_s14 + $0x48] sm:$0xff]  ;;  %vm9171_vm11 = vcmp.lt.s32.totalorder %v5615_v19, 112  ;;  %vm1537_vm12 = vmand %vm9174_vm5, %vm686_vm9 }
 0x133   : > { %894 = vmatpush.msrb.mxu2 %v846_v3  ;;  %923 = vmatpush.msrb.mxu3 %v847_v39  ;;  %9199 = vst [vmem:[#allocation20_spill] sm:$0xff] %v6259_v0 }
 0x134   : > { %4835 = vmatmul.msk.f32.vlgmr.msrb.gmra.mxu2 %vm496_vm8, %v4831_v47  ;;  %4839 = vmatmul.msk.f32.vlgmr.msrb.gmra.mxu3 %vm496_vm8, %v4831_v47  ;;  %9200 = vst [vmem:[#allocation21_spill] sm:$0xff] %v6262_v9 }
 0x135   : > { %1122 = vmatpush.msra.mxu2 %v1095_v45  ;;  %1151 = vmatpush.msra.mxu3 %v1096_v46 }
 0x136   : > { %1356 = vrot.lane.b32.xlu1 %v5535_v11, %s5374_s24  ;;  %1340 = vrot.lane.b32.xlu0 %v5532_v10, %s5374_s24  ;;  %v4844_v10 = vld [vmem:[%s9105_s1 + $0x88] sm:$0xff] }
 0x137   : > { %v1057_v52 = vpop.permute.xlu1 %1056  ;;  %v1041_v53 = vpop.permute.xlu0 %1040  ;;  %1500 = vrot.lane.b32.xlu2 %v5487_v1, %s5375_s13  ;;  %v4832_v1 = vld [vmem:[%s9105_s1 + $0x68] sm:$0xff] }
 0x138   : > { %v1067_v54 = vsel %vm9175_vm15, %v1041_v53, %v1057_v52  ;;  %v1075_v11 = vsel %vm9175_vm15, %v1057_v52, %v1041_v53 }
 0x139   : > { %v1093_v55 = vmul.f32 %v6130_v8, %v1067_v54  ;;  %v1094_v56 = vmul.f32 %v6135_v41, %v1075_v11  ;;  %v6180_v58 = vpop.permute.xlu2 %1048  ;;  %4848 = vmatmul.msk.f32.gmra.mxu0 %vm496_vm8, %v4844_v10  ;;  %v5333_v11 = vld [vmem:[%s5481_s14 + $0x38] sm:$0xff] }
 0x13a   : > { %4852 = vmatmul.msk.f32.gmra.mxu1 %vm496_vm8, %v4844_v10  ;;  %v5334_v10 = vld [vmem:[%s5481_s14 + $0x30] sm:$0xff] }
 0x13b   : > { %1123 = vmatpush.msra.mxu2 %v1093_v55  ;;  %1152 = vmatpush.msra.mxu3 %v1094_v56 }
 0x13c   : > { %4836 = vmatmul.msk.f32.gmra.mxu2 %vm496_vm8, %v4832_v1  ;;  %4840 = vmatmul.msk.f32.gmra.mxu3 %vm496_vm8, %v4832_v1 }
 0x13e   : > { %1338 = vrot.lane.b32.xlu1 %v5547_v13, %s5374_s24  ;;  %1516 = vrot.lane.b32.xlu0 %v5326_v59, %s5375_s13  ;;  %v5335_v59 = vld [vmem:[%s5481_s14 + $0x20] sm:$0xff] }
 0x13f   : > { %v1037_v61 = vpop.permute.xlu1 %1036  ;;  %v1055_v57 = vpop.permute.xlu0 %1054  ;;  %1354 = vrot.lane.b32.xlu2 %v5544_v12, %s5374_s24 }
 0x140   : > { %v1066_v62 = vsel %vm9175_vm15, %v6097_v23, %v1055_v57  ;;  %v1074_v13 = vsel %vm9175_vm15, %v1055_v57, %v6097_v23  ;;  %v1065_v18 = vsel %vm9175_vm15, %v1037_v61, %v1053_v40  ;;  %v1073_v12 = vsel %vm9175_vm15, %v1053_v40, %v1037_v61  ;;  %v5328_v23 = vld [vmem:[%s5481_s14 + $0x50] sm:$0xff]  ;;  %v4834_v40 = vld [vmem:[%s9105_s1 + $0x78] sm:$0xff] }
 0x141   : > { %v1091_v14 = vmul.f32 %v6130_v8, %v1066_v62  ;;  %v1092_v2 = vmul.f32 %v6135_v41, %v1074_v13  ;;  %v6210_v4 = vpop.permute.xlu2 %1030  ;;  %4849 = vmatmul.msk.f32.gmra.mxu0 %vm496_vm8, %v4845_v17  ;;  %v1089_v15 = vmul.f32 %v6130_v8, %v1065_v18  ;;  %v1090_v5 = vmul.f32 %v6135_v41, %v1073_v12  ;;  %v5336_v13 = vld [vmem:[%s5481_s14 + $0x10] sm:$0xff] }
 0x142   : > { %4853 = vmatmul.msk.f32.gmra.mxu1 %vm496_vm8, %v4845_v17  ;;  %v5337_v17 = vld [vmem:[%s5481_s14 + $0x28] sm:$0xff] }
 0x143   : > { %1124 = vmatpush.msra.mxu2 %v1091_v14  ;;  %1153 = vmatpush.msra.mxu3 %v1092_v2 }
 0x144   : > { %4837 = vmatmul.msk.f32.gmra.mxu2 %vm496_vm8, %v4833_v20  ;;  %4841 = vmatmul.msk.f32.gmra.mxu3 %vm496_vm8, %v4833_v20  ;;  %v5338_v20 = vld [vmem:[%s5481_s14 + $0x18] sm:$0xff]  ;;  %s5381_s14 = smov 49  }
 0x145   : > { %1125 = vmatpush.msra.mxu2 %v1089_v15  ;;  %1154 = vmatpush.msra.mxu3 %v1090_v5 }
 0x146   : > { %1514 = vrot.lane.b32.xlu1 %v5327_v60, %s5375_s13  ;;  %1498 = vrot.lane.b32.xlu0 %v5328_v23, %s5375_s13 }
 0x147   : > { %v1051_v26 = vpop.permute.xlu1 %1050  ;;  %v1035_v32 = vpop.permute.xlu0 %1034  ;;  %1336 = vrot.lane.b32.xlu2 %v6231_v35, %s5374_s24 }
 0x148   : > { %v1064_v33 = vsel %vm9175_vm15, %v1035_v32, %v1051_v26  ;;  %v1072_v34 = vsel %vm9175_vm15, %v1051_v26, %v1035_v32 }
 0x149   : > { %v1087_v6 = vmul.f32 %v6130_v8, %v1064_v33  ;;  %v1088_v37 = vmul.f32 %v6135_v41, %v1072_v34  ;;  %v1207_v7 = vpop.permute.xlu2 %1206  ;;  %4850 = vmatmul.msk.f32.gmra.mxu0 %vm496_vm8, %v4846_v36 }
 0x14a   : > { %4854 = vmatmul.msk.f32.gmra.mxu1 %vm496_vm8, %v4846_v36 }
 0x14b   : > { %1126 = vmatpush.msra.mxu2 %v1087_v6  ;;  %1155 = vmatpush.msra.mxu3 %v1088_v37 }
 0x14c   : > { %4838 = vmatmul.msk.f32.gmra.mxu2 %vm496_vm8, %v4834_v40  ;;  %4842 = vmatmul.msk.f32.gmra.mxu3 %vm496_vm8, %v4834_v40  ;;  %v4857_v40 = vld [vmem:[%s9105_s1 + $0xa0] sm:$0xff] }
 0x14e   : > { %1496 = vrot.lane.b32.xlu1 %v5330_v42, %s5375_s13  ;;  %1352 = vrot.lane.b32.xlu0 %v5331_v43, %s5374_s24 }
 0x14f   : > { %v1033_v38 = vpop.permute.xlu1 %1032  ;;  %v1211_v44 = vpop.permute.xlu0 %1210  ;;  %1512 = vrot.lane.b32.xlu2 %v5332_v51, %s5375_s13  ;;  %v4858_v51 = vld [vmem:[%s9105_s1 + $0xa8] sm:$0xff] }
 0x150   : > { %v1220_v45 = vsel %vm9172_vm1, %v6153_v48, %v1211_v44  ;;  %v1228_v46 = vsel %vm9172_vm1, %v1211_v44, %v6153_v48  ;;  %v1063_v3 = vsel %vm9175_vm15, %v1033_v38, %v6180_v58  ;;  %v1071_v39 = vsel %vm9175_vm15, %v6180_v58, %v1033_v38 }
 0x151   : > { %v1251_v47 = vmul.f32 %v6259_v0, %v1220_v45  ;;  %v1252_v52 = vmul.f32 %v6262_v9, %v1228_v46  ;;  %v1085_v53 = vmul.f32 %v6130_v8, %v1063_v3  ;;  %v1086_v48 = vmul.f32 %v6135_v41, %v1071_v39  ;;  %v1189_v54 = vpop.permute.xlu2 %1188 }
 0x153   : > { %1127 = vmatpush.msra.mxu2 %v1085_v53  ;;  %1156 = vmatpush.msra.mxu3 %v1086_v48 }
 0x154   : > { %1278 = vmatpush.msra.mxu0 %v1251_v47  ;;  %1307 = vmatpush.msra.mxu1 %v1252_v52 }
 0x156   : > { %1510 = vrot.lane.b32.xlu1 %v5333_v11, %s5375_s13  ;;  %1494 = vrot.lane.b32.xlu0 %v5334_v10, %s5375_s13 }
 0x157   : > { %v1209_v55 = vpop.permute.xlu1 %1208  ;;  %v1193_v56 = vpop.permute.xlu0 %1192  ;;  %1492 = vrot.lane.b32.xlu2 %v5335_v59, %s5375_s13 }
 0x158   : > { %v1219_v58 = vsel %vm9172_vm1, %v1193_v56, %v1209_v55  ;;  %v1227_v1 = vsel %vm9172_vm1, %v1209_v55, %v1193_v56 }
 0x159   : > { %v1249_v61 = vmul.f32 %v6259_v0, %v1219_v58  ;;  %v1250_v57 = vmul.f32 %v6262_v9, %v1227_v1  ;;  %v1203_v62 = vpop.permute.xlu2 %1202  ;;  %v4859_v58 = vld [vmem:[%s9105_s1 + $0xb0] sm:$0xff] }
 0x15b   : > { %1279 = vmatpush.msra.mxu0 %v1249_v61  ;;  %1308 = vmatpush.msra.mxu1 %v1250_v57 }
 0x15e   : > { %1490 = vrot.lane.b32.xlu1 %v5336_v13, %s5375_s13  ;;  %1508 = vrot.lane.b32.xlu0 %v5337_v17, %s5375_s13 }
 0x15f   : > { %v1191_v18 = vpop.permute.xlu1 %1190  ;;  %v1047_v12 = vpop.permute.xlu0 %1046  ;;  %1506 = vrot.lane.b32.xlu2 %v5338_v20, %s5375_s13  ;;  %v6385_v20 = vsel %vm9174_vm5, 1.0, %v9116_v29 }
 0x160   : > { %v1062_v14 = vsel %vm9175_vm15, %v6210_v4, %v1047_v12  ;;  %v1070_v2 = vsel %vm9175_vm15, %v1047_v12, %v6210_v4  ;;  %v1218_v15 = vsel %vm9172_vm1, %v1191_v18, %v1207_v7  ;;  %v1226_v5 = vsel %vm9172_vm1, %v1207_v7, %v1191_v18  ;;  %9201 = vst [vmem:[#allocation22_spill] sm:$0xff] %v6385_v20 }
 0x161   : > { %v1083_v60 = vmul.f32 %v6130_v8, %v1062_v14  ;;  %v1084_v23 = vmul.f32 %v6135_v41, %v1070_v2  ;;  %v1247_v26 = vmul.f32 %v6259_v0, %v1218_v15  ;;  %v1248_v32 = vmul.f32 %v6262_v9, %v1226_v5  ;;  %v1183_v33 = vpop.permute.xlu2 %1182  ;;  %v4860_v14 = vld [vmem:[%s9105_s1 + $0xb8] sm:$0xff]  ;;  %v4871_v5 = vld [vmem:[%s9105_s1 + $0xc0] sm:$0xff] }
 0x163   : > { %1128 = vmatpush.msra.mxu2 %v1083_v60  ;;  %1157 = vmatpush.msra.mxu3 %v1084_v23  ;;  %v6390_v60 = vsel %vm9173_vm6, 1.0, %v9116_v29 }
 0x164   : > { %1280 = vmatpush.msra.mxu0 %v1247_v26  ;;  %1309 = vmatpush.msra.mxu1 %v1248_v32  ;;  %9202 = vst [vmem:[#allocation23_spill] sm:$0xff] %v6390_v60 }
 0x166   : > { %1504 = vrot.lane.b32.xlu1 %v5331_v43, %s5375_s13  ;;  %1488 = vrot.lane.b32.xlu0 %v6231_v35, %s5375_s13 }
 0x167   : > { %v1045_v4 = vpop.permute.xlu1 %1044  ;;  %v1029_v34 = vpop.permute.xlu0 %1028 }
 0x168   : > { %v1061_v36 = vsel %vm9175_vm15, %v1029_v34, %v1045_v4  ;;  %v1069_v6 = vsel %vm9175_vm15, %v1045_v4, %v1029_v34 }
 0x169   : > { %v1081_v37 = vmul.f32 %v6130_v8, %v1061_v36  ;;  %v1082_v7 = vmul.f32 %v6135_v41, %v1069_v6  ;;  %v1197_v42 = vpop.permute.xlu2 %1196  ;;  %v4872_v6 = vld [vmem:[%s9105_s1 + $0xc8] sm:$0xff] }
 0x16b   : > { %1129 = vmatpush.msra.mxu2 %v1081_v37  ;;  %1158 = vmatpush.msra.mxu3 %v1082_v7 }
 0x16c   : > { %4861 = vmatmul.msk.f32.vlgmr.msra.gmra.mxu2 %vm496_vm8, %v4857_v40  ;;  %4865 = vmatmul.msk.f32.vlgmr.msra.gmra.mxu3 %vm496_vm8, %v4857_v40 }
 0x16f   : > { %v1187_v35 = vpop.permute.xlu1 %1186  ;;  %v1205_v43 = vpop.permute.xlu0 %1204 }
 0x170   : > { %v1217_v38 = vsel %vm9172_vm1, %v1189_v54, %v1205_v43  ;;  %v1225_v44 = vsel %vm9172_vm1, %v1205_v43, %v1189_v54  ;;  %v1216_v45 = vsel %vm9172_vm1, %v1187_v35, %v1203_v62  ;;  %v1224_v46 = vsel %vm9172_vm1, %v1203_v62, %v1187_v35 }
 0x171   : > { %v1245_v3 = vmul.f32 %v6259_v0, %v1217_v38  ;;  %v1246_v39 = vmul.f32 %v6262_v9, %v1225_v44  ;;  %v1243_v47 = vmul.f32 %v6259_v0, %v1216_v45  ;;  %v1244_v52 = vmul.f32 %v6262_v9, %v1224_v46  ;;  %v1349_v53 = vpop.permute.xlu2 %1348 }
 0x173   : > { %1281 = vmatpush.msra.mxu0 %v1245_v3  ;;  %1310 = vmatpush.msra.mxu1 %v1246_v39  ;;  %v4873_v39 = vld [vmem:[%s9105_s1 + $0xd0] sm:$0xff] }
 0x174   : > { %4862 = vmatmul.msk.f32.gmra.mxu2 %vm496_vm8, %v4858_v51  ;;  %4866 = vmatmul.msk.f32.gmra.mxu3 %vm496_vm8, %v4858_v51 }
 0x175   : > { %1282 = vmatpush.msra.mxu0 %v1243_v47  ;;  %1311 = vmatpush.msra.mxu1 %v1244_v52 }
 0x177   : > { %v1201_v48 = vpop.permute.xlu1 %1200  ;;  %v1185_v54 = vpop.permute.xlu0 %1184 }
 0x178   : > { %v1215_v11 = vsel %vm9172_vm1, %v1185_v54, %v1201_v48  ;;  %v1223_v10 = vsel %vm9172_vm1, %v1201_v48, %v1185_v54 }
 0x179   : > { %v1241_v55 = vmul.f32 %v6259_v0, %v1215_v11  ;;  %v1242_v56 = vmul.f32 %v6262_v9, %v1223_v10  ;;  %v1363_v1 = vpop.permute.xlu2 %1362  ;;  %v4874_v11 = vld [vmem:[%s9105_s1 + $0xd8] sm:$0xff] }
 0x17b   : > { %1283 = vmatpush.msra.mxu0 %v1241_v55  ;;  %1312 = vmatpush.msra.mxu1 %v1242_v56  ;;  %v6441_v55 = vsel %vm1537_vm12, 1.0, %v9116_v29  ;;  %v6444_v56 = vsel %vm1538_vm0, 1.0, %v9116_v29  ;;  %vm1755_vm0 = vcmask 261120   ;;  %vm2807_vm12 = vcmask 1041408  }
 0x17c   : > { %4863 = vmatmul.msk.f32.gmra.mxu2 %vm496_vm8, %v4859_v58  ;;  %4867 = vmatmul.msk.f32.gmra.mxu3 %vm496_vm8, %v4859_v58  ;;  %9203 = vst [vmem:[#allocation24_spill] sm:$0xff] %v6441_v55 }
 0x17d   : > { %9204 = vst [vmem:[#allocation25_spill] sm:$0xff] %v6444_v56 }
 0x17f   : > { %v1181_v59 = vpop.permute.xlu1 %1180  ;;  %v1199_v61 = vpop.permute.xlu0 %1198 }
 0x180   : > { %v1214_v57 = vsel %vm9172_vm1, %v1183_v33, %v1199_v61  ;;  %v1222_v62 = vsel %vm9172_vm1, %v1199_v61, %v1183_v33  ;;  %v1213_v13 = vsel %vm9172_vm1, %v1181_v59, %v1197_v42  ;;  %v1221_v17 = vsel %vm9172_vm1, %v1197_v42, %v1181_v59 }
 0x181   : > { %v1239_v18 = vmul.f32 %v6259_v0, %v1214_v57  ;;  %v1240_v12 = vmul.f32 %v6262_v9, %v1222_v62  ;;  %v1237_v2 = vmul.f32 %v6259_v0, %v1213_v13  ;;  %v1238_v15 = vmul.f32 %v6262_v9, %v1221_v17  ;;  %v1343_v4 = vpop.permute.xlu2 %1342 }
 0x183   : > { %1284 = vmatpush.msra.mxu0 %v1239_v18  ;;  %1313 = vmatpush.msra.mxu1 %v1240_v12 }
 0x184   : > { %4864 = vmatmul.msk.f32.gmra.mxu2 %vm496_vm8, %v4860_v14  ;;  %4868 = vmatmul.msk.f32.gmra.mxu3 %vm496_vm8, %v4860_v14 }
 0x185   : > { %1285 = vmatpush.msra.mxu0 %v1237_v2  ;;  %1314 = vmatpush.msra.mxu1 %v1238_v15 }
 0x186   : > { %4875 = vmatmul.msk.f32.vlgmr.msra.gmra.mxu0 %vm496_vm8, %v4871_v5  ;;  %4879 = vmatmul.msk.f32.vlgmr.msra.gmra.mxu1 %vm496_vm8, %v4871_v5  ;;  %v6458_v5 = vpop.f32.mrf.mxu0 }
 0x187   : > { %v1367_v23 = vpop.permute.xlu1 %1366  ;;  %v1351_v26 = vpop.permute.xlu0 %1350 }
 0x188   : > { %v1376_v32 = vsel %vm9171_vm11, %v1351_v26, %v1367_v23  ;;  %v1384_v33 = vsel %vm9171_vm11, %v1367_v23, %v1351_v26  ;;  %v6460_v23 = vpop.f32.mrf.mxu1 }
 0x189   : > { %v1403_v34 = vmul.f32 %v6385_v20, %v1376_v32  ;;  %v1404_v36 = vmul.f32 %v6390_v60, %v1384_v33  ;;  %v1519_v45 = vpop.permute.xlu2 %1518 }
 0x18b   : > { %1430 = vmatpush.msrb.mxu2 %v1403_v34  ;;  %1459 = vmatpush.msrb.mxu3 %v1404_v36 }
 0x18e   : > { %4876 = vmatmul.msk.f32.gmra.mxu0 %vm496_vm8, %v4872_v6  ;;  %4880 = vmatmul.msk.f32.gmra.mxu1 %vm496_vm8, %v4872_v6 }
 0x18f   : > { %v1347_v37 = vpop.permute.xlu1 %1346  ;;  %v1365_v7 = vpop.permute.xlu0 %1364 }
 0x190   : > { %v1375_v40 = vsel %vm9171_vm11, %v1349_v53, %v1365_v7  ;;  %v1383_v42 = vsel %vm9171_vm11, %v1365_v7, %v1349_v53  ;;  %v1374_v35 = vsel %vm9171_vm11, %v1347_v37, %v1363_v1  ;;  %v1382_v43 = vsel %vm9171_vm11, %v1363_v1, %v1347_v37 }
 0x191   : > { %v1401_v38 = vmul.f32 %v6385_v20, %v1375_v40  ;;  %v1402_v44 = vmul.f32 %v6390_v60, %v1383_v42  ;;  %v1399_v46 = vmul.f32 %v6385_v20, %v1374_v35  ;;  %v1400_v3 = vmul.f32 %v6390_v60, %v1382_v43  ;;  %v1501_v10 = vpop.permute.xlu2 %1500 }
 0x193   : > { %1431 = vmatpush.msrb.mxu2 %v1401_v38  ;;  %1460 = vmatpush.msrb.mxu3 %v1402_v44 }
 0x195   : > { %1432 = vmatpush.msrb.mxu2 %v1399_v46  ;;  %1461 = vmatpush.msrb.mxu3 %v1400_v3  ;;  %v6482_v46 = vpop.f32.mrf.mxu1 }
 0x196   : > { %4877 = vmatmul.msk.f32.gmra.mxu0 %vm496_vm8, %v4873_v39  ;;  %4881 = vmatmul.msk.f32.gmra.mxu1 %vm496_vm8, %v4873_v39 }
 0x197   : > { %v1361_v51 = vpop.permute.xlu1 %1360  ;;  %v1345_v47 = vpop.permute.xlu0 %1344 }
 0x198   : > { %v1373_v52 = vsel %vm9171_vm11, %v1345_v47, %v1361_v51  ;;  %v1381_v53 = vsel %vm9171_vm11, %v1361_v51, %v1345_v47 }
 0x199   : > { %v1397_v48 = vmul.f32 %v6385_v20, %v1373_v52  ;;  %v1398_v54 = vmul.f32 %v6390_v60, %v1381_v53  ;;  %v1355_v14 = vpop.permute.xlu2 %1354 }
 0x19b   : > { %1433 = vmatpush.msrb.mxu2 %v1397_v48  ;;  %1462 = vmatpush.msrb.mxu3 %v1398_v54 }
 0x19e   : > { %4878 = vmatmul.msk.f32.gmra.mxu0 %vm496_vm8, %v4874_v11  ;;  %4882 = vmatmul.msk.f32.gmra.mxu1 %vm496_vm8, %v4874_v11  ;;  %v6492_v11 = vpop.f32.mrf.mxu1 }
 0x19f   : > { %v1503_v58 = vpop.permute.xlu1 %1502  ;;  %v1359_v1 = vpop.permute.xlu0 %1358 }
 0x1a0   : > { %v1372_v59 = vsel %vm9171_vm11, %v1343_v4, %v1359_v1  ;;  %v1380_v61 = vsel %vm9171_vm11, %v1359_v1, %v1343_v4  ;;  %v1528_v57 = vsel %vm9170_vm4, %v1503_v58, %v1519_v45  ;;  %v1536_v62 = vsel %vm9170_vm4, %v1519_v45, %v1503_v58  ;;  %v6480_v45 = vpop.f32.mrf.mxu0 }
 0x1a1   : > { %v1557_v13 = vmul.f32 %v6441_v55, %v1528_v57  ;;  %v1558_v17 = vmul.f32 %v6444_v56, %v1536_v62  ;;  %v1395_v18 = vmul.f32 %v6385_v20, %v1372_v59  ;;  %v1396_v12 = vmul.f32 %v6390_v60, %v1380_v61  ;;  %v1337_v42 = vpop.permute.xlu2 %1336 }
 0x1a3   : > { %1434 = vmatpush.msrb.mxu2 %v1395_v18  ;;  %1463 = vmatpush.msrb.mxu3 %v1396_v12  ;;  %v4885_v12 = vld [vmem:[%s9105_s1 + $0xe0] sm:$0xff] }
 0x1a4   : > { %1584 = vmatpush.msrb.mxu0 %v1557_v13  ;;  %1613 = vmatpush.msrb.mxu1 %v1558_v17 }
 0x1a8   : > { %v1357_v2 = vpop.permute.xlu1 %1356  ;;  %v1341_v15 = vpop.permute.xlu0 %1340 }
 0x1a9   : > { %v1371_v26 = vsel %vm9171_vm11, %v1341_v15, %v1357_v2  ;;  %v1379_v32 = vsel %vm9171_vm11, %v1357_v2, %v1341_v15  ;;  %v1513_v48 = vpop.permute.xlu2 %1512  ;;  %v6490_v54 = vpop.f32.mrf.mxu0 }
 0x1aa   : > { %v1393_v33 = vmul.f32 %v6385_v20, %v1371_v26  ;;  %v1394_v4 = vmul.f32 %v6390_v60, %v1379_v32  ;;  %v6513_v15 = vpop.f32.mrf.mxu1 }
 0x1ac   : > { %1435 = vmatpush.msrb.mxu2 %v1393_v33  ;;  %1464 = vmatpush.msrb.mxu3 %v1394_v4 }
 0x1b0   : > { %v1339_v34 = vpop.permute.xlu1 %1338  ;;  %v1517_v36 = vpop.permute.xlu0 %1516 }
 0x1b1   : > { %v1527_v6 = vsel %vm9170_vm4, %v1501_v10, %v1517_v36  ;;  %v1535_v37 = vsel %vm9170_vm4, %v1517_v36, %v1501_v10  ;;  %v1370_v7 = vsel %vm9171_vm11, %v1339_v34, %v1355_v14  ;;  %v1378_v40 = vsel %vm9171_vm11, %v1355_v14, %v1339_v34  ;;  %v1493_v14 = vpop.permute.xlu2 %1492  ;;  %v6511_v2 = vpop.f32.mrf.mxu0 }
 0x1b2   : > { %v1391_v35 = vmul.f32 %v6385_v20, %v1370_v7  ;;  %v1392_v43 = vmul.f32 %v6390_v60, %v1378_v40  ;;  %v1555_v38 = vmul.f32 %v6441_v55, %v1527_v6  ;;  %v1556_v44 = vmul.f32 %v6444_v56, %v1535_v37  ;;  %v4886_v6 = vld [vmem:[%s9105_s1 + $0xe8] sm:$0xff] }
 0x1b4   : > { %1436 = vmatpush.msrb.mxu2 %v1391_v35  ;;  %1465 = vmatpush.msrb.mxu3 %v1392_v43 }
 0x1b5   : > { %1585 = vmatpush.msrb.mxu0 %v1555_v38  ;;  %1614 = vmatpush.msrb.mxu1 %v1556_v44  ;;  %v6532_v38 = vpop.f32.mrf.mxu1 }
 0x1b6   : > { %v626_v8 = vadd.f32 %v6532_v38, %v6460_v23 }
 0x1b8   : > { %v1515_v3 = vpop.permute.xlu1 %1514  ;;  %v1499_v39 = vpop.permute.xlu0 %1498 }
 0x1b9   : > { %v1526_v51 = vsel %vm9170_vm4, %v1499_v39, %v1515_v3  ;;  %v1534_v47 = vsel %vm9170_vm4, %v1515_v3, %v1499_v39  ;;  %v1507_v37 = vpop.permute.xlu2 %1506 }
 0x1ba   : > { %v1553_v52 = vmul.f32 %v6441_v55, %v1526_v51  ;;  %v1554_v53 = vmul.f32 %v6444_v56, %v1534_v47  ;;  %v4887_v47 = vld [vmem:[%s9105_s1 + $0xf0] sm:$0xff] }
 0x1bc   : > { %1586 = vmatpush.msrb.mxu0 %v1553_v52  ;;  %1615 = vmatpush.msrb.mxu1 %v1554_v53 }
 0x1c0   : > { %v1497_v10 = vpop.permute.xlu1 %1496  ;;  %v1353_v58 = vpop.permute.xlu0 %1352 }
 0x1c1   : > { %v1369_v1 = vsel %vm9171_vm11, %v1337_v42, %v1353_v58  ;;  %v1377_v59 = vsel %vm9171_vm11, %v1353_v58, %v1337_v42  ;;  %v1525_v61 = vsel %vm9170_vm4, %v1497_v10, %v1513_v48  ;;  %v1533_v57 = vsel %vm9170_vm4, %v1513_v48, %v1497_v10  ;;  %v6526_v42 = vpop.f32.mrf.mxu0  ;;  %v1643_v10 = vld [vmem:[%s9106_s2 + $0x8] sm:$0xff]  ;;  %v1645_v58 = vld [vmem:[%s9106_s2 + $0x18] sm:$0xff] }
 0x1c2   : > { %v1389_v62 = vmul.f32 %v6385_v20, %v1369_v1  ;;  %v1390_v13 = vmul.f32 %v6390_v60, %v1377_v59  ;;  %v1551_v17 = vmul.f32 %v6441_v55, %v1525_v61  ;;  %v1552_v18 = vmul.f32 %v6444_v56, %v1533_v57 }
 0x1c3   : > { %v5376_v48 = vmov 0   ;;  %v597_v41 = vadd.f32 %v6526_v42, %v6458_v5 }
 0x1c4   : > { %1437 = vmatpush.msrb.mxu2 %v1389_v62  ;;  %1466 = vmatpush.msrb.mxu3 %v1390_v13  ;;  %v1644_v62 = vld [vmem:[%s9106_s2 + $0x10] sm:$0xff] }
 0x1c5   : > { %1587 = vmatpush.msrb.mxu0 %v1551_v17  ;;  %1616 = vmatpush.msrb.mxu1 %v1552_v18  ;;  %v4899_v18 = vld [vmem:[%s9105_s1 + $0x100] sm:$0xff] }
 0x1c6   : > { %4889 = vmatmul.msk.f32.vlgmr.msrb.gmra.mxu2 %vm496_vm8, %v4885_v12  ;;  %4893 = vmatmul.msk.f32.vlgmr.msrb.gmra.mxu3 %vm496_vm8, %v4885_v12 }
 0x1c7   : > { %5297 = vset.pattern.permute.xlu1 %v5376_v48  ;;  %5295 = vset.pattern.permute.xlu2 %v5376_v48 }
 0x1c8   : > { %v1511_v26 = vpop.permute.xlu1 %1510  ;;  %v1495_v32 = vpop.permute.xlu0 %1494  ;;  %1653 = vperm.xlu1 %5297, %v1643_v10   ;;  %1663 = vperm.xlu2 %5295, %v1645_v58  }
 0x1c9   : > { %v1524_v33 = vsel %vm9170_vm4, %v1495_v32, %v1511_v26  ;;  %v1532_v4 = vsel %vm9170_vm4, %v1511_v26, %v1495_v32  ;;  %5296 = vset.pattern.permute.xlu0 %v5376_v48  ;;  %v6565_v12 = vpop.f32.mrf.mxu0  ;;  %v6570_v26 = vpop.f32.mrf.mxu1  ;;  %v1642_v32 = vld [vmem:[%s9106_s2] sm:$0xff] }
 0x1ca   : > { %v1549_v34 = vmul.f32 %v6441_v55, %v1524_v33  ;;  %v1550_v36 = vmul.f32 %v6444_v56, %v1532_v4  ;;  %1658 = vperm.xlu0 %5296, %v1644_v62   ;;  %v4900_v33 = vld [vmem:[%s9105_s1 + $0x108] sm:$0xff]  ;;  %v600_v27 = vadd.f32 %v6565_v12, %v6480_v45  ;;  %v629_v50 = vadd.f32 %v6570_v26, %v6482_v46 }
 0x1cc   : > { %1588 = vmatpush.msrb.mxu0 %v1549_v34  ;;  %1617 = vmatpush.msrb.mxu1 %v1550_v36  ;;  %v4901_v36 = vld [vmem:[%s9105_s1 + $0x110] sm:$0xff] }
 0x1ce   : > { %4890 = vmatmul.msk.f32.gmra.mxu2 %vm496_vm8, %v4886_v6  ;;  %4894 = vmatmul.msk.f32.gmra.mxu3 %vm496_vm8, %v4886_v6  ;;  %v602_v6 = vpop.f32.mrf.mxu2 }
 0x1cf   : > { %v603_v45 = vadd.f32 %v602_v6, %v6490_v54 }
 0x1d0   : > { %v1491_v7 = vpop.permute.xlu1 %1490  ;;  %v1509_v40 = vpop.permute.xlu0 %1508  ;;  %1648 = vperm.xlu2 %5295, %v1642_v32  }
 0x1d1   : > { %v1523_v35 = vsel %vm9170_vm4, %v1493_v14, %v1509_v40  ;;  %v1531_v43 = vsel %vm9170_vm4, %v1509_v40, %v1493_v14  ;;  %v1522_v44 = vsel %vm9170_vm4, %v1491_v7, %v1507_v37  ;;  %v1530_v3 = vsel %vm9170_vm4, %v1507_v37, %v1491_v7  ;;  %v4888_v14 = vld [vmem:[%s9105_s1 + $0xf8] sm:$0xff]  ;;  %v744_v4 = vpop.f32.mrf.mxu0  ;;  %v773_v34 = vpop.f32.mrf.mxu1 }
 0x1d2   : > { %v1547_v39 = vmul.f32 %v6441_v55, %v1523_v35  ;;  %v1548_v51 = vmul.f32 %v6444_v56, %v1531_v43  ;;  %v1545_v52 = vmul.f32 %v6441_v55, %v1522_v44  ;;  %v1546_v53 = vmul.f32 %v6444_v56, %v1530_v3  ;;  %v631_v7 = vpop.f32.mrf.mxu3  ;;  %v4902_v35 = vld [vmem:[%s9105_s1 + $0x118] sm:$0xff] }
 0x1d3   : > { %v785_v22 = vadd.f32 %v744_v4, %v597_v41  ;;  %v786_v28 = vadd.f32 %v773_v34, %v626_v8  ;;  %v632_v46 = vadd.f32 %v631_v7, %v6492_v11 }
 0x1d4   : > { %1589 = vmatpush.msrb.mxu0 %v1547_v39  ;;  %1618 = vmatpush.msrb.mxu1 %v1548_v51 }
 0x1d6   : > { %4891 = vmatmul.msk.f32.gmra.mxu2 %vm496_vm8, %v4887_v47  ;;  %4895 = vmatmul.msk.f32.gmra.mxu3 %vm496_vm8, %v4887_v47  ;;  %v6594_v43 = vpop.f32.mrf.mxu2 }
 0x1d7   : > { %1590 = vmatpush.msrb.mxu0 %v1545_v52  ;;  %1619 = vmatpush.msrb.mxu1 %v1546_v53 }
 0x1d8   : > { %v1505_v1 = vpop.permute.xlu1 %1504  ;;  %v1489_v59 = vpop.permute.xlu0 %1488 }
 0x1d9   : > { %v1521_v61 = vsel %vm9170_vm4, %v1489_v59, %v1505_v1  ;;  %v1529_v57 = vsel %vm9170_vm4, %v1505_v1, %v1489_v59  ;;  %v747_v37 = vpop.f32.mrf.mxu0  ;;  %v776_v40 = vpop.f32.mrf.mxu1 }
 0x1da   : > { %v1543_v13 = vmul.f32 %v6441_v55, %v1521_v61  ;;  %v1544_v17 = vmul.f32 %v6444_v56, %v1529_v57  ;;  %v6598_v3 = vpop.f32.mrf.mxu3  ;;  %v787_v19 = vadd.f32 %v747_v37, %v600_v27 }
 0x1db   : > { %v635_v7 = vadd.f32 %v6598_v3, %v6513_v15 }
 0x1dc   : > { %1591 = vmatpush.msrb.mxu0 %v1543_v13  ;;  %1620 = vmatpush.msrb.mxu1 %v1544_v17 }
 0x1dd   : > { %4903 = vmatmul.msk.f32.vlgmr.msrb.gmra.mxu0 %vm496_vm8, %v4899_v18  ;;  %4907 = vmatmul.msk.f32.vlgmr.msrb.gmra.mxu1 %vm496_vm8, %v4899_v18 }
 0x1de   : > { %4892 = vmatmul.msk.f32.gmra.mxu2 %vm496_vm8, %v4888_v14  ;;  %4896 = vmatmul.msk.f32.gmra.mxu3 %vm496_vm8, %v4888_v14  ;;  %v896_v51 = vpop.f32.mrf.mxu2 }
 0x1df   : > { %v937_v49 = vadd.f32 %v896_v51, %v785_v22 }
 0x1e1   : > { %v6596_v44 = vpop.f32.mrf.mxu0  ;;  %v6600_v39 = vpop.f32.mrf.mxu1 }
 0x1e2   : > { %v925_v52 = vpop.f32.mrf.mxu3  ;;  %v790_v27 = vadd.f32 %v6600_v39, %v632_v46 }
 0x1e3   : > { %v938_v31 = vadd.f32 %v925_v52, %v786_v28 }
 0x1e5   : > { %4904 = vmatmul.msk.f32.gmra.mxu0 %vm496_vm8, %v4900_v33  ;;  %4908 = vmatmul.msk.f32.gmra.mxu1 %vm496_vm8, %v4900_v33 }
 0x1e6   : > { %v899_v48 = vpop.f32.mrf.mxu2 }
 0x1e7   : > { %v939_v22 = vadd.f32 %v899_v48, %v787_v19 }
 0x1e9   : > { %v6602_v47 = vpop.f32.mrf.mxu0  ;;  %v6604_v53 = vpop.f32.mrf.mxu1 }
 0x1ea   : > { %v928_v58 = vpop.f32.mrf.mxu3 }
 0x1ed   : > { %4905 = vmatmul.msk.f32.gmra.mxu0 %vm496_vm8, %v4901_v36  ;;  %4909 = vmatmul.msk.f32.gmra.mxu1 %vm496_vm8, %v4901_v36 }
 0x1ee   : > { %v6606_v59 = vpop.f32.mrf.mxu2 }
 0x1f1   : > { %v979_v10 = vpop.f32.mrf.mxu0  ;;  %v1008_v1 = vpop.f32.mrf.mxu1 }
 0x1f2   : > { %v6608_v57 = vpop.f32.mrf.mxu3  ;;  %v1020_v41 = vadd.f32 %v979_v10, %v937_v49  ;;  %v1021_v8 = vadd.f32 %v1008_v1, %v938_v31 }
 0x1f3   : > { %v942_v39 = vadd.f32 %v6608_v57, %v790_v27 }
 0x1f5   : > { %4906 = vmatmul.msk.f32.gmra.mxu0 %vm496_vm8, %v4902_v35  ;;  %4910 = vmatmul.msk.f32.gmra.mxu1 %vm496_vm8, %v4902_v35 }
 0x1f6   : > { %v6610_v13 = vpop.f32.mrf.mxu2 }
 0x1f9   : > { %v982_v61 = vpop.f32.mrf.mxu0  ;;  %v1011_v62 = vpop.f32.mrf.mxu1 }
 0x1fa   : > { %v6614_v18 = vpop.f32.mrf.mxu3 }
 0x1fe   : > { %v1131_v32 = vpop.f32.mrf.mxu2 }
 0x1ff   : > { %v1172_v4 = vadd.f32 %v1131_v32, %v1020_v41 }
 0x201   : > { %v6612_v17 = vpop.f32.mrf.mxu0  ;;  %v6616_v14 = vpop.f32.mrf.mxu1 }
 0x202   : > { %v1160_v33 = vpop.f32.mrf.mxu3 }
 0x203   : > { %v1173_v34 = vadd.f32 %v1160_v33, %v1021_v8 }
 0x206   : > { %v1134_v29 = vpop.f32.mrf.mxu2 }
 0x209   : > { %v6618_v36 = vpop.f32.mrf.mxu0  ;;  %v6620_v35 = vpop.f32.mrf.mxu1 }
 0x20a   : > { %v1163_v16 = vpop.f32.mrf.mxu3 }
 0x20e   : > { %v6622_v24 = vpop.f32.mrf.mxu2 }
 0x211   : > { %v1287_v25 = vpop.f32.mrf.mxu0  ;;  %v1316_v63 = vpop.f32.mrf.mxu1 }
 0x212   : > { %v6624_v60 = vpop.f32.mrf.mxu3  ;;  %v1328_v12 = vadd.f32 %v1287_v25, %v1172_v4  ;;  %v1329_v26 = vadd.f32 %v1316_v63, %v1173_v34  ;;  %v606_v63 = vadd.f32 %v6594_v43, %v6511_v2  ;;  %v792_v43 = vadd.f32 %v6604_v53, %v635_v7 }
 0x214   : > { %v791_v15 = vadd.f32 %v6602_v47, %v606_v63  ;;  %v944_v53 = vadd.f32 %v6614_v18, %v792_v43 }
 0x216   : > { %v6626_v55 = vpop.f32.mrf.mxu2  ;;  %v943_v47 = vadd.f32 %v6610_v13, %v791_v15  ;;  %v1027_v13 = vadd.f32 %v6620_v35, %v944_v53 }
 0x219   : > { %v1290_v20 = vpop.f32.mrf.mxu0  ;;  %v1319_v56 = vpop.f32.mrf.mxu1 }
 0x21a   : > { %v6632_v9 = vpop.f32.mrf.mxu3 }
 0x21b   : > { %9205 = vst [vmem:[#allocation26_spill] sm:$0xff] %v6632_v9  ;;  %v788_v9 = vadd.f32 %v776_v40, %v629_v50  ;;  %v1022_v50 = vadd.f32 %v982_v61, %v939_v22 }
 0x21d   : > { %v940_v28 = vadd.f32 %v928_v58, %v788_v9  ;;  %v1174_v11 = vadd.f32 %v1134_v29, %v1022_v50 }
 0x21f   : > { %v1023_v37 = vadd.f32 %v1011_v62, %v940_v28  ;;  %v1330_v48 = vadd.f32 %v1290_v20, %v1174_v11 }
 0x221   : > { %v6634_v0 = vpop.f32.mrf.mxu0  ;;  %v6636_v21 = vpop.f32.mrf.mxu1  ;;  %v1175_v19 = vadd.f32 %v1163_v16, %v1023_v37 }
 0x222   : > { %v6646_v38 = vpop.permute.xlu2 %1663 }
 0x223   : > { %9208 = vst [vmem:[#allocation29_spill] sm:$0xff] %v6646_v38  ;;  %v789_v38 = vadd.f32 %v6596_v44, %v603_v45  ;;  %v1331_v10 = vadd.f32 %v1319_v56, %v1175_v19  ;;  %v9209_v45 = vld [vmem:[#allocation26_spill] sm:$0xff] }
 0x224   : > { %v1179_v46 = vadd.f32 %v9209_v45, %v1027_v13 }
 0x225   : > { %v941_v44 = vadd.f32 %v6606_v59, %v789_v38  ;;  %v1025_v59 = vadd.f32 %v6616_v14, %v942_v39 }
 0x227   : > { %v1024_v56 = vadd.f32 %v6612_v17, %v941_v44  ;;  %v1177_v33 = vadd.f32 %v6624_v60, %v1025_v59  ;;  %v9213_v59 = vld [vmem:[#allocation5_spill] sm:$0xff] }
 0x229   : > { %v6642_v30 = vpop.f32.mrf.mxu0  ;;  %v6644_v23 = vpop.f32.mrf.mxu1  ;;  %v1176_v32 = vadd.f32 %v6622_v24, %v1024_v56  ;;  %v1333_v17 = vadd.f32 %v6636_v21, %v1177_v33  ;;  %v1026_v21 = vadd.f32 %v6618_v36, %v943_v47 }
 0x22a   : > { %9206 = vst [vmem:[#allocation27_spill] sm:$0xff] %v6642_v30  ;;  %v1649_v6 = vpop.permute.xlu2 %1648 }
 0x22b   : > { %9207 = vst [vmem:[#allocation28_spill] sm:$0xff] %v6644_v23  ;;  %v1178_v34 = vadd.f32 %v6626_v55, %v1026_v21 }
 0x232   : > { %v9211_v27 = vld [vmem:[#allocation28_spill] sm:$0xff] }
 0x23a   : > { %v1654_v2 = vpop.permute.xlu1 %1653 }
 0x23c   : > { %v1659_v24 = vpop.permute.xlu0 %1658 }
 0x249   : > { %v1439_v5 = vpop.f32.mrf.mxu2  ;;  %v1468_v42 = vpop.f32.mrf.mxu3 }
 0x24a   : > { %v1480_v51 = vadd.f32 %v1439_v5, %v1328_v12  ;;  %v1481_v52 = vadd.f32 %v1468_v42, %v1329_v26 }
 0x251   : > { %v1442_v30 = vpop.f32.mrf.mxu2  ;;  %v1471_v23 = vpop.f32.mrf.mxu3 }
 0x252   : > { %v1482_v29 = vadd.f32 %v1442_v30, %v1330_v48  ;;  %v1483_v16 = vadd.f32 %v1471_v23, %v1331_v10  ;;  %v1332_v23 = vadd.f32 %v6634_v0, %v1176_v32  ;;  %v9214_v32 = vld [vmem:[#allocation8_spill] sm:$0xff] }
 0x259   : > { %v1445_v57 = vpop.f32.mrf.mxu2  ;;  %v1474_v62 = vpop.f32.mrf.mxu3 }
 0x25a   : > { %v1593_v49 = vpop.f32.mrf.mxu0  ;;  %v1622_v31 = vpop.f32.mrf.mxu1  ;;  %v1484_v41 = vadd.f32 %v1445_v57, %v1332_v23  ;;  %v1485_v8 = vadd.f32 %v1474_v62, %v1333_v17 }
 0x25b   : > { %v1634_v40 = vadd.f32 %v1593_v49, %v1480_v51  ;;  %v1635_v54 = vadd.f32 %v1622_v31, %v1481_v52  ;;  %v9210_v51 = vld [vmem:[#allocation27_spill] sm:$0xff]  ;;  %v1335_v49 = vadd.f32 %v9211_v27, %v1179_v46  ;;  %v2672_v27 = vld [vmem:[%s9108_s4 + $0x18] sm:$0xff] }
 0x25c   : > { %v1334_v52 = vadd.f32 %v9210_v51, %v1178_v34  ;;  %v4913_v51 = vld [vmem:[%s9107_s3 + $0x30] sm:$0xff] }
 0x25d   : > { %v1666_v9 = vadd.f32 %v1649_v6, %v1634_v40  ;;  %v1667_v25 = vadd.f32 %v1649_v6, %v1635_v54  ;;  %v9212_v6 = vld [vmem:[#allocation29_spill] sm:$0xff] }
 0x25f   : > { %v6658_v58 = vmax.f32 %v1666_v9, 0.0  ;;  %v6660_v1 = vmax.f32 %v1667_v25, 0.0 }
 0x261   : > { %1726 = vrot.lane.b32.xlu2 %v6660_v1, %s5367_s15  ;;  %1718 = vrot.lane.b32.xlu1 %v6658_v58, %s5367_s15  ;;  %v1448_v12 = vpop.f32.mrf.mxu2  ;;  %v1477_v26 = vpop.f32.mrf.mxu3 }
 0x262   : > { %v1596_v3 = vpop.f32.mrf.mxu0  ;;  %v1625_v20 = vpop.f32.mrf.mxu1  ;;  %v1486_v36 = vadd.f32 %v1448_v12, %v1334_v52  ;;  %v1487_v35 = vadd.f32 %v1477_v26, %v1335_v49 }
 0x263   : > { %v1636_v61 = vadd.f32 %v1596_v3, %v1482_v29  ;;  %v1637_v30 = vadd.f32 %v1625_v20, %v1483_v16 }
 0x265   : > { %v1668_v5 = vadd.f32 %v1654_v2, %v1636_v61  ;;  %v1669_v42 = vadd.f32 %v1654_v2, %v1637_v30 }
 0x267   : > { %v6676_v38 = vmax.f32 %v1668_v5, 0.0  ;;  %v6678_v14 = vmax.f32 %v1669_v42, 0.0  ;;  %v9215_v5 = vld [vmem:[#allocation9_spill] sm:$0xff] }
 0x269   : > { %1728 = vrot.lane.b32.xlu0 %v6678_v14, %s5367_s15  ;;  %1720 = vrot.lane.b32.xlu2 %v6676_v38, %s5367_s15 }
 0x26a   : > { %1906 = vrot.lane.b32.xlu1 %v6678_v14, %s5369_s17  ;;  %v1599_v60 = vpop.f32.mrf.mxu0  ;;  %v1628_v0 = vpop.f32.mrf.mxu1 }
 0x26b   : > { %v1638_v18 = vadd.f32 %v1599_v60, %v1484_v41  ;;  %v1639_v4 = vadd.f32 %v1628_v0, %v1485_v8 }
 0x26d   : > { %v1670_v22 = vadd.f32 %v1659_v24, %v1638_v18  ;;  %v1671_v28 = vadd.f32 %v1659_v24, %v1639_v4  ;;  %v4911_v4 = vld [vmem:[%s9107_s3 + $0x20] sm:$0xff] }
 0x26f   : > { %v6692_v31 = vmax.f32 %v1670_v22, 0.0  ;;  %v6694_v50 = vmax.f32 %v1671_v28, 0.0  ;;  %v4912_v28 = vld [vmem:[%s9107_s3 + $0x28] sm:$0xff] }
 0x271   : > { %1898 = vrot.lane.b32.xlu0 %v6676_v38, %s5369_s17  ;;  %1900 = vrot.lane.b32.xlu2 %v6692_v31, %s5369_s17 }
 0x272   : > { %1730 = vrot.lane.b32.xlu1 %v6694_v50, %s5367_s15  ;;  %v1602_v55 = vpop.f32.mrf.mxu0  ;;  %v1631_v37 = vpop.f32.mrf.mxu1 }
 0x273   : > { %v1640_v40 = vadd.f32 %v1602_v55, %v1486_v36  ;;  %v1641_v54 = vadd.f32 %v1631_v37, %v1487_v35  ;;  %v4914_v35 = vld [vmem:[%s9107_s3 + $0x38] sm:$0xff] }
 0x275   : > { %v1672_v11 = vadd.f32 %v9212_v6, %v1640_v40  ;;  %v1673_v19 = vadd.f32 %v9212_v6, %v1641_v54  ;;  %v9216_v6 = vld [vmem:[#allocation14_spill] sm:$0xff] }
 0x277   : > { %v6704_v9 = vmax.f32 %v1672_v11, 0.0  ;;  %v6706_v25 = vmax.f32 %v1673_v19, 0.0  ;;  %v9217_v19 = vld [vmem:[#allocation15_spill] sm:$0xff] }
 0x279   : > { %1722 = vrot.lane.b32.xlu0 %v6692_v31, %s5367_s15  ;;  %1732 = vrot.lane.b32.xlu2 %v6706_v25, %s5367_s15 }
 0x27a   : > { %1724 = vrot.lane.b32.xlu1 %v6704_v9, %s5367_s15 }
 0x281   : > { %1908 = vrot.lane.b32.xlu0 %v6694_v50, %s5369_s17  ;;  %1686 = vrot.lane.b32.xlu2 %v6692_v31, %s5368_s16 }
 0x282   : > { %1896 = vrot.lane.b32.xlu1 %v6658_v58, %s5369_s17 }
 0x289   : > { %1694 = vrot.lane.b32.xlu0 %v6694_v50, %s5368_s16  ;;  %1904 = vrot.lane.b32.xlu2 %v6660_v1, %s5369_s17 }
 0x28a   : > { %1692 = vrot.lane.b32.xlu1 %v6678_v14, %s5368_s16 }
 0x291   : > { %1684 = vrot.lane.b32.xlu0 %v6676_v38, %s5368_s16  ;;  %1682 = vrot.lane.b32.xlu2 %v6658_v58, %s5368_s16 }
 0x292   : > { %2023 = vrot.lane.b32.xlu1 %v6694_v50, %s5371_s18 }
 0x299   : > { %1902 = vrot.lane.b32.xlu0 %v6704_v9, %s5369_s17  ;;  %1696 = vrot.lane.b32.xlu2 %v6706_v25, %s5368_s16 }
 0x29a   : > { %1910 = vrot.lane.b32.xlu1 %v6706_v25, %s5369_s17 }
 0x2a1   : > { %1690 = vrot.lane.b32.xlu0 %v6660_v1, %s5368_s16  ;;  %2013 = vrot.lane.b32.xlu2 %v6676_v38, %s5371_s18 }
 0x2a2   : > { %1688 = vrot.lane.b32.xlu1 %v6704_v9, %s5368_s16 }
 0x2a9   : > { %2015 = vrot.lane.b32.xlu0 %v6692_v31, %s5371_s18  ;;  %2019 = vrot.lane.b32.xlu2 %v6660_v1, %s5371_s18 }
 0x2aa   : > { %2011 = vrot.lane.b32.xlu1 %v6658_v58, %s5371_s18 }
 0x2b1   : > { %2021 = vrot.lane.b32.xlu0 %v6678_v14, %s5371_s18  ;;  %2328 = vrot.lane.b32.xlu2 %v6692_v31, %s5373_s22 }
 0x2b2   : > { %2017 = vrot.lane.b32.xlu1 %v6704_v9, %s5371_s18 }
 0x2b9   : > { %2330 = vrot.lane.b32.xlu0 %v6704_v9, %s5373_s22  ;;  %2025 = vrot.lane.b32.xlu2 %v6706_v25, %s5371_s18 }
 0x2ba   : > { %2338 = vrot.lane.b32.xlu1 %v6706_v25, %s5373_s22 }
 0x2bb   : > { %v1727_v63 = vpop.permute.xlu2 %1726 }
 0x2c1   : > { %2336 = vrot.lane.b32.xlu0 %v6694_v50, %s5373_s22  ;;  %2223 = vrot.lane.b32.xlu2 %v6706_v25, %s5372_s19 }
 0x2c2   : > { %2215 = vrot.lane.b32.xlu1 %v6704_v9, %s5372_s19 }
 0x2c3   : > { %v1721_v7 = vpop.permute.xlu2 %1720 }
 0x2c9   : > { %2326 = vrot.lane.b32.xlu0 %v6676_v38, %s5373_s22  ;;  %2213 = vrot.lane.b32.xlu2 %v6692_v31, %s5372_s19 }
 0x2ca   : > { %2334 = vrot.lane.b32.xlu1 %v6678_v14, %s5373_s22 }
 0x2cb   : > { %v6774_v44 = vpop.permute.xlu2 %1900 }
 0x2d1   : > { %2221 = vrot.lane.b32.xlu0 %v6694_v50, %s5372_s19  ;;  %2332 = vrot.lane.b32.xlu2 %v6660_v1, %s5373_s22 }
 0x2d2   : > { %2324 = vrot.lane.b32.xlu1 %v6658_v58, %s5373_s22 }
 0x2d3   : > { %v1733_v39 = vpop.permute.xlu2 %1732  ;;  %v1719_v48 = vpop.permute.xlu1 %1718 }
 0x2d4   : > { %v1738_v17 = vsel %vm9180_vm2, %v1727_v63, %v1719_v48  ;;  %v1734_v8 = vsel %vm9180_vm2, %v1719_v48, %v1727_v63 }
 0x2d5   : > { %v1742_v18 = vmul.f32 %v9214_v32, %v1738_v17  ;;  %v1743_v34 = vmul.f32 %v9215_v5, %v1734_v8  ;;  %v9218_v17 = vld [vmem:[#allocation12_spill] sm:$0xff]  ;;  %v9219_v8 = vld [vmem:[#allocation13_spill] sm:$0xff] }
 0x2d9   : > { %2211 = vrot.lane.b32.xlu0 %v6676_v38, %s5372_s19  ;;  %2209 = vrot.lane.b32.xlu2 %v6658_v58, %s5372_s19 }
 0x2da   : > { %2219 = vrot.lane.b32.xlu1 %v6678_v14, %s5372_s19 }
 0x2db   : > { %v1729_v10 = vpop.permute.xlu0 %1728  ;;  %v6788_v29 = vpop.permute.xlu2 %1686 }
 0x2dc   : > { %v6790_v16 = vpop.permute.xlu1 %1906  ;;  %v1739_v47 = vsel %vm9180_vm2, %v1729_v10, %v1721_v7  ;;  %v1735_v53 = vsel %vm9180_vm2, %v1721_v7, %v1729_v10  ;;  %v2671_v7 = vld [vmem:[%s9108_s4 + $0x10] sm:$0xff] }
 0x2dd   : > { %v1744_v24 = vmul.f32 %v9214_v32, %v1739_v47  ;;  %v1745_v21 = vmul.f32 %v9215_v5, %v1735_v53 }
 0x2e1   : > { %2217 = vrot.lane.b32.xlu0 %v6660_v1, %s5372_s19  ;;  %2568 = vrot.lane.b32.xlu2 %v6706_v25, %s5375_s13 }
 0x2e2   : > { %2560 = vrot.lane.b32.xlu1 %v6704_v9, %s5375_s13 }
 0x2e3   : > { %v6798_v2 = vpop.permute.xlu0 %1898  ;;  %v6800_v15 = vpop.permute.xlu2 %1904 }
 0x2e4   : > { %v1731_v43 = vpop.permute.xlu1 %1730  ;;  %v1917_v48 = vsel %vm9177_vm13, %v6790_v16, %v6798_v2  ;;  %v1913_v10 = vsel %vm9177_vm13, %v6798_v2, %v6790_v16 }
 0x2e5   : > { %v1922_v16 = vmul.f32 %v9216_v6, %v1917_v48 }
 0x2e9   : > { %2558 = vrot.lane.b32.xlu0 %v6692_v31, %s5375_s13  ;;  %2445 = vrot.lane.b32.xlu2 %v6704_v9, %s5374_s24 }
 0x2ea   : > { %2566 = vrot.lane.b32.xlu1 %v6694_v50, %s5375_s13 }
 0x2eb   : > { %v1723_v3 = vpop.permute.xlu0 %1722  ;;  %v6808_v20 = vpop.permute.xlu2 %1682 }
 0x2ec   : > { %v1725_v56 = vpop.permute.xlu1 %1724  ;;  %v1740_v61 = vsel %vm9180_vm2, %v1731_v43, %v1723_v3  ;;  %v1736_v62 = vsel %vm9180_vm2, %v1723_v3, %v1731_v43 }
 0x2ed   : > { %v1737_v30 = vsel %vm9180_vm2, %v1725_v56, %v1733_v39  ;;  %v1741_v57 = vsel %vm9180_vm2, %v1733_v39, %v1725_v56  ;;  %v1746_v23 = vmul.f32 %v9214_v32, %v1740_v61  ;;  %v1747_v41 = vmul.f32 %v9215_v5, %v1736_v62  ;;  %v2669_v39 = vld [vmem:[%s9108_s4] sm:$0xff] }
 0x2ee   : > { %v1748_v33 = vmul.f32 %v9214_v32, %v1741_v57  ;;  %v1749_v42 = vmul.f32 %v9215_v5, %v1737_v30  ;;  %v1923_v57 = vmul.f32 %v9217_v19, %v1913_v10 }
 0x2f0   : > { %1780 = vmatpush.msra.mxu2 %v1748_v33  ;;  %1809 = vmatpush.msra.mxu3 %v1749_v42 }
 0x2f1   : > { %2453 = vrot.lane.b32.xlu0 %v6706_v25, %s5374_s24  ;;  %2564 = vrot.lane.b32.xlu2 %v6678_v14, %s5375_s13 }
 0x2f2   : > { %2556 = vrot.lane.b32.xlu1 %v6676_v38, %s5375_s13  ;;  %1781 = vmatpush.msra.mxu2 %v1746_v23 }
 0x2f3   : > { %1810 = vmatpush.msra.mxu3 %v1747_v41  ;;  %v1909_v60 = vpop.permute.xlu0 %1908  ;;  %v6837_v0 = vpop.permute.xlu2 %1696 }
 0x2f4   : > { %1782 = vmatpush.msra.mxu2 %v1744_v24  ;;  %v1897_v13 = vpop.permute.xlu1 %1896  ;;  %v1918_v55 = vsel %vm9177_vm13, %v1909_v60, %v6774_v44  ;;  %v1914_v54 = vsel %vm9177_vm13, %v6774_v44, %v1909_v60  ;;  %v2670_v44 = vld [vmem:[%s9108_s4 + $0x8] sm:$0xff] }
 0x2f5   : > { %1811 = vmatpush.msra.mxu3 %v1745_v21  ;;  %v1924_v3 = vmul.f32 %v9216_v6, %v1918_v55  ;;  %v1916_v56 = vsel %vm9177_vm13, %v6800_v15, %v1897_v13  ;;  %v1925_v61 = vmul.f32 %v9217_v19, %v1914_v54  ;;  %v1912_v30 = vsel %vm9177_vm13, %v1897_v13, %v6800_v15  ;;  %v9221_v55 = vld [vmem:[#allocation17_spill] sm:$0xff] }
 0x2f6   : > { %1783 = vmatpush.msra.mxu2 %v1742_v18  ;;  %v1920_v33 = vmul.f32 %v9216_v6, %v1916_v56  ;;  %v1921_v53 = vmul.f32 %v9217_v19, %v1912_v30  ;;  %v1716_v30 = vld [vmem:[%s9107_s3 + $0x10] sm:$0xff] }
 0x2f7   : > { %1812 = vmatpush.msra.mxu3 %v1743_v34  ;;  %4915 = vmatmul.msk.f32.vlgmr.msra.gmra.mxu2 %vm1755_vm0, %v4911_v4 }
 0x2f8   : > { %4919 = vmatmul.msk.f32.vlgmr.msra.gmra.mxu3 %vm1755_vm0, %v4911_v4 }
 0x2f9   : > { %2443 = vrot.lane.b32.xlu0 %v6692_v31, %s5374_s24  ;;  %2554 = vrot.lane.b32.xlu2 %v6658_v58, %s5375_s13 }
 0x2fa   : > { %2451 = vrot.lane.b32.xlu1 %v6694_v50, %s5374_s24 }
 0x2fb   : > { %v1695_v45 = vpop.permute.xlu0 %1694  ;;  %v6853_v46 = vpop.permute.xlu2 %2013 }
 0x2fc   : > { %v6855_v22 = vpop.permute.xlu1 %1692  ;;  %v1704_v42 = vsel %vm9181_vm7, %v1695_v45, %v6788_v29  ;;  %v1700_v23 = vsel %vm9181_vm7, %v6788_v29, %v1695_v45  ;;  %v4931_v29 = vld [vmem:[%s9107_s3 + $0x40] sm:$0xff] }
 0x2ff   : > { %4916 = vmatmul.msk.f32.gmra.mxu2 %vm1755_vm0, %v4912_v28 }
 0x300   : > { %4920 = vmatmul.msk.f32.gmra.mxu3 %vm1755_vm0, %v4912_v28 }
 0x301   : > { %2562 = vrot.lane.b32.xlu0 %v6660_v1, %s5375_s13  ;;  %2449 = vrot.lane.b32.xlu2 %v6678_v14, %s5374_s24 }
 0x302   : > { %2441 = vrot.lane.b32.xlu1 %v6676_v38, %s5374_s24 }
 0x303   : > { %v1685_v12 = vpop.permute.xlu0 %1684  ;;  %v6873_v52 = vpop.permute.xlu2 %2019 }
 0x304   : > { %v6868_v26 = vpop.permute.xlu1 %2023  ;;  %v1703_v60 = vsel %vm9181_vm7, %v6855_v22, %v1685_v12  ;;  %v1699_v21 = vsel %vm9181_vm7, %v1685_v12, %v6855_v22 }
 0x305   : > { %v1709_v34 = vmul.f32 %v9219_v8, %v1699_v21  ;;  %v9224_v21 = vld [vmem:[#allocation18_spill] sm:$0xff] }
 0x307   : > { %4917 = vmatmul.msk.f32.gmra.mxu2 %vm1755_vm0, %v4913_v51 }
 0x308   : > { %4921 = vmatmul.msk.f32.gmra.mxu3 %vm1755_vm0, %v4913_v51 }
 0x309   : > { %2439 = vrot.lane.b32.xlu0 %v6658_v58, %s5374_s24  ;;  %2690 = vperm.xlu2 %5295, %v2672_v27   ;;  %v1715_v27 = vld [vmem:[%s9107_s3 + $0x8] sm:$0xff] }
 0x30a   : > { %2447 = vrot.lane.b32.xlu1 %v6660_v1, %s5374_s24 }
 0x30b   : > { %v1903_v49 = vpop.permute.xlu0 %1902  ;;  %v6917_v43 = vpop.permute.xlu2 %2328 }
 0x30c   : > { %v1911_v36 = vpop.permute.xlu1 %1910 }
 0x30d   : > { %v1915_v37 = vsel %vm9177_vm13, %v1903_v49, %v1911_v36  ;;  %v1919_v40 = vsel %vm9177_vm13, %v1911_v36, %v1903_v49  ;;  %v9220_v36 = vld [vmem:[#allocation16_spill] sm:$0xff] }
 0x30e   : > { %v1926_v11 = vmul.f32 %v9216_v6, %v1919_v40  ;;  %v1927_v63 = vmul.f32 %v9217_v19, %v1915_v37 }
 0x30f   : > { %4918 = vmatmul.msk.f32.gmra.mxu2 %vm1755_vm0, %v4914_v35 }
 0x310   : > { %1957 = vmatpush.msrb.mxu2 %v1926_v11  ;;  %1986 = vmatpush.msrb.mxu3 %v1927_v63 }
 0x311   : > { %2685 = vperm.xlu0 %5296, %v2671_v7   ;;  %2675 = vperm.xlu2 %5295, %v2669_v39  }
 0x312   : > { %2680 = vperm.xlu1 %5297, %v2670_v44   ;;  %1958 = vmatpush.msrb.mxu2 %v1924_v3 }
 0x313   : > { %1987 = vmatpush.msrb.mxu3 %v1925_v61  ;;  %v1691_v2 = vpop.permute.xlu0 %1690  ;;  %v2026_v13 = vpop.permute.xlu2 %2025 }
 0x314   : > { %4922 = vmatmul.msk.f32.gmra.mxu3 %vm1755_vm0, %v4914_v35  ;;  %1959 = vmatpush.msrb.mxu2 %v1922_v16  ;;  %v1689_v62 = vpop.permute.xlu1 %1688  ;;  %v1698_v18 = vsel %vm9181_vm7, %v6808_v20, %v1691_v2 }
 0x315   : > { %1988 = vmatpush.msrb.mxu3 %v1923_v57  ;;  %v1701_v15 = vsel %vm9181_vm7, %v1689_v62, %v6837_v0  ;;  %v1705_v47 = vsel %vm9181_vm7, %v6837_v0, %v1689_v62  ;;  %v1710_v0 = vmul.f32 %v9218_v17, %v1704_v42  ;;  %v1707_v22 = vmul.f32 %v9219_v8, %v1698_v18  ;;  %v9223_v62 = vld [vmem:[#allocation21_spill] sm:$0xff]  ;;  %v4934_v42 = vld [vmem:[%s9107_s3 + $0x58] sm:$0xff] }
 0x316   : > { %v1712_v41 = vmul.f32 %v9218_v17, %v1705_v47  ;;  %v1713_v24 = vmul.f32 %v9219_v8, %v1701_v15  ;;  %1960 = vmatpush.msrb.mxu2 %v1920_v33  ;;  %v4955_v18 = vld [vmem:[%s9107_s3 + $0x80] sm:$0xff] }
 0x317   : > { %1989 = vmatpush.msrb.mxu3 %v1921_v53  ;;  %4935 = vmatmul.msk.f32.vlgmr.msrb.gmra.mxu2 %vm1755_vm0, %v4931_v29 }
 0x318   : > { %2155 = vmatpush.msra.mxu2 %v6704_v9  ;;  %1850 = vmatpush.msra.mxu0 %v1712_v41  ;;  %v1711_v9 = vmul.f32 %v9219_v8, %v1700_v23 }
 0x319   : > { %2184 = vmatpush.msra.mxu3 %v6706_v25  ;;  %1879 = vmatpush.msra.mxu1 %v1713_v24  ;;  %v1702_v25 = vsel %vm9181_vm7, %v1691_v2, %v6808_v20  ;;  %v1714_v20 = vld [vmem:[%s9107_s3] sm:$0xff]  ;;  %v9222_v2 = vld [vmem:[#allocation20_spill] sm:$0xff] }
 0x31a   : > { %2156 = vmatpush.msra.mxu2 %v6692_v31  ;;  %1851 = vmatpush.msra.mxu0 %v1710_v0  ;;  %v1708_v31 = vmul.f32 %v9218_v17, %v1703_v60  ;;  %v1717_v60 = vld [vmem:[%s9107_s3 + $0x18] sm:$0xff] }
 0x31b   : > { %2185 = vmatpush.msra.mxu3 %v6694_v50  ;;  %1880 = vmatpush.msra.mxu1 %v1711_v9  ;;  %v2016_v4 = vpop.permute.xlu0 %2015  ;;  %v1706_v50 = vmul.f32 %v9218_v17, %v1702_v25  ;;  %v2224_v28 = vpop.permute.xlu2 %2223  ;;  %v9225_v25 = vld [vmem:[#allocation19_spill] sm:$0xff] }
 0x31c   : > { %4939 = vmatmul.msk.f32.vlgmr.msrb.gmra.mxu3 %vm1755_vm0, %v4931_v29  ;;  %2157 = vmatpush.msra.mxu2 %v6676_v38  ;;  %v2012_v45 = vpop.permute.xlu1 %2011  ;;  %v4932_v38 = vld [vmem:[%s9107_s3 + $0x48] sm:$0xff]  ;;  %v2033_v49 = vsel %vm9176_vm14, %v6868_v26, %v2016_v4 }
 0x31d   : > { %2186 = vmatpush.msra.mxu3 %v6678_v14  ;;  %1852 = vmatpush.msra.mxu0 %v1708_v31  ;;  %v2027_v63 = vsel %vm9176_vm14, %v2012_v45, %v6873_v52  ;;  %v2039_v7 = vmul.f32 %v9220_v36, %v2033_v49  ;;  %v4944_v49 = vld [vmem:[%s9107_s3 + $0x68] sm:$0xff] }
 0x31e   : > { %1881 = vmatpush.msra.mxu1 %v1709_v34  ;;  %2158 = vmatpush.msra.mxu2 %v6658_v58  ;;  %v2036_v3 = vmul.f32 %v9221_v55, %v2027_v63 }
 0x31f   : > { %2187 = vmatpush.msra.mxu3 %v6660_v1  ;;  %1853 = vmatpush.msra.mxu0 %v1706_v50  ;;  %v2029_v1 = vsel %vm9176_vm14, %v2016_v4, %v6868_v26  ;;  %v4933_v26 = vld [vmem:[%s9107_s3 + $0x50] sm:$0xff]  ;;  %v4943_v50 = vld [vmem:[%s9107_s3 + $0x60] sm:$0xff] }
 0x320   : > { %1882 = vmatpush.msra.mxu1 %v1707_v22  ;;  %4923 = vmatmul.msk.f32.vlgmr.msra.gmra.mxu0 %vm1755_vm0, %v1714_v20  ;;  %v2040_v11 = vmul.f32 %v9221_v55, %v2029_v1 }
 0x321   : > { %4927 = vmatmul.msk.f32.vlgmr.msra.gmra.mxu1 %vm1755_vm0, %v1714_v20  ;;  %4936 = vmatmul.msk.f32.gmra.mxu2 %vm1755_vm0, %v4932_v38 }
 0x323   : > { %v2022_v14 = vpop.permute.xlu0 %2021  ;;  %v2214_v16 = vpop.permute.xlu2 %2213 }
 0x324   : > { %4940 = vmatmul.msk.f32.gmra.mxu3 %vm1755_vm0, %v4932_v38  ;;  %v2018_v58 = vpop.permute.xlu1 %2017  ;;  %v2028_v40 = vsel %vm9176_vm14, %v6853_v46, %v2022_v14  ;;  %v2032_v54 = vsel %vm9176_vm14, %v2022_v14, %v6853_v46  ;;  %v2031_v46 = vsel %vm9176_vm14, %v6873_v52, %v2012_v45  ;;  %v4956_v38 = vld [vmem:[%s9107_s3 + $0x88] sm:$0xff] }
 0x325   : > { %v2030_v12 = vsel %vm9176_vm14, %v2018_v58, %v2026_v13  ;;  %v2034_v51 = vsel %vm9176_vm14, %v2026_v13, %v2018_v58  ;;  %v2038_v39 = vmul.f32 %v9221_v55, %v2028_v40  ;;  %v2037_v44 = vmul.f32 %v9220_v36, %v2032_v54 }
 0x326   : > { %v2041_v35 = vmul.f32 %v9220_v36, %v2034_v51  ;;  %v2042_v37 = vmul.f32 %v9221_v55, %v2030_v12  ;;  %v2035_v61 = vmul.f32 %v9220_v36, %v2031_v46 }
 0x328   : > { %4924 = vmatmul.msk.f32.gmra.mxu0 %vm1755_vm0, %v1715_v27  ;;  %2101 = vmatpush.msrb.mxu1 %v2042_v37 }
 0x329   : > { %4928 = vmatmul.msk.f32.gmra.mxu1 %vm1755_vm0, %v1715_v27  ;;  %2072 = vmatpush.msrb.mxu0 %v2041_v35 }
 0x32a   : > { %2102 = vmatpush.msrb.mxu1 %v2040_v11  ;;  %4937 = vmatmul.msk.f32.gmra.mxu2 %vm1755_vm0, %v4933_v26  ;;  %v4957_v11 = vld [vmem:[%s9107_s3 + $0x90] sm:$0xff] }
 0x32b   : > { %2073 = vmatpush.msrb.mxu0 %v2039_v7  ;;  %v2331_v48 = vpop.permute.xlu0 %2330 }
 0x32c   : > { %4941 = vmatmul.msk.f32.gmra.mxu3 %vm1755_vm0, %v4933_v26  ;;  %2103 = vmatpush.msrb.mxu1 %v2038_v39  ;;  %v2339_v10 = vpop.permute.xlu1 %2338 }
 0x32d   : > { %2074 = vmatpush.msrb.mxu0 %v2037_v44  ;;  %v2343_v56 = vsel %vm9172_vm1, %v2331_v48, %v2339_v10  ;;  %v2347_v52 = vsel %vm9172_vm1, %v2339_v10, %v2331_v48  ;;  %v4945_v48 = vld [vmem:[%s9107_s3 + $0x70] sm:$0xff] }
 0x32e   : > { %v2354_v57 = vmul.f32 %v9222_v2, %v2343_v56  ;;  %v2355_v33 = vmul.f32 %v9223_v62, %v2347_v52  ;;  %2104 = vmatpush.msrb.mxu1 %v2036_v3  ;;  %v4958_v3 = vld [vmem:[%s9107_s3 + $0x98] sm:$0xff] }
 0x32f   : > { %2075 = vmatpush.msrb.mxu0 %v2035_v61 }
 0x330   : > { %4925 = vmatmul.msk.f32.gmra.mxu0 %vm1755_vm0, %v1716_v30  ;;  %2385 = vmatpush.msrb.mxu2 %v2354_v57 }
 0x331   : > { %4929 = vmatmul.msk.f32.gmra.mxu1 %vm1755_vm0, %v1716_v30  ;;  %2414 = vmatpush.msrb.mxu3 %v2355_v33  ;;  %v4946_v33 = vld [vmem:[%s9107_s3 + $0x78] sm:$0xff] }
 0x332   : > { %4938 = vmatmul.msk.f32.gmra.mxu2 %vm1755_vm0, %v4934_v42 }
 0x333   : > { %v2337_v15 = vpop.permute.xlu0 %2336 }
 0x334   : > { %4942 = vmatmul.msk.f32.gmra.mxu3 %vm1755_vm0, %v4934_v42  ;;  %v2342_v47 = vsel %vm9172_vm1, %v6917_v43, %v2337_v15  ;;  %v2346_v53 = vsel %vm9172_vm1, %v2337_v15, %v6917_v43  ;;  %v2216_v23 = vpop.permute.xlu1 %2215  ;;  %v2333_v43 = vpop.permute.xlu2 %2332 }
 0x335   : > { %v2228_v41 = vsel %vm9175_vm15, %v2216_v23, %v2224_v28  ;;  %v2232_v24 = vsel %vm9175_vm15, %v2224_v28, %v2216_v23  ;;  %v2352_v0 = vmul.f32 %v9222_v2, %v2342_v47  ;;  %v2353_v29 = vmul.f32 %v9223_v62, %v2346_v53  ;;  %v9226_v53 = vld [vmem:[#allocation24_spill] sm:$0xff] }
 0x336   : > { %v2239_v9 = vmul.f32 %v9224_v21, %v2228_v41  ;;  %v2240_v13 = vmul.f32 %v9225_v25, %v2232_v24  ;;  %v9227_v41 = vld [vmem:[#allocation25_spill] sm:$0xff] }
 0x337   : > { %2386 = vmatpush.msrb.mxu2 %v2352_v0  ;;  %2415 = vmatpush.msrb.mxu3 %v2353_v29 }
 0x338   : > { %4926 = vmatmul.msk.f32.gmra.mxu0 %vm1755_vm0, %v1717_v60  ;;  %2299 = vmatpush.msra.mxu1 %v2240_v13 }
 0x339   : > { %4930 = vmatmul.msk.f32.gmra.mxu1 %vm1755_vm0, %v1717_v60  ;;  %2270 = vmatpush.msra.mxu0 %v2239_v9  ;;  %v4979_v60 = vld [vmem:[%s9107_s3 + $0xc0] sm:$0xff] }
 0x33a   : > { %4959 = vmatmul.msk.f32.vlgmr.msra.gmra.mxu2 %vm1755_vm0, %v4955_v18 }
 0x33b   : > { %v2327_v4 = vpop.permute.xlu0 %2326 }
 0x33c   : > { %4963 = vmatmul.msk.f32.vlgmr.msra.gmra.mxu3 %vm1755_vm0, %v4955_v18  ;;  %v2335_v31 = vpop.permute.xlu1 %2334  ;;  %v2210_v14 = vpop.permute.xlu2 %2209 }
 0x33d   : > { %v2341_v34 = vsel %vm9172_vm1, %v2327_v4, %v2335_v31  ;;  %v2345_v45 = vsel %vm9172_vm1, %v2335_v31, %v2327_v4 }
 0x33e   : > { %v2350_v20 = vmul.f32 %v9222_v2, %v2341_v34  ;;  %v2351_v22 = vmul.f32 %v9223_v62, %v2345_v45  ;;  %v4980_v34 = vld [vmem:[%s9107_s3 + $0xc8] sm:$0xff] }
 0x340   : > { %4947 = vmatmul.msk.f32.vlgmr.msrb.gmra.mxu0 %vm1755_vm0, %v4943_v50  ;;  %2387 = vmatpush.msrb.mxu2 %v2350_v20 }
 0x341   : > { %4951 = vmatmul.msk.f32.vlgmr.msrb.gmra.mxu1 %vm1755_vm0, %v4943_v50  ;;  %2416 = vmatpush.msrb.mxu3 %v2351_v22 }
 0x342   : > { %4960 = vmatmul.msk.f32.gmra.mxu2 %vm1755_vm0, %v4956_v38 }
 0x343   : > { %v2222_v28 = vpop.permute.xlu0 %2221 }
 0x344   : > { %4964 = vmatmul.msk.f32.gmra.mxu3 %vm1755_vm0, %v4956_v38  ;;  %v2227_v58 = vsel %vm9175_vm15, %v2214_v16, %v2222_v28  ;;  %v2231_v1 = vsel %vm9175_vm15, %v2222_v28, %v2214_v16  ;;  %v2325_v12 = vpop.permute.xlu1 %2324  ;;  %v2569_v63 = vpop.permute.xlu2 %2568  ;;  %v9228_v38 = vld [vmem:[#allocation22_spill] sm:$0xff]  ;;  %v9229_v28 = vld [vmem:[#allocation23_spill] sm:$0xff] }
 0x345   : > { %v2340_v51 = vsel %vm9172_vm1, %v2325_v12, %v2333_v43  ;;  %v2344_v27 = vsel %vm9172_vm1, %v2333_v43, %v2325_v12  ;;  %v2237_v35 = vmul.f32 %v9224_v21, %v2227_v58  ;;  %v2238_v37 = vmul.f32 %v9225_v25, %v2231_v1  ;;  %v4967_v43 = vld [vmem:[%s9107_s3 + $0xa0] sm:$0xff] }
 0x346   : > { %v2348_v40 = vmul.f32 %v9222_v2, %v2340_v51  ;;  %v2349_v54 = vmul.f32 %v9223_v62, %v2344_v27  ;;  %v4968_v51 = vld [vmem:[%s9107_s3 + $0xa8] sm:$0xff] }
 0x347   : > { %2271 = vmatpush.msra.mxu0 %v2237_v35  ;;  %2300 = vmatpush.msra.mxu1 %v2238_v37  ;;  %v4981_v35 = vld [vmem:[%s9107_s3 + $0xd0] sm:$0xff] }
 0x348   : > { %4948 = vmatmul.msk.f32.gmra.mxu0 %vm1755_vm0, %v4944_v49  ;;  %2388 = vmatpush.msrb.mxu2 %v2348_v40 }
 0x349   : > { %4952 = vmatmul.msk.f32.gmra.mxu1 %vm1755_vm0, %v4944_v49  ;;  %2417 = vmatpush.msrb.mxu3 %v2349_v54 }
 0x34a   : > { %4961 = vmatmul.msk.f32.gmra.mxu2 %vm1755_vm0, %v4957_v11 }
 0x34b   : > { %v2212_v26 = vpop.permute.xlu0 %2211 }
 0x34c   : > { %4965 = vmatmul.msk.f32.gmra.mxu3 %vm1755_vm0, %v4957_v11  ;;  %v2220_v7 = vpop.permute.xlu1 %2219  ;;  %v2446_v47 = vpop.permute.xlu2 %2445 }
 0x34d   : > { %v2226_v46 = vsel %vm9175_vm15, %v2212_v26, %v2220_v7  ;;  %v2230_v39 = vsel %vm9175_vm15, %v2220_v7, %v2212_v26 }
 0x34e   : > { %v2235_v44 = vmul.f32 %v9224_v21, %v2226_v46  ;;  %v2236_v10 = vmul.f32 %v9225_v25, %v2230_v39  ;;  %v4982_v39 = vld [vmem:[%s9107_s3 + $0xd8] sm:$0xff] }
 0x350   : > { %4949 = vmatmul.msk.f32.gmra.mxu0 %vm1755_vm0, %v4945_v48  ;;  %2301 = vmatpush.msra.mxu1 %v2236_v10 }
 0x351   : > { %4953 = vmatmul.msk.f32.gmra.mxu1 %vm1755_vm0, %v4945_v48  ;;  %2272 = vmatpush.msra.mxu0 %v2235_v44 }
 0x352   : > { %4962 = vmatmul.msk.f32.gmra.mxu2 %vm1755_vm0, %v4958_v3 }
 0x353   : > { %v2218_v56 = vpop.permute.xlu0 %2217 }
 0x354   : > { %4966 = vmatmul.msk.f32.gmra.mxu3 %vm1755_vm0, %v4958_v3  ;;  %v2225_v52 = vsel %vm9175_vm15, %v2210_v14, %v2218_v56  ;;  %v2229_v61 = vsel %vm9175_vm15, %v2218_v56, %v2210_v14  ;;  %v2561_v30 = vpop.permute.xlu1 %2560  ;;  %v2565_v31 = vpop.permute.xlu2 %2564 }
 0x355   : > { %v2573_v16 = vsel %vm9170_vm4, %v2561_v30, %v2569_v63  ;;  %v2577_v57 = vsel %vm9170_vm4, %v2569_v63, %v2561_v30  ;;  %v2233_v42 = vmul.f32 %v9224_v21, %v2225_v52  ;;  %v2234_v15 = vmul.f32 %v9225_v25, %v2229_v61  ;;  %v4969_v63 = vld [vmem:[%s9107_s3 + $0xb0] sm:$0xff]  ;;  %v4970_v30 = vld [vmem:[%s9107_s3 + $0xb8] sm:$0xff] }
 0x356   : > { %v2584_v23 = vmul.f32 %v9226_v53, %v2573_v16  ;;  %v2585_v24 = vmul.f32 %v9227_v41, %v2577_v57 }
 0x357   : > { %2273 = vmatpush.msra.mxu0 %v2233_v42  ;;  %2302 = vmatpush.msra.mxu1 %v2234_v15  ;;  %v5003_v15 = vld [vmem:[%s9107_s3 + $0x100] sm:$0xff] }
 0x358   : > { %4950 = vmatmul.msk.f32.gmra.mxu0 %vm1755_vm0, %v4946_v33  ;;  %2615 = vmatpush.msra.mxu2 %v2584_v23 }
 0x359   : > { %4954 = vmatmul.msk.f32.gmra.mxu1 %vm1755_vm0, %v4946_v33  ;;  %2644 = vmatpush.msra.mxu3 %v2585_v24 }
 0x35a   : > { %4983 = vmatmul.msk.f32.vlgmr.msrb.gmra.mxu2 %vm1755_vm0, %v4979_v60 }
 0x35b   : > { %v2559_v0 = vpop.permute.xlu0 %2558 }
 0x35c   : > { %4987 = vmatmul.msk.f32.vlgmr.msrb.gmra.mxu3 %vm1755_vm0, %v4979_v60  ;;  %v2567_v29 = vpop.permute.xlu1 %2566  ;;  %v2555_v37 = vpop.permute.xlu2 %2554 }
 0x35d   : > { %v2572_v9 = vsel %vm9170_vm4, %v2559_v0, %v2567_v29  ;;  %v2576_v13 = vsel %vm9170_vm4, %v2567_v29, %v2559_v0 }
 0x35e   : > { %v2582_v18 = vmul.f32 %v9226_v53, %v2572_v9  ;;  %v2583_v4 = vmul.f32 %v9227_v41, %v2576_v13 }
 0x360   : > { %4971 = vmatmul.msk.f32.vlgmr.msra.gmra.mxu0 %vm1755_vm0, %v4967_v43  ;;  %2616 = vmatpush.msra.mxu2 %v2582_v18  ;;  %v5004_v18 = vld [vmem:[%s9107_s3 + $0x108] sm:$0xff] }
 0x361   : > { %4975 = vmatmul.msk.f32.vlgmr.msra.gmra.mxu1 %vm1755_vm0, %v4967_v43  ;;  %2645 = vmatpush.msra.mxu3 %v2583_v4  ;;  %v4991_v43 = vld [vmem:[%s9107_s3 + $0xe0] sm:$0xff] }
 0x362   : > { %4984 = vmatmul.msk.f32.gmra.mxu2 %vm1755_vm0, %v4980_v34 }
 0x363   : > { %v2454_v45 = vpop.permute.xlu0 %2453 }
 0x364   : > { %4988 = vmatmul.msk.f32.gmra.mxu3 %vm1755_vm0, %v4980_v34  ;;  %v2458_v50 = vsel %vm9171_vm11, %v2446_v47, %v2454_v45  ;;  %v2462_v20 = vsel %vm9171_vm11, %v2454_v45, %v2446_v47  ;;  %v2557_v22 = vpop.permute.xlu1 %2556  ;;  %v2450_v44 = vpop.permute.xlu2 %2449  ;;  %v4992_v34 = vld [vmem:[%s9107_s3 + $0xe8] sm:$0xff]  ;;  %v5005_v45 = vld [vmem:[%s9107_s3 + $0x110] sm:$0xff] }
 0x365   : > { %v2469_v14 = vmul.f32 %v9228_v38, %v2458_v50  ;;  %v2470_v58 = vmul.f32 %v9229_v28, %v2462_v20  ;;  %v2571_v1 = vsel %vm9170_vm4, %v2557_v22, %v2565_v31  ;;  %v2575_v12 = vsel %vm9170_vm4, %v2565_v31, %v2557_v22  ;;  %v4993_v22 = vld [vmem:[%s9107_s3 + $0xf0] sm:$0xff] }
 0x366   : > { %v2580_v27 = vmul.f32 %v9226_v53, %v2571_v1  ;;  %v2581_v49 = vmul.f32 %v9227_v41, %v2575_v12  ;;  %v4994_v1 = vld [vmem:[%s9107_s3 + $0xf8] sm:$0xff] }
 0x367   : > { %2500 = vmatpush.msrb.mxu0 %v2469_v14  ;;  %2529 = vmatpush.msrb.mxu1 %v2470_v58  ;;  %v5006_v14 = vld [vmem:[%s9107_s3 + $0x118] sm:$0xff] }
 0x368   : > { %4972 = vmatmul.msk.f32.gmra.mxu0 %vm1755_vm0, %v4968_v51  ;;  %2617 = vmatpush.msra.mxu2 %v2580_v27 }
 0x369   : > { %4976 = vmatmul.msk.f32.gmra.mxu1 %vm1755_vm0, %v4968_v51  ;;  %2646 = vmatpush.msra.mxu3 %v2581_v49 }
 0x36a   : > { %4985 = vmatmul.msk.f32.gmra.mxu2 %vm1755_vm0, %v4981_v35 }
 0x36b   : > { %v2444_v40 = vpop.permute.xlu0 %2443 }
 0x36c   : > { %4989 = vmatmul.msk.f32.gmra.mxu3 %vm1755_vm0, %v4981_v35  ;;  %v2452_v54 = vpop.permute.xlu1 %2451 }
 0x36d   : > { %v2457_v11 = vsel %vm9171_vm11, %v2444_v40, %v2452_v54  ;;  %v2461_v26 = vsel %vm9171_vm11, %v2452_v54, %v2444_v40 }
 0x36e   : > { %v2467_v7 = vmul.f32 %v9228_v38, %v2457_v11  ;;  %v2468_v46 = vmul.f32 %v9229_v28, %v2461_v26 }
 0x370   : > { %4973 = vmatmul.msk.f32.gmra.mxu0 %vm1755_vm0, %v4969_v63  ;;  %2530 = vmatpush.msrb.mxu1 %v2468_v46 }
 0x371   : > { %4977 = vmatmul.msk.f32.gmra.mxu1 %vm1755_vm0, %v4969_v63  ;;  %2501 = vmatpush.msrb.mxu0 %v2467_v7 }
 0x372   : > { %4986 = vmatmul.msk.f32.gmra.mxu2 %vm1755_vm0, %v4982_v39 }
 0x373   : > { %v2563_v48 = vpop.permute.xlu0 %2562 }
 0x374   : > { %4990 = vmatmul.msk.f32.gmra.mxu3 %vm1755_vm0, %v4982_v39  ;;  %v2570_v10 = vsel %vm9170_vm4, %v2555_v37, %v2563_v48  ;;  %v2574_v3 = vsel %vm9170_vm4, %v2563_v48, %v2555_v37  ;;  %v2442_v56 = vpop.permute.xlu1 %2441 }
 0x375   : > { %v2456_v52 = vsel %vm9171_vm11, %v2442_v56, %v2450_v44  ;;  %v2460_v61 = vsel %vm9171_vm11, %v2450_v44, %v2442_v56  ;;  %v2578_v16 = vmul.f32 %v9226_v53, %v2570_v10  ;;  %v2579_v57 = vmul.f32 %v9227_v41, %v2574_v3 }
 0x376   : > { %v2465_v33 = vmul.f32 %v9228_v38, %v2456_v52  ;;  %v2466_v42 = vmul.f32 %v9229_v28, %v2460_v61 }
 0x377   : > { %2618 = vmatpush.msra.mxu2 %v2578_v16  ;;  %2647 = vmatpush.msra.mxu3 %v2579_v57 }
 0x378   : > { %4974 = vmatmul.msk.f32.gmra.mxu0 %vm1755_vm0, %v4970_v30  ;;  %2531 = vmatpush.msrb.mxu1 %v2466_v42 }
 0x379   : > { %4978 = vmatmul.msk.f32.gmra.mxu1 %vm1755_vm0, %v4970_v30  ;;  %2502 = vmatpush.msrb.mxu0 %v2465_v33 }
 0x37a   : > { %v1785_v47 = vpop.f32.mrf.mxu2  ;;  %5007 = vmatmul.msk.f32.vlgmr.msra.gmra.mxu2 %vm1755_vm0, %v5003_v15 }
 0x37b   : > { %v2440_v23 = vpop.permute.xlu0 %2439  ;;  %v1814_v24 = vpop.f32.mrf.mxu3 }
 0x37c   : > { %v2448_v60 = vpop.permute.xlu1 %2447  ;;  %5011 = vmatmul.msk.f32.vlgmr.msra.gmra.mxu3 %vm1755_vm0, %v5003_v15 }
 0x37d   : > { %v2455_v0 = vsel %vm9171_vm11, %v2440_v23, %v2448_v60  ;;  %v2459_v29 = vsel %vm9171_vm11, %v2448_v60, %v2440_v23 }
 0x37e   : > { %v2463_v9 = vmul.f32 %v9228_v38, %v2455_v0  ;;  %v2464_v13 = vmul.f32 %v9229_v28, %v2459_v29 }
 0x380   : > { %2503 = vmatpush.msrb.mxu0 %v2463_v9  ;;  %2532 = vmatpush.msrb.mxu1 %v2464_v13 }
 0x381   : > { %4995 = vmatmul.msk.f32.vlgmr.msrb.gmra.mxu0 %vm1755_vm0, %v4991_v43  ;;  %4999 = vmatmul.msk.f32.vlgmr.msrb.gmra.mxu1 %vm1755_vm0, %v4991_v43 }
 0x382   : > { %v1788_v4 = vpop.f32.mrf.mxu2  ;;  %5008 = vmatmul.msk.f32.gmra.mxu2 %vm1755_vm0, %v5004_v18 }
 0x383   : > { %v1817_v31 = vpop.f32.mrf.mxu3 }
 0x384   : > { %5012 = vmatmul.msk.f32.gmra.mxu3 %vm1755_vm0, %v5004_v18 }
 0x389   : > { %4996 = vmatmul.msk.f32.gmra.mxu0 %vm1755_vm0, %v4992_v34  ;;  %5000 = vmatmul.msk.f32.gmra.mxu1 %vm1755_vm0, %v4992_v34 }
 0x38a   : > { %v1791_v50 = vpop.f32.mrf.mxu2  ;;  %5009 = vmatmul.msk.f32.gmra.mxu2 %vm1755_vm0, %v5005_v45 }
 0x38b   : > { %v1820_v20 = vpop.f32.mrf.mxu3 }
 0x38c   : > { %5013 = vmatmul.msk.f32.gmra.mxu3 %vm1755_vm0, %v5005_v45 }
 0x391   : > { %4997 = vmatmul.msk.f32.gmra.mxu0 %vm1755_vm0, %v4993_v22  ;;  %5001 = vmatmul.msk.f32.gmra.mxu1 %vm1755_vm0, %v4993_v22 }
 0x392   : > { %5010 = vmatmul.msk.f32.gmra.mxu2 %vm1755_vm0, %v5006_v14  ;;  %v1794_v58 = vpop.f32.mrf.mxu2 }
 0x394   : > { %5014 = vmatmul.msk.f32.gmra.mxu3 %vm1755_vm0, %v5006_v14 }
 0x397   : > { %v1823_v12 = vpop.f32.mrf.mxu3 }
 0x399   : > { %4998 = vmatmul.msk.f32.gmra.mxu0 %vm1755_vm0, %v4994_v1  ;;  %5002 = vmatmul.msk.f32.gmra.mxu1 %vm1755_vm0, %v4994_v1 }
 0x39a   : > { %v1962_v35 = vpop.f32.mrf.mxu2 }
 0x39d   : > { %v1855_v51 = vpop.f32.mrf.mxu0 }
 0x39e   : > { %v1856_v27 = vadd.f32 %v1855_v51, %v1785_v47  ;;  %v1884_v49 = vpop.f32.mrf.mxu1 }
 0x39f   : > { %v1885_v37 = vadd.f32 %v1884_v49, %v1814_v24  ;;  %v1991_v40 = vpop.f32.mrf.mxu3 }
 0x3a0   : > { %v2003_v54 = vadd.f32 %v1962_v35, %v1856_v27 }
 0x3a1   : > { %v2004_v11 = vadd.f32 %v1991_v40, %v1885_v37 }
 0x3a4   : > { %v1965_v46 = vpop.f32.mrf.mxu2 }
 0x3a5   : > { %v1858_v26 = vpop.f32.mrf.mxu0 }
 0x3a6   : > { %v1859_v63 = vadd.f32 %v1858_v26, %v1788_v4  ;;  %v1887_v7 = vpop.f32.mrf.mxu1 }
 0x3a7   : > { %v1888_v39 = vadd.f32 %v1887_v7, %v1817_v31  ;;  %v1994_v48 = vpop.f32.mrf.mxu3 }
 0x3a8   : > { %v2005_v44 = vadd.f32 %v1965_v46, %v1859_v63 }
 0x3a9   : > { %v2006_v10 = vadd.f32 %v1994_v48, %v1888_v39 }
 0x3ad   : > { %v1861_v3 = vpop.f32.mrf.mxu0  ;;  %v1968_v61 = vpop.f32.mrf.mxu2 }
 0x3ae   : > { %v1862_v56 = vadd.f32 %v1861_v3, %v1791_v50  ;;  %v1890_v52 = vpop.f32.mrf.mxu1 }
 0x3af   : > { %v1891_v30 = vadd.f32 %v1890_v52, %v1820_v20  ;;  %v1997_v16 = vpop.f32.mrf.mxu3 }
 0x3b0   : > { %v2007_v57 = vadd.f32 %v1968_v61, %v1862_v56 }
 0x3b1   : > { %v2008_v33 = vadd.f32 %v1997_v16, %v1891_v30 }
 0x3b5   : > { %v1864_v42 = vpop.f32.mrf.mxu0  ;;  %v1971_v23 = vpop.f32.mrf.mxu2 }
 0x3b6   : > { %v1865_v15 = vadd.f32 %v1864_v42, %v1794_v58  ;;  %v1893_v47 = vpop.f32.mrf.mxu1 }
 0x3b7   : > { %v1894_v24 = vadd.f32 %v1893_v47, %v1823_v12  ;;  %v2000_v60 = vpop.f32.mrf.mxu3 }
 0x3b8   : > { %v7260_v0 = vadd.f32 %v1971_v23, %v1865_v15 }
 0x3b9   : > { %v7262_v29 = vadd.f32 %v2000_v60, %v1894_v24 }
 0x3bd   : > { %v2077_v9 = vpop.f32.mrf.mxu0  ;;  %v2160_v18 = vpop.f32.mrf.mxu2 }
 0x3be   : > { %v2118_v13 = vadd.f32 %v2077_v9, %v2003_v54  ;;  %v2106_v43 = vpop.f32.mrf.mxu1 }
 0x3bf   : > { %v2119_v4 = vadd.f32 %v2106_v43, %v2004_v11  ;;  %v2189_v31 = vpop.f32.mrf.mxu3 }
 0x3c0   : > { %v2201_v34 = vadd.f32 %v2160_v18, %v2118_v13 }
 0x3c1   : > { %v2202_v45 = vadd.f32 %v2189_v31, %v2119_v4 }
 0x3c5   : > { %v2080_v50 = vpop.f32.mrf.mxu0  ;;  %v2163_v22 = vpop.f32.mrf.mxu2 }
 0x3c6   : > { %v2109_v20 = vpop.f32.mrf.mxu1  ;;  %v2120_v15 = vadd.f32 %v2080_v50, %v2005_v44 }
 0x3c7   : > { %v2192_v14 = vpop.f32.mrf.mxu3  ;;  %v2121_v47 = vadd.f32 %v2109_v20, %v2006_v10 }
 0x3c8   : > { %v2203_v60 = vadd.f32 %v2163_v22, %v2120_v15 }
 0x3c9   : > { %v2204_v9 = vadd.f32 %v2192_v14, %v2121_v47 }
 0x3cd   : > { %v2083_v58 = vpop.f32.mrf.mxu0  ;;  %v2166_v12 = vpop.f32.mrf.mxu2 }
 0x3ce   : > { %v2112_v1 = vpop.f32.mrf.mxu1  ;;  %v2122_v31 = vadd.f32 %v2083_v58, %v2007_v57 }
 0x3cf   : > { %v2195_v51 = vpop.f32.mrf.mxu3  ;;  %v2123_v41 = vadd.f32 %v2112_v1, %v2008_v33  ;;  %v2691_v33 = vpop.permute.xlu2 %2690 }
 0x3d0   : > { %v2205_v2 = vadd.f32 %v2166_v12, %v2122_v31 }
 0x3d1   : > { %v2206_v25 = vadd.f32 %v2195_v51, %v2123_v41 }
 0x3d5   : > { %v2086_v27 = vpop.f32.mrf.mxu0  ;;  %v2169_v35 = vpop.f32.mrf.mxu2 }
 0x3d6   : > { %v2115_v49 = vpop.f32.mrf.mxu1  ;;  %v2124_v57 = vadd.f32 %v2086_v27, %v7260_v0 }
 0x3d7   : > { %v2198_v37 = vpop.f32.mrf.mxu3  ;;  %v2125_v58 = vadd.f32 %v2115_v49, %v7262_v29 }
 0x3dd   : > { %v2275_v40 = vpop.f32.mrf.mxu0  ;;  %v2390_v26 = vpop.f32.mrf.mxu2 }
 0x3de   : > { %v2304_v54 = vpop.f32.mrf.mxu1  ;;  %v2316_v50 = vadd.f32 %v2275_v40, %v2201_v34 }
 0x3df   : > { %v2419_v63 = vpop.f32.mrf.mxu3  ;;  %v2317_v20 = vadd.f32 %v2304_v54, %v2202_v45  ;;  %v2208_v45 = vadd.f32 %v2198_v37, %v2125_v58 }
 0x3e0   : > { %v2431_v12 = vadd.f32 %v2390_v26, %v2316_v50 }
 0x3e1   : > { %v2432_v41 = vadd.f32 %v2419_v63, %v2317_v20 }
 0x3e5   : > { %v2278_v11 = vpop.f32.mrf.mxu0  ;;  %v2393_v46 = vpop.f32.mrf.mxu2 }
 0x3e6   : > { %v2307_v7 = vpop.f32.mrf.mxu1  ;;  %v2318_v18 = vadd.f32 %v2278_v11, %v2203_v60  ;;  %v2681_v11 = vpop.permute.xlu1 %2680 }
 0x3e7   : > { %v2422_v39 = vpop.f32.mrf.mxu3  ;;  %v2319_v4 = vadd.f32 %v2307_v7, %v2204_v9 }
 0x3e8   : > { %v2433_v53 = vadd.f32 %v2393_v46, %v2318_v18  ;;  %v2686_v46 = vpop.permute.xlu0 %2685 }
 0x3e9   : > { %v2434_v28 = vadd.f32 %v2422_v39, %v2319_v4 }
 0x3ed   : > { %v2281_v48 = vpop.f32.mrf.mxu0  ;;  %v2396_v56 = vpop.f32.mrf.mxu2 }
 0x3ee   : > { %v2310_v3 = vpop.f32.mrf.mxu1  ;;  %v2320_v22 = vadd.f32 %v2281_v48, %v2205_v2  ;;  %v2207_v2 = vadd.f32 %v2169_v35, %v2124_v57 }
 0x3ef   : > { %v2425_v52 = vpop.f32.mrf.mxu3  ;;  %v2321_v14 = vadd.f32 %v2310_v3, %v2206_v25 }
 0x3f5   : > { %v2284_v61 = vpop.f32.mrf.mxu0  ;;  %v7264_v16 = vpop.f32.mrf.mxu2 }
 0x3f6   : > { %v2313_v30 = vpop.f32.mrf.mxu1  ;;  %v2322_v40 = vadd.f32 %v2284_v61, %v2207_v2 }
 0x3f7   : > { %v7266_v42 = vpop.f32.mrf.mxu3  ;;  %v2323_v54 = vadd.f32 %v2313_v30, %v2208_v45 }
 0x3f8   : > { %v2437_v37 = vadd.f32 %v7264_v16, %v2322_v40  ;;  %v2744_v40 = vld [vmem:[%s9109_s5] sm:$0x3] }
 0x3fd   : > { %v2620_v13 = vpop.f32.mrf.mxu2 }
 0x3fe   : > { %v2505_v23 = vpop.f32.mrf.mxu0  ;;  %v2534_v24 = vpop.f32.mrf.mxu1 }
 0x3ff   : > { %v2649_v43 = vpop.f32.mrf.mxu3  ;;  %v2546_v25 = vadd.f32 %v2505_v23, %v2431_v12 }
 0x401   : > { %v2661_v39 = vadd.f32 %v2620_v13, %v2546_v25 }
 0x405   : > { %v2623_v44 = vpop.f32.mrf.mxu2 }
 0x406   : > { %v2508_v38 = vpop.f32.mrf.mxu0  ;;  %v2537_v62 = vpop.f32.mrf.mxu1 }
 0x407   : > { %v2548_v21 = vadd.f32 %v2508_v38, %v2433_v53  ;;  %v2549_v55 = vadd.f32 %v2537_v62, %v2434_v28  ;;  %v2652_v10 = vpop.f32.mrf.mxu3  ;;  %v2435_v53 = vadd.f32 %v2396_v56, %v2320_v22  ;;  %v2436_v62 = vadd.f32 %v2425_v52, %v2321_v14  ;;  %v2676_v56 = vpop.permute.xlu2 %2675 }
 0x408   : > { %v2438_v52 = vadd.f32 %v7266_v42, %v2323_v54  ;;  %v2693_v60 = vadd.f32 %v2676_v56, %v2661_v39  ;;  %v2769_v39 = vld [vmem:[%s9110_s6] sm:$0xff] }
 0x409   : > { %v2663_v15 = vadd.f32 %v2623_v44, %v2548_v21  ;;  %v2664_v47 = vadd.f32 %v2652_v10, %v2549_v55  ;;  %v2547_v21 = vadd.f32 %v2534_v24, %v2432_v41 }
 0x40a   : > { %v7286_v10 = vmax.f32 %v2693_v60, 0.0 }
 0x40b   : > { %v2695_v1 = vadd.f32 %v2681_v11, %v2663_v15  ;;  %v2696_v7 = vadd.f32 %v2681_v11, %v2664_v47  ;;  %v2662_v35 = vadd.f32 %v2649_v43, %v2547_v21 }
 0x40d   : > { %v7270_v38 = vmax.f32 %v2695_v1, 0.0  ;;  %v7272_v28 = vmax.f32 %v2696_v7, 0.0  ;;  %v2626_v27 = vpop.f32.mrf.mxu2  ;;  %v2694_v61 = vadd.f32 %v2676_v56, %v2662_v35  ;;  %v5377_v1 = vmov 256.0   ;;  %v2771_v56 = vld [vmem:[%s9110_s6 + $0x10] sm:$0xff] }
 0x40e   : > { %v2511_v55 = vpop.f32.mrf.mxu0  ;;  %v2540_v34 = vpop.f32.mrf.mxu1  ;;  %5298 = vrcp.f32 %v5377_v1 }
 0x40f   : > { %v2550_v0 = vadd.f32 %v2511_v55, %v2435_v53  ;;  %v2551_v51 = vadd.f32 %v2540_v34, %v2436_v62  ;;  %v2655_v29 = vpop.f32.mrf.mxu3  ;;  %v2712_v49 = vadd.f32 %v7272_v28, %v7270_v38  ;;  %v7288_v50 = vmax.f32 %v2694_v61, 0.0 }
 0x411   : > { %v2665_v26 = vadd.f32 %v2626_v27, %v2550_v0  ;;  %v2666_v63 = vadd.f32 %v2655_v29, %v2551_v51  ;;  %2713 = vadd.xlane.f32.xlu2 %v2712_v49  ;;  %v2709_v47 = vadd.f32 %v7288_v50, %v7286_v10  ;;  %v2732_v58 = vmax.f32 %v7286_v10, %v7288_v50 }
 0x413   : > { %v2697_v48 = vadd.f32 %v2686_v46, %v2665_v26  ;;  %v2698_v3 = vadd.f32 %v2686_v46, %v2666_v63 }
 0x414   : > { %v5299_v7 = vpop.eup %5298 }
 0x415   : > { %v7278_v23 = vmax.f32 %v2697_v48, 0.0  ;;  %v7280_v24 = vmax.f32 %v2698_v3, 0.0  ;;  %v2629_v31 = vpop.f32.mrf.mxu2  ;;  %v2722_v12 = vmul.f32 256.0, %v5299_v7  ;;  %vm2726_vm8 = vweird.f32 %v5299_v7  ;;  %v2770_v3 = vld [vmem:[%s9110_s6 + $0x8] sm:$0xff] }
 0x416   : > { %v2514_v30 = vpop.f32.mrf.mxu0  ;;  %v2543_v9 = vpop.f32.mrf.mxu1 }
 0x417   : > { %v2552_v18 = vadd.f32 %v2514_v30, %v2437_v37  ;;  %v2553_v4 = vadd.f32 %v2543_v9, %v2438_v52  ;;  %v2658_v13 = vpop.f32.mrf.mxu3  ;;  %v2738_v43 = vmax.f32 %v7278_v23, %v7280_v24  ;;  %v2715_v16 = vadd.f32 %v7280_v24, %v7278_v23  ;;  %v2772_v37 = vld [vmem:[%s9110_s6 + $0x18] sm:$0xff] }
 0x418   : > { %v2723_v41 = vsub.f32 1.0, %v2722_v12 }
 0x419   : > { %v2667_v44 = vadd.f32 %v2629_v31, %v2552_v18  ;;  %v2668_v42 = vadd.f32 %v2658_v13, %v2553_v4  ;;  %2739 = vmax.xlane.f32.xlu0 %v2738_v43  ;;  %2716 = vadd.xlane.f32.xlu1 %v2715_v16 }
 0x41a   : > { %v2724_v53 = vmul.f32 %v5299_v7, %v2723_v41 }
 0x41b   : > { %v2699_v20 = vadd.f32 %v2691_v33, %v2667_v44  ;;  %v2700_v22 = vadd.f32 %v2691_v33, %v2668_v42  ;;  %v2735_v33 = vmax.f32 %v7270_v38, %v7272_v28 }
 0x41c   : > { %v2725_v21 = vadd.f32 %v5299_v7, %v2724_v53 }
 0x41d   : > { %v7290_v14 = vmax.f32 %v2699_v20, 0.0  ;;  %v7292_v15 = vmax.f32 %v2700_v22, 0.0 }
 0x41e   : > { %v2727_v55 = vsel %vm2726_vm8, %v5299_v7, %v2725_v21  ;;  %vm2794_vm8 = vcmask 15360  }
 0x41f   : > { %v2718_v11 = vadd.f32 %v7292_v15, %v7290_v14  ;;  %v2741_v57 = vmax.f32 %v7290_v14, %v7292_v15 }
 0x421   : > { %2710 = vadd.xlane.f32.xlu1 %v2709_v47  ;;  %2719 = vadd.xlane.f32.xlu0 %v2718_v11 }
 0x422   : > { %2742 = vmax.xlane.f32.xlu2 %v2741_v57 }
 0x429   : > { %2733 = vmax.xlane.f32.xlu0 %v2732_v58 }
 0x42a   : > { %2736 = vmax.xlane.f32.xlu2 %v2735_v33 }
 0x484   : > { %v2714_v2 = vpop.xlane.xlu2 %2713 }
 0x485   : > { %v2729_v29 = vmul.f32 %v2727_v55, %v2714_v2 }
 0x48c   : > { %v2740_v62 = vpop.xlane.xlu0 %2739  ;;  %v2717_v25 = vpop.xlane.xlu1 %2716 }
 0x48d   : > { %v2730_v51 = vmul.f32 %v2727_v55, %v2717_v25 }
 0x494   : > { %v2720_v34 = vpop.xlane.xlu0 %2719  ;;  %v2711_v27 = vpop.xlane.xlu1 %2710 }
 0x495   : > { %v2731_v45 = vmul.f32 %v2727_v55, %v2720_v34  ;;  %v2743_v0 = vpop.xlane.xlu2 %2742  ;;  %v2728_v49 = vmul.f32 %v2727_v55, %v2711_v27 }
 0x496   : > { %2785 = vmatpush.msra.mxu1 %v2743_v0 }
 0x497   : > { %2760 = vmatpush.msra.mxu0 %v2731_v45 }
 0x498   : > { %2786 = vmatpush.msra.mxu1 %v2740_v62 }
 0x499   : > { %2761 = vmatpush.msra.mxu0 %v2730_v51 }
 0x49b   : > { %2762 = vmatpush.msra.mxu0 %v2729_v29 }
 0x49c   : > { %v2734_v26 = vpop.xlane.xlu0 %2733 }
 0x49d   : > { %v2737_v54 = vpop.xlane.xlu2 %2736  ;;  %2763 = vmatpush.msra.mxu0 %v2728_v49 }
 0x49e   : > { %2787 = vmatpush.msra.mxu1 %v2737_v54  ;;  %5015 = vmatmul.msk.f32.vlgmr.msra.gmra.mxu0 %vm1755_vm0, %v2744_v40 }
 0x4a0   : > { %2788 = vmatpush.msra.mxu1 %v2734_v26 }
 0x4a1   : > { %5016 = vmatmul.msk.f32.vlgmr.msra.gmra.mxu1 %vm1755_vm0, %v2744_v40 }
 0x51b   : > { %v2765_v63 = vpop.f32.mrf.mxu0 }
 0x51c   : > { %v2768_v46 = vmax.f32 %v2765_v63, 0.0 }
 0x51e   : > { %v2790_v35 = vpop.f32.mrf.mxu1  ;;  %5022 = vmatpush.msk.msrb.mxu3 %vm2807_vm12, %v2768_v46 }
 0x51f   : > { %v2793_v48 = vmax.f32 %v2790_v35, 0.0  ;;  %5023 = vmatmul.msk.f32.vlgmr.msrb.gmra.mxu3 %vm2794_vm8, %v2769_v39 }
 0x521   : > { %5017 = vmatpush.msk.msrb.mxu2 %vm2807_vm12, %v2793_v48 }
 0x522   : > { %5018 = vmatmul.msk.f32.vlgmr.msrb.gmra.mxu2 %vm2794_vm8, %v2769_v39 }
 0x527   : > { %5024 = vmatmul.msk.f32.gmra.mxu3 %vm2794_vm8, %v2770_v3 }
 0x52a   : > { %5019 = vmatmul.msk.f32.gmra.mxu2 %vm2794_vm8, %v2770_v3 }
 0x52f   : > { %5025 = vmatmul.msk.f32.gmra.mxu3 %vm2794_vm8, %v2771_v56 }
 0x532   : > { %5020 = vmatmul.msk.f32.gmra.mxu2 %vm2794_vm8, %v2771_v56 }
 0x537   : > { %5026 = vmatmul.msk.f32.gmra.mxu3 %vm2794_vm8, %v2772_v37 }
 0x53a   : > { %5021 = vmatmul.msk.f32.gmra.mxu2 %vm2794_vm8, %v2772_v37 }
 0x5a2   : > { %v2860_v52 = vpop.f32.mrf.mxu3 }
 0x5a5   : > { %v2828_v60 = vpop.f32.mrf.mxu2 }
 0x5a6   : > { %v2861_v61 = vadd.f32 %v2860_v52, %v2828_v60 }
 0x5a8   : > { %v2872_v30 = vsub.f32 0.0, %v2861_v61 }
 0x5aa   : > { %v2876_v9 = vmul.f32 1.442695, %v2872_v30  ;;  %v2863_v18 = vpop.f32.mrf.mxu3 }
 0x5ac   : > { %5300 = vpow2.f32 %v2876_v9 }
 0x5ad   : > { %v2831_v4 = vpop.f32.mrf.mxu2 }
 0x5ae   : > { %v2864_v31 = vadd.f32 %v2863_v18, %v2831_v4 }
 0x5b0   : > { %v2873_v13 = vsub.f32 0.0, %v2864_v31 }
 0x5b2   : > { %v5301_v43 = vpop.eup %5300  ;;  %v2878_v16 = vmul.f32 1.442695, %v2873_v13  ;;  %v2866_v44 = vpop.f32.mrf.mxu3 }
 0x5b3   : > { %v2884_v42 = vadd.f32 1.0, %v5301_v43 }
 0x5b4   : > { %5302 = vpow2.f32 %v2878_v16 }
 0x5b5   : > { %5304 = vrcp.f32 %v2884_v42  ;;  %v2834_v20 = vpop.f32.mrf.mxu2  ;;  %v2899_v62 = vand.u32 2147483648, %v2884_v42  ;;  %v2897_v21 = vand.u32 2147483647, %v2884_v42  ;;  %vm2893_vm12 = vweird.f32 %v2884_v42 }
 0x5b6   : > { %v2867_v22 = vadd.f32 %v2866_v44, %v2834_v20 }
 0x5b7   : > { %v2900_v27 = vor.u32 1.1754944e-38, %v2899_v62  ;;  %vm2898_vm4 = vcmp.eq.f32.partialorder %v2897_v21, 8.507059e+37 }
 0x5b8   : > { %v2874_v47 = vsub.f32 0.0, %v2867_v22 }
 0x5ba   : > { %v5303_v11 = vpop.eup %5302  ;;  %v2880_v57 = vmul.f32 1.442695, %v2874_v47  ;;  %v2869_v1 = vpop.f32.mrf.mxu3 }
 0x5bb   : > { %v5305_v58 = vpop.eup %5304  ;;  %v2885_v33 = vadd.f32 1.0, %v5303_v11 }
 0x5bc   : > { %5306 = vpow2.f32 %v2880_v57  ;;  %v2889_v7 = vmul.f32 %v5305_v58, %v2884_v42  ;;  %vm2894_vm0 = vweird.f32 %v5305_v58 }
 0x5bd   : > { %5308 = vrcp.f32 %v2885_v33  ;;  %v2837_v12 = vpop.f32.mrf.mxu2  ;;  %vm2895_vm8 = vmor %vm2893_vm12, %vm2894_vm0  ;;  %v2914_v26 = vand.u32 2147483648, %v2885_v33  ;;  %v2912_v46 = vand.u32 2147483647, %v2885_v33  ;;  %vm2908_vm1 = vweird.f32 %v2885_v33 }
 0x5be   : > { %v2870_v41 = vadd.f32 %v2869_v1, %v2837_v12  ;;  %v2890_v53 = vsub.f32 1.0, %v2889_v7  ;;  %v5378_v1 = vmov 32.0  }
 0x5bf   : > { %v2915_v56 = vor.u32 1.1754944e-38, %v2914_v26  ;;  %vm2913_vm0 = vcmp.eq.f32.partialorder %v2912_v46, 8.507059e+37 }
 0x5c0   : > { %v2875_v2 = vsub.f32 0.0, %v2870_v41  ;;  %v2891_v25 = vmul.f32 %v5305_v58, %v2890_v53 }
 0x5c2   : > { %v5307_v55 = vpop.eup %5306  ;;  %v2882_v34 = vmul.f32 1.442695, %v2875_v2  ;;  %v2892_v45 = vadd.f32 %v5305_v58, %v2891_v25 }
 0x5c3   : > { %v5309_v0 = vpop.eup %5308  ;;  %v2886_v51 = vadd.f32 1.0, %v5307_v55 }
 0x5c4   : > { %5310 = vpow2.f32 %v2882_v34  ;;  %v2896_v29 = vsel %vm2895_vm8, %v5305_v58, %v2892_v45  ;;  %v2904_v49 = vmul.f32 %v5309_v0, %v2885_v33  ;;  %vm2909_vm11 = vweird.f32 %v5309_v0 }
 0x5c5   : > { %5312 = vrcp.f32 %v2886_v51  ;;  %v2901_v40 = vsel %vm2898_vm4, %v2900_v27, %v2896_v29  ;;  %vm2910_vm6 = vmor %vm2908_vm1, %vm2909_vm11  ;;  %v2929_v30 = vand.u32 2147483648, %v2886_v51  ;;  %v2927_v18 = vand.u32 2147483647, %v2886_v51 }
 0x5c6   : > { %2950 = vperm.xlu1 %5297, %v2901_v40   ;;  %v2905_v54 = vsub.f32 1.0, %v2904_v49  ;;  %vm2923_vm12 = vweird.f32 %v2886_v51 }
 0x5c7   : > { %v2930_v13 = vor.u32 1.1754944e-38, %v2929_v30  ;;  %vm2928_vm5 = vcmp.eq.f32.partialorder %v2927_v18, 8.507059e+37 }
 0x5c8   : > { %v2906_v63 = vmul.f32 %v5309_v0, %v2905_v54 }
 0x5ca   : > { %v5311_v39 = vpop.eup %5310  ;;  %v2907_v35 = vadd.f32 %v5309_v0, %v2906_v63 }
 0x5cb   : > { %v5313_v48 = vpop.eup %5312  ;;  %v2887_v3 = vadd.f32 1.0, %v5311_v39 }
 0x5cc   : > { %v2911_v37 = vsel %vm2910_vm6, %v5309_v0, %v2907_v35  ;;  %v2919_v52 = vmul.f32 %v5313_v48, %v2886_v51  ;;  %vm2924_vm4 = vweird.f32 %v5313_v48 }
 0x5cd   : > { %5314 = vrcp.f32 %v2887_v3  ;;  %v2916_v60 = vsel %vm2913_vm0, %v2915_v56, %v2911_v37  ;;  %vm2925_vm8 = vmor %vm2923_vm12, %vm2924_vm4  ;;  %v2944_v20 = vand.u32 2147483648, %v2887_v3  ;;  %v2942_v47 = vand.u32 2147483647, %v2887_v3 }
 0x5ce   : > { %2955 = vperm.xlu2 %5295, %v2916_v60   ;;  %v2920_v61 = vsub.f32 1.0, %v2919_v52  ;;  %vm2938_vm6 = vweird.f32 %v2887_v3  ;;  %5316 = vrcp.f32 %v5378_v1 }
 0x5cf   : > { %v2945_v57 = vor.u32 1.1754944e-38, %v2944_v20  ;;  %vm2943_vm0 = vcmp.eq.f32.partialorder %v2942_v47, 8.507059e+37 }
 0x5d0   : > { %v2921_v9 = vmul.f32 %v5313_v48, %v2920_v61 }
 0x5d2   : > { %v2922_v4 = vadd.f32 %v5313_v48, %v2921_v9 }
 0x5d3   : > { %v5315_v31 = vpop.eup %5314 }
 0x5d4   : > { %v2926_v43 = vsel %vm2925_vm8, %v5313_v48, %v2922_v4  ;;  %v2934_v16 = vmul.f32 %v5315_v31, %v2887_v3  ;;  %vm2939_vm1 = vweird.f32 %v5315_v31  ;;  %v5317_v53 = vpop.eup %5316 }
 0x5d5   : > { %v2931_v44 = vsel %vm2928_vm5, %v2930_v13, %v2926_v43  ;;  %vm2940_vm11 = vmor %vm2938_vm6, %vm2939_vm1  ;;  %v2995_v45 = vmul.f32 32.0, %v5317_v53  ;;  %vm2999_vm5 = vweird.f32 %v5317_v53 }
 0x5d6   : > { %2960 = vperm.xlu0 %5296, %v2931_v44   ;;  %v2935_v42 = vsub.f32 1.0, %v2934_v16 }
 0x5d7   : > { %v2996_v29 = vsub.f32 1.0, %v2995_v45 }
 0x5d8   : > { %v2936_v22 = vmul.f32 %v5315_v31, %v2935_v42 }
 0x5d9   : > { %v2997_v39 = vmul.f32 %v5317_v53, %v2996_v29 }
 0x5da   : > { %v2937_v11 = vadd.f32 %v5315_v31, %v2936_v22 }
 0x5db   : > { %v2998_v61 = vadd.f32 %v5317_v53, %v2997_v39  ;;  %v9232_v39 = vld [vmem:[#allocation6_spill] sm:$0xff] }
 0x5dc   : > { %v2941_v58 = vsel %vm2940_vm11, %v5315_v31, %v2937_v11  ;;  %vm3028_vm4 = vcmp.ge.s32.totalorder %v9232_v39, 3  ;;  %vm3025_vm11 = vcmp.lt.s32.totalorder %v9213_v59, 51 }
 0x5dd   : > { %v2946_v33 = vsel %vm2943_vm0, %v2945_v57, %v2941_v58  ;;  %v3000_v16 = vsel %vm2999_vm5, %v5317_v53, %v2998_v61 }
 0x5de   : > { %2965 = vperm.xlu1 %5297, %v2946_v33  }
 0x628   : > { %v2956_v12 = vpop.permute.xlu2 %2955 }
 0x629   : > { %v7328_v25 = vmul.f32 %v2956_v12, %v7270_v38  ;;  %v7331_v21 = vmul.f32 %v2956_v12, %v7272_v28 }
 0x638   : > { %v2951_v7 = vpop.permute.xlu1 %2950 }
 0x639   : > { %v7322_v62 = vmul.f32 %v2951_v7, %v7286_v10  ;;  %v7325_v2 = vmul.f32 %v2951_v7, %v7288_v50 }
 0x63b   : > { %v2976_v10 = vadd.f32 %v7328_v25, %v7322_v62  ;;  %v2985_v50 = vadd.f32 %v7331_v21, %v7325_v2 }
 0x648   : > { %v2961_v41 = vpop.permute.xlu0 %2960 }
 0x649   : > { %v7334_v55 = vmul.f32 %v2961_v41, %v7278_v23  ;;  %v7337_v34 = vmul.f32 %v2961_v41, %v7280_v24 }
 0x64b   : > { %v2977_v38 = vadd.f32 %v2976_v10, %v7334_v55  ;;  %v2986_v51 = vadd.f32 %v2985_v50, %v7337_v34  ;;  %v3003_v24 = vmax.f32 %v7322_v62, %v7334_v55  ;;  %v3012_v27 = vmax.f32 %v7325_v2, %v7337_v34 }
 0x650   : > { %v2966_v0 = vpop.permute.xlu1 %2965 }
 0x651   : > { %v7346_v28 = vmul.f32 %v2966_v0, %v7290_v14  ;;  %v7349_v23 = vmul.f32 %v2966_v0, %v7292_v15 }
 0x653   : > { %9230 = vst [vmem:[#allocation26_spill] sm:$0xff] %v7346_v28  ;;  %v2978_v49 = vadd.f32 %v2977_v38, %v7346_v28  ;;  %v2987_v40 = vadd.f32 %v2986_v51, %v7349_v23  ;;  %v3004_v54 = vmax.f32 %v7328_v25, %v7346_v28  ;;  %v3013_v14 = vmax.f32 %v7331_v21, %v7349_v23 }
 0x654   : > { %9231 = vst [vmem:[#allocation27_spill] sm:$0xff] %v7349_v23 }
 0x655   : > { %v2979_v26 = vrot.slane %v2978_v49, 4  ;;  %v2988_v15 = vrot.slane %v2987_v40, 4  ;;  %v3005_v63 = vmax.f32 %v3003_v24, %v3004_v54  ;;  %v3014_v46 = vmax.f32 %v3012_v27, %v3013_v14 }
 0x657   : > { %v2980_v35 = vadd.f32 %v2979_v26, %v2978_v49  ;;  %v2989_v48 = vadd.f32 %v2988_v15, %v2987_v40  ;;  %v3006_v3 = vrot.slane %v3005_v63, 4  ;;  %v3015_v56 = vrot.slane %v3014_v46, 4 }
 0x659   : > { %v2981_v37 = vrot.slane %v2980_v35, 2  ;;  %v2990_v52 = vrot.slane %v2989_v48, 2  ;;  %v3007_v60 = vmax.f32 %v3005_v63, %v3006_v3  ;;  %v3016_v30 = vmax.f32 %v3014_v46, %v3015_v56  ;;  %v9235_v3 = vld [vmem:[#allocation11_spill] sm:$0xff] }
 0x65a   : > { %vm3031_vm1 = vcmp.ge.s32.totalorder %v9235_v3, 3  ;;  %vm3068_vm15 = vcmp.ge.s32.totalorder %v9235_v3, 2  ;;  %vm9182_vm2 = vcmp.lt.s32.totalorder %v9235_v3, 14 }
 0x65b   : > { %v2982_v9 = vadd.f32 %v2981_v37, %v2980_v35  ;;  %v2991_v18 = vadd.f32 %v2990_v52, %v2989_v48  ;;  %v3008_v4 = vrot.slane %v3007_v60, 2  ;;  %v3017_v44 = vrot.slane %v3016_v30, 2  ;;  %v9233_v35 = vld [vmem:[#allocation10_spill] sm:$0xff]  ;;  %v9234_v48 = vld [vmem:[#allocation7_spill] sm:$0xff] }
 0x65c   : > { %vm3030_vm12 = vcmp.ge.s32.totalorder %v9233_v35, 3  ;;  %vm3029_vm8 = vcmp.ge.s32.totalorder %v9234_v48, 3  ;;  %vm9183_vm5 = vcmp.ge.s32.totalorder %v9233_v35, 2 }
 0x65d   : > { %v2983_v31 = vrot.slane %v2982_v9, 1  ;;  %v2992_v13 = vrot.slane %v2991_v18, 1  ;;  %v3009_v43 = vmax.f32 %v3007_v60, %v3008_v4  ;;  %v3018_v58 = vmax.f32 %v3016_v30, %v3017_v44  ;;  %vm3032_vm6 = vmand %vm3028_vm4, %vm3030_vm12 }
 0x65e   : > { %vm3033_vm0 = vmand %vm3029_vm8, %vm3031_vm1  ;;  %v9236_v30 = vmov 0.0  }
 0x65f   : > { %v2984_v42 = vadd.f32 %v2983_v31, %v2982_v9  ;;  %v2993_v20 = vadd.f32 %v2992_v13, %v2991_v18  ;;  %v3010_v22 = vrot.slane %v3009_v43, 1  ;;  %v3019_v33 = vrot.slane %v3018_v58, 1  ;;  %vm7506_vm14 = vmand %vm3028_vm4, %vm9183_vm5 }
 0x660   : > { %v5027_v9 = vsel %vm3032_vm6, 1.0, %v9236_v30  ;;  %v5028_v18 = vsel %vm3033_vm0, 1.0, %v9236_v30  ;;  %vm7514_vm6 = vmand %vm3029_vm8, %vm3068_vm15 }
 0x661   : > { %v7361_v47 = vmul.f32 %v3000_v16, %v2984_v42  ;;  %v7363_v11 = vmul.f32 %v3000_v16, %v2993_v20  ;;  %v7365_v57 = vmax.f32 %v3009_v43, %v3010_v22  ;;  %v7370_v1 = vmax.f32 %v3018_v58, %v3019_v33  ;;  %vm3104_vm0 = vmand %vm3028_vm4, %vm394_vm3 }
 0x662   : > { %v5034_v43 = vsel %vm3104_vm0, 1.0, %v9236_v30  ;;  %vm3207_vm0 = vcmp.lt.s32.totalorder %v9233_v35, 14  ;;  %vm3210_vm7 = vmand %vm3029_vm8, %vm9182_vm2  ;;  %vm3241_vm2 = vcmp.lt.s32.totalorder %v9213_v59, 45 }
 0x663   : > { %3023 = vrot.lane.b32.xlu2 %v7363_v11, %s5379_s25  ;;  %3040 = vrot.lane.b32.xlu1 %v7365_v57, %s5379_s25 }
 0x664   : > { %3021 = vrot.lane.b32.xlu0 %v7361_v47, %s5379_s25 }
 0x66b   : > { %3062 = vrot.lane.b32.xlu1 %v7363_v11, %s5380_s26  ;;  %3060 = vrot.lane.b32.xlu2 %v7361_v47, %s5380_s26 }
 0x66c   : > { %3042 = vrot.lane.b32.xlu0 %v7370_v1, %s5379_s25  ;;  %s5391_s25 = smov 30  }
 0x673   : > { %3097 = vrot.lane.b32.xlu1 %v7361_v47, %s5381_s14  ;;  %3079 = vrot.lane.b32.xlu2 %v7370_v1, %s5380_s26 }
 0x674   : > { %3077 = vrot.lane.b32.xlu0 %v7365_v57, %s5380_s26  ;;  %s5392_s26 = smov 29  }
 0x67b   : > { %3114 = vrot.lane.b32.xlu1 %v7370_v1, %s5381_s14  ;;  %3112 = vrot.lane.b32.xlu2 %v7365_v57, %s5381_s14 }
 0x67c   : > { %3099 = vrot.lane.b32.xlu0 %v7363_v11, %s5381_s14  ;;  %s5393_s14 = smov 19  }
 0x683   : > { %3145 = vrot.lane.b32.xlu1 %v7365_v57, %s5382_s29  ;;  %3134 = vrot.lane.b32.xlu2 %v7363_v11, %s5382_s29 }
 0x684   : > { %3132 = vrot.lane.b32.xlu0 %v7361_v47, %s5382_s29 }
 0x68b   : > { %3167 = vrot.lane.b32.xlu1 %v7363_v11, %s5383_s30  ;;  %3165 = vrot.lane.b32.xlu2 %v7361_v47, %s5383_s30 }
 0x68c   : > { %3147 = vrot.lane.b32.xlu0 %v7370_v1, %s5382_s29  ;;  %s5394_s29 = smov 18  }
 0x693   : > { %3200 = vrot.lane.b32.xlu1 %v7361_v47, %s5384_s9  ;;  %3182 = vrot.lane.b32.xlu2 %v7370_v1, %s5383_s30 }
 0x694   : > { %3180 = vrot.lane.b32.xlu0 %v7365_v57, %s5383_s30  ;;  %s7475_s30 = sld [smem:[#allocation2 + $0x31]] }
 0x69a   : > { %v3055_v22 = vstv %s7475_s30  ;;  %s7744_s30 = sld [smem:[#allocation2 + $0x37]] }
 0x69b   : > { %3219 = vrot.lane.b32.xlu1 %v7370_v1, %s5384_s9  ;;  %3217 = vrot.lane.b32.xlu2 %v7365_v57, %s5384_s9 }
 0x69c   : > { %3202 = vrot.lane.b32.xlu0 %v7363_v11, %s5384_s9  ;;  %s7485_s9 = sld [smem:[#allocation2]] }
 0x6a3   : > { %3254 = vrot.lane.b32.xlu1 %v7365_v57, %s5385_s10  ;;  %3239 = vrot.lane.b32.xlu2 %v7363_v11, %s5385_s10 }
 0x6a4   : > { %3237 = vrot.lane.b32.xlu0 %v7361_v47, %s5385_s10 }
 0x6ab   : > { %3276 = vrot.lane.b32.xlu1 %v7363_v11, %s5386_s11  ;;  %3274 = vrot.lane.b32.xlu2 %v7361_v47, %s5386_s11 }
 0x6ac   : > { %3256 = vrot.lane.b32.xlu0 %v7370_v1, %s5385_s10  ;;  %s7496_s10 = sld [smem:[#allocation2 + $0x1]] }
 0x6b2   : > { %v3086_v13 = vstv %s7496_s10  ;;  %s7815_s10 = sld [smem:[#allocation2 + $0x8]] }
 0x6b3   : > { %3311 = vrot.lane.b32.xlu1 %v7361_v47, %s5387_s12  ;;  %3293 = vrot.lane.b32.xlu2 %v7370_v1, %s5386_s11 }
 0x6b4   : > { %3291 = vrot.lane.b32.xlu0 %v7365_v57, %s5386_s11  ;;  %s7518_s11 = sld [smem:[#allocation2 + $0x32]] }
 0x6bb   : > { %3328 = vrot.lane.b32.xlu1 %v7370_v1, %s5387_s12  ;;  %3326 = vrot.lane.b32.xlu2 %v7365_v57, %s5387_s12 }
 0x6bc   : > { %3313 = vrot.lane.b32.xlu0 %v7363_v11, %s5387_s12  ;;  %s7528_s12 = sld [smem:[#allocation2 + $0x2]] }
 0x6bd   : > { %v7405_v7 = vpop.permute.xlu2 %3023 }
 0x6c3   : > { %3361 = vrot.lane.b32.xlu1 %v7365_v57, %s5388_s20  ;;  %3348 = vrot.lane.b32.xlu2 %v7363_v11, %s5388_s20 }
 0x6c4   : > { %3346 = vrot.lane.b32.xlu0 %v7361_v47, %s5388_s20 }
 0x6c5   : > { %v7410_v12 = vpop.permute.xlu2 %3060 }
 0x6cb   : > { %3383 = vrot.lane.b32.xlu1 %v7363_v11, %s5389_s21  ;;  %3381 = vrot.lane.b32.xlu2 %v7361_v47, %s5389_s21 }
 0x6cc   : > { %3363 = vrot.lane.b32.xlu0 %v7370_v1, %s5388_s20  ;;  %s7570_s20 = sld [smem:[#allocation2 + $0x33]] }
 0x6cd   : > { %v7415_v41 = vpop.permute.xlu2 %3079 }
 0x6d3   : > { %3414 = vrot.lane.b32.xlu1 %v7361_v47, %s5390_s23  ;;  %3396 = vrot.lane.b32.xlu2 %v7370_v1, %s5389_s21 }
 0x6d4   : > { %3394 = vrot.lane.b32.xlu0 %v7365_v57, %s5389_s21  ;;  %s7590_s21 = sld [smem:[#allocation2 + $0x3]] }
 0x6d5   : > { %v3041_v53 = vpop.permute.xlu1 %3040  ;;  %v7420_v45 = vpop.permute.xlu2 %3112 }
 0x6d6   : > { %v3022_v10 = vpop.permute.xlu0 %3021 }
 0x6d7   : > { %v3026_v4 = vsel %vm3025_vm11, %v3022_v10, %v7405_v7  ;;  %v3027_v31 = vsel %vm3025_vm11, %v7405_v7, %v3022_v10  ;;  %v3049_v7 = vstv %s7485_s9  ;;  %v5031_v10 = vsel %vm7514_vm6, 1.0, %v9236_v30  ;;  %s5395_s9 = smov 14  }
 0x6d8   : > { %v3038_v42 = vmul.f32 %v5027_v9, %v3027_v31  ;;  %v3039_v20 = vmul.f32 %v5028_v18, %v3026_v4  ;;  %vm9241_vm6 = vcmp.ge.s32.totalorder %v9235_v3, 1 }
 0x6d9   : > { %vm3105_vm13 = vmand %vm3029_vm8, %vm9241_vm6  ;;  %vm3169_vm6 = vcmp.lt.s32.totalorder %v9213_v59, 47 }
 0x6db   : > { %3431 = vrot.lane.b32.xlu1 %v7370_v1, %s5390_s23  ;;  %3429 = vrot.lane.b32.xlu2 %v7365_v57, %s5390_s23 }
 0x6dc   : > { %3416 = vrot.lane.b32.xlu0 %v7363_v11, %s5390_s23  ;;  %s7596_s23 = sld [smem:[#allocation2 + $0x4]] }
 0x6dd   : > { %v7425_v50 = vpop.permute.xlu1 %3062  ;;  %v7427_v0 = vpop.permute.xlu2 %3134 }
 0x6de   : > { %v3043_v38 = vpop.permute.xlu0 %3042 }
 0x6df   : > { %v3044_v60 = vsel %vm3025_vm11, %v3041_v53, %v3043_v38  ;;  %v3045_v61 = vsel %vm3025_vm11, %v3043_v38, %v3041_v53  ;;  %vm3064_vm11 = vcmp.lt.s32.totalorder %v9213_v59, 50  ;;  %v5030_v53 = vsel %vm7506_vm14, 1.0, %v9236_v30 }
 0x6e0   : > { %v3046_v16 = vmul.f32 %v5027_v9, %v3045_v61  ;;  %v3047_v44 = vmul.f32 %v5028_v18, %v3044_v60  ;;  %v3065_v60 = vsel %vm3064_vm11, %v7410_v12, %v7425_v50  ;;  %v3066_v61 = vsel %vm3064_vm11, %v7425_v50, %v7410_v12 }
 0x6e1   : > { %vm3101_vm14 = vcmp.lt.s32.totalorder %v9213_v59, 49  ;;  %v3050_v12 = vmul.f32 %v3049_v7, %v3038_v42  ;;  %v3051_v50 = vmul.f32 %v3049_v7, %v3039_v20  ;;  %v3075_v23 = vmul.f32 %v5030_v53, %v3066_v61 }
 0x6e2   : > { %v3056_v18 = vmul.f32 %v3055_v22, %v3046_v16  ;;  %v3057_v4 = vmul.f32 %v3055_v22, %v3047_v44  ;;  %v3076_v28 = vmul.f32 %v5031_v10, %v3065_v60  ;;  %v5035_v22 = vsel %vm3105_vm13, 1.0, %v9236_v30 }
 0x6e3   : > { %3464 = vrot.lane.b32.xlu1 %v7365_v57, %s5391_s25  ;;  %3451 = vrot.lane.b32.xlu2 %v7363_v11, %s5391_s25  ;;  %vm3136_vm13 = vcmp.lt.s32.totalorder %v9213_v59, 48 }
 0x6e4   : > { %3449 = vrot.lane.b32.xlu0 %v7361_v47, %s5391_s25  ;;  %v3058_v20 = vadd.f32 %v3056_v18, %v3050_v12  ;;  %v3059_v7 = vadd.f32 %v3057_v4, %v3051_v50  ;;  %v3088_v61 = vmul.f32 %v3086_v13, %v3076_v28  ;;  %v5038_v12 = vsel %vm3028_vm4, 1.0, %v9236_v30 }
 0x6e5   : > { %v7432_v51 = vpop.permute.xlu1 %3097  ;;  %v7434_v24 = vpop.permute.xlu2 %3165 }
 0x6e6   : > { %v7436_v27 = vpop.permute.xlu0 %3077 }
 0x6e7   : > { %v3082_v9 = vsel %vm3064_vm11, %v7415_v41, %v7436_v27  ;;  %v3081_v31 = vsel %vm3064_vm11, %v7436_v27, %v7415_v41  ;;  %v3092_v27 = vstv %s7518_s11  ;;  %vm7629_vm11 = vmand %vm3028_vm4, %vm686_vm9  ;;  %s5396_s11 = smov 13  }
 0x6e8   : > { %v3083_v16 = vmul.f32 %v5030_v53, %v3082_v9  ;;  %v3084_v44 = vmul.f32 %v5031_v10, %v3081_v31  ;;  %v3121_v53 = vstv %s7528_s12  ;;  %s7864_s12 = sld [smem:[#allocation2 + $0x39]] }
 0x6ea   : > { %v3093_v9 = vmul.f32 %v3092_v27, %v3083_v16  ;;  %v3094_v4 = vmul.f32 %v3092_v27, %v3084_v44 }
 0x6eb   : > { %3486 = vrot.lane.b32.xlu1 %v7363_v11, %s5392_s26  ;;  %3484 = vrot.lane.b32.xlu2 %v7361_v47, %s5392_s26 }
 0x6ec   : > { %3466 = vrot.lane.b32.xlu0 %v7370_v1, %s5391_s25  ;;  %s7667_s25 = sld [smem:[#allocation2 + $0x35]] }
 0x6ed   : > { %v7441_v29 = vpop.permute.xlu1 %3114  ;;  %v7443_v49 = vpop.permute.xlu2 %3182 }
 0x6ee   : > { %v7445_v40 = vpop.permute.xlu0 %3099  ;;  %v3117_v28 = vsel %vm3101_vm14, %v7441_v29, %v7420_v45 }
 0x6ef   : > { %v3103_v41 = vsel %vm3101_vm14, %v7445_v40, %v7432_v51  ;;  %v3102_v42 = vsel %vm3101_vm14, %v7432_v51, %v7445_v40  ;;  %v3087_v40 = vmul.f32 %v3086_v13, %v3075_v23  ;;  %v5039_v23 = vsel %vm3029_vm8, 1.0, %v9236_v30 }
 0x6f0   : > { %v3110_v10 = vmul.f32 %v5034_v43, %v3103_v41  ;;  %v3111_v31 = vmul.f32 %v5035_v22, %v3102_v42  ;;  %v3090_v41 = vadd.f32 %v3088_v61, %v3059_v7  ;;  %v3116_v13 = vsel %vm3101_vm14, %v7420_v45, %v7441_v29  ;;  %vm7646_vm14 = vmand %vm3029_vm8, %vm687_vm10 }
 0x6f1   : > { %v3089_v50 = vadd.f32 %v3087_v40, %v3058_v20  ;;  %v3127_v20 = vstv %s7570_s20  ;;  %v3118_v61 = vmul.f32 %v5034_v43, %v3117_v28  ;;  %s7871_s20 = sld [smem:[#allocation2 + $0x9]] }
 0x6f2   : > { %v3122_v16 = vmul.f32 %v3121_v53, %v3110_v10  ;;  %v3123_v7 = vmul.f32 %v3121_v53, %v3111_v31  ;;  %v3096_v40 = vadd.f32 %v3094_v4, %v3090_v41  ;;  %v5042_v41 = vsel %vm7629_vm11, 1.0, %v9236_v30 }
 0x6f3   : > { %3519 = vrot.lane.b32.xlu1 %v7361_v47, %s5393_s14  ;;  %3501 = vrot.lane.b32.xlu2 %v7370_v1, %s5392_s26  ;;  %v3095_v42 = vadd.f32 %v3093_v9, %v3089_v50  ;;  %v3154_v9 = vstv %s7590_s21  ;;  %vm3204_vm11 = vcmp.lt.s32.totalorder %v9213_v59, 46  ;;  %v5047_v53 = vsel %vm3210_vm7, 1.0, %v9236_v30  ;;  %s7884_s21 = sld [smem:[#allocation2 + $0x3a]] }
 0x6f4   : > { %3499 = vrot.lane.b32.xlu0 %v7365_v57, %s5392_s26  ;;  %v3125_v50 = vadd.f32 %v3123_v7, %v3096_v40  ;;  %s7725_s26 = sld [smem:[#allocation2 + $0x36]] }
 0x6f5   : > { %v7450_v54 = vpop.permute.xlu1 %3145  ;;  %v7452_v14 = vpop.permute.xlu2 %3217 }
 0x6f6   : > { %v7454_v26 = vpop.permute.xlu0 %3132 }
 0x6f7   : > { %v3137_v27 = vsel %vm3136_vm13, %v7454_v26, %v7427_v0  ;;  %v3138_v44 = vsel %vm3136_vm13, %v7427_v0, %v7454_v26  ;;  %v3119_v0 = vmul.f32 %v5035_v22, %v3116_v13  ;;  %v3124_v22 = vadd.f32 %v3122_v16, %v3095_v42 }
 0x6f8   : > { %v3143_v26 = vmul.f32 %v5038_v12, %v3138_v44  ;;  %v3144_v43 = vmul.f32 %v5039_v23, %v3137_v27  ;;  %v3128_v13 = vmul.f32 %v3127_v20, %v3118_v61  ;;  %v5043_v16 = vsel %vm7646_vm14, 1.0, %v9236_v30 }
 0x6f9   : > { %v3129_v42 = vmul.f32 %v3127_v20, %v3119_v0  ;;  %vm3244_vm14 = vcmp.lt.s32.totalorder %v9233_v35, 13 }
 0x6fa   : > { %v3156_v7 = vmul.f32 %v3154_v9, %v3144_v43  ;;  %v3130_v40 = vadd.f32 %v3128_v13, %v3124_v22  ;;  %vm3246_vm7 = vmand %vm3028_vm4, %vm3244_vm14 }
 0x6fb   : > { %3536 = vrot.lane.b32.xlu1 %v7370_v1, %s5393_s14  ;;  %3534 = vrot.lane.b32.xlu2 %v7365_v57, %s5393_s14  ;;  %v3131_v45 = vadd.f32 %v3129_v42, %v3125_v50 }
 0x6fc   : > { %3521 = vrot.lane.b32.xlu0 %v7363_v11, %s5393_s14  ;;  %s7738_s14 = sld [smem:[#allocation2 + $0x6]] }
 0x6fd   : > { %v7459_v15 = vpop.permute.xlu1 %3167  ;;  %v7461_v63 = vpop.permute.xlu2 %3239 }
 0x6fe   : > { %v7463_v46 = vpop.permute.xlu0 %3147  ;;  %v3170_v61 = vsel %vm3169_vm6, %v7434_v24, %v7459_v15 }
 0x6ff   : > { %v3150_v29 = vsel %vm3136_vm13, %v7463_v46, %v7450_v54  ;;  %v3149_v10 = vsel %vm3136_vm13, %v7450_v54, %v7463_v46  ;;  %v3189_v54 = vstv %s7596_s23  ;;  %vm3209_vm13 = vmand %vm3028_vm4, %vm3207_vm0  ;;  %v3179_v22 = vmul.f32 %v5043_v16, %v3170_v61  ;;  %s7908_s23 = sld [smem:[#allocation2 + $0xa]] }
 0x700   : > { %v3151_v46 = vmul.f32 %v5038_v12, %v3150_v29  ;;  %v3152_v44 = vmul.f32 %v5039_v23, %v3149_v10  ;;  %v3155_v12 = vmul.f32 %v3154_v9, %v3143_v26  ;;  %v3171_v23 = vsel %vm3169_vm6, %v7459_v15, %v7434_v24 }
 0x701   : > { %v5046_v20 = vsel %vm3209_vm13, 1.0, %v9236_v30  ;;  %vm3245_vm13 = vcmp.lt.s32.totalorder %v9235_v3, 13  ;;  %v3158_v15 = vadd.f32 %v3156_v7, %v3131_v45  ;;  %v3178_v10 = vmul.f32 %v5042_v41, %v3171_v23 }
 0x702   : > { %v3157_v24 = vadd.f32 %v3155_v12, %v3130_v40  ;;  %v3191_v7 = vmul.f32 %v3189_v54, %v3179_v22  ;;  %v5050_v23 = vsel %vm3246_vm7, 1.0, %v9236_v30  ;;  %vm3281_vm4 = vcmp.ge.s32.totalorder %v9232_v39, 2 }
 0x703   : > { %3569 = vrot.lane.b32.xlu1 %v7365_v57, %s5394_s29  ;;  %3556 = vrot.lane.b32.xlu2 %v7363_v11, %s5394_s29  ;;  %vm3278_vm7 = vcmp.lt.s32.totalorder %v9213_v59, 35 }
 0x704   : > { %3554 = vrot.lane.b32.xlu0 %v7361_v47, %s5394_s29 }
 0x705   : > { %v7477_v56 = vpop.permute.xlu1 %3200  ;;  %v7479_v37 = vpop.permute.xlu2 %3274 }
 0x706   : > { %v7487_v52 = vpop.permute.xlu0 %3180 }
 0x707   : > { %v3184_v0 = vsel %vm3169_vm6, %v7487_v52, %v7443_v49  ;;  %v3185_v26 = vsel %vm3169_vm6, %v7443_v49, %v7487_v52  ;;  %vm3247_vm6 = vmand %vm3029_vm8, %vm3245_vm13  ;;  %vm3282_vm8 = vcmp.ge.s32.totalorder %v9234_v48, 2 }
 0x708   : > { %v3186_v49 = vmul.f32 %v5042_v41, %v3185_v26  ;;  %v3187_v52 = vmul.f32 %v5043_v16, %v3184_v0  ;;  %v5051_v26 = vsel %vm3247_vm6, 1.0, %v9236_v30  ;;  %vm3284_vm6 = vmand %vm3282_vm8, %vm3031_vm1 }
 0x70b   : > { %3591 = vrot.lane.b32.xlu1 %v7363_v11, %s5368_s16  ;;  %3589 = vrot.lane.b32.xlu2 %v7361_v47, %s5368_s16 }
 0x70c   : > { %3571 = vrot.lane.b32.xlu0 %v7370_v1, %s5394_s29  ;;  %s7741_s29 = sld [smem:[#allocation2 + $0x7]] }
 0x70d   : > { %v7530_v58 = vpop.permute.xlu1 %3219  ;;  %v7532_v33 = vpop.permute.xlu2 %3293 }
 0x70e   : > { %v7545_v38 = vpop.permute.xlu0 %3202  ;;  %v3222_v0 = vsel %vm3204_vm11, %v7530_v58, %v7452_v14 }
 0x70f   : > { %v3205_v9 = vsel %vm3204_vm11, %v7477_v56, %v7545_v38  ;;  %v3206_v50 = vsel %vm3204_vm11, %v7545_v38, %v7477_v56  ;;  %v3190_v56 = vmul.f32 %v3189_v54, %v3178_v10 }
 0x710   : > { %v3215_v38 = vmul.f32 %v5046_v20, %v3206_v50  ;;  %v3216_v12 = vmul.f32 %v5047_v53, %v3205_v9 }
 0x713   : > { %3617 = vrot.lane.b32.xlu1 %v7361_v47, %s5367_s15  ;;  %3599 = vrot.lane.b32.xlu2 %v7370_v1, %s5368_s16 }
 0x714   : > { %3597 = vrot.lane.b32.xlu0 %v7365_v57, %s5368_s16  ;;  %s7603_s16 = sld [smem:[#allocation2 + $0x34]] }
 0x715   : > { %v7592_v60 = vpop.permute.xlu1 %3254  ;;  %v7594_v51 = vpop.permute.xlu2 %3326 }
 0x716   : > { %v7598_v18 = vpop.permute.xlu0 %3237 }
 0x71a   : > { %v3160_v27 = vstv %s7603_s16  ;;  %s5397_s16 = smov 3  }
 0x71b   : > { %3627 = vrot.lane.b32.xlu1 %v7370_v1, %s5367_s15  ;;  %3625 = vrot.lane.b32.xlu2 %v7365_v57, %s5367_s15  ;;  %v3161_v29 = vmul.f32 %v3160_v27, %v3151_v46  ;;  %v3162_v43 = vmul.f32 %v3160_v27, %v3152_v44  ;;  %v3195_v44 = vstv %s7667_s25  ;;  %s7915_s25 = sld [smem:[#allocation2 + $0x3b]] }
 0x71c   : > { %3619 = vrot.lane.b32.xlu0 %v7363_v11, %s5367_s15  ;;  %s7679_s15 = sld [smem:[#allocation2 + $0x5]]  ;;  %v3196_v40 = vmul.f32 %v3195_v44, %v3186_v49  ;;  %v3197_v61 = vmul.f32 %v3195_v44, %v3187_v52  ;;  %v3263_v44 = vstv %s7738_s14  ;;  %s5398_s14 = smov 2  }
 0x71d   : > { %v7659_v31 = vpop.permute.xlu1 %3276  ;;  %v7661_v4 = vpop.permute.xlu2 %3348  ;;  %v3163_v27 = vadd.f32 %v3161_v29, %v3157_v24  ;;  %v3164_v16 = vadd.f32 %v3162_v43, %v3158_v15  ;;  %v3221_v29 = vsel %vm3204_vm11, %v7452_v14, %v7530_v58  ;;  %v3242_v43 = vsel %vm3241_vm2, %v7598_v18, %v7461_v63  ;;  %vm3283_vm11 = vmand %vm3281_vm4, %vm3030_vm12 }
 0x71e   : > { %v7673_v28 = vpop.permute.xlu0 %3256  ;;  %v3243_v24 = vsel %vm3241_vm2, %v7461_v63, %v7598_v18  ;;  %v3223_v18 = vmul.f32 %v5046_v20, %v3222_v0  ;;  %v3224_v10 = vmul.f32 %v5047_v53, %v3221_v29  ;;  %v3253_v9 = vmul.f32 %v5051_v26, %v3242_v43 }
 0x71f   : > { %v3192_v45 = vadd.f32 %v3190_v56, %v3163_v27  ;;  %v3193_v54 = vadd.f32 %v3191_v7, %v3164_v16  ;;  %v3252_v52 = vmul.f32 %v5050_v23, %v3243_v24  ;;  %v3258_v50 = vsel %vm3241_vm2, %v7592_v60, %v7673_v28 }
 0x720   : > { %v3259_v20 = vsel %vm3241_vm2, %v7673_v28, %v7592_v60  ;;  %v3232_v27 = vstv %s7725_s26  ;;  %v3300_v56 = vstv %s7741_s29  ;;  %v3261_v60 = vmul.f32 %v5051_v26, %v3258_v50  ;;  %vm7803_vm2 = vmand %vm3281_vm4, %vm9183_vm5  ;;  %s7946_s26 = sld [smem:[#allocation2 + $0x3c]] }
 0x721   : > { %v3198_v15 = vadd.f32 %v3196_v40, %v3192_v45  ;;  %v3199_v63 = vadd.f32 %v3197_v61, %v3193_v54  ;;  %v3260_v7 = vmul.f32 %v5050_v23, %v3259_v20  ;;  %v3233_v40 = vmul.f32 %v3232_v27, %v3223_v18  ;;  %s7976_s29 = sld [smem:[#allocation2 + $0xc]] }
 0x722   : > { %v3226_v42 = vstv %s7679_s15  ;;  %v3234_v61 = vmul.f32 %v3232_v27, %v3224_v10  ;;  %v3264_v45 = vmul.f32 %v3263_v44, %v3252_v52  ;;  %v3265_v29 = vmul.f32 %v3263_v44, %v3253_v9  ;;  %s7928_s15 = sld [smem:[#allocation2 + $0xb]] }
 0x723   : > { %3653 = vrot.lane.b32.xlu1 %v7365_v57, %s5369_s17  ;;  %3647 = vrot.lane.b32.xlu2 %v7363_v11, %s5369_s17  ;;  %v3227_v14 = vmul.f32 %v3226_v42, %v3215_v38  ;;  %v3228_v58 = vmul.f32 %v3226_v42, %v3216_v12  ;;  %v5054_v38 = vsel %vm3283_vm11, 1.0, %v9236_v30  ;;  %v3269_v12 = vstv %s7744_s30  ;;  %vm7811_vm11 = vmand %vm3282_vm8, %vm3068_vm15  ;;  %s8011_s30 = sld [smem:[#allocation2 + $0x3d]] }
 0x724   : > { %3645 = vrot.lane.b32.xlu0 %v7361_v47, %s5369_s17  ;;  %v5055_v23 = vsel %vm3284_vm6, 1.0, %v9236_v30  ;;  %v3279_v26 = vsel %vm3278_vm7, %v7479_v37, %v7659_v31  ;;  %v3280_v54 = vsel %vm3278_vm7, %v7659_v31, %v7479_v37  ;;  %vm3315_vm5 = vcmp.lt.s32.totalorder %v9213_v59, 34 }
 0x725   : > { %v7720_v46 = vpop.permute.xlu1 %3311  ;;  %v7722_v13 = vpop.permute.xlu2 %3381  ;;  %v3229_v16 = vadd.f32 %v3227_v14, %v3198_v15  ;;  %v3230_v42 = vadd.f32 %v3228_v58, %v3199_v63  ;;  %v3270_v31 = vmul.f32 %v3269_v12, %v3260_v7  ;;  %v3271_v58 = vmul.f32 %v3269_v12, %v3261_v60 }
 0x726   : > { %v7731_v41 = vpop.permute.xlu0 %3291  ;;  %v5058_v15 = vsel %vm7803_vm2, 1.0, %v9236_v30  ;;  %v5059_v63 = vsel %vm7811_vm11, 1.0, %v9236_v30  ;;  %v3290_v9 = vmul.f32 %v5055_v23, %v3279_v26  ;;  %vm9252_vm6 = vcmp.ge.s32.totalorder %v9235_v3, 1 }
 0x727   : > { %v3235_v43 = vadd.f32 %v3233_v40, %v3229_v16  ;;  %v3236_v24 = vadd.f32 %v3234_v61, %v3230_v42  ;;  %v3295_v14 = vsel %vm3278_vm7, %v7731_v41, %v7532_v33  ;;  %v3296_v37 = vsel %vm3278_vm7, %v7532_v33, %v7731_v41  ;;  %vm7860_vm7 = vmand %vm3281_vm4, %vm394_vm3 }
 0x728   : > { %v3289_v41 = vmul.f32 %v5054_v38, %v3280_v54  ;;  %v3297_v20 = vmul.f32 %v5054_v38, %v3296_v37  ;;  %v3298_v27 = vmul.f32 %v5055_v23, %v3295_v14  ;;  %vm3354_vm2 = vmand %vm3282_vm8, %vm9252_vm6  ;;  %v3302_v40 = vmul.f32 %v3300_v56, %v3290_v9 }
 0x729   : > { %v3266_v52 = vadd.f32 %v3264_v45, %v3235_v43  ;;  %v3267_v33 = vadd.f32 %v3265_v29, %v3236_v24  ;;  %vm3350_vm11 = vcmp.lt.s32.totalorder %v9213_v59, 33  ;;  %v5062_v29 = vsel %vm7860_vm7, 1.0, %v9236_v30  ;;  %vm3421_vm7 = vmand %vm3281_vm4, %vm686_vm9 }
 0x72a   : > { %v3301_v60 = vmul.f32 %v3300_v56, %v3289_v41  ;;  %v5063_v0 = vsel %vm3354_vm2, 1.0, %v9236_v30  ;;  %vm3422_vm6 = vmand %vm3282_vm8, %vm687_vm10  ;;  %vm3418_vm2 = vcmp.lt.s32.totalorder %v9213_v59, 31 }
 0x72b   : > { %3675 = vrot.lane.b32.xlu1 %v7363_v11, %s5395_s9  ;;  %3673 = vrot.lane.b32.xlu2 %v7361_v47, %s5395_s9  ;;  %v3272_v7 = vadd.f32 %v3270_v31, %v3266_v52  ;;  %v3273_v38 = vadd.f32 %v3271_v58, %v3267_v33 }
 0x72c   : > { %3655 = vrot.lane.b32.xlu0 %v7370_v1, %s5369_s17  ;;  %s7795_s17 = sld [smem:[#allocation2 + $0x38]] }
 0x72d   : > { %v7771_v22 = vpop.permute.xlu1 %3328  ;;  %v7773_v49 = vpop.permute.xlu2 %3396  ;;  %v3303_v56 = vadd.f32 %v3301_v60, %v3272_v7  ;;  %v3304_v23 = vadd.f32 %v3302_v40, %v3273_v38  ;;  %v3370_v7 = vstv %s7871_s20  ;;  %s5089_s20 = sld [smem:[#allocation2 + $0x40]] }
 0x72e   : > { %v3314_v53 = vpop.permute.xlu0 %3313  ;;  %v3330_v26 = vsel %vm3315_vm5, %v7594_v51, %v7771_v22  ;;  %v3331_v54 = vsel %vm3315_vm5, %v7771_v22, %v7594_v51 }
 0x72f   : > { %v3316_v44 = vsel %vm3315_vm5, %v7720_v46, %v3314_v53  ;;  %v3317_v16 = vsel %vm3315_vm5, %v3314_v53, %v7720_v46  ;;  %v3335_v46 = vstv %s7815_s10  ;;  %v3332_v9 = vmul.f32 %v5058_v15, %v3331_v54  ;;  %s8066_s10 = sld [smem:[#allocation2 + $0x3f]] }
 0x730   : > { %v3324_v53 = vmul.f32 %v5058_v15, %v3317_v16  ;;  %v3325_v28 = vmul.f32 %v5059_v63, %v3316_v44  ;;  %vm3385_vm5 = vcmp.lt.s32.totalorder %v9213_v59, 32 }
 0x732   : > { %v3306_v42 = vstv %s7795_s17  ;;  %v3336_v14 = vmul.f32 %v3335_v46, %v3324_v53  ;;  %v3337_v37 = vmul.f32 %v3335_v46, %v3325_v28  ;;  %v5066_v46 = vsel %vm3281_vm4, 1.0, %v9236_v30  ;;  %s8060_s17 = sld [smem:[#allocation2 + $0xe]] }
 0x733   : > { %3708 = vrot.lane.b32.xlu1 %v7361_v47, %s5396_s11  ;;  %3690 = vrot.lane.b32.xlu2 %v7370_v1, %s5395_s9  ;;  %v3307_v61 = vmul.f32 %v3306_v42, %v3297_v20  ;;  %v3308_v45 = vmul.f32 %v3306_v42, %v3298_v27  ;;  %v3333_v20 = vmul.f32 %v5059_v63, %v3330_v26  ;;  %v3341_v27 = vstv %s7864_s12  ;;  %s8086_s12 = sld [smem:[#allocation2 + $0xf]] }
 0x734   : > { %3688 = vrot.lane.b32.xlu0 %v7365_v57, %s5395_s9  ;;  %v3342_v63 = vmul.f32 %v3341_v27, %v3332_v9  ;;  %v5067_v53 = vsel %vm3282_vm8, 1.0, %v9236_v30  ;;  %v3409_v9 = vstv %s7915_s25  ;;  %s8017_s9 = sld [smem:[#allocation2 + $0xd]] }
 0x735   : > { %v3362_v18 = vpop.permute.xlu1 %3361  ;;  %v7847_v10 = vpop.permute.xlu2 %3429  ;;  %v3309_v33 = vadd.f32 %v3307_v61, %v3303_v56  ;;  %v3310_v41 = vadd.f32 %v3308_v45, %v3304_v23  ;;  %s5092_s25 = sld [smem:[#allocation2 + $0x11]] }
 0x736   : > { %v3347_v50 = vpop.permute.xlu0 %3346 }
 0x737   : > { %v3351_v31 = vsel %vm3350_vm11, %v3347_v50, %v7661_v4  ;;  %v3352_v58 = vsel %vm3350_vm11, %v7661_v4, %v3347_v50  ;;  %v3338_v42 = vadd.f32 %v3336_v14, %v3309_v33  ;;  %v3339_v12 = vadd.f32 %v3337_v37, %v3310_v41 }
 0x738   : > { %v3359_v44 = vmul.f32 %v5062_v29, %v3352_v58  ;;  %v3360_v16 = vmul.f32 %v5063_v0, %v3351_v31  ;;  %v3376_v50 = vstv %s7884_s21  ;;  %s5090_s21 = sld [smem:[#allocation2 + $0x10]] }
 0x739   : > { %v3344_v61 = vadd.f32 %v3342_v63, %v3338_v42  ;;  %v3438_v42 = vstv %s7928_s15  ;;  %s5093_s15 = sld [smem:[#allocation2 + $0x42]] }
 0x73a   : > { %v3371_v38 = vmul.f32 %v3370_v7, %v3359_v44  ;;  %v3372_v60 = vmul.f32 %v3370_v7, %v3360_v16 }
 0x73b   : > { %3725 = vrot.lane.b32.xlu1 %v7370_v1, %s5396_s11  ;;  %3723 = vrot.lane.b32.xlu2 %v7365_v57, %s5396_s11 }
 0x73c   : > { %3710 = vrot.lane.b32.xlu0 %v7363_v11, %s5396_s11  ;;  %v3373_v37 = vadd.f32 %v3371_v38, %v3344_v61  ;;  %s5399_s11 = smov 126  }
 0x73d   : > { %v3384_v43 = vpop.permute.xlu1 %3383  ;;  %v7894_v24 = vpop.permute.xlu2 %3451 }
 0x73e   : > { %v3364_v52 = vpop.permute.xlu0 %3363 }
 0x73f   : > { %v3365_v51 = vsel %vm3350_vm11, %v3362_v18, %v3364_v52  ;;  %v3366_v22 = vsel %vm3350_vm11, %v3364_v52, %v3362_v18  ;;  %v3343_v18 = vmul.f32 %v3341_v27, %v3333_v20  ;;  %v5070_v20 = vsel %vm3421_vm7, 1.0, %v9236_v30  ;;  %vm7983_vm11 = vmand %vm3281_vm4, %vm3207_vm0 }
 0x740   : > { %v3367_v4 = vmul.f32 %v5062_v29, %v3366_v22  ;;  %v3368_v15 = vmul.f32 %v5063_v0, %v3365_v51  ;;  %v3386_v29 = vsel %vm3385_vm5, %v7722_v13, %v3384_v43  ;;  %v3387_v0 = vsel %vm3385_vm5, %v3384_v43, %v7722_v13 }
 0x741   : > { %v3345_v45 = vadd.f32 %v3343_v18, %v3339_v12  ;;  %v3392_v58 = vmul.f32 %v5066_v46, %v3387_v0  ;;  %v3393_v52 = vmul.f32 %v5067_v53, %v3386_v29  ;;  %v3403_v13 = vstv %s7908_s23  ;;  %s5091_s23 = sld [smem:[#allocation2 + $0x41]] }
 0x742   : > { %v3377_v23 = vmul.f32 %v3376_v50, %v3367_v4  ;;  %v3378_v26 = vmul.f32 %v3376_v50, %v3368_v15  ;;  %v5071_v27 = vsel %vm3422_vm6, 1.0, %v9236_v30  ;;  %v3444_v29 = vstv %s7946_s26  ;;  %s5402_s26 = smov 114  }
 0x743   : > { %3756 = vrot.lane.b32.xlu1 %v7365_v57, %s5397_s16  ;;  %3745 = vrot.lane.b32.xlu2 %v7363_v11, %s5397_s16  ;;  %v3374_v31 = vadd.f32 %v3372_v60, %v3345_v45  ;;  %v3404_v51 = vmul.f32 %v3403_v13, %v3392_v58  ;;  %v3405_v22 = vmul.f32 %v3403_v13, %v3393_v52  ;;  %vm3453_vm6 = vcmp.lt.s32.totalorder %v9213_v59, 30 }
 0x744   : > { %3743 = vrot.lane.b32.xlu0 %v7361_v47, %s5397_s16  ;;  %v5074_v52 = vsel %vm7983_vm11, 1.0, %v9236_v30  ;;  %vm3492_vm11 = vmand %vm3282_vm8, %vm3245_vm13 }
 0x745   : > { %v3415_v28 = vpop.permute.xlu1 %3414  ;;  %v7926_v40 = vpop.permute.xlu2 %3484  ;;  %v3380_v41 = vadd.f32 %v3378_v26, %v3374_v31 }
 0x746   : > { %v3395_v56 = vpop.permute.xlu0 %3394 }
 0x747   : > { %v3398_v54 = vsel %vm3385_vm5, %v3395_v56, %v7773_v49  ;;  %v3399_v14 = vsel %vm3385_vm5, %v7773_v49, %v3395_v56  ;;  %v3379_v49 = vadd.f32 %v3377_v23, %v3373_v37  ;;  %v3407_v50 = vadd.f32 %v3405_v22, %v3380_v41 }
 0x748   : > { %v3400_v43 = vmul.f32 %v5066_v46, %v3399_v14  ;;  %v3401_v33 = vmul.f32 %v5067_v53, %v3398_v54  ;;  %vm9255_vm5 = vcmp.lt.s32.totalorder %v9235_v3, 14  ;;  %v3473_v41 = vstv %s7976_s29  ;;  %s8175_s29 = sld [smem:[#allocation2 + $0x43]] }
 0x749   : > { %v3406_v18 = vadd.f32 %v3404_v51, %v3379_v49  ;;  %vm3457_vm7 = vmand %vm3282_vm8, %vm9255_vm5  ;;  %vm3488_vm5 = vcmp.lt.s32.totalorder %v9213_v59, 29 }
 0x74a   : > { %v3410_v12 = vmul.f32 %v3409_v9, %v3400_v43  ;;  %v3411_v7 = vmul.f32 %v3409_v9, %v3401_v33  ;;  %v5075_v13 = vsel %vm3457_vm7, 1.0, %v9236_v30  ;;  %vm9257_vm7 = vcmp.ge.s32.totalorder %v9234_v48, 1 }
 0x74b   : > { %3778 = vrot.lane.b32.xlu1 %v7363_v11, %s5398_s14  ;;  %3776 = vrot.lane.b32.xlu2 %v7361_v47, %s5398_s14 }
 0x74c   : > { %3758 = vrot.lane.b32.xlu0 %v7370_v1, %s5397_s16  ;;  %v3412_v0 = vadd.f32 %v3410_v12, %v3406_v18  ;;  %v3413_v56 = vadd.f32 %v3411_v7, %v3407_v50  ;;  %v5079_v7 = vsel %vm3492_vm11, 1.0, %v9236_v30  ;;  %vm9258_vm11 = vcmp.ge.s32.totalorder %v9233_v35, 2  ;;  %s5401_s16 = smov 115  }
 0x74d   : > { %v3432_v44 = vpop.permute.xlu1 %3431  ;;  %v7963_v16 = vpop.permute.xlu2 %3501 }
 0x74e   : > { %v3433_v4 = vsel %vm3418_vm2, %v7847_v10, %v3432_v44  ;;  %v3434_v15 = vsel %vm3418_vm2, %v3432_v44, %v7847_v10  ;;  %v3417_v63 = vpop.permute.xlu0 %3416  ;;  %v3508_v10 = vstv %s8017_s9  ;;  %s8228_s9 = sld [smem:[#allocation2 + $0x14]] }
 0x74f   : > { %v3419_v38 = vsel %vm3418_vm2, %v3415_v28, %v3417_v63  ;;  %v3420_v60 = vsel %vm3418_vm2, %v3417_v63, %v3415_v28  ;;  %v3435_v46 = vmul.f32 %v5070_v20, %v3434_v15  ;;  %v3436_v53 = vmul.f32 %v5071_v27, %v3433_v4  ;;  %vm3491_vm2 = vmand %vm3281_vm4, %vm3244_vm14 }
 0x750   : > { %v3427_v61 = vmul.f32 %v5070_v20, %v3420_v60  ;;  %v3428_v45 = vmul.f32 %v5071_v27, %v3419_v38  ;;  %v5078_v12 = vsel %vm3491_vm2, 1.0, %v9236_v30  ;;  %v3479_v38 = vstv %s8011_s30  ;;  %s8183_s30 = sld [smem:[#allocation2 + $0x13]] }
 0x751   : > { %v3445_v28 = vmul.f32 %v3444_v29, %v3435_v46  ;;  %v3446_v54 = vmul.f32 %v3444_v29, %v3436_v53  ;;  %vm9256_vm4 = vcmp.ge.s32.totalorder %v9232_v39, 1  ;;  %vm3523_vm2 = vcmp.lt.s32.totalorder %v9213_v59, 19 }
 0x752   : > { %v3439_v23 = vmul.f32 %v3438_v42, %v3427_v61  ;;  %v3440_v26 = vmul.f32 %v3438_v42, %v3428_v45  ;;  %vm3526_vm8 = vmand %vm9256_vm4, %vm3030_vm12 }
 0x753   : > { %3809 = vrot.lane.b32.xlu1 %v7361_v47, %s5371_s18  ;;  %3791 = vrot.lane.b32.xlu2 %v7370_v1, %s5398_s14 }
 0x754   : > { %v3441_v14 = vadd.f32 %v3439_v23, %v3412_v0  ;;  %v3442_v37 = vadd.f32 %v3440_v26, %v3413_v56  ;;  %3789 = vrot.lane.b32.xlu0 %v7365_v57, %s5398_s14  ;;  %s5094_s14 = sld [smem:[#allocation2 + $0x12]] }
 0x755   : > { %v3465_v31 = vpop.permute.xlu1 %3464  ;;  %v7998_v58 = vpop.permute.xlu2 %3534 }
 0x756   : > { %v3447_v43 = vadd.f32 %v3445_v28, %v3441_v14  ;;  %v3448_v33 = vadd.f32 %v3446_v54, %v3442_v37  ;;  %v3450_v49 = vpop.permute.xlu0 %3449 }
 0x757   : > { %v3454_v9 = vsel %vm3453_vm6, %v3450_v49, %v7894_v24  ;;  %v3455_v20 = vsel %vm3453_vm6, %v7894_v24, %v3450_v49 }
 0x758   : > { %v3462_v51 = vmul.f32 %v5074_v52, %v3455_v20  ;;  %v3463_v22 = vmul.f32 %v5075_v13, %v3454_v9 }
 0x75a   : > { %v3474_v27 = vmul.f32 %v3473_v41, %v3462_v51  ;;  %v3475_v44 = vmul.f32 %v3473_v41, %v3463_v22  ;;  %v5082_v22 = vsel %vm3526_vm8, 1.0, %v9236_v30  ;;  %vm9260_vm8 = vmmov %vm9257_vm7 }
 0x75b   : > { %3819 = vrot.lane.b32.xlu1 %v7370_v1, %s5371_s18  ;;  %3817 = vrot.lane.b32.xlu2 %v7365_v57, %s5371_s18 }
 0x75c   : > { %v3476_v24 = vadd.f32 %v3474_v27, %v3447_v43  ;;  %v3477_v42 = vadd.f32 %v3475_v44, %v3448_v33  ;;  %3811 = vrot.lane.b32.xlu0 %v7363_v11, %s5371_s18  ;;  %s5081_s18 = sld [smem:[#allocation2 + $0x3e]] }
 0x75d   : > { %v3487_v4 = vpop.permute.xlu1 %3486  ;;  %v8032_v15 = vpop.permute.xlu2 %3556 }
 0x75e   : > { %v3489_v63 = vsel %vm3488_vm5, %v7926_v40, %v3487_v4  ;;  %v3490_v18 = vsel %vm3488_vm5, %v3487_v4, %v7926_v40  ;;  %v3467_v50 = vpop.permute.xlu0 %3466  ;;  %v3543_v4 = vstv %s8060_s17  ;;  %s8254_s17 = sld [smem:[#allocation2 + $0x15]] }
 0x75f   : > { %v3468_v60 = vsel %vm3453_vm6, %v3465_v31, %v3467_v50  ;;  %v3469_v46 = vsel %vm3453_vm6, %v3467_v50, %v3465_v31  ;;  %v3497_v53 = vmul.f32 %v5078_v12, %v3490_v18  ;;  %v3498_v61 = vmul.f32 %v5079_v7, %v3489_v63  ;;  %vm3527_vm6 = vmand %vm9257_vm7, %vm3031_vm1 }
 0x760   : > { %v3470_v45 = vmul.f32 %v5074_v52, %v3469_v46  ;;  %v3471_v29 = vmul.f32 %v5075_v13, %v3468_v60  ;;  %v5083_v27 = vsel %vm3527_vm6, 1.0, %v9236_v30  ;;  %vm3562_vm7 = vmand %vm9260_vm8, %vm3068_vm15  ;;  %vm3558_vm6 = vcmp.lt.s32.totalorder %v9213_v59, 18 }
 0x761   : > { %v3509_v40 = vmul.f32 %v3508_v10, %v3497_v53  ;;  %v3510_v23 = vmul.f32 %v3508_v10, %v3498_v61  ;;  %v3549_v53 = vstv %s8066_s10  ;;  %vm9265_vm8 = vcmp.lt.s32.totalorder %v9213_v59, 16  ;;  %s8278_s10 = sld [smem:[#allocation2 + $0x16]] }
 0x762   : > { %v3480_v0 = vmul.f32 %v3479_v38, %v3470_v45  ;;  %v3481_v56 = vmul.f32 %v3479_v38, %v3471_v29  ;;  %v3514_v13 = vstv %s5081_s18  ;;  %s8234_s18 = sld [smem:[#allocation2 + $0x45]] }
 0x763   : > { %3857 = vrot.lane.b32.xlu1 %v7365_v57, %s5372_s19  ;;  %3851 = vrot.lane.b32.xlu2 %v7363_v11, %s5372_s19 }
 0x764   : > { %v3482_v26 = vadd.f32 %v3480_v0, %v3476_v24  ;;  %v3483_v28 = vadd.f32 %v3481_v56, %v3477_v42  ;;  %3849 = vrot.lane.b32.xlu0 %v7361_v47, %s5372_s19 }
 0x765   : > { %v3520_v54 = vpop.permute.xlu1 %3519  ;;  %v8052_v14 = vpop.permute.xlu2 %3589 }
 0x766   : > { %v3511_v37 = vadd.f32 %v3509_v40, %v3482_v26  ;;  %v3512_v31 = vadd.f32 %v3510_v23, %v3483_v28  ;;  %v3500_v52 = vpop.permute.xlu0 %3499  ;;  %v5087_v26 = vsel %vm3562_vm7, 1.0, %v9236_v30  ;;  %vm9266_vm7 = vmmov %vm9265_vm8 }
 0x767   : > { %v3503_v43 = vsel %vm3488_vm5, %v3500_v52, %v7963_v16  ;;  %v3504_v33 = vsel %vm3488_vm5, %v7963_v16, %v3500_v52  ;;  %vm9259_vm5 = vmmov %vm9256_vm4 }
 0x768   : > { %v3505_v49 = vmul.f32 %v5078_v12, %v3504_v33  ;;  %v3506_v41 = vmul.f32 %v5079_v7, %v3503_v43  ;;  %vm3561_vm4 = vmand %vm9259_vm5, %vm9258_vm11 }
 0x769   : > { %v5086_v23 = vsel %vm3561_vm4, 1.0, %v9236_v30 }
 0x76a   : > { %v3515_v9 = vmul.f32 %v3514_v13, %v3505_v49  ;;  %v3516_v20 = vmul.f32 %v3514_v13, %v3506_v41 }
 0x76b   : > { %3879 = vrot.lane.b32.xlu1 %v7363_v11, %s5399_s11  ;;  %3877 = vrot.lane.b32.xlu2 %v7361_v47, %s5399_s11 }
 0x76c   : > { %v3517_v16 = vadd.f32 %v3515_v9, %v3511_v37  ;;  %v3518_v51 = vadd.f32 %v3516_v20, %v3512_v31  ;;  %3859 = vrot.lane.b32.xlu0 %v7370_v1, %s5372_s19  ;;  %s5400_s19 = smov 125   ;;  %v3578_v31 = vstv %s8086_s12  ;;  %s5404_s12 = smov 109  }
 0x76d   : > { %v3537_v44 = vpop.permute.xlu1 %3536  ;;  %v8081_v24 = vpop.permute.xlu2 %3599 }
 0x76e   : > { %v3538_v42 = vsel %vm3523_vm2, %v7998_v58, %v3537_v44  ;;  %v3539_v12 = vsel %vm3523_vm2, %v3537_v44, %v7998_v58  ;;  %v3522_v7 = vpop.permute.xlu0 %3521  ;;  %v3584_v44 = vstv %s5089_s20  ;;  %s8314_s20 = sld [smem:[#allocation2 + $0x48]] }
 0x76f   : > { %v3524_v63 = vsel %vm3523_vm2, %v3520_v54, %v3522_v7  ;;  %v3525_v18 = vsel %vm3523_vm2, %v3522_v7, %v3520_v54  ;;  %v3540_v50 = vmul.f32 %v5082_v22, %v3539_v12  ;;  %v3541_v38 = vmul.f32 %v5083_v27, %v3538_v42 }
 0x770   : > { %v3532_v60 = vmul.f32 %v5082_v22, %v3525_v18  ;;  %v3533_v46 = vmul.f32 %v5083_v27, %v3524_v63  ;;  %vm9261_vm2 = vcmp.lt.s32.totalorder %v9213_v59, 17 }
 0x771   : > { %v3550_v58 = vmul.f32 %v3549_v53, %v3540_v50  ;;  %v3551_v29 = vmul.f32 %v3549_v53, %v3541_v38  ;;  %vm9262_vm11 = vmmov %vm9261_vm2  ;;  %v3606_v50 = vstv %s5090_s21  ;;  %s8316_s21 = sld [smem:[#allocation2 + $0x18]] }
 0x772   : > { %v3544_v61 = vmul.f32 %v3543_v4, %v3532_v60  ;;  %v3545_v45 = vmul.f32 %v3543_v4, %v3533_v46  ;;  %vm9263_vm5 = vmmov %vm9261_vm2 }
 0x773   : > { %3910 = vrot.lane.b32.xlu1 %v7361_v47, %s5400_s19  ;;  %3892 = vrot.lane.b32.xlu2 %v7370_v1, %s5399_s11  ;;  %vm9264_vm4 = vmmov %vm9261_vm2 }
 0x774   : > { %v3546_v10 = vadd.f32 %v3544_v61, %v3517_v16  ;;  %v3547_v0 = vadd.f32 %v3545_v45, %v3518_v51  ;;  %3890 = vrot.lane.b32.xlu0 %v7365_v57, %s5399_s11  ;;  %s5111_s11 = sld [smem:[#allocation2 + $0x47]] }
 0x775   : > { %v3570_v56 = vpop.permute.xlu1 %3569  ;;  %v8103_v40 = vpop.permute.xlu2 %3625 }
 0x776   : > { %v3552_v28 = vadd.f32 %v3550_v58, %v3546_v10  ;;  %v3553_v54 = vadd.f32 %v3551_v29, %v3547_v0  ;;  %v3555_v37 = vpop.permute.xlu0 %3554 }
 0x777   : > { %v3559_v52 = vsel %vm3558_vm6, %v3555_v37, %v8032_v15  ;;  %v3560_v13 = vsel %vm3558_vm6, %v8032_v15, %v3555_v37 }
 0x778   : > { %v3567_v43 = vmul.f32 %v5086_v23, %v3560_v13  ;;  %v3568_v33 = vmul.f32 %v5087_v26, %v3559_v52 }
 0x77a   : > { %v3579_v49 = vmul.f32 %v3578_v31, %v3567_v43  ;;  %v3580_v41 = vmul.f32 %v3578_v31, %v3568_v33 }
 0x77b   : > { %3925 = vrot.lane.b32.xlu1 %v7370_v1, %s5400_s19  ;;  %3923 = vrot.lane.b32.xlu2 %v7365_v57, %s5400_s19 }
 0x77c   : > { %v3581_v9 = vadd.f32 %v3579_v49, %v3552_v28  ;;  %v3582_v20 = vadd.f32 %v3580_v41, %v3553_v54  ;;  %3912 = vrot.lane.b32.xlu0 %v7363_v11, %s5400_s19  ;;  %v3634_v49 = vstv %s5092_s25  ;;  %s5112_s19 = sld [smem:[#allocation2 + $0x17]] }
 0x77d   : > { %v3592_v16 = vpop.permute.xlu1 %3591  ;;  %v8117_v51 = vpop.permute.xlu2 %3647  ;;  %s8337_s25 = sld [smem:[#allocation2 + $0x19]] }
 0x77e   : > { %v3593_v15 = vsel %vm9261_vm2, %v8052_v14, %v3592_v16  ;;  %v3594_v22 = vsel %vm9262_vm11, %v3592_v16, %v8052_v14  ;;  %v3572_v27 = vpop.permute.xlu0 %3571  ;;  %vm9269_vm11 = vcmp.lt.s32.totalorder %v9213_v59, 15 }
 0x77f   : > { %v3573_v42 = vsel %vm3558_vm6, %v3570_v56, %v3572_v27  ;;  %v3574_v12 = vsel %vm3558_vm6, %v3572_v27, %v3570_v56  ;;  %v3595_v7 = vmul.f32 %v9218_v17, %v3594_v22  ;;  %v3596_v4 = vmul.f32 %v9219_v8, %v3593_v15  ;;  %vm9267_vm6 = vmmov %vm9266_vm7 }
 0x780   : > { %v3575_v63 = vmul.f32 %v5086_v23, %v3574_v12  ;;  %v3576_v18 = vmul.f32 %v5087_v26, %v3573_v42  ;;  %v3612_v56 = vstv %s5091_s23  ;;  %vm9268_vm2 = vmmov %vm9267_vm6  ;;  %v3640_v27 = vstv %s5093_s15  ;;  %s5405_s23 = smov 99   ;;  %s5406_s15 = smov 98  }
 0x781   : > { %v3607_v14 = vmul.f32 %v3606_v50, %v3595_v7  ;;  %v3608_v46 = vmul.f32 %v3606_v50, %v3596_v4 }
 0x782   : > { %v3585_v38 = vmul.f32 %v3584_v44, %v3575_v63  ;;  %v3586_v60 = vmul.f32 %v3584_v44, %v3576_v18 }
 0x783   : > { %3958 = vrot.lane.b32.xlu1 %v7365_v57, %s5401_s16  ;;  %3945 = vrot.lane.b32.xlu2 %v7363_v11, %s5401_s16 }
 0x784   : > { %v3587_v53 = vadd.f32 %v3585_v38, %v3581_v9  ;;  %v3588_v61 = vadd.f32 %v3586_v60, %v3582_v20  ;;  %3943 = vrot.lane.b32.xlu0 %v7361_v47, %s5401_s16  ;;  %v3662_v38 = vstv %s5094_s14  ;;  %s8369_s14 = sld [smem:[#allocation2 + $0x1a]] }
 0x785   : > { %v3618_v45 = vpop.permute.xlu1 %3617  ;;  %v8134_v58 = vpop.permute.xlu2 %3673 }
 0x786   : > { %v3609_v29 = vadd.f32 %v3607_v14, %v3587_v53  ;;  %v3610_v10 = vadd.f32 %v3608_v46, %v3588_v61  ;;  %v3598_v0 = vpop.permute.xlu0 %3597 }
 0x787   : > { %v3601_v23 = vsel %vm9263_vm5, %v3598_v0, %v8081_v24  ;;  %v3602_v26 = vsel %vm9264_vm4, %v8081_v24, %v3598_v0  ;;  %vm9270_vm5 = vmmov %vm9269_vm11  ;;  %vm9271_vm4 = vcmp.ge.s32.totalorder %v9232_v39, 1 }
 0x788   : > { %v3603_v28 = vmul.f32 %v9218_v17, %v3602_v26  ;;  %v3604_v54 = vmul.f32 %v9219_v8, %v3601_v23 }
 0x78a   : > { %v3613_v37 = vmul.f32 %v3612_v56, %v3603_v28  ;;  %v3614_v31 = vmul.f32 %v3612_v56, %v3604_v54 }
 0x78b   : > { %3980 = vrot.lane.b32.xlu1 %v7363_v11, %s5402_s26  ;;  %3978 = vrot.lane.b32.xlu2 %v7361_v47, %s5402_s26 }
 0x78c   : > { %v3615_v52 = vadd.f32 %v3613_v37, %v3609_v29  ;;  %v3616_v13 = vadd.f32 %v3614_v31, %v3610_v10  ;;  %3960 = vrot.lane.b32.xlu0 %v7370_v1, %s5401_s16  ;;  %v3668_v37 = vstv %s8175_s29  ;;  %s8322_s16 = sld [smem:[#allocation2 + $0x49]] }
 0x78d   : > { %v3628_v43 = vpop.permute.xlu1 %3627  ;;  %v8147_v33 = vpop.permute.xlu2 %3690  ;;  %s5121_s29 = sld [smem:[#allocation2 + $0x4b]] }
 0x78e   : > { %v3629_v17 = vsel %vm9265_vm8, %v8103_v40, %v3628_v43  ;;  %v3630_v8 = vsel %vm9266_vm7, %v3628_v43, %v8103_v40  ;;  %v3620_v24 = vpop.permute.xlu0 %3619  ;;  %vm3680_vm8 = vmand %vm9271_vm4, %vm3207_vm0  ;;  %vm9272_vm7 = vcmp.lt.s32.totalorder %v9235_v3, 14 }
 0x78f   : > { %v3621_v41 = vsel %vm9267_vm6, %v3618_v45, %v3620_v24  ;;  %v3622_v9 = vsel %vm9268_vm2, %v3620_v24, %v3618_v45  ;;  %v3631_v20 = vmul.f32 %v9214_v32, %v3630_v8  ;;  %v3632_v16 = vmul.f32 %v9215_v5, %v3629_v17  ;;  %vm9274_vm4 = vmmov %vm9270_vm5 }
 0x790   : > { %v3623_v15 = vmul.f32 %v9214_v32, %v3622_v9  ;;  %v3624_v22 = vmul.f32 %v9215_v5, %v3621_v41  ;;  %vm9273_vm6 = vcmp.ge.s32.totalorder %v9234_v48, 1  ;;  %v5096_v10 = vsel %vm3680_vm8, 1.0, %v9236_v30 }
 0x791   : > { %v3641_v42 = vmul.f32 %v3640_v27, %v3631_v20  ;;  %v3642_v12 = vmul.f32 %v3640_v27, %v3632_v16  ;;  %vm3681_vm2 = vmand %vm9273_vm6, %vm9272_vm7  ;;  %v3697_v24 = vstv %s8183_s30  ;;  %vm9275_vm8 = vcmp.ge.s32.totalorder %v9232_v39, 1  ;;  %s5407_s30 = smov 97  }
 0x792   : > { %v3635_v44 = vmul.f32 %v3634_v49, %v3623_v15  ;;  %v3636_v40 = vmul.f32 %v3634_v49, %v3624_v22  ;;  %v5097_v0 = vsel %vm3681_vm2, 1.0, %v9236_v30  ;;  %vm3715_vm7 = vmand %vm9275_vm8, %vm3244_vm14  ;;  %vm9276_vm8 = vcmp.ge.s32.totalorder %v9233_v35, 2 }
 0x793   : > { %4013 = vrot.lane.b32.xlu1 %v7361_v47, %s5373_s22  ;;  %3995 = vrot.lane.b32.xlu2 %v7370_v1, %s5402_s26  ;;  %vm3716_vm2 = vmand %vm9273_vm6, %vm3245_vm13 }
 0x794   : > { %v3637_v7 = vadd.f32 %v3635_v44, %v3615_v52  ;;  %v3638_v4 = vadd.f32 %v3636_v40, %v3616_v13  ;;  %3993 = vrot.lane.b32.xlu0 %v7365_v57, %s5402_s26  ;;  %s8365_s26 = sld [smem:[#allocation2 + $0x4a]] }
 0x795   : > { %v3654_v63 = vpop.permute.xlu1 %3653  ;;  %v8167_v18 = vpop.permute.xlu2 %3723 }
 0x796   : > { %v3643_v32 = vadd.f32 %v3641_v42, %v3637_v7  ;;  %v3644_v50 = vadd.f32 %v3642_v12, %v3638_v4  ;;  %v3646_v5 = vpop.permute.xlu0 %3645 }
 0x797   : > { %v3649_v60 = vsel %vm9269_vm11, %v3646_v5, %v8117_v51  ;;  %v3650_v14 = vsel %vm9270_vm5, %v8117_v51, %v3646_v5  ;;  %vm3677_vm11 = vcmp.lt.s32.totalorder %v9213_v59, 14  ;;  %v5101_v5 = vsel %vm3716_vm2, 1.0, %v9236_v30 }
 0x798   : > { %v3651_v46 = vmul.f32 %v9216_v6, %v3650_v14  ;;  %v3652_v53 = vmul.f32 %v9217_v19, %v3649_v60 }
 0x79a   : > { %v3663_v61 = vmul.f32 %v3662_v38, %v3651_v46  ;;  %v3664_v45 = vmul.f32 %v3662_v38, %v3652_v53 }
 0x79b   : > { %4023 = vrot.lane.b32.xlu1 %v7370_v1, %s5373_s22  ;;  %4021 = vrot.lane.b32.xlu2 %v7365_v57, %s5373_s22 }
 0x79c   : > { %v3665_v51 = vadd.f32 %v3663_v61, %v3643_v32  ;;  %v3666_v29 = vadd.f32 %v3664_v45, %v3644_v50  ;;  %4015 = vrot.lane.b32.xlu0 %v7363_v11, %s5373_s22  ;;  %s5099_s22 = sld [smem:[#allocation2 + $0x44]]  ;;  %v5100_v50 = vsel %vm3715_vm7, 1.0, %v9236_v30  ;;  %v3732_v61 = vstv %s8228_s9 }
 0x79d   : > { %v3676_v56 = vpop.permute.xlu1 %3675  ;;  %v8198_v23 = vpop.permute.xlu2 %3745  ;;  %vm9277_vm7 = vcmp.lt.s32.totalorder %v9213_v59, 1  ;;  %s8413_s9 = sld [smem:[#allocation2 + $0x4c]] }
 0x79e   : > { %v3678_v26 = vsel %vm3677_vm11, %v8134_v58, %v3676_v56  ;;  %v3679_v28 = vsel %vm3677_vm11, %v3676_v56, %v8134_v58  ;;  %v3656_v54 = vpop.permute.xlu0 %3655  ;;  %vm9278_vm6 = vmmov %vm9277_vm7 }
 0x79f   : > { %v3657_v31 = vsel %vm9270_vm5, %v3654_v63, %v3656_v54  ;;  %v3658_v52 = vsel %vm9274_vm4, %v3656_v54, %v3654_v63  ;;  %v3686_v13 = vmul.f32 %v5096_v10, %v3679_v28  ;;  %v3687_v43 = vmul.f32 %v5097_v0, %v3678_v26  ;;  %vm9279_vm2 = vmmov %vm9278_vm6 }
 0x7a0   : > { %v3659_v17 = vmul.f32 %v9216_v6, %v3658_v52  ;;  %v3660_v8 = vmul.f32 %v9217_v19, %v3657_v31  ;;  %v3738_v26 = vstv %s8234_s18  ;;  %vm3747_vm5 = vcmp.lt.s32.totalorder %v9213_v59, 3  ;;  %s5408_s18 = smov 96  }
 0x7a1   : > { %v3698_v58 = vmul.f32 %v3697_v24, %v3686_v13  ;;  %v3699_v9 = vmul.f32 %v3697_v24, %v3687_v43  ;;  %vm3780_vm4 = vcmp.lt.s32.totalorder %v9213_v59, 2 }
 0x7a2   : > { %v3669_v49 = vmul.f32 %v3668_v37, %v3659_v17  ;;  %v3670_v41 = vmul.f32 %v3668_v37, %v3660_v8  ;;  %v3703_v44 = vstv %s5099_s22  ;;  %v5104_v17 = vsel %vm3030_vm12, 1.0, %v9236_v30  ;;  %s8411_s22 = sld [smem:[#allocation2 + $0x1b]] }
 0x7a3   : > { %4049 = vrot.lane.b32.xlu1 %v7365_v57, %s5374_s24  ;;  %4043 = vrot.lane.b32.xlu2 %v7363_v11, %s5374_s24  ;;  %v5105_v8 = vsel %vm3031_vm1, 1.0, %v9236_v30 }
 0x7a4   : > { %v3671_v20 = vadd.f32 %v3669_v49, %v3665_v51  ;;  %v3672_v16 = vadd.f32 %v3670_v41, %v3666_v29  ;;  %4041 = vrot.lane.b32.xlu0 %v7361_v47, %s5374_s24 }
 0x7a5   : > { %v3709_v15 = vpop.permute.xlu1 %3708  ;;  %v8220_v6 = vpop.permute.xlu2 %3776 }
 0x7a6   : > { %v3700_v19 = vadd.f32 %v3698_v58, %v3671_v20  ;;  %v3701_v22 = vadd.f32 %v3699_v9, %v3672_v16  ;;  %v3689_v27 = vpop.permute.xlu0 %3688  ;;  %v3765_v58 = vstv %s8254_s17  ;;  %s8432_s17 = sld [smem:[#allocation2 + $0x1c]] }
 0x7a7   : > { %v3692_v40 = vsel %vm3677_vm11, %v3689_v27, %v8147_v33  ;;  %v3693_v42 = vsel %vm3677_vm11, %v8147_v33, %v3689_v27  ;;  %vm3712_vm11 = vcmp.lt.s32.totalorder %v9213_v59, 13 }
 0x7a8   : > { %v3694_v12 = vmul.f32 %v5096_v10, %v3693_v42  ;;  %v3695_v7 = vmul.f32 %v5097_v0, %v3692_v40  ;;  %v5109_v40 = vsel %vm3068_vm15, 1.0, %v9236_v30 }
 0x7aa   : > { %v3704_v4 = vmul.f32 %v3703_v44, %v3694_v12  ;;  %v3705_v63 = vmul.f32 %v3703_v44, %v3695_v7 }
 0x7ab   : > { %4071 = vrot.lane.b32.xlu1 %v7363_v11, %s5375_s13  ;;  %4069 = vrot.lane.b32.xlu2 %v7361_v47, %s5375_s13 }
 0x7ac   : > { %v3706_v33 = vadd.f32 %v3704_v4, %v3700_v19  ;;  %v3707_v32 = vadd.f32 %v3705_v63, %v3701_v22  ;;  %4051 = vrot.lane.b32.xlu0 %v7370_v1, %s5374_s24  ;;  %s5403_s24 = smov 110  }
 0x7ad   : > { %v3726_v38 = vpop.permute.xlu1 %3725  ;;  %v8249_v60 = vpop.permute.xlu2 %3791 }
 0x7ae   : > { %v3727_v14 = vsel %vm3712_vm11, %v8167_v18, %v3726_v38  ;;  %v3728_v46 = vsel %vm3712_vm11, %v3726_v38, %v8167_v18  ;;  %v3711_v53 = vpop.permute.xlu0 %3710 }
 0x7af   : > { %v3713_v45 = vsel %vm3712_vm11, %v3709_v15, %v3711_v53  ;;  %v3714_v51 = vsel %vm3712_vm11, %v3711_v53, %v3709_v15  ;;  %v3729_v29 = vmul.f32 %v5100_v50, %v3728_v46  ;;  %v3730_v10 = vmul.f32 %v5101_v5, %v3727_v14  ;;  %vm9280_vm11 = vmmov %vm9279_vm2 }
 0x7b0   : > { %v3721_v0 = vmul.f32 %v5100_v50, %v3714_v51  ;;  %v3722_v56 = vmul.f32 %v5101_v5, %v3713_v45  ;;  %v3798_v53 = vstv %s8278_s10  ;;  %s8467_s10 = sld [smem:[#allocation2 + $0x1d]] }
 0x7b1   : > { %v3739_v18 = vmul.f32 %v3738_v26, %v3729_v29  ;;  %v3740_v37 = vmul.f32 %v3738_v26, %v3730_v10 }
 0x7b2   : > { %v3733_v28 = vmul.f32 %v3732_v61, %v3721_v0  ;;  %v3734_v54 = vmul.f32 %v3732_v61, %v3722_v56 }
 0x7b3   : > { %4097 = vrot.lane.b32.xlu1 %v7361_v47, %s5403_s24  ;;  %4079 = vrot.lane.b32.xlu2 %v7370_v1, %s5375_s13 }
 0x7b4   : > { %v3735_v31 = vadd.f32 %v3733_v28, %v3706_v33  ;;  %v3736_v52 = vadd.f32 %v3734_v54, %v3707_v32  ;;  %4077 = vrot.lane.b32.xlu0 %v7365_v57, %s5375_s13  ;;  %s5107_s13 = sld [smem:[#allocation2 + $0x46]] }
 0x7b5   : > { %v3757_v13 = vpop.permute.xlu1 %3756  ;;  %v8263_v43 = vpop.permute.xlu2 %3817 }
 0x7b6   : > { %v3741_v24 = vadd.f32 %v3739_v18, %v3735_v31  ;;  %v3742_v49 = vadd.f32 %v3740_v37, %v3736_v52  ;;  %v3744_v41 = vpop.permute.xlu0 %3743  ;;  %v3804_v18 = vstv %s5111_s11  ;;  %s5133_s11 = sld [smem:[#allocation2 + $0x4e]] }
 0x7b7   : > { %v3748_v9 = vsel %vm3747_vm5, %v3744_v41, %v8198_v23  ;;  %v3749_v20 = vsel %vm3747_vm5, %v8198_v23, %v3744_v41  ;;  %v5108_v23 = vsel %vm9276_vm8, 1.0, %v9236_v30  ;;  %vm3881_vm8 = vcmp.lt.s32.totalorder %v9213_v59, 126 }
 0x7b8   : > { %v3754_v16 = vmul.f32 %v5104_v17, %v3749_v20  ;;  %v3755_v15 = vmul.f32 %v5105_v8, %v3748_v9 }
 0x7ba   : > { %v3766_v19 = vmul.f32 %v3765_v58, %v3754_v16  ;;  %v3767_v22 = vmul.f32 %v3765_v58, %v3755_v15  ;;  %v3771_v33 = vstv %s5107_s13  ;;  %v3826_v16 = vstv %s5112_s19  ;;  %s8461_s13 = sld [smem:[#allocation2 + $0x4d]] }
 0x7bb   : > { %4114 = vrot.lane.b32.xlu1 %v7370_v1, %s5403_s24  ;;  %4112 = vrot.lane.b32.xlu2 %v7365_v57, %s5403_s24  ;;  %s5134_s19 = sld [smem:[#allocation2 + $0x1e]] }
 0x7bc   : > { %v3768_v27 = vadd.f32 %v3766_v19, %v3741_v24  ;;  %v3769_v44 = vadd.f32 %v3767_v22, %v3742_v49  ;;  %4099 = vrot.lane.b32.xlu0 %v7363_v11, %s5403_s24  ;;  %s5409_s24 = smov 95  }
 0x7bd   : > { %v3779_v42 = vpop.permute.xlu1 %3778  ;;  %v8290_v12 = vpop.permute.xlu2 %3851 }
 0x7be   : > { %v3781_v7 = vsel %vm3780_vm4, %v8220_v6, %v3779_v42  ;;  %v3782_v4 = vsel %vm3780_vm4, %v3779_v42, %v8220_v6  ;;  %v3759_v63 = vpop.permute.xlu0 %3758  ;;  %v3832_v42 = vstv %s8314_s20  ;;  %s5135_s20 = sld [smem:[#allocation2 + $0x4f]] }
 0x7bf   : > { %v3760_v32 = vsel %vm3747_vm5, %v3757_v13, %v3759_v63  ;;  %v3761_v50 = vsel %vm3747_vm5, %v3759_v63, %v3757_v13  ;;  %v3787_v5 = vmul.f32 %v5108_v23, %v3782_v4  ;;  %v3788_v38 = vmul.f32 %v5109_v40, %v3781_v7 }
 0x7c0   : > { %v3762_v14 = vmul.f32 %v5104_v17, %v3761_v50  ;;  %v3763_v46 = vmul.f32 %v5105_v8, %v3760_v32  ;;  %v3844_v63 = vstv %s8322_s16  ;;  %vm9282_vm5 = vcmp.lt.s32.totalorder %v9213_v59, 127  ;;  %s5412_s16 = smov 83  }
 0x7c1   : > { %v3799_v6 = vmul.f32 %v3798_v53, %v3787_v5  ;;  %v3800_v51 = vmul.f32 %v3798_v53, %v3788_v38 }
 0x7c2   : > { %v3772_v61 = vmul.f32 %v3771_v33, %v3762_v14  ;;  %v3773_v45 = vmul.f32 %v3771_v33, %v3763_v46  ;;  %v3845_v46 = vmul.f32 %v3844_v63, %v7365_v57 }
 0x7c3   : > { %4147 = vrot.lane.b32.xlu1 %v7365_v57, %s5404_s12  ;;  %4134 = vrot.lane.b32.xlu2 %v7363_v11, %s5404_s12 }
 0x7c4   : > { %v3774_v29 = vadd.f32 %v3772_v61, %v3768_v27  ;;  %v3775_v10 = vadd.f32 %v3773_v45, %v3769_v44  ;;  %4132 = vrot.lane.b32.xlu0 %v7361_v47, %s5404_s12  ;;  %v9281_v27 = vld [vmem:[#allocation17_spill] sm:$0xff] }
 0x7c5   : > { %v3810_v0 = vpop.permute.xlu1 %3809  ;;  %v8306_v56 = vpop.permute.xlu2 %3877 }
 0x7c6   : > { %v3801_v26 = vadd.f32 %v3799_v6, %v3774_v29  ;;  %v3802_v28 = vadd.f32 %v3800_v51, %v3775_v10  ;;  %v3790_v54 = vpop.permute.xlu0 %3789  ;;  %v3846_v51 = vmul.f32 %v3844_v63, %v7370_v1  ;;  %v3866_v29 = vstv %s8337_s25  ;;  %s5137_s25 = sld [smem:[#allocation2 + $0x50]] }
 0x7c7   : > { %v3793_v37 = vsel %vm3780_vm4, %v3790_v54, %v8249_v60  ;;  %v3794_v31 = vsel %vm3780_vm4, %v8249_v60, %v3790_v54  ;;  %vm9283_vm4 = vmmov %vm9282_vm5  ;;  %v9284_v54 = vld [vmem:[#allocation18_spill] sm:$0xff] }
 0x7c8   : > { %v3795_v52 = vmul.f32 %v5108_v23, %v3794_v31  ;;  %v3796_v13 = vmul.f32 %v5109_v40, %v3793_v37  ;;  %v9285_v37 = vld [vmem:[#allocation19_spill] sm:$0xff] }
 0x7ca   : > { %v3805_v17 = vmul.f32 %v3804_v18, %v3795_v52  ;;  %v3806_v8 = vmul.f32 %v3804_v18, %v3796_v13 }
 0x7cb   : > { %4169 = vrot.lane.b32.xlu1 %v7363_v11, %s5405_s23  ;;  %4167 = vrot.lane.b32.xlu2 %v7361_v47, %s5405_s23 }
 0x7cc   : > { %v3807_v24 = vadd.f32 %v3805_v17, %v3801_v26  ;;  %v3808_v60 = vadd.f32 %v3806_v8, %v3802_v28  ;;  %4149 = vrot.lane.b32.xlu0 %v7370_v1, %s5404_s12  ;;  %s5410_s12 = smov 94  }
 0x7cd   : > { %v3820_v49 = vpop.permute.xlu1 %3819  ;;  %v8325_v41 = vpop.permute.xlu2 %3892 }
 0x7ce   : > { %v3821_v58 = vsel %vm9277_vm7, %v8263_v43, %v3820_v49  ;;  %v3822_v9 = vsel %vm9278_vm6, %v3820_v49, %v8263_v43  ;;  %v3812_v20 = vpop.permute.xlu0 %3811  ;;  %v3838_v43 = vstv %s8316_s21  ;;  %vm9286_vm7 = vcmp.lt.s32.totalorder %v9235_v3, 14  ;;  %vm9287_vm6 = vmmov %vm9283_vm4  ;;  %s5411_s21 = smov 93  }
 0x7cf   : > { %v3813_v15 = vsel %vm9279_vm2, %v3810_v0, %v3812_v20  ;;  %v3814_v19 = vsel %vm9280_vm11, %v3812_v20, %v3810_v0  ;;  %v3823_v22 = vmul.f32 %v9220_v36, %v3822_v9  ;;  %v3824_v44 = vmul.f32 %v9281_v27, %v3821_v58  ;;  %vm9288_vm2 = vmmov %vm9283_vm4 }
 0x7d0   : > { %v3815_v23 = vmul.f32 %v9220_v36, %v3814_v19  ;;  %v3816_v40 = vmul.f32 %v9281_v27, %v3813_v15  ;;  %v3840_v36 = vmul.f32 %v3838_v43, %v7363_v11  ;;  %v3839_v45 = vmul.f32 %v3838_v43, %v7361_v47 }
 0x7d1   : > { %v3833_v33 = vmul.f32 %v3832_v42, %v3823_v22  ;;  %v3834_v32 = vmul.f32 %v3832_v42, %v3824_v44  ;;  %v5119_v49 = vsel %vm9286_vm7, 1.0, %v9236_v30  ;;  %v3872_v19 = vstv %s8365_s26  ;;  %s5139_s26 = sld [smem:[#allocation2 + $0x51]] }
 0x7d2   : > { %v3827_v7 = vmul.f32 %v3826_v16, %v3815_v23  ;;  %v3828_v4 = vmul.f32 %v3826_v16, %v3816_v40  ;;  %v3899_v43 = vstv %s8369_s14  ;;  %vm3914_vm11 = vcmp.lt.s32.totalorder %v9213_v59, 125  ;;  %s5413_s14 = smov 82  }
 0x7d3   : > { %4204 = vrot.lane.b32.xlu1 %v7361_v47, %s5406_s15  ;;  %4186 = vrot.lane.b32.xlu2 %v7370_v1, %s5405_s23 }
 0x7d4   : > { %v3829_v50 = vadd.f32 %v3827_v7, %v3807_v24  ;;  %v3830_v5 = vadd.f32 %v3828_v4, %v3808_v60  ;;  %4184 = vrot.lane.b32.xlu0 %v7365_v57, %s5405_s23  ;;  %v5118_v60 = vsel %vm3207_vm0, 1.0, %v9236_v30  ;;  %s5136_s23 = sld [smem:[#allocation2 + $0x1f]] }
 0x7d5   : > { %v3858_v38 = vpop.permute.xlu1 %3857  ;;  %v8353_v14 = vpop.permute.xlu2 %3923 }
 0x7d6   : > { %v3835_v53 = vadd.f32 %v3833_v33, %v3829_v50  ;;  %v3836_v61 = vadd.f32 %v3834_v32, %v3830_v5  ;;  %v3850_v6 = vpop.permute.xlu0 %3849 }
 0x7d7   : > { %v3853_v10 = vsel %vm9282_vm5, %v3850_v6, %v8290_v12  ;;  %v3854_v0 = vsel %vm9283_vm4, %v8290_v12, %v3850_v6  ;;  %vm9289_vm5 = vcmp.lt.s32.totalorder %v9232_v39, 15 }
 0x7d8   : > { %v3841_v26 = vadd.f32 %v3839_v45, %v3835_v53  ;;  %v3842_v28 = vadd.f32 %v3840_v36, %v3836_v61  ;;  %v3855_v18 = vmul.f32 %v9284_v54, %v3853_v10  ;;  %v3856_v31 = vmul.f32 %v9285_v37, %v3854_v0  ;;  %vm3950_vm4 = vmand %vm9289_vm5, %vm3030_vm12 }
 0x7d9   : > { %v3905_v53 = vstv %s5121_s29  ;;  %s8569_s29 = sld [smem:[#allocation2 + $0x21]] }
 0x7da   : > { %v3847_v52 = vadd.f32 %v3845_v46, %v3841_v26  ;;  %v3848_v13 = vadd.f32 %v3846_v51, %v3842_v28  ;;  %v3867_v17 = vmul.f32 %v3866_v29, %v3855_v18  ;;  %v3868_v8 = vmul.f32 %v3866_v29, %v3856_v31 }
 0x7db   : > { %4221 = vrot.lane.b32.xlu1 %v7370_v1, %s5406_s15  ;;  %4219 = vrot.lane.b32.xlu2 %v7365_v57, %s5406_s15  ;;  %v5122_v26 = vsel %vm3244_vm14, 1.0, %v9236_v30  ;;  %v5123_v28 = vsel %vm3245_vm13, 1.0, %v9236_v30 }
 0x7dc   : > { %v3869_v12 = vadd.f32 %v3867_v17, %v3847_v52  ;;  %v3870_v24 = vadd.f32 %v3868_v8, %v3848_v13  ;;  %4206 = vrot.lane.b32.xlu0 %v7363_v11, %s5406_s15  ;;  %v3932_v13 = vstv %s8411_s22  ;;  %s5138_s15 = sld [smem:[#allocation2 + $0x20]]  ;;  %s5414_s22 = smov 81  }
 0x7dd   : > { %v3880_v58 = vpop.permute.xlu1 %3879  ;;  %v8384_v9 = vpop.permute.xlu2 %3945 }
 0x7de   : > { %v3882_v20 = vsel %vm3881_vm8, %v8306_v56, %v3880_v58  ;;  %v3883_v16 = vsel %vm3881_vm8, %v3880_v58, %v8306_v56  ;;  %v3860_v15 = vpop.permute.xlu0 %3859  ;;  %v3938_v58 = vstv %s8413_s9  ;;  %s8596_s9 = sld [smem:[#allocation2 + $0x22]] }
 0x7df   : > { %v3861_v22 = vsel %vm9287_vm6, %v3858_v38, %v3860_v15  ;;  %v3862_v27 = vsel %vm9288_vm2, %v3860_v15, %v3858_v38  ;;  %v3888_v44 = vmul.f32 %v5118_v60, %v3882_v20  ;;  %v3889_v23 = vmul.f32 %v5119_v49, %v3883_v16 }
 0x7e0   : > { %v3863_v40 = vmul.f32 %v9284_v54, %v3861_v22  ;;  %v3864_v42 = vmul.f32 %v9285_v37, %v3862_v27  ;;  %vm3947_vm6 = vcmp.lt.s32.totalorder %v9213_v59, 115  ;;  %vm9291_vm2 = vcmp.ge.s32.totalorder %v9233_v35, 2 }
 0x7e1   : > { %v3900_v56 = vmul.f32 %v3899_v43, %v3888_v44  ;;  %v3901_v63 = vmul.f32 %v3899_v43, %v3889_v23  ;;  %v5126_v23 = vsel %vm3950_vm4, 1.0, %v9236_v30 }
 0x7e2   : > { %v3873_v7 = vmul.f32 %v3872_v19, %v3863_v40  ;;  %v3874_v4 = vmul.f32 %v3872_v19, %v3864_v42 }
 0x7e3   : > { %4254 = vrot.lane.b32.xlu1 %v7365_v57, %s5407_s30  ;;  %4241 = vrot.lane.b32.xlu2 %v7363_v11, %s5407_s30 }
 0x7e4   : > { %v3875_v33 = vadd.f32 %v3873_v7, %v3869_v12  ;;  %v3876_v32 = vadd.f32 %v3874_v4, %v3870_v24  ;;  %4239 = vrot.lane.b32.xlu0 %v7361_v47, %s5407_s30  ;;  %v3967_v4 = vstv %s8432_s17  ;;  %s8627_s17 = sld [smem:[#allocation2 + $0x53]] }
 0x7e5   : > { %v3911_v50 = vpop.permute.xlu1 %3910  ;;  %v8403_v5 = vpop.permute.xlu2 %3978 }
 0x7e6   : > { %v3903_v36 = vadd.f32 %v3901_v63, %v3876_v32  ;;  %v3891_v38 = vpop.permute.xlu0 %3890  ;;  %v3902_v46 = vadd.f32 %v3900_v56, %v3875_v33 }
 0x7e7   : > { %v3894_v61 = vsel %vm3881_vm8, %v3891_v38, %v8325_v41  ;;  %v3895_v45 = vsel %vm3881_vm8, %v8325_v41, %v3891_v38  ;;  %vm9290_vm8 = vcmp.lt.s32.totalorder %v9234_v48, 15 }
 0x7e8   : > { %v3896_v6 = vmul.f32 %v5118_v60, %v3894_v61  ;;  %v3897_v51 = vmul.f32 %v5119_v49, %v3895_v45  ;;  %vm3951_vm7 = vmand %vm9290_vm8, %vm3031_vm1 }
 0x7e9   : > { %v5127_v40 = vsel %vm3951_vm7, 1.0, %v9236_v30  ;;  %vm9293_vm4 = vmmov %vm9290_vm8  ;;  %vm3982_vm7 = vcmp.lt.s32.totalorder %v9213_v59, 114 }
 0x7ea   : > { %v3906_v29 = vmul.f32 %v3905_v53, %v3896_v6  ;;  %v3907_v10 = vmul.f32 %v3905_v53, %v3897_v51  ;;  %vm3986_vm8 = vmand %vm9293_vm4, %vm3068_vm15  ;;  %vm9300_vm4 = vcmp.lt.s32.totalorder %v9213_v59, 112 }
 0x7eb   : > { %4276 = vrot.lane.b32.xlu1 %v7363_v11, %s5408_s18  ;;  %4274 = vrot.lane.b32.xlu2 %v7361_v47, %s5408_s18  ;;  %v5131_v53 = vsel %vm3986_vm8, 1.0, %v9236_v30  ;;  %vm9301_vm8 = vmmov %vm9300_vm4 }
 0x7ec   : > { %v3908_v0 = vadd.f32 %v3906_v29, %v3902_v46  ;;  %v3909_v41 = vadd.f32 %v3907_v10, %v3903_v36  ;;  %4256 = vrot.lane.b32.xlu0 %v7370_v1, %s5407_s30  ;;  %v3973_v10 = vstv %s8461_s13  ;;  %s8577_s30 = sld [smem:[#allocation2 + $0x52]] }
 0x7ed   : > { %v3926_v54 = vpop.permute.xlu1 %3925  ;;  %v8427_v18 = vpop.permute.xlu2 %3995  ;;  %s5151_s13 = sld [smem:[#allocation2 + $0x54]] }
 0x7ee   : > { %v3927_v37 = vsel %vm3914_vm11, %v8353_v14, %v3926_v54  ;;  %v3928_v31 = vsel %vm3914_vm11, %v3926_v54, %v8353_v14  ;;  %v3913_v52 = vpop.permute.xlu0 %3912 }
 0x7ef   : > { %v3915_v17 = vsel %vm3914_vm11, %v3911_v50, %v3913_v52  ;;  %v3916_v8 = vsel %vm3914_vm11, %v3913_v52, %v3911_v50  ;;  %v3929_v12 = vmul.f32 %v5122_v26, %v3927_v37  ;;  %v3930_v24 = vmul.f32 %v5123_v28, %v3928_v31  ;;  %vm9292_vm11 = vmmov %vm9289_vm5 }
 0x7f0   : > { %v3921_v60 = vmul.f32 %v5122_v26, %v3915_v17  ;;  %v3922_v49 = vmul.f32 %v5123_v28, %v3916_v8  ;;  %vm3985_vm5 = vmand %vm9292_vm11, %vm9291_vm2  ;;  %v4002_v31 = vstv %s8467_s10  ;;  %s5416_s10 = smov 79  }
 0x7f1   : > { %v3939_v14 = vmul.f32 %v3938_v58, %v3929_v12  ;;  %v3940_v15 = vmul.f32 %v3938_v58, %v3930_v24  ;;  %v5130_v46 = vsel %vm3985_vm5, 1.0, %v9236_v30 }
 0x7f2   : > { %v3933_v20 = vmul.f32 %v3932_v13, %v3921_v60  ;;  %v3934_v16 = vmul.f32 %v3932_v13, %v3922_v49 }
 0x7f3   : > { %4307 = vrot.lane.b32.xlu1 %v7361_v47, %s5409_s24  ;;  %4289 = vrot.lane.b32.xlu2 %v7370_v1, %s5408_s18 }
 0x7f4   : > { %v3935_v19 = vadd.f32 %v3933_v20, %v3908_v0  ;;  %v3936_v22 = vadd.f32 %v3934_v16, %v3909_v41  ;;  %4287 = vrot.lane.b32.xlu0 %v7365_v57, %s5408_s18  ;;  %v4008_v16 = vstv %s5133_s11  ;;  %s5415_s18 = smov 80   ;;  %s8673_s11 = sld [smem:[#allocation2 + $0x24]] }
 0x7f5   : > { %v3959_v27 = vpop.permute.xlu1 %3958  ;;  %v8450_v44 = vpop.permute.xlu2 %4021 }
 0x7f6   : > { %v3942_v42 = vadd.f32 %v3940_v15, %v3936_v22  ;;  %v3944_v43 = vpop.permute.xlu0 %3943  ;;  %v3941_v7 = vadd.f32 %v3939_v14, %v3935_v19 }
 0x7f7   : > { %v3948_v56 = vsel %vm3947_vm6, %v3944_v43, %v8384_v9  ;;  %v3949_v63 = vsel %vm3947_vm6, %v8384_v9, %v3944_v43 }
 0x7f8   : > { %v3956_v33 = vmul.f32 %v5126_v23, %v3948_v56  ;;  %v3957_v32 = vmul.f32 %v5127_v40, %v3949_v63  ;;  %v4030_v63 = vstv %s5134_s19  ;;  %s5417_s19 = smov 78  }
 0x7fa   : > { %v3968_v50 = vmul.f32 %v3967_v4, %v3956_v33  ;;  %v3969_v36 = vmul.f32 %v3967_v4, %v3957_v32 }
 0x7fb   : > { %4324 = vrot.lane.b32.xlu1 %v7370_v1, %s5409_s24  ;;  %4322 = vrot.lane.b32.xlu2 %v7365_v57, %s5409_s24 }
 0x7fc   : > { %v3970_v9 = vadd.f32 %v3968_v50, %v3941_v7  ;;  %v3971_v38 = vadd.f32 %v3969_v36, %v3942_v42  ;;  %4309 = vrot.lane.b32.xlu0 %v7363_v11, %s5409_s24  ;;  %v9298_v50 = vld [vmem:[#allocation20_spill] sm:$0xff]  ;;  %s8633_s24 = sld [smem:[#allocation2 + $0x23]] }
 0x7fd   : > { %v3981_v61 = vpop.permute.xlu1 %3980  ;;  %v8482_v45 = vpop.permute.xlu2 %4043 }
 0x7fe   : > { %v3983_v6 = vsel %vm3982_vm7, %v8403_v5, %v3981_v61  ;;  %v3984_v51 = vsel %vm3982_vm7, %v3981_v61, %v8403_v5  ;;  %v3961_v29 = vpop.permute.xlu0 %3960  ;;  %v4036_v61 = vstv %s5135_s20  ;;  %s8698_s20 = sld [smem:[#allocation2 + $0x25]] }
 0x7ff   : > { %v3962_v0 = vsel %vm3947_vm6, %v3959_v27, %v3961_v29  ;;  %v3963_v41 = vsel %vm3947_vm6, %v3961_v29, %v3959_v27  ;;  %v3991_v26 = vmul.f32 %v5130_v46, %v3983_v6  ;;  %v3992_v28 = vmul.f32 %v5131_v53, %v3984_v51 }
 0x800   : > { %v3964_v54 = vmul.f32 %v5126_v23, %v3962_v0  ;;  %v3965_v37 = vmul.f32 %v5127_v40, %v3963_v41  ;;  %vm9294_vm6 = vcmp.lt.s32.totalorder %v9213_v59, 113 }
 0x801   : > { %v4003_v5 = vmul.f32 %v4002_v31, %v3991_v26  ;;  %v4004_v17 = vmul.f32 %v4002_v31, %v3992_v28  ;;  %vm9295_vm2 = vmmov %vm9294_vm6  ;;  %v4058_v31 = vstv %s5136_s23  ;;  %s5159_s23 = sld [smem:[#allocation2 + $0x56]] }
 0x802   : > { %v3974_v52 = vmul.f32 %v3973_v10, %v3964_v54  ;;  %v3975_v13 = vmul.f32 %v3973_v10, %v3965_v37  ;;  %vm9296_vm11 = vmmov %vm9295_vm2 }
 0x803   : > { %4357 = vrot.lane.b32.xlu1 %v7365_v57, %s5410_s12  ;;  %4344 = vrot.lane.b32.xlu2 %v7363_v11, %s5410_s12  ;;  %vm9297_vm5 = vmmov %vm9295_vm2 }
 0x804   : > { %v3976_v8 = vadd.f32 %v3974_v52, %v3970_v9  ;;  %v3977_v12 = vadd.f32 %v3975_v13, %v3971_v38  ;;  %4342 = vrot.lane.b32.xlu0 %v7361_v47, %s5410_s12  ;;  %v9299_v9 = vld [vmem:[#allocation21_spill] sm:$0xff] }
 0x805   : > { %v4014_v24 = vpop.permute.xlu1 %4013  ;;  %v8499_v60 = vpop.permute.xlu2 %4069 }
 0x806   : > { %v4006_v49 = vadd.f32 %v4004_v17, %v3977_v12  ;;  %v3994_v58 = vpop.permute.xlu0 %3993  ;;  %v4005_v20 = vadd.f32 %v4003_v5, %v3976_v8  ;;  %v9302_v5 = vld [vmem:[#allocation22_spill] sm:$0xff]  ;;  %v9303_v8 = vld [vmem:[#allocation23_spill] sm:$0xff] }
 0x807   : > { %v3997_v14 = vsel %vm3982_vm7, %v3994_v58, %v8427_v18  ;;  %v3998_v15 = vsel %vm3982_vm7, %v8427_v18, %v3994_v58  ;;  %vm9304_vm7 = vcmp.lt.s32.totalorder %v9213_v59, 111 }
 0x808   : > { %v3999_v19 = vmul.f32 %v5130_v46, %v3997_v14  ;;  %v4000_v22 = vmul.f32 %v5131_v53, %v3998_v15 }
 0x80a   : > { %v4009_v27 = vmul.f32 %v4008_v16, %v3999_v19  ;;  %v4010_v23 = vmul.f32 %v4008_v16, %v4000_v22  ;;  %v4064_v22 = vstv %s5137_s25  ;;  %s5163_s25 = sld [smem:[#allocation2 + $0x57]] }
 0x80b   : > { %4379 = vrot.lane.b32.xlu1 %v7363_v11, %s5411_s21  ;;  %4377 = vrot.lane.b32.xlu2 %v7361_v47, %s5411_s21 }
 0x80c   : > { %v4011_v40 = vadd.f32 %v4009_v27, %v4005_v20  ;;  %v4012_v42 = vadd.f32 %v4010_v23, %v4006_v49  ;;  %4359 = vrot.lane.b32.xlu0 %v7370_v1, %s5410_s12  ;;  %s8679_s12 = sld [smem:[#allocation2 + $0x55]] }
 0x80d   : > { %v4024_v43 = vpop.permute.xlu1 %4023  ;;  %v8510_v7 = vpop.permute.xlu2 %4079 }
 0x80e   : > { %v4025_v18 = vsel %vm9294_vm6, %v8450_v44, %v4024_v43  ;;  %v4026_v4 = vsel %vm9295_vm2, %v4024_v43, %v8450_v44  ;;  %v4016_v56 = vpop.permute.xlu0 %4015  ;;  %vm9305_vm6 = vmmov %vm9304_vm7  ;;  %v9309_v43 = vld [vmem:[#allocation25_spill] sm:$0xff] }
 0x80f   : > { %v4017_v33 = vsel %vm9296_vm11, %v4014_v24, %v4016_v56  ;;  %v4018_v32 = vsel %vm9297_vm5, %v4016_v56, %v4014_v24  ;;  %v4027_v36 = vmul.f32 %v9298_v50, %v4025_v18  ;;  %v4028_v38 = vmul.f32 %v9299_v9, %v4026_v4  ;;  %vm9306_vm2 = vmmov %vm9300_vm4 }
 0x810   : > { %v4019_v46 = vmul.f32 %v9298_v50, %v4017_v33  ;;  %v4020_v53 = vmul.f32 %v9299_v9, %v4018_v32  ;;  %vm9307_vm11 = vmmov %vm9306_vm2 }
 0x811   : > { %v4037_v51 = vmul.f32 %v4036_v61, %v4027_v36  ;;  %v4038_v29 = vmul.f32 %v4036_v61, %v4028_v38  ;;  %vm9310_vm5 = vmmov %vm9305_vm6 }
 0x812   : > { %v4031_v6 = vmul.f32 %v4030_v63, %v4019_v46  ;;  %v4032_v44 = vmul.f32 %v4030_v63, %v4020_v53  ;;  %v4086_v63 = vstv %s5138_s15  ;;  %s5166_s15 = sld [smem:[#allocation2 + $0x27]] }
 0x813   : > { %4412 = vrot.lane.b32.xlu1 %v7361_v47, %s5412_s16  ;;  %4394 = vrot.lane.b32.xlu2 %v7370_v1, %s5411_s21 }
 0x814   : > { %v4033_v10 = vadd.f32 %v4031_v6, %v4011_v40  ;;  %v4034_v0 = vadd.f32 %v4032_v44, %v4012_v42  ;;  %4392 = vrot.lane.b32.xlu0 %v7365_v57, %s5411_s21  ;;  %v9308_v40 = vld [vmem:[#allocation24_spill] sm:$0xff]  ;;  %v4092_v44 = vstv %s5139_s26  ;;  %s5418_s21 = smov 77   ;;  %s8785_s26 = sld [smem:[#allocation2 + $0x58]] }
 0x815   : > { %v4050_v41 = vpop.permute.xlu1 %4049  ;;  %v8529_v26 = vpop.permute.xlu2 %4112 }
 0x816   : > { %v4040_v28 = vadd.f32 %v4038_v29, %v4034_v0  ;;  %v4042_v54 = vpop.permute.xlu0 %4041  ;;  %v4039_v37 = vadd.f32 %v4037_v51, %v4033_v10 }
 0x817   : > { %v4045_v52 = vsel %vm9300_vm4, %v4042_v54, %v8482_v45  ;;  %v4046_v13 = vsel %vm9301_vm8, %v8482_v45, %v4042_v54  ;;  %vm9311_vm4 = vmmov %vm9310_vm5  ;;  %vm9312_vm8 = vcmp.lt.s32.totalorder %v9232_v39, 15 }
 0x818   : > { %v4047_v17 = vmul.f32 %v9302_v5, %v4045_v52  ;;  %v4048_v12 = vmul.f32 %v9303_v8, %v4046_v13 }
 0x81a   : > { %v4059_v24 = vmul.f32 %v4058_v31, %v4047_v17  ;;  %v4060_v49 = vmul.f32 %v4058_v31, %v4048_v12  ;;  %v4121_v12 = vstv %s8569_s29  ;;  %s8802_s29 = sld [smem:[#allocation2 + $0x59]] }
 0x81b   : > { %4431 = vrot.lane.b32.xlu1 %v7370_v1, %s5412_s16  ;;  %4429 = vrot.lane.b32.xlu2 %v7365_v57, %s5412_s16 }
 0x81c   : > { %v4061_v58 = vadd.f32 %v4059_v24, %v4039_v37  ;;  %v4062_v20 = vadd.f32 %v4060_v49, %v4040_v28  ;;  %4414 = vrot.lane.b32.xlu0 %v7363_v11, %s5412_s16  ;;  %s5162_s16 = sld [smem:[#allocation2 + $0x26]] }
 0x81d   : > { %v4072_v16 = vpop.permute.xlu1 %4071  ;;  %v8542_v14 = vpop.permute.xlu2 %4134 }
 0x81e   : > { %v4073_v45 = vsel %vm9304_vm7, %v8499_v60, %v4072_v16  ;;  %v4074_v15 = vsel %vm9305_vm6, %v4072_v16, %v8499_v60  ;;  %v4052_v19 = vpop.permute.xlu0 %4051  ;;  %vm4104_vm7 = vmand %vm9312_vm8, %vm3207_vm0  ;;  %vm9313_vm6 = vcmp.lt.s32.totalorder %v9235_v3, 14 }
 0x81f   : > { %v4053_v27 = vsel %vm9306_vm2, %v4050_v41, %v4052_v19  ;;  %v4054_v23 = vsel %vm9307_vm11, %v4052_v19, %v4050_v41  ;;  %v4075_v42 = vmul.f32 %v9308_v40, %v4073_v45  ;;  %v4076_v18 = vmul.f32 %v9309_v43, %v4074_v15 }
 0x820   : > { %v4055_v4 = vmul.f32 %v9302_v5, %v4053_v27  ;;  %v4056_v56 = vmul.f32 %v9303_v8, %v4054_v23  ;;  %vm9314_vm2 = vcmp.lt.s32.totalorder %v9234_v48, 15  ;;  %v5140_v37 = vsel %vm4104_vm7, 1.0, %v9236_v30 }
 0x821   : > { %v4087_v32 = vmul.f32 %v4086_v63, %v4075_v42  ;;  %v4088_v50 = vmul.f32 %v4086_v63, %v4076_v18  ;;  %vm4105_vm11 = vmand %vm9314_vm2, %vm9313_vm6  ;;  %v4127_v15 = vstv %s8577_s30  ;;  %s8831_s30 = sld [smem:[#allocation2 + $0x29]] }
 0x822   : > { %v4065_v33 = vmul.f32 %v4064_v22, %v4055_v4  ;;  %v4066_v60 = vmul.f32 %v4064_v22, %v4056_v56  ;;  %v5141_v31 = vsel %vm4105_vm11, 1.0, %v9236_v30  ;;  %vm9316_vm7 = vmmov %vm9314_vm2  ;;  %vm4136_vm2 = vcmp.lt.s32.totalorder %v9213_v59, 109 }
 0x823   : > { %4464 = vrot.lane.b32.xlu1 %v7365_v57, %s5413_s14  ;;  %4451 = vrot.lane.b32.xlu2 %v7363_v11, %s5413_s14  ;;  %vm4140_vm6 = vmand %vm9316_vm7, %vm3245_vm13  ;;  %vm4174_vm11 = vcmp.lt.s32.totalorder %v9232_v39, 14  ;;  %vm4171_vm7 = vcmp.lt.s32.totalorder %v9213_v59, 99 }
 0x824   : > { %v4067_v36 = vadd.f32 %v4065_v33, %v4061_v58  ;;  %v4068_v9 = vadd.f32 %v4066_v60, %v4062_v20  ;;  %4449 = vrot.lane.b32.xlu0 %v7361_v47, %s5413_s14  ;;  %v5145_v4 = vsel %vm4140_vm6, 1.0, %v9236_v30  ;;  %v4156_v60 = vstv %s8596_s9  ;;  %s8859_s9 = sld [smem:[#allocation2 + $0x2a]] }
 0x825   : > { %v4098_v38 = vpop.permute.xlu1 %4097  ;;  %v8561_v46 = vpop.permute.xlu2 %4167  ;;  %vm9317_vm6 = vcmp.ge.s32.totalorder %v9233_v35, 2 }
 0x826   : > { %v4090_v53 = vadd.f32 %v4088_v50, %v4068_v9  ;;  %v4078_v61 = vpop.permute.xlu0 %4077  ;;  %v4089_v6 = vadd.f32 %v4087_v32, %v4067_v36 }
 0x827   : > { %v4081_v51 = vsel %vm9310_vm5, %v4078_v61, %v8510_v7  ;;  %v4082_v29 = vsel %vm9311_vm4, %v8510_v7, %v4078_v61  ;;  %vm4101_vm5 = vcmp.lt.s32.totalorder %v9213_v59, 110  ;;  %vm9315_vm4 = vmmov %vm9312_vm8 }
 0x828   : > { %v4083_v10 = vmul.f32 %v9308_v40, %v4081_v51  ;;  %v4084_v0 = vmul.f32 %v9309_v43, %v4082_v29  ;;  %vm4139_vm8 = vmand %vm9315_vm4, %vm3244_vm14 }
 0x829   : > { %v5144_v18 = vsel %vm4139_vm8, 1.0, %v9236_v30  ;;  %vm4176_vm4 = vmand %vm4174_vm11, %vm3030_vm12 }
 0x82a   : > { %v4093_v41 = vmul.f32 %v4092_v44, %v4083_v10  ;;  %v4094_v28 = vmul.f32 %v4092_v44, %v4084_v0 }
 0x82b   : > { %4486 = vrot.lane.b32.xlu1 %v7363_v11, %s5414_s22  ;;  %4484 = vrot.lane.b32.xlu2 %v7361_v47, %s5414_s22 }
 0x82c   : > { %v4095_v7 = vadd.f32 %v4093_v41, %v4089_v6  ;;  %v4096_v54 = vadd.f32 %v4094_v28, %v4090_v53  ;;  %4466 = vrot.lane.b32.xlu0 %v7370_v1, %s5413_s14  ;;  %v5148_v6 = vsel %vm4176_vm4, 1.0, %v9236_v30  ;;  %v4162_v28 = vstv %s8627_s17  ;;  %s8791_s14 = sld [smem:[#allocation2 + $0x28]] }
 0x82d   : > { %v4115_v52 = vpop.permute.xlu1 %4114  ;;  %v8591_v13 = vpop.permute.xlu2 %4186  ;;  %s8907_s17 = sld [smem:[#allocation2 + $0x2b]] }
 0x82e   : > { %v4116_v5 = vsel %vm4101_vm5, %v8529_v26, %v4115_v52  ;;  %v4117_v17 = vsel %vm4101_vm5, %v4115_v52, %v8529_v26  ;;  %v4100_v8 = vpop.permute.xlu0 %4099 }
 0x82f   : > { %v4102_v24 = vsel %vm4101_vm5, %v4098_v38, %v4100_v8  ;;  %v4103_v49 = vsel %vm4101_vm5, %v4100_v8, %v4098_v38  ;;  %v4118_v58 = vmul.f32 %v5140_v37, %v4116_v5  ;;  %v4119_v20 = vmul.f32 %v5141_v31, %v4117_v17 }
 0x830   : > { %v4110_v16 = vmul.f32 %v5140_v37, %v4102_v24  ;;  %v4111_v45 = vmul.f32 %v5141_v31, %v4103_v49  ;;  %vm4175_vm5 = vcmp.lt.s32.totalorder %v9234_v48, 14  ;;  %v4193_v17 = vstv %s8633_s24  ;;  %s8911_s24 = sld [smem:[#allocation2 + $0x5c]] }
 0x831   : > { %v4128_v26 = vmul.f32 %v4127_v15, %v4118_v58  ;;  %v4129_v27 = vmul.f32 %v4127_v15, %v4119_v20  ;;  %vm4177_vm8 = vmand %vm4175_vm5, %vm3031_vm1 }
 0x832   : > { %v4122_v19 = vmul.f32 %v4121_v12, %v4110_v16  ;;  %v4123_v22 = vmul.f32 %v4121_v12, %v4111_v45  ;;  %v5149_v44 = vsel %vm4177_vm8, 1.0, %v9236_v30  ;;  %vm4212_vm4 = vmand %vm4175_vm5, %vm3068_vm15  ;;  %vm4208_vm8 = vcmp.lt.s32.totalorder %v9213_v59, 98 }
 0x833   : > { %4519 = vrot.lane.b32.xlu1 %v7361_v47, %s5415_s18  ;;  %4501 = vrot.lane.b32.xlu2 %v7370_v1, %s5414_s22 }
 0x834   : > { %v4124_v23 = vadd.f32 %v4122_v19, %v4095_v7  ;;  %v4125_v40 = vadd.f32 %v4123_v22, %v4096_v54  ;;  %4499 = vrot.lane.b32.xlu0 %v7365_v57, %s5414_s22  ;;  %v4199_v22 = vstv %s5151_s13  ;;  %s8841_s22 = sld [smem:[#allocation2 + $0x5a]] }
 0x835   : > { %v4148_v42 = vpop.permute.xlu1 %4147  ;;  %v8614_v43 = vpop.permute.xlu2 %4219  ;;  %s8949_s13 = sld [smem:[#allocation2 + $0x2c]] }
 0x836   : > { %v4131_v56 = vadd.f32 %v4129_v27, %v4125_v40  ;;  %v4133_v63 = vpop.permute.xlu0 %4132  ;;  %v4130_v33 = vadd.f32 %v4128_v26, %v4124_v23 }
 0x837   : > { %v4137_v32 = vsel %vm4136_vm2, %v4133_v63, %v8542_v14  ;;  %v4138_v50 = vsel %vm4136_vm2, %v8542_v14, %v4133_v63  ;;  %v5153_v63 = vsel %vm4212_vm4, 1.0, %v9236_v30  ;;  %vm4243_vm4 = vcmp.lt.s32.totalorder %v9213_v59, 97 }
 0x838   : > { %v4145_v36 = vmul.f32 %v5144_v18, %v4137_v32  ;;  %v4146_v9 = vmul.f32 %v5145_v4, %v4138_v50 }
 0x83a   : > { %v4157_v38 = vmul.f32 %v4156_v60, %v4145_v36  ;;  %v4158_v53 = vmul.f32 %v4156_v60, %v4146_v9  ;;  %v4228_v9 = vstv %s8673_s11  ;;  %s8962_s11 = sld [smem:[#allocation2 + $0x2d]] }
 0x83b   : > { %4534 = vrot.lane.b32.xlu1 %v7370_v1, %s5415_s18  ;;  %4532 = vrot.lane.b32.xlu2 %v7365_v57, %s5415_s18 }
 0x83c   : > { %v4159_v14 = vadd.f32 %v4157_v38, %v4130_v33  ;;  %v4160_v61 = vadd.f32 %v4158_v53, %v4131_v56  ;;  %4521 = vrot.lane.b32.xlu0 %v7363_v11, %s5415_s18  ;;  %s8893_s18 = sld [smem:[#allocation2 + $0x5b]] }
 0x83d   : > { %v4170_v51 = vpop.permute.xlu1 %4169  ;;  %v8648_v29 = vpop.permute.xlu2 %4241 }
 0x83e   : > { %v4172_v10 = vsel %vm4171_vm7, %v8561_v46, %v4170_v51  ;;  %v4173_v0 = vsel %vm4171_vm7, %v4170_v51, %v8561_v46  ;;  %v4150_v41 = vpop.permute.xlu0 %4149  ;;  %v4234_v51 = vstv %s8679_s12  ;;  %s8998_s12 = sld [smem:[#allocation2 + $0x5e]] }
 0x83f   : > { %v4151_v7 = vsel %vm4136_vm2, %v4148_v42, %v4150_v41  ;;  %v4152_v54 = vsel %vm4136_vm2, %v4150_v41, %v4148_v42  ;;  %v4182_v37 = vmul.f32 %v5148_v6, %v4172_v10  ;;  %v4183_v31 = vmul.f32 %v5149_v44, %v4173_v0  ;;  %vm4211_vm2 = vmand %vm4174_vm11, %vm9317_vm6 }
 0x840   : > { %v4153_v52 = vmul.f32 %v5144_v18, %v4151_v7  ;;  %v4154_v5 = vmul.f32 %v5145_v4, %v4152_v54  ;;  %v5152_v56 = vsel %vm4211_vm2, 1.0, %v9236_v30  ;;  %vm9318_vm6 = vcmp.ge.s32.totalorder %v9235_v3, 1 }
 0x841   : > { %v4194_v46 = vmul.f32 %v4193_v17, %v4182_v37  ;;  %v4195_v24 = vmul.f32 %v4193_v17, %v4183_v31  ;;  %vm4247_vm2 = vmand %vm4175_vm5, %vm9318_vm6 }
 0x842   : > { %v4163_v8 = vmul.f32 %v4162_v28, %v4153_v52  ;;  %v4164_v12 = vmul.f32 %v4162_v28, %v4154_v5  ;;  %v5157_v52 = vsel %vm4247_vm2, 1.0, %v9236_v30  ;;  %vm4315_vm6 = vmand %vm4175_vm5, %vm687_vm10  ;;  %vm4311_vm2 = vcmp.lt.s32.totalorder %v9213_v59, 95 }
 0x843   : > { %4567 = vrot.lane.b32.xlu1 %v7365_v57, %s5416_s10  ;;  %4554 = vrot.lane.b32.xlu2 %v7363_v11, %s5416_s10 }
 0x844   : > { %v4165_v49 = vadd.f32 %v4163_v8, %v4159_v14  ;;  %v4166_v58 = vadd.f32 %v4164_v12, %v4160_v61  ;;  %4552 = vrot.lane.b32.xlu0 %v7361_v47, %s5416_s10  ;;  %v4263_v8 = vstv %s8698_s20  ;;  %s9010_s20 = sld [smem:[#allocation2 + $0x5f]] }
 0x845   : > { %v4205_v20 = vpop.permute.xlu1 %4204  ;;  %v8665_v16 = vpop.permute.xlu2 %4274 }
 0x846   : > { %v4197_v45 = vadd.f32 %v4195_v24, %v4166_v58  ;;  %v4185_v15 = vpop.permute.xlu0 %4184  ;;  %v4196_v19 = vadd.f32 %v4194_v46, %v4165_v49 }
 0x847   : > { %v4188_v26 = vsel %vm4171_vm7, %v4185_v15, %v8591_v13  ;;  %v4189_v27 = vsel %vm4171_vm7, %v8591_v13, %v4185_v15  ;;  %vm4246_vm7 = vmand %vm4174_vm11, %vm394_vm3 }
 0x848   : > { %v4190_v23 = vmul.f32 %v5148_v6, %v4188_v26  ;;  %v4191_v40 = vmul.f32 %v5149_v44, %v4189_v27  ;;  %v5156_v31 = vsel %vm4246_vm7, 1.0, %v9236_v30  ;;  %vm4314_vm7 = vmand %vm4174_vm11, %vm686_vm9 }
 0x84a   : > { %v4200_v42 = vmul.f32 %v4199_v22, %v4190_v23  ;;  %v4201_v18 = vmul.f32 %v4199_v22, %v4191_v40 }
 0x84b   : > { %4589 = vrot.lane.b32.xlu1 %v7363_v11, %s5417_s19  ;;  %4587 = vrot.lane.b32.xlu2 %v7361_v47, %s5417_s19 }
 0x84c   : > { %v4202_v13 = vadd.f32 %v4200_v42, %v4196_v19  ;;  %v4203_v4 = vadd.f32 %v4201_v18, %v4197_v45  ;;  %4569 = vrot.lane.b32.xlu0 %v7370_v1, %s5416_s10  ;;  %v5161_v19 = vsel %vm4175_vm5, 1.0, %v9236_v30  ;;  %s8958_s10 = sld [smem:[#allocation2 + $0x5d]] }
 0x84d   : > { %v4222_v33 = vpop.permute.xlu1 %4221  ;;  %v8693_v60 = vpop.permute.xlu2 %4289 }
 0x84e   : > { %v4223_v32 = vsel %vm4208_vm8, %v8614_v43, %v4222_v33  ;;  %v4224_v50 = vsel %vm4208_vm8, %v4222_v33, %v8614_v43  ;;  %v4207_v36 = vpop.permute.xlu0 %4206 }
 0x84f   : > { %v4209_v38 = vsel %vm4208_vm8, %v4205_v20, %v4207_v36  ;;  %v4210_v53 = vsel %vm4208_vm8, %v4207_v36, %v4205_v20  ;;  %v4225_v14 = vmul.f32 %v5152_v56, %v4223_v32  ;;  %v4226_v61 = vmul.f32 %v5153_v63, %v4224_v50 }
 0x850   : > { %v4217_v6 = vmul.f32 %v5152_v56, %v4209_v38  ;;  %v4218_v44 = vmul.f32 %v5153_v63, %v4210_v53  ;;  %vm4278_vm8 = vcmp.lt.s32.totalorder %v9213_v59, 96  ;;  %v4296_v56 = vstv %s5162_s16  ;;  %s9054_s16 = sld [smem:[#allocation2 + $0x30]] }
 0x851   : > { %v4235_v43 = vmul.f32 %v4234_v51, %v4225_v14  ;;  %v4236_v41 = vmul.f32 %v4234_v51, %v4226_v61  ;;  %v4302_v61 = vstv %s5163_s25  ;;  %s9068_s25 = sld [smem:[#allocation2 + $0x61]] }
 0x852   : > { %v4229_v10 = vmul.f32 %v4228_v9, %v4217_v6  ;;  %v4230_v0 = vmul.f32 %v4228_v9, %v4218_v44 }
 0x853   : > { %4622 = vrot.lane.b32.xlu1 %v7361_v47, %s5418_s21  ;;  %4604 = vrot.lane.b32.xlu2 %v7370_v1, %s5417_s19 }
 0x854   : > { %v4231_v28 = vadd.f32 %v4229_v10, %v4202_v13  ;;  %v4232_v7 = vadd.f32 %v4230_v0, %v4203_v4  ;;  %4602 = vrot.lane.b32.xlu0 %v7365_v57, %s5417_s19  ;;  %s9006_s19 = sld [smem:[#allocation2 + $0x2e]] }
 0x855   : > { %v4255_v54 = vpop.permute.xlu1 %4254  ;;  %v8715_v37 = vpop.permute.xlu2 %4322 }
 0x856   : > { %v4238_v47 = vadd.f32 %v4236_v41, %v4232_v7  ;;  %v4240_v5 = vpop.permute.xlu0 %4239  ;;  %v4237_v17 = vadd.f32 %v4235_v43, %v4231_v28 }
 0x857   : > { %v4244_v12 = vsel %vm4243_vm4, %v4240_v5, %v8648_v29  ;;  %v4245_v46 = vsel %vm4243_vm4, %v8648_v29, %v4240_v5  ;;  %v5160_v29 = vsel %vm4174_vm11, 1.0, %v9236_v30 }
 0x858   : > { %v4252_v24 = vmul.f32 %v5156_v31, %v4244_v12  ;;  %v4253_v49 = vmul.f32 %v5157_v52, %v4245_v46 }
 0x85a   : > { %v4264_v58 = vmul.f32 %v4263_v8, %v4252_v24  ;;  %v4265_v20 = vmul.f32 %v4263_v8, %v4253_v49 }
 0x85b   : > { %4639 = vrot.lane.b32.xlu1 %v7370_v1, %s5418_s21  ;;  %4637 = vrot.lane.b32.xlu2 %v7365_v57, %s5418_s21 }
 0x85c   : > { %v4266_v45 = vadd.f32 %v4264_v58, %v4237_v17  ;;  %v4267_v15 = vadd.f32 %v4265_v20, %v4238_v47  ;;  %4624 = vrot.lane.b32.xlu0 %v7363_v11, %s5418_s21  ;;  %v4269_v11 = vstv %s5159_s23  ;;  %v4331_v47 = vstv %s5166_s15  ;;  %s9044_s21 = sld [smem:[#allocation2 + $0x2f]]  ;;  %s5207_s15 = sshll.u32 %s9332_s28, 6 }
 0x85d   : > { %v4277_v22 = vpop.permute.xlu1 %4276  ;;  %v8742_v27 = vpop.permute.xlu2 %4344  ;;  %s9047_s23 = sld [smem:[#allocation2 + $0x60]] }
 0x85e   : > { %v4279_v1 = vsel %vm4278_vm8, %v8665_v16, %v4277_v22  ;;  %v4280_v57 = vsel %vm4278_vm8, %v4277_v22, %v8665_v16  ;;  %v4257_v26 = vpop.permute.xlu0 %4256 }
 0x85f   : > { %v4258_v23 = vsel %vm4243_vm4, %v4255_v54, %v4257_v26  ;;  %v4259_v40 = vsel %vm4243_vm4, %v4257_v26, %v4255_v54  ;;  %v4285_v42 = vmul.f32 %v5160_v29, %v4279_v1  ;;  %v4286_v18 = vmul.f32 %v5161_v19, %v4280_v57  ;;  %vm4349_vm4 = vmand %vm4174_vm11, %vm3207_vm0 }
 0x860   : > { %v4260_v13 = vmul.f32 %v5156_v31, %v4258_v23  ;;  %v4261_v4 = vmul.f32 %v5157_v52, %v4259_v40  ;;  %v5165_v54 = vsel %vm4315_vm6, 1.0, %v9236_v30 }
 0x861   : > { %v4297_v32 = vmul.f32 %v4296_v56, %v4285_v42  ;;  %v4298_v16 = vmul.f32 %v4296_v56, %v4286_v18  ;;  %v5168_v56 = vsel %vm4349_vm4, 1.0, %v9236_v30  ;;  %vm4420_vm4 = vcmp.lt.s32.totalorder %v9234_v48, 13 }
 0x862   : > { %v4270_v63 = vmul.f32 %v4269_v11, %v4260_v13  ;;  %v4271_v33 = vmul.f32 %v4269_v11, %v4261_v4 }
 0x864   : > { %v4272_v50 = vadd.f32 %v4270_v63, %v4266_v45  ;;  %v4273_v36 = vadd.f32 %v4271_v33, %v4267_v15 }
 0x865   : > { %v4308_v9 = vpop.permute.xlu1 %4307  ;;  %v8754_v0 = vpop.permute.xlu2 %4377 }
 0x866   : > { %v4300_v38 = vadd.f32 %v4298_v16, %v4273_v36  ;;  %v4288_v53 = vpop.permute.xlu0 %4287  ;;  %v4299_v14 = vadd.f32 %v4297_v32, %v4272_v50 }
 0x867   : > { %v4291_v6 = vsel %vm4278_vm8, %v4288_v53, %v8693_v60  ;;  %v4292_v44 = vsel %vm4278_vm8, %v8693_v60, %v4288_v53  ;;  %v5164_v60 = vsel %vm4314_vm7, 1.0, %v9236_v30  ;;  %vm4346_vm8 = vcmp.lt.s32.totalorder %v9213_v59, 94 }
 0x868   : > { %v4293_v51 = vmul.f32 %v5160_v29, %v4291_v6  ;;  %v4294_v10 = vmul.f32 %v5161_v19, %v4292_v44  ;;  %vm9319_vm7 = vcmp.lt.s32.totalorder %v9235_v3, 14  ;;  %v4337_v53 = vstv %s8785_s26 }
 0x869   : > { %vm4350_vm6 = vmand %vm4175_vm5, %vm9319_vm7  ;;  %vm4419_vm7 = vcmp.lt.s32.totalorder %v9232_v39, 13 }
 0x86a   : > { %v4303_v43 = vmul.f32 %v4302_v61, %v4293_v51  ;;  %v4304_v41 = vmul.f32 %v4302_v61, %v4294_v10  ;;  %v5169_v63 = vsel %vm4350_vm6, 1.0, %v9236_v30  ;;  %vm4381_vm6 = vcmp.lt.s32.totalorder %v9213_v59, 93 }
 0x86b   : > { %v4372_v51 = vstv %s8802_s29  ;;  %s319_s29 = scalar_lea.vmem %s9112_s8, %s5207_s15 }
 0x86c   : > { %v4305_v28 = vadd.f32 %v4303_v43, %v4299_v14  ;;  %v4306_v7 = vadd.f32 %v4304_v41, %v4300_v38  ;;  %v4366_v14 = vstv %s8791_s14 }
 0x86d   : > { %v4325_v31 = vpop.permute.xlu1 %4324  ;;  %v8771_v49 = vpop.permute.xlu2 %4394 }
 0x86e   : > { %v4310_v52 = vpop.permute.xlu0 %4309  ;;  %v4326_v13 = vsel %vm4311_vm2, %v8715_v37, %v4325_v31  ;;  %v4327_v4 = vsel %vm4311_vm2, %v4325_v31, %v8715_v37 }
 0x86f   : > { %v4312_v5 = vsel %vm4311_vm2, %v4308_v9, %v4310_v52  ;;  %v4313_v17 = vsel %vm4311_vm2, %v4310_v52, %v4308_v9  ;;  %v4328_v16 = vmul.f32 %v5164_v60, %v4326_v13  ;;  %v4329_v50 = vmul.f32 %v5165_v54, %v4327_v4  ;;  %vm4384_vm2 = vmand %vm4174_vm11, %vm3244_vm14 }
 0x870   : > { %v4320_v8 = vmul.f32 %v5164_v60, %v4312_v5  ;;  %v4321_v12 = vmul.f32 %v5165_v54, %v4313_v17  ;;  %vm4385_vm11 = vmand %vm4175_vm5, %vm3245_vm13  ;;  %v5172_v44 = vsel %vm4384_vm2, 1.0, %v9236_v30 }
 0x871   : > { %vm4422_vm5 = vmand %vm4420_vm4, %vm3031_vm1  ;;  %v5173_v31 = vsel %vm4385_vm11, 1.0, %v9236_v30  ;;  %vm9322_vm1 = vcmp.ge.s32.totalorder %v9233_v35, 2  ;;  %vm4453_vm11 = vcmp.lt.s32.totalorder %v9213_v59, 82 }
 0x872   : > { %v4332_v46 = vmul.f32 %v4331_v47, %v4320_v8  ;;  %v4333_v24 = vmul.f32 %v4331_v47, %v4321_v12  ;;  %vm8899_vm2 = vmand %vm4419_vm7, %vm9322_vm1 }
 0x873   : > { %vm4559_vm1 = vmand %vm4419_vm7, %vm686_vm9 }
 0x874   : > { %v4334_v58 = vadd.f32 %v4332_v46, %v4305_v28  ;;  %v4335_v20 = vadd.f32 %v4333_v24, %v4306_v7  ;;  %v4338_v28 = vmul.f32 %v4337_v53, %v4328_v16  ;;  %v4339_v7 = vmul.f32 %v4337_v53, %v4329_v50  ;;  %vm9035_vm9 = vmand %vm4419_vm7, %vm3207_vm0 }
 0x875   : > { %v4358_v45 = vpop.permute.xlu1 %4357  ;;  %v8773_v29 = vpop.permute.xlu2 %4429  ;;  %vm4629_vm0 = vmand %vm4419_vm7, %vm3244_vm14 }
 0x876   : > { %v4343_v15 = vpop.permute.xlu0 %4342  ;;  %v4341_v5 = vadd.f32 %v4339_v7, %v4335_v20  ;;  %v4340_v17 = vadd.f32 %v4338_v28, %v4334_v58  ;;  %v5200_v35 = vsel %vm4629_vm0, 1.0, %v9236_v30 }
 0x877   : > { %v4347_v33 = vsel %vm4346_vm8, %v4343_v15, %v8742_v27  ;;  %v4348_v32 = vsel %vm4346_vm8, %v8742_v27, %v4343_v15 }
 0x878   : > { %v4355_v37 = vmul.f32 %v5168_v56, %v4347_v33  ;;  %v4356_v9 = vmul.f32 %v5169_v63, %v4348_v32  ;;  %v4407_v33 = vstv %s8841_s22 }
 0x87a   : > { %v4367_v60 = vmul.f32 %v4366_v14, %v4355_v37  ;;  %v4368_v54 = vmul.f32 %v4366_v14, %v4356_v9 }
 0x87c   : > { %v4369_v20 = vadd.f32 %v4367_v60, %v4340_v17  ;;  %v4370_v58 = vadd.f32 %v4368_v54, %v4341_v5 }
 0x87d   : > { %v4380_v19 = vpop.permute.xlu1 %4379  ;;  %v8777_v26 = vpop.permute.xlu2 %4451 }
 0x87e   : > { %v4360_v22 = vpop.permute.xlu0 %4359  ;;  %v4382_v52 = vsel %vm4381_vm6, %v8754_v0, %v4380_v19  ;;  %v4383_v47 = vsel %vm4381_vm6, %v4380_v19, %v8754_v0 }
 0x87f   : > { %v4361_v38 = vsel %vm4346_vm8, %v4358_v45, %v4360_v22  ;;  %v4362_v27 = vsel %vm4346_vm8, %v4360_v22, %v4358_v45  ;;  %vm8851_vm8 = vmand %vm4419_vm7, %vm3030_vm12  ;;  %vm4416_vm12 = vcmp.lt.s32.totalorder %v9213_v59, 83  ;;  %v5177_v45 = vsel %vm4422_vm5, 1.0, %v9236_v30 }
 0x880   : > { %v4363_v10 = vmul.f32 %v5168_v56, %v4361_v38  ;;  %v4364_v43 = vmul.f32 %v5169_v63, %v4362_v27  ;;  %v5176_v0 = vsel %vm8851_vm8, 1.0, %v9236_v30  ;;  %v4390_v15 = vmul.f32 %v5172_v44, %v4382_v52 }
 0x881   : > { %v4391_v19 = vmul.f32 %v5173_v31, %v4383_v47  ;;  %v4401_v63 = vstv %s8831_s30  ;;  %vm9325_vm8 = vcmp.ge.s32.totalorder %v9235_v3, 1 }
 0x882   : > { %v4373_v46 = vmul.f32 %v4372_v51, %v4363_v10  ;;  %v4374_v24 = vmul.f32 %v4372_v51, %v4364_v43  ;;  %v4402_v38 = vmul.f32 %v4401_v63, %v4390_v15  ;;  %v5180_v10 = vsel %vm8899_vm2, 1.0, %v9236_v30  ;;  %vm4492_vm5 = vmand %vm4420_vm4, %vm9325_vm8 }
 0x883   : > { %v4403_v27 = vmul.f32 %v4401_v63, %v4391_v19  ;;  %vm4560_vm2 = vmand %vm4420_vm4, %vm687_vm10  ;;  %vm9328_vm10 = vcmp.lt.s32.totalorder %v9235_v3, 14  ;;  %vm4626_vm8 = vcmp.lt.s32.totalorder %v9213_v59, 77 }
 0x884   : > { %v4375_v50 = vadd.f32 %v4373_v46, %v4369_v20  ;;  %v4376_v37 = vadd.f32 %v4374_v24, %v4370_v58  ;;  %v4444_v46 = vstv %s8893_s18  ;;  %v4473_v24 = vstv %s8907_s17 }
 0x885   : > { %v8775_v1 = vpop.permute.xlu1 %4412  ;;  %v8783_v40 = vpop.permute.xlu2 %4484 }
 0x886   : > { %v4393_v57 = vpop.permute.xlu0 %4392  ;;  %v4405_v41 = vadd.f32 %v4403_v27, %v4376_v37  ;;  %v4404_v28 = vadd.f32 %v4402_v38, %v4375_v50 }
 0x887   : > { %v4396_v8 = vsel %vm4381_vm6, %v4393_v57, %v8771_v49  ;;  %v4397_v12 = vsel %vm4381_vm6, %v8771_v49, %v4393_v57  ;;  %vm4457_vm6 = vmand %vm4420_vm4, %vm3068_vm15 }
 0x888   : > { %v4398_v22 = vmul.f32 %v5172_v44, %v4396_v8  ;;  %v4399_v13 = vmul.f32 %v5173_v31, %v4397_v12  ;;  %v5181_v43 = vsel %vm4457_vm6, 1.0, %v9236_v30  ;;  %vm4491_vm15 = vmand %vm4419_vm7, %vm394_vm3  ;;  %vm4488_vm3 = vcmp.lt.s32.totalorder %v9213_v59, 81 }
 0x889   : > { %vm4556_vm6 = vcmp.lt.s32.totalorder %v9213_v59, 79 }
 0x88a   : > { %v4408_v53 = vmul.f32 %v4407_v33, %v4398_v22  ;;  %v4409_v14 = vmul.f32 %v4407_v33, %v4399_v13 }
 0x88c   : > { %v4410_v54 = vadd.f32 %v4408_v53, %v4404_v28  ;;  %v4411_v31 = vadd.f32 %v4409_v14, %v4405_v41  ;;  %v4508_v41 = vstv %s8949_s13  ;;  %v4514_v28 = vstv %s8958_s10 }
 0x88d   : > { %v8779_v11 = vpop.permute.xlu1 %4431  ;;  %v8819_v36 = vpop.permute.xlu2 %4501 }
 0x88e   : > { %v8781_v23 = vpop.permute.xlu0 %4414  ;;  %v4433_v44 = vsel %vm4416_vm12, %v8773_v29, %v8779_v11  ;;  %v4434_v51 = vsel %vm4416_vm12, %v8779_v11, %v8773_v29 }
 0x88f   : > { %v4417_v49 = vsel %vm4416_vm12, %v8775_v1, %v8781_v23  ;;  %v4418_v57 = vsel %vm4416_vm12, %v8781_v23, %v8775_v1  ;;  %v4438_v1 = vstv %s8859_s9  ;;  %v4435_v52 = vmul.f32 %v5176_v0, %v4433_v44 }
 0x890   : > { %v4427_v23 = vmul.f32 %v5176_v0, %v4417_v49  ;;  %v4428_v9 = vmul.f32 %v5177_v45, %v4418_v57  ;;  %v4436_v47 = vmul.f32 %v5177_v45, %v4434_v51  ;;  %v5185_v57 = vsel %vm4492_vm5, 1.0, %v9236_v30 }
 0x891   : > { %v4445_v19 = vmul.f32 %v4444_v46, %v4435_v52  ;;  %vm4523_vm12 = vcmp.lt.s32.totalorder %v9213_v59, 80 }
 0x892   : > { %v4439_v11 = vmul.f32 %v4438_v1, %v4427_v23  ;;  %v4440_v60 = vmul.f32 %v4438_v1, %v4428_v9  ;;  %v4446_v22 = vmul.f32 %v4444_v46, %v4436_v47 }
 0x894   : > { %v4441_v45 = vadd.f32 %v4439_v11, %v4410_v54  ;;  %v4442_v20 = vadd.f32 %v4440_v60, %v4411_v31  ;;  %v4541_v60 = vstv %s8962_s11 }
 0x895   : > { %v8793_v42 = vpop.permute.xlu1 %4464  ;;  %v8887_v4 = vpop.permute.xlu2 %4532 }
 0x896   : > { %v8800_v18 = vpop.permute.xlu0 %4449  ;;  %v4448_v32 = vadd.f32 %v4446_v22, %v4442_v20  ;;  %v4447_v50 = vadd.f32 %v4445_v19, %v4441_v45 }
 0x897   : > { %v4454_v7 = vsel %vm4453_vm11, %v8800_v18, %v8777_v26  ;;  %v4455_v29 = vsel %vm4453_vm11, %v8777_v26, %v8800_v18 }
 0x898   : > { %v4462_v17 = vmul.f32 %v5180_v10, %v4454_v7  ;;  %v4463_v8 = vmul.f32 %v5181_v43, %v4455_v29 }
 0x89a   : > { %v4474_v13 = vmul.f32 %v4473_v24, %v4462_v17  ;;  %v4475_v49 = vmul.f32 %v4473_v24, %v4463_v8  ;;  %v5192_v8 = vsel %vm4559_vm1, 1.0, %v9236_v30 }
 0x89c   : > { %v4476_v27 = vadd.f32 %v4474_v13, %v4447_v50  ;;  %v4477_v53 = vadd.f32 %v4475_v49, %v4448_v32 }
 0x89d   : > { %v8834_v61 = vpop.permute.xlu1 %4486  ;;  %v8951_v0 = vpop.permute.xlu2 %4554 }
 0x89e   : > { %v8843_v6 = vpop.permute.xlu0 %4466  ;;  %v4489_v63 = vsel %vm4488_vm3, %v8783_v40, %v8834_v61  ;;  %v4490_v33 = vsel %vm4488_vm3, %v8834_v61, %v8783_v40  ;;  %v5188_v40 = vsel %vm4419_vm7, 1.0, %v9236_v30  ;;  %v5189_v61 = vsel %vm4420_vm4, 1.0, %v9236_v30 }
 0x89f   : > { %v4468_v26 = vsel %vm4453_vm11, %v8793_v42, %v8843_v6  ;;  %v4469_v18 = vsel %vm4453_vm11, %v8843_v6, %v8793_v42  ;;  %v5184_v42 = vsel %vm4491_vm15, 1.0, %v9236_v30  ;;  %v4479_v6 = vstv %s8911_s24  ;;  %vm4595_vm11 = vmand %vm4420_vm4, %vm9328_vm10 }
 0x8a0   : > { %v4470_v58 = vmul.f32 %v5180_v10, %v4468_v26  ;;  %v4471_v15 = vmul.f32 %v5181_v43, %v4469_v18  ;;  %v4497_v14 = vmul.f32 %v5184_v42, %v4489_v63  ;;  %v4498_v44 = vmul.f32 %v5185_v57, %v4490_v33 }
 0x8a1   : > { %v5193_v26 = vsel %vm4560_vm2, 1.0, %v9236_v30  ;;  %vm4591_vm15 = vcmp.lt.s32.totalorder %v9213_v59, 78 }
 0x8a2   : > { %v4480_v23 = vmul.f32 %v4479_v6, %v4470_v58  ;;  %v4481_v9 = vmul.f32 %v4479_v6, %v4471_v15  ;;  %v4509_v31 = vmul.f32 %v4508_v41, %v4497_v14  ;;  %v4510_v52 = vmul.f32 %v4508_v41, %v4498_v44 }
 0x8a3   : > { %v5196_v14 = vsel %vm9035_vm9, 1.0, %v9236_v30  ;;  %v5197_v44 = vsel %vm4595_vm11, 1.0, %v9236_v30 }
 0x8a4   : > { %v4482_v7 = vadd.f32 %v4480_v23, %v4476_v27  ;;  %v4483_v29 = vadd.f32 %v4481_v9, %v4477_v53 }
 0x8a5   : > { %v8889_v56 = vpop.permute.xlu1 %4519  ;;  %v4588_v11 = vpop.permute.xlu2 %4587 }
 0x8a6   : > { %v4500_v16 = vpop.permute.xlu0 %4499  ;;  %v4512_v18 = vadd.f32 %v4510_v52, %v4483_v29 }
 0x8a7   : > { %v4503_v37 = vsel %vm4488_vm3, %v4500_v16, %v8819_v36  ;;  %v4504_v1 = vsel %vm4488_vm3, %v8819_v36, %v4500_v16  ;;  %vm4630_vm3 = vmand %vm4420_vm4, %vm3245_vm13 }
 0x8a8   : > { %v4505_v10 = vmul.f32 %v5184_v42, %v4503_v37  ;;  %v4506_v36 = vmul.f32 %v5185_v57, %v4504_v1  ;;  %v4547_v57 = vstv %s8998_s12  ;;  %v4576_v37 = vstv %s9006_s19 }
 0x8aa   : > { %v4515_v47 = vmul.f32 %v4514_v28, %v4505_v10  ;;  %v4516_v17 = vmul.f32 %v4514_v28, %v4506_v36 }
 0x8ac   : > { %v4518_v22 = vadd.f32 %v4516_v17, %v4512_v18  ;;  %v4617_v18 = vstv %s9047_s23 }
 0x8ad   : > { %v8933_v5 = vpop.permute.xlu1 %4534  ;;  %v4605_v1 = vpop.permute.xlu2 %4604 }
 0x8ae   : > { %v4522_v12 = vpop.permute.xlu0 %4521  ;;  %v4536_v46 = vsel %vm4523_vm12, %v8887_v4, %v8933_v5  ;;  %v4537_v24 = vsel %vm4523_vm12, %v8933_v5, %v8887_v4 }
 0x8af   : > { %v4524_v16 = vsel %vm4523_vm12, %v8889_v56, %v4522_v12  ;;  %v4525_v43 = vsel %vm4523_vm12, %v4522_v12, %v8889_v56  ;;  %v4511_v12 = vadd.f32 %v4509_v31, %v4482_v7  ;;  %v4538_v13 = vmul.f32 %v5188_v40, %v4536_v46 }
 0x8b0   : > { %v4530_v54 = vmul.f32 %v5188_v40, %v4524_v16  ;;  %v4531_v56 = vmul.f32 %v5189_v61, %v4525_v43  ;;  %v4539_v49 = vmul.f32 %v5189_v61, %v4537_v24  ;;  %v5201_v24 = vsel %vm4630_vm3, 1.0, %v9236_v30 }
 0x8b1   : > { %v4517_v19 = vadd.f32 %v4515_v47, %v4511_v12  ;;  %v4548_v40 = vmul.f32 %v4547_v57, %v4538_v13 }
 0x8b2   : > { %v4542_v20 = vmul.f32 %v4541_v60, %v4530_v54  ;;  %v4543_v42 = vmul.f32 %v4541_v60, %v4531_v56  ;;  %v4549_v61 = vmul.f32 %v4547_v57, %v4539_v49  ;;  %v4652_v57 = vstv %s9068_s25 }
 0x8b4   : > { %v4544_v32 = vadd.f32 %v4542_v20, %v4517_v19  ;;  %v4545_v50 = vadd.f32 %v4543_v42, %v4518_v22  ;;  %v4646_v20 = vstv %s9054_s16 }
 0x8b5   : > { %v4568_v38 = vpop.permute.xlu1 %4567  ;;  %v4638_v39 = vpop.permute.xlu2 %4637 }
 0x8b6   : > { %v4553_v51 = vpop.permute.xlu0 %4552  ;;  %v4551_v10 = vadd.f32 %v4549_v61, %v4545_v50  ;;  %v4550_v36 = vadd.f32 %v4548_v40, %v4544_v32 }
 0x8b7   : > { %v4557_v6 = vsel %vm4556_vm6, %v4553_v51, %v8951_v0  ;;  %v4558_v58 = vsel %vm4556_vm6, %v8951_v0, %v4553_v51 }
 0x8b8   : > { %v4565_v63 = vmul.f32 %v5192_v8, %v4557_v6  ;;  %v4566_v33 = vmul.f32 %v5193_v26, %v4558_v58 }
 0x8ba   : > { %v4577_v27 = vmul.f32 %v4576_v37, %v4565_v63  ;;  %v4578_v53 = vmul.f32 %v4576_v37, %v4566_v33 }
 0x8bc   : > { %v4579_v54 = vadd.f32 %v4577_v27, %v4550_v36  ;;  %v4580_v56 = vadd.f32 %v4578_v53, %v4551_v10 }
 0x8bd   : > { %v4590_v45 = vpop.permute.xlu1 %4589 }
 0x8be   : > { %v4570_v15 = vpop.permute.xlu0 %4569  ;;  %v4592_v16 = vsel %vm4591_vm15, %v4588_v11, %v4590_v45  ;;  %v4593_v43 = vsel %vm4591_vm15, %v4590_v45, %v4588_v11  ;;  %v4611_v11 = vstv %s9044_s21 }
 0x8bf   : > { %v4571_v4 = vsel %vm4556_vm6, %v4568_v38, %v4570_v15  ;;  %v4572_v5 = vsel %vm4556_vm6, %v4570_v15, %v4568_v38  ;;  %v4582_v38 = vstv %s9010_s20  ;;  %v4600_v31 = vmul.f32 %v5196_v14, %v4592_v16 }
 0x8c0   : > { %v4573_v23 = vmul.f32 %v5192_v8, %v4571_v4  ;;  %v4574_v9 = vmul.f32 %v5193_v26, %v4572_v5  ;;  %v4601_v52 = vmul.f32 %v5197_v44, %v4593_v43 }
 0x8c1   : > { %v4612_v12 = vmul.f32 %v4611_v11, %v4600_v31 }
 0x8c2   : > { %v4583_v28 = vmul.f32 %v4582_v38, %v4573_v23  ;;  %v4584_v7 = vmul.f32 %v4582_v38, %v4574_v9  ;;  %v4613_v46 = vmul.f32 %v4611_v11, %v4601_v52 }
 0x8c4   : > { %v4585_v8 = vadd.f32 %v4583_v28, %v4579_v54  ;;  %v4586_v26 = vadd.f32 %v4584_v7, %v4580_v56 }
 0x8c5   : > { %v4623_v51 = vpop.permute.xlu1 %4622 }
 0x8c6   : > { %v4603_v41 = vpop.permute.xlu0 %4602  ;;  %v4615_v15 = vadd.f32 %v4613_v46, %v4586_v26  ;;  %v4614_v19 = vadd.f32 %v4612_v12, %v4585_v8 }
 0x8c7   : > { %v4606_v29 = vsel %vm4591_vm15, %v4603_v41, %v4605_v1  ;;  %v4607_v60 = vsel %vm4591_vm15, %v4605_v1, %v4603_v41 }
 0x8c8   : > { %v4608_v47 = vmul.f32 %v5196_v14, %v4606_v29  ;;  %v4609_v17 = vmul.f32 %v5197_v44, %v4607_v60 }
 0x8ca   : > { %v4618_v42 = vmul.f32 %v4617_v18, %v4608_v47  ;;  %v4619_v3 = vmul.f32 %v4617_v18, %v4609_v17 }
 0x8cc   : > { %v4620_v63 = vadd.f32 %v4618_v42, %v4614_v19  ;;  %v4621_v33 = vadd.f32 %v4619_v3, %v4615_v15 }
 0x8cd   : > { %v4640_v45 = vpop.permute.xlu1 %4639 }
 0x8ce   : > { %v4641_v48 = vsel %vm4626_vm8, %v4638_v39, %v4640_v45  ;;  %v4642_v6 = vsel %vm4626_vm8, %v4640_v45, %v4638_v39  ;;  %v4625_v58 = vpop.permute.xlu0 %4624 }
 0x8cf   : > { %v4627_v22 = vsel %vm4626_vm8, %v4623_v51, %v4625_v58  ;;  %v4628_v30 = vsel %vm4626_vm8, %v4625_v58, %v4623_v51  ;;  %v4643_v13 = vmul.f32 %v5200_v35, %v4641_v48  ;;  %v4644_v49 = vmul.f32 %v5201_v24, %v4642_v6  ;;  %v9329_v48 = vld [vmem:[#allocation26_spill] sm:$0xff]  ;;  %v9330_v58 = vld [vmem:[#allocation27_spill] sm:$0xff] }
 0x8d0   : > { %v4635_v4 = vmul.f32 %v5200_v35, %v4627_v22  ;;  %v4636_v5 = vmul.f32 %v5201_v24, %v4628_v30 }
 0x8d1   : > { %v4653_v50 = vmul.f32 %v4652_v57, %v4643_v13  ;;  %v4654_v37 = vmul.f32 %v4652_v57, %v4644_v49 }
 0x8d2   : > { %v4647_v0 = vmul.f32 %v4646_v20, %v4635_v4  ;;  %v4648_v32 = vmul.f32 %v4646_v20, %v4636_v5 }
 0x8d4   : > { %v4649_v1 = vadd.f32 %v4647_v0, %v4620_v63  ;;  %v4650_v23 = vadd.f32 %v4648_v32, %v4621_v33 }
 0x8d6   : > { %v4655_v9 = vadd.f32 %v4653_v50, %v4649_v1  ;;  %v4656_v40 = vadd.f32 %v4654_v37, %v4650_v23 }
 0x8d8   : > { %v4657_v61 = vsub.f32 0.0, %v4655_v9  ;;  %v4658_v38 = vsub.f32 0.0, %v4656_v40 }
 0x8da   : > { %v4659_v27 = vmul.f32 1.442695, %v4657_v61  ;;  %v4661_v59 = vmul.f32 1.442695, %v4658_v38 }
 0x8dc   : > { %5318 = vpow2.f32 %v4659_v27 }
 0x8dd   : > { %5320 = vpow2.f32 %v4661_v59 }
 0x8e2   : > { %v5319_v53 = vpop.eup %5318 }
 0x8e3   : > { %v5321_v14 = vpop.eup %5320  ;;  %v4663_v44 = vadd.f32 1.0, %v5319_v53 }
 0x8e4   : > { %v4664_v51 = vadd.f32 1.0, %v5321_v14 }
 0x8e5   : > { %5322 = vrcp.f32 %v4663_v44  ;;  %v4676_v28 = vand.u32 2147483648, %v4663_v44  ;;  %v4674_v60 = vand.u32 2147483647, %v4663_v44  ;;  %vm4670_vm7 = vweird.f32 %v4663_v44 }
 0x8e6   : > { %5324 = vrcp.f32 %v4664_v51  ;;  %v4691_v54 = vand.u32 2147483648, %v4664_v51  ;;  %v4689_v31 = vand.u32 2147483647, %v4664_v51  ;;  %vm4685_vm5 = vweird.f32 %v4664_v51 }
 0x8e7   : > { %v4677_v11 = vor.u32 1.1754944e-38, %v4676_v28  ;;  %vm4675_vm12 = vcmp.eq.f32.partialorder %v4674_v60, 8.507059e+37 }
 0x8e8   : > { %v4692_v8 = vor.u32 1.1754944e-38, %v4691_v54  ;;  %vm4690_vm2 = vcmp.eq.f32.partialorder %v4689_v31, 8.507059e+37 }
 0x8eb   : > { %v5323_v10 = vpop.eup %5322 }
 0x8ec   : > { %v5325_v36 = vpop.eup %5324  ;;  %v4666_v16 = vmul.f32 %v5323_v10, %v4663_v44  ;;  %vm4671_vm14 = vweird.f32 %v5323_v10 }
 0x8ed   : > { %v4681_v43 = vmul.f32 %v5325_v36, %v4664_v51  ;;  %vm4686_vm13 = vweird.f32 %v5325_v36  ;;  %vm4672_vm4 = vmor %vm4670_vm7, %vm4671_vm14 }
 0x8ee   : > { %v4667_v41 = vsub.f32 1.0, %v4666_v16  ;;  %vm4687_vm1 = vmor %vm4685_vm5, %vm4686_vm13 }
 0x8ef   : > { %v4682_v7 = vsub.f32 1.0, %v4681_v43 }
 0x8f0   : > { %v4668_v29 = vmul.f32 %v5323_v10, %v4667_v41 }
 0x8f1   : > { %v4683_v56 = vmul.f32 %v5325_v36, %v4682_v7 }
 0x8f2   : > { %v4669_v52 = vadd.f32 %v5323_v10, %v4668_v29 }
 0x8f3   : > { %v4684_v47 = vadd.f32 %v5325_v36, %v4683_v56 }
 0x8f4   : > { %v4673_v17 = vsel %vm4672_vm4, %v5323_v10, %v4669_v52 }
 0x8f5   : > { %v4678_v26 = vsel %vm4675_vm12, %v4677_v11, %v4673_v17  ;;  %v4688_v18 = vsel %vm4687_vm1, %v5325_v36, %v4684_v47 }
 0x8f6   : > { %v4693_v35 = vsel %vm4690_vm2, %v4692_v8, %v4688_v18  ;;  %v4695_v39 = vperm.slane %v4678_v26, 0 }
 0x8f7   : > { %v4696_v12 = vperm.slane %v4693_v35, 0 }
 0x8f8   : > { %v4697_v46 = vmul.f32 %v4695_v39, %v7322_v62  ;;  %v4699_v24 = vmul.f32 %v4695_v39, %v7328_v25  ;;  %v4701_v42 = vmul.f32 %v4695_v39, %v7334_v55  ;;  %v4703_v6 = vmul.f32 %v4695_v39, %v9329_v48 }
 0x8f9   : > { %v4698_v45 = vmul.f32 %v4696_v12, %v7325_v2  ;;  %v4700_v20 = vmul.f32 %v4696_v12, %v7331_v21  ;;  %v4702_v3 = vmul.f32 %v4696_v12, %v7337_v34  ;;  %v4704_v15 = vmul.f32 %v4696_v12, %v9330_v58 }
 0x8fa   : > { %4705 = vst [vmem:[%s319_s29] sm:$0xff] %v4697_v46 }
 0x8fb   : > { %4706 = vst [vmem:[%s319_s29 + $0x8] sm:$0xff] %v4698_v45 }
 0x8fc   : > { %4707 = vst [vmem:[%s319_s29 + $0x10] sm:$0xff] %v4699_v24 }
 0x8fd   : > { %4708 = vst [vmem:[%s319_s29 + $0x18] sm:$0xff] %v4700_v20 }
 0x8fe   : > { %4709 = vst [vmem:[%s319_s29 + $0x20] sm:$0xff] %v4701_v42 }
 0x8ff   : > { %4710 = vst [vmem:[%s319_s29 + $0x28] sm:$0xff] %v4702_v3 }
 0x900   : > { %4711 = vst [vmem:[%s319_s29 + $0x30] sm:$0xff] %v4703_v6 }
 0x901   : > { %4712 = vst [vmem:[%s319_s29 + $0x38] sm:$0xff] %v4704_v15 }
 0x902 PF: > { %s19_s27 = sadd.s32 1, %s5364_s27  }
 0x903   : > { %p16_p7 = scmp.ge.s32.totalorder %s19_s27, 4  }
 0x905   :  { %18 = sbr.rel (!%p16_p7) target bundleno = 1 (0x1), region = 103 }
 0x90a   :  { %4734 = vsyncpa [#allocation3], 1 }
 0x90b   :  { %4736 = vsyncpa [#allocation3 + $0x1], 1 }

</bundles_post_ra>
